<compile_context>
chip_gen: v7x
topology: tpu7x:2x2x1
jax: 0.10.0
libtpu: 0.0.40
codegen_flags: <defaults>
</compile_context>

<pallas_src>
import functools
import numpy as np

import jax
import jax.numpy as jnp
from jax.experimental import pallas as pl
from jax.experimental.pallas import tpu as pltpu

# ------------------------- model hyper-parameters ---------------------------
N_LAYERS = 2
N_HEADS = 2
HIDDEN = 32                         # num_hidden_channels (requested)
HEAD_DIM = -(-HIDDEN // N_HEADS)    # ceil(32 / 2) = 16  (true_out_channels)
LAYER_OUT = HEAD_DIM * N_HEADS      # 32
HC = LAYER_OUT
IN_CH = 8
OUT_CH = 4
NEG_SLOPE = 0.2                     # GATv2Conv default leaky_relu slope

# --------------------- packed parameter-slab layout -------------------------
# One f32 slab [64, 128]; four 32-lane columns.  Rows below are sublane offsets.
PSLAB_ROWS, PSLAB_LANES = 64, 128
C_COL0, C_COL1, C_COL2, C_COL3 = 0, 32, 64, 96
# lane column 0 (lanes 0:32): the six 8-row "x" weights, all biases, att params
R_WL0, R_WR0, R_C0WE, R_WL1X, R_WR1X, R_C1WX = 0, 8, 16, 24, 32, 40
(R_BL0, R_BR0, R_BIAS0, R_C0B, R_BL1, R_BR1, R_BIAS1, R_C1B,
 R_CLFB) = 48, 49, 50, 51, 52, 53, 54, 55, 56
R_ATT0, R_ATT1 = 57, 59
# lane column 1 (lanes 32:64)
R_C0WN, R_WL1H = 0, 32
# lane column 2 (lanes 64:96)
R_WR1H, R_C1WH = 0, 32
# lane column 3 (lanes 96:128)
R_C1WN, R_CLFW = 0, 32

# packed node-output slab lanes: [h0 | h1 | y | zeros]
NODE_SLAB_LANES = 128
EW_SLAB_ROWS = 8                    # 2*N_HEADS rows used, rest zero


# ------------------------------ fused kernel --------------------------------
def fused_gatv2_kernel(x_ref, mask_ref, edge_ref, p_ref,
                       nodes_ref, ew_ref,
                       *, n_heads, head_dim, neg_slope):
    n = x_ref.shape[0]
    e_pad = edge_ref.shape[1]
    hc = n_heads * head_dim

    x = x_ref[...]                       # [N, IN_CH]
    mask = mask_ref[...]                 # [N, N] additive: 0 on edges, -1e30 off

    # ---- static slices into the single packed parameter slab (one DMA) -----
    wl0 = p_ref[R_WL0:R_WL0 + IN_CH, C_COL0:C_COL0 + hc]
    wr0 = p_ref[R_WR0:R_WR0 + IN_CH, C_COL0:C_COL0 + hc]
    c0_we = p_ref[R_C0WE:R_C0WE + IN_CH, C_COL0:C_COL0 + hc]
    wl1x = p_ref[R_WL1X:R_WL1X + IN_CH, C_COL0:C_COL0 + hc]
    wr1x = p_ref[R_WR1X:R_WR1X + IN_CH, C_COL0:C_COL0 + hc]
    c1_wx = p_ref[R_C1WX:R_C1WX + IN_CH, C_COL0:C_COL0 + hc]
    bl0 = p_ref[R_BL0:R_BL0 + 1, C_COL0:C_COL0 + hc]
    br0 = p_ref[R_BR0:R_BR0 + 1, C_COL0:C_COL0 + hc]
    bias0 = p_ref[R_BIAS0:R_BIAS0 + 1, C_COL0:C_COL0 + hc]
    c0_b = p_ref[R_C0B:R_C0B + 1, C_COL0:C_COL0 + hc]
    bl1 = p_ref[R_BL1:R_BL1 + 1, C_COL0:C_COL0 + hc]
    br1 = p_ref[R_BR1:R_BR1 + 1, C_COL0:C_COL0 + hc]
    bias1 = p_ref[R_BIAS1:R_BIAS1 + 1, C_COL0:C_COL0 + hc]
    c1_b = p_ref[R_C1B:R_C1B + 1, C_COL0:C_COL0 + hc]
    clf_b = p_ref[R_CLFB:R_CLFB + 1, C_COL0:C_COL0 + OUT_CH]
    att0 = p_ref[R_ATT0:R_ATT0 + n_heads, C_COL0:C_COL0 + head_dim]
    att1 = p_ref[R_ATT1:R_ATT1 + n_heads, C_COL0:C_COL0 + head_dim]
    c0_wn = p_ref[R_C0WN:R_C0WN + hc, C_COL1:C_COL1 + hc]
    wl1h = p_ref[R_WL1H:R_WL1H + hc, C_COL1:C_COL1 + hc]
    wr1h = p_ref[R_WR1H:R_WR1H + hc, C_COL2:C_COL2 + hc]
    c1_wh = p_ref[R_C1WH:R_C1WH + hc, C_COL2:C_COL2 + hc]
    c1_wn = p_ref[R_C1WN:R_C1WN + hc, C_COL3:C_COL3 + hc]
    clf_w = p_ref[R_CLFW:R_CLFW + hc, C_COL3:C_COL3 + OUT_CH]

    # One-hot edge-endpoint matrices for the in-kernel per-edge attention gather.
    # Padded edge columns carry -1, so their one-hot columns are all zero.
    edge = edge_ref[...]                                                 # [2, E_pad]
    node_iota = jax.lax.broadcasted_iota(jnp.int32, (n, e_pad), 0)       # [N, E_pad]
    onehot_src = (node_iota == edge[0:1, :]).astype(jnp.float32)         # [N, E_pad]
    onehot_dst = (node_iota == edge[1:2, :]).astype(jnp.float32)         # [N, E_pad]
    onehot_dst_t = jnp.concatenate([onehot_dst] * n_heads, axis=0)       # [H*N, E_pad]

    def conv(xl, xr, att, bias):
        """One GATv2Conv given source/target transforms xl/xr: [N, H*C]."""
        # hoisted out of the head loop: one broadcast-add + leaky_relu on the
        # full [N, N, H*C] tensor (the only O(N^2*C) intermediate).
        e_all = xr[:, None, :] + xl[None, :, :]                  # [N, N, HC]
        e_all = jnp.where(e_all >= 0, e_all, neg_slope * e_all)

        outs, alphas = [], []
        for h in range(n_heads):                                 # static loop
            lo = h * head_dim
            att_h = att[h:h + 1, :].reshape(1, 1, head_dim)
            score = jnp.sum(e_all[:, :, lo:lo + head_dim] * att_h, axis=-1)  # [N,N]
            # masked softmax over sources j per target i (PyG softmax(alpha, idx)).
            # Self-loops guarantee >=1 unmasked entry per row.
            score = score + mask
            m = jnp.max(score, axis=-1, keepdims=True)
            p = jnp.exp(score - m)
            alpha = p / jnp.sum(p, axis=-1, keepdims=True)       # exact divide
            alphas.append(alpha)
            # aggregate: out[i] = sum_j alpha[i, j] * x_j[j]
            outs.append(jnp.dot(alpha, xl[:, lo:lo + head_dim],
                                preferred_element_type=jnp.float32))

        out = jnp.concatenate(outs, axis=1) + bias               # [N, HC]

        # batched per-edge gather for all heads: e_w[h, e] = alpha_h[dst[e], src[e]]
        alpha_all = jnp.concatenate(alphas, axis=0)              # [H*N, N]
        t = jnp.dot(alpha_all, onehot_src,
                    preferred_element_type=jnp.float32)          # [H*N, E_pad]
        t = t * onehot_dst_t
        ew = jnp.sum(t.reshape(n_heads, n, e_pad), axis=1)       # [H, E_pad]
        return out, ew

    # ------------------------------ layer 0 ---------------------------------
    # GATv2Conv: lin_l (sources) and lin_r (targets) both carry a bias in PyG.
    xl0 = jnp.dot(x, wl0, preferred_element_type=jnp.float32) + bl0
    xr0 = jnp.dot(x, wr0, preferred_element_type=jnp.float32) + br0
    conv0, ew0 = conv(xl0, xr0, att0, bias0)

    # comb0 = ReLU(Linear([x || conv0])) with the concat folded into split matmuls
    h0 = jnp.maximum(
        jnp.dot(x, c0_we, preferred_element_type=jnp.float32)
        + jnp.dot(conv0, c0_wn, preferred_element_type=jnp.float32)
        + c0_b, 0.0)

    # ------------------------------ layer 1 ---------------------------------
    # skip connection: conv input = [h0 || x], concat folded into split matmuls
    xl1 = (jnp.dot(h0, wl1h, preferred_element_type=jnp.float32)
           + jnp.dot(x, wl1x, preferred_element_type=jnp.float32) + bl1)
    xr1 = (jnp.dot(h0, wr1h, preferred_element_type=jnp.float32)
           + jnp.dot(x, wr1x, preferred_element_type=jnp.float32) + br1)
    conv1, ew1 = conv(xl1, xr1, att1, bias1)

    # comb1 = ReLU(Linear([h0 || x || conv1]))
    h1 = jnp.maximum(
        jnp.dot(h0, c1_wh, preferred_element_type=jnp.float32)
        + jnp.dot(x, c1_wx, preferred_element_type=jnp.float32)
        + jnp.dot(conv1, c1_wn, preferred_element_type=jnp.float32)
        + c1_b, 0.0)

    # ----------------------------- classifier -------------------------------
    y = jnp.dot(h1, clf_w, preferred_element_type=jnp.float32) + clf_b   # [N, 4]

    # --------------- lane-dense packed output stores (2 stores) -------------
    used = 2 * hc + OUT_CH
    nodes_ref[...] = jnp.concatenate(
        [h0, h1, y, jnp.zeros((n, NODE_SLAB_LANES - used), jnp.float32)], axis=1)
    ew_ref[...] = jnp.concatenate(
        [ew0, ew1,
         jnp.zeros((EW_SLAB_ROWS - 2 * n_heads, e_pad), jnp.float32)], axis=0)


# ---------------------------- pallas_call wrapper ----------------------------
def gatv2_forward(x, adj, edge_index, pslab):
    """Returns (h_list, [y_pred], e_w_list) matching BaseGNN.forward (eval mode)."""
    # TODO(synk): F.dropout is identity here (eval mode / p=0); no stochastic path implemented.
    n, _ = x.shape
    e_cnt = edge_index.shape[1]
    e_pad = 128 * pl.cdiv(e_cnt, 128)

    # adj is only a mask -> precompute the additive -1e30 softmax mask once.
    adj_bias = jnp.where(adj > 0, 0.0, -1e30).astype(jnp.float32)
    # pad the edge list to a lane-dense width; -1 sentinel => zero one-hot column.
    edge_p = jnp.full((2, e_pad), -1, jnp.int32).at[:, :e_cnt].set(
        edge_index.astype(jnp.int32))

    def full(shape):
        zeros = (0,) * len(shape)
        return pl.BlockSpec(shape, lambda i, z=zeros: z)

    inputs = [x, adj_bias, edge_p, pslab]
    out_shape = [
        jax.ShapeDtypeStruct((n, NODE_SLAB_LANES), jnp.float32),   # h0|h1|y packed
        jax.ShapeDtypeStruct((EW_SLAB_ROWS, e_pad), jnp.float32),  # ew0|ew1 packed
    ]

    kern = functools.partial(fused_gatv2_kernel, n_heads=N_HEADS,
                             head_dim=HEAD_DIM, neg_slope=NEG_SLOPE)
    nodes, ew = pl.pallas_call(
        kern,
        grid=(1,),
        in_specs=[full(a.shape) for a in inputs],
        out_specs=[full(s.shape) for s in out_shape],
        out_shape=out_shape,
        compiler_params=pltpu.CompilerParams(dimension_semantics=("arbitrary",)),
    )(*inputs)

    # un-pack outside the kernel (cheap XLA slices).
    h0 = nodes[:, :LAYER_OUT]
    h1 = nodes[:, LAYER_OUT:2 * LAYER_OUT]
    y = nodes[:, 2 * LAYER_OUT:2 * LAYER_OUT + OUT_CH]
    ew0 = ew[0:N_HEADS, :e_cnt].T            # PyG order/shape [E, heads]
    ew1 = ew[N_HEADS:2 * N_HEADS, :e_cnt].T
    return [h0, h1], [y], [ew0, ew1]


# ----------------------------- parameter init --------------------------------
def _glorot(key, shape):
    fan_in, fan_out = shape
    std = (2.0 / (fan_in + fan_out)) ** 0.5
    return std * jax.random.normal(key, shape, jnp.float32)


def _bias(key, dim):
    return 0.01 * jax.random.normal(key, (1, dim), jnp.float32)


def init_param_slab(key):
    """Build the single lane-dense [64, 128] f32 parameter slab."""
    hc = N_HEADS * HEAD_DIM
    slab = np.zeros((PSLAB_ROWS, PSLAB_LANES), np.float32)

    def put(arr, row, col):
        a = np.asarray(arr)
        slab[row:row + a.shape[0], col:col + a.shape[1]] = a

    # ----- layer 0 (conv input = x : IN_CH) -----
    key, k1, k2, k3, k4, k5, k6 = jax.random.split(key, 7)
    put(_glorot(k1, (IN_CH, hc)), R_WL0, C_COL0)
    put(_glorot(k2, (IN_CH, hc)), R_WR0, C_COL0)
    put(_glorot(k3, (N_HEADS, HEAD_DIM)), R_ATT0, C_COL0)
    put(_bias(k4, hc), R_BL0, C_COL0)
    put(_bias(k5, hc), R_BR0, C_COL0)
    put(_bias(k6, hc), R_BIAS0, C_COL0)
    key, kc, kcb = jax.random.split(key, 3)
    c0 = np.asarray(_glorot(kc, (IN_CH + LAYER_OUT, LAYER_OUT)))   # Linear(8+32, 32)
    put(c0[:IN_CH], R_C0WE, C_COL0)
    put(c0[IN_CH:], R_C0WN, C_COL1)
    put(_bias(kcb, LAYER_OUT), R_C0B, C_COL0)

    # ----- layer 1 (conv input = [h0 || x] : 32 + 8 = 40, skip connection) -----
    in1 = LAYER_OUT + IN_CH
    key, k1, k2, k3, k4, k5, k6 = jax.random.split(key, 7)
    wl1 = np.asarray(_glorot(k1, (in1, hc)))
    wr1 = np.asarray(_glorot(k2, (in1, hc)))
    put(wl1[:LAYER_OUT], R_WL1H, C_COL1)
    put(wl1[LAYER_OUT:], R_WL1X, C_COL0)
    put(wr1[:LAYER_OUT], R_WR1H, C_COL2)
    put(wr1[LAYER_OUT:], R_WR1X, C_COL0)
    put(_glorot(k3, (N_HEADS, HEAD_DIM)), R_ATT1, C_COL0)
    put(_bias(k4, hc), R_BL1, C_COL0)
    put(_bias(k5, hc), R_BR1, C_COL0)
    put(_bias(k6, hc), R_BIAS1, C_COL0)
    key, kc, kcb = jax.random.split(key, 3)
    c1 = np.asarray(_glorot(kc, (in1 + LAYER_OUT, LAYER_OUT)))     # Linear(40+32, 32)
    put(c1[:LAYER_OUT], R_C1WH, C_COL2)
    put(c1[LAYER_OUT:in1], R_C1WX, C_COL0)
    put(c1[in1:], R_C1WN, C_COL3)
    put(_bias(kcb, LAYER_OUT), R_C1B, C_COL0)

    # ----- classifier -----
    key, kw, kb = jax.random.split(key, 3)
    put(_glorot(kw, (LAYER_OUT, OUT_CH)), R_CLFW, C_COL3)
    put(_bias(kb, OUT_CH), R_CLFB, C_COL0)
    return jnp.asarray(slab)


# ----------------------------------- main ------------------------------------
if __name__ == "__main__":
    key = jax.random.PRNGKey(0)
    k_x, k_e, k_p = jax.random.split(key, 3)

    N = 16
    x = jax.random.normal(k_x, (N, IN_CH), jnp.float32)

    # Deterministic random edge_index [2, E]; dedupe, remove self-loops, then
    # add self-loops for every node (GATv2Conv add_self_loops=True semantics).
    raw = np.asarray(jax.random.randint(k_e, (2, 48), 0, N))
    pairs = sorted({(int(s), int(d)) for s, d in zip(raw[0], raw[1]) if s != d})
    src = np.array([p[0] for p in pairs] + list(range(N)), dtype=np.int32)
    dst = np.array([p[1] for p in pairs] + list(range(N)), dtype=np.int32)
    src_j, dst_j = jnp.asarray(src), jnp.asarray(dst)
    edge_index = jnp.stack([src_j, dst_j]).astype(jnp.int32)      # [2, E]
    adj = jnp.zeros((N, N), jnp.float32).at[dst_j, src_j].set(1.0)

    pslab = init_param_slab(k_p)

    h_list, y_list, e_w_list = gatv2_forward(x, adj, edge_index, pslab)
    jax.block_until_ready((h_list, y_list, e_w_list))

    assert y_list[0].shape == (N, OUT_CH)
    assert all(h.shape == (N, LAYER_OUT) for h in h_list)
    assert all(e.shape == (src.shape[0], N_HEADS) for e in e_w_list)
    assert all(bool(jnp.all(jnp.isfinite(a))) for a in y_list + h_list + e_w_list)
    # attention rows over real edges should sum to ~1 per target node (exact divide)
    row_sums = jnp.zeros((N, N_HEADS)).at[dst_j].add(e_w_list[0])
    assert bool(jnp.allclose(row_sums, 1.0, atol=1e-5))
    print("KERNEL_OK")
</pallas_src>

<mosaic_0001>
module attributes {stable_mosaic.version = 11 : i64} {
  func.func @fused_gatv2_kernel(%arg0: i32, %arg1: memref<16x8xf32, #tpu.memory_space<vmem>>, %arg2: memref<16x16xf32, #tpu.memory_space<vmem>>, %arg3: memref<2x128xi32, #tpu.memory_space<vmem>>, %arg4: memref<64x128xf32, #tpu.memory_space<vmem>>, %arg5: memref<16x128xf32, #tpu.memory_space<vmem>>, %arg6: memref<8x128xf32, #tpu.memory_space<vmem>>) attributes {dimension_semantics = [#tpu.dimension_semantics<arbitrary>], iteration_bounds = array<i64: 1>, scalar_prefetch = 0 : i64, scratch_operands = 0 : i64, tpu.core_type = #tpu.core_type<tc>, window_params = [{pipeline_mode = #tpu.pipeline_mode<synchronous>, transform_indices = @transform_0, window_bounds = array<i64: 16, 8>}, {pipeline_mode = #tpu.pipeline_mode<synchronous>, transform_indices = @transform_1, window_bounds = array<i64: 16, 16>}, {pipeline_mode = #tpu.pipeline_mode<synchronous>, transform_indices = @transform_2, window_bounds = array<i64: 2, 128>}, {pipeline_mode = #tpu.pipeline_mode<synchronous>, transform_indices = @transform_3, window_bounds = array<i64: 64, 128>}, {pipeline_mode = #tpu.pipeline_mode<synchronous>, transform_indices = @transform_4, window_bounds = array<i64: 16, 128>}, {pipeline_mode = #tpu.pipeline_mode<synchronous>, transform_indices = @transform_5, window_bounds = array<i64: 8, 128>}]} {
    %c0 = arith.constant 0 : index
    %c0_0 = arith.constant 0 : index
    %0 = vector.load %arg1[%c0, %c0_0] : memref<16x8xf32, #tpu.memory_space<vmem>>, vector<16x8xf32>
    %c0_1 = arith.constant 0 : index
    %c0_2 = arith.constant 0 : index
    %1 = vector.load %arg2[%c0_1, %c0_2] : memref<16x16xf32, #tpu.memory_space<vmem>>, vector<16x16xf32>
    %c0_3 = arith.constant 0 : index
    %c0_4 = arith.constant 0 : index
    %2 = vector.load %arg4[%c0_3, %c0_4] : memref<64x128xf32, #tpu.memory_space<vmem>>, vector<8x32xf32>
    %c8 = arith.constant 8 : index
    %c0_5 = arith.constant 0 : index
    %3 = vector.load %arg4[%c8, %c0_5] : memref<64x128xf32, #tpu.memory_space<vmem>>, vector<8x32xf32>
    %c16 = arith.constant 16 : index
    %c0_6 = arith.constant 0 : index
    %4 = vector.load %arg4[%c16, %c0_6] : memref<64x128xf32, #tpu.memory_space<vmem>>, vector<8x32xf32>
    %c24 = arith.constant 24 : index
    %c0_7 = arith.constant 0 : index
    %5 = vector.load %arg4[%c24, %c0_7] : memref<64x128xf32, #tpu.memory_space<vmem>>, vector<8x32xf32>
    %c32 = arith.constant 32 : index
    %c0_8 = arith.constant 0 : index
    %6 = vector.load %arg4[%c32, %c0_8] : memref<64x128xf32, #tpu.memory_space<vmem>>, vector<8x32xf32>
    %c40 = arith.constant 40 : index
    %c0_9 = arith.constant 0 : index
    %7 = vector.load %arg4[%c40, %c0_9] : memref<64x128xf32, #tpu.memory_space<vmem>>, vector<8x32xf32>
    %c48 = arith.constant 48 : index
    %c0_10 = arith.constant 0 : index
    %8 = vector.load %arg4[%c48, %c0_10] : memref<64x128xf32, #tpu.memory_space<vmem>>, vector<1x32xf32>
    %c49 = arith.constant 49 : index
    %c0_11 = arith.constant 0 : index
    %9 = vector.load %arg4[%c49, %c0_11] : memref<64x128xf32, #tpu.memory_space<vmem>>, vector<1x32xf32>
    %c50 = arith.constant 50 : index
    %c0_12 = arith.constant 0 : index
    %10 = vector.load %arg4[%c50, %c0_12] : memref<64x128xf32, #tpu.memory_space<vmem>>, vector<1x32xf32>
    %c51 = arith.constant 51 : index
    %c0_13 = arith.constant 0 : index
    %11 = vector.load %arg4[%c51, %c0_13] : memref<64x128xf32, #tpu.memory_space<vmem>>, vector<1x32xf32>
    %c52 = arith.constant 52 : index
    %c0_14 = arith.constant 0 : index
    %12 = vector.load %arg4[%c52, %c0_14] : memref<64x128xf32, #tpu.memory_space<vmem>>, vector<1x32xf32>
    %c53 = arith.constant 53 : index
    %c0_15 = arith.constant 0 : index
    %13 = vector.load %arg4[%c53, %c0_15] : memref<64x128xf32, #tpu.memory_space<vmem>>, vector<1x32xf32>
    %c54 = arith.constant 54 : index
    %c0_16 = arith.constant 0 : index
    %14 = vector.load %arg4[%c54, %c0_16] : memref<64x128xf32, #tpu.memory_space<vmem>>, vector<1x32xf32>
    %c55 = arith.constant 55 : index
    %c0_17 = arith.constant 0 : index
    %15 = vector.load %arg4[%c55, %c0_17] : memref<64x128xf32, #tpu.memory_space<vmem>>, vector<1x32xf32>
    %c56 = arith.constant 56 : index
    %c0_18 = arith.constant 0 : index
    %16 = vector.load %arg4[%c56, %c0_18] : memref<64x128xf32, #tpu.memory_space<vmem>>, vector<1x4xf32>
    %c57 = arith.constant 57 : index
    %c0_19 = arith.constant 0 : index
    %17 = vector.load %arg4[%c57, %c0_19] : memref<64x128xf32, #tpu.memory_space<vmem>>, vector<2x16xf32>
    %c59 = arith.constant 59 : index
    %c0_20 = arith.constant 0 : index
    %18 = vector.load %arg4[%c59, %c0_20] : memref<64x128xf32, #tpu.memory_space<vmem>>, vector<2x16xf32>
    %c0_21 = arith.constant 0 : index
    %c32_22 = arith.constant 32 : index
    %19 = vector.load %arg4[%c0_21, %c32_22] : memref<64x128xf32, #tpu.memory_space<vmem>>, vector<32x32xf32>
    %c32_23 = arith.constant 32 : index
    %c32_24 = arith.constant 32 : index
    %20 = vector.load %arg4[%c32_23, %c32_24] : memref<64x128xf32, #tpu.memory_space<vmem>>, vector<32x32xf32>
    %c0_25 = arith.constant 0 : index
    %c64 = arith.constant 64 : index
    %21 = vector.load %arg4[%c0_25, %c64] : memref<64x128xf32, #tpu.memory_space<vmem>>, vector<32x32xf32>
    %c32_26 = arith.constant 32 : index
    %c64_27 = arith.constant 64 : index
    %22 = vector.load %arg4[%c32_26, %c64_27] : memref<64x128xf32, #tpu.memory_space<vmem>>, vector<32x32xf32>
    %c0_28 = arith.constant 0 : index
    %c96 = arith.constant 96 : index
    %23 = vector.load %arg4[%c0_28, %c96] : memref<64x128xf32, #tpu.memory_space<vmem>>, vector<32x32xf32>
    %c32_29 = arith.constant 32 : index
    %c96_30 = arith.constant 96 : index
    %24 = vector.load %arg4[%c32_29, %c96_30] : memref<64x128xf32, #tpu.memory_space<vmem>>, vector<32x4xf32>
    %c0_31 = arith.constant 0 : index
    %c0_32 = arith.constant 0 : index
    %25 = vector.load %arg3[%c0_31, %c0_32] : memref<2x128xi32, #tpu.memory_space<vmem>>, vector<2x128xi32>
    %26 = tpu.iota {dimensions = array<i32: 0>} : vector<16x128xi32>
    %27 = vector.extract_strided_slice %25 {offsets = [0, 0], sizes = [1, 128], strides = [1, 1]} : vector<2x128xi32> to vector<1x128xi32>
    %28 = vector.broadcast %27 : vector<1x128xi32> to vector<16x128xi32>
    %29 = arith.cmpi eq, %26, %28 : vector<16x128xi32>
    %30 = arith.extui %29 : vector<16x128xi1> to vector<16x128xi32>
    %31 = arith.sitofp %30 : vector<16x128xi32> to vector<16x128xf32>
    %32 = vector.extract_strided_slice %25 {offsets = [1, 0], sizes = [1, 128], strides = [1, 1]} : vector<2x128xi32> to vector<1x128xi32>
    %33 = vector.broadcast %32 : vector<1x128xi32> to vector<16x128xi32>
    %34 = arith.cmpi eq, %26, %33 : vector<16x128xi32>
    %35 = arith.extui %34 : vector<16x128xi1> to vector<16x128xi32>
    %36 = arith.sitofp %35 : vector<16x128xi32> to vector<16x128xf32>
    %37 = tpu.concatenate %36, %36 in 0 : vector<16x128xf32>, vector<16x128xf32> -> vector<32x128xf32>
    %cst = arith.constant dense<0.000000e+00> : vector<16x32xf32>
    %38 = tpu.matmul %0, %2, %cst {dimension_numbers = #tpu.dot_dimension_numbers<[1], [0], [0], [1], [0, 0, 1, 1], [], []>} : vector<16x8xf32>, vector<8x32xf32>, vector<16x32xf32> -> vector<16x32xf32>
    %39 = vector.broadcast %8 : vector<1x32xf32> to vector<16x32xf32>
    %40 = arith.addf %38, %39 : vector<16x32xf32>
    %cst_33 = arith.constant dense<0.000000e+00> : vector<16x32xf32>
    %41 = tpu.matmul %0, %3, %cst_33 {dimension_numbers = #tpu.dot_dimension_numbers<[1], [0], [0], [1], [0, 0, 1, 1], [], []>} : vector<16x8xf32>, vector<8x32xf32>, vector<16x32xf32> -> vector<16x32xf32>
    %42 = vector.broadcast %9 : vector<1x32xf32> to vector<16x32xf32>
    %43 = arith.addf %41, %42 : vector<16x32xf32>
    %44 = vector.shape_cast %43 : vector<16x32xf32> to vector<16x1x32xf32>
    %45 = vector.shape_cast %40 : vector<16x32xf32> to vector<1x16x32xf32>
    %46 = vector.broadcast %44 : vector<16x1x32xf32> to vector<16x16x32xf32>
    %47 = vector.broadcast %45 : vector<1x16x32xf32> to vector<16x16x32xf32>
    %48 = arith.addf %46, %47 : vector<16x16x32xf32>
    %cst_34 = arith.constant 0.000000e+00 : f32
    %49 = vector.broadcast %cst_34 : f32 to vector<16x16x32xf32>
    %50 = arith.cmpf oge, %48, %49 : vector<16x16x32xf32>
    %cst_35 = arith.constant 2.000000e-01 : f32
    %51 = vector.broadcast %cst_35 : f32 to vector<16x16x32xf32>
    %52 = arith.mulf %51, %48 : vector<16x16x32xf32>
    %53 = arith.select %50, %48, %52 : vector<16x16x32xi1>, vector<16x16x32xf32>
    %54 = vector.extract_strided_slice %17 {offsets = [0, 0], sizes = [1, 16], strides = [1, 1]} : vector<2x16xf32> to vector<1x16xf32>
    %55 = vector.shape_cast %54 : vector<1x16xf32> to vector<1x1x16xf32>
    %56 = vector.extract_strided_slice %53 {offsets = [0, 0, 0], sizes = [16, 16, 16], strides = [1, 1, 1]} : vector<16x16x32xf32> to vector<16x16x16xf32>
    %57 = vector.broadcast %55 : vector<1x1x16xf32> to vector<16x16x16xf32>
    %58 = arith.mulf %56, %57 : vector<16x16x16xf32>
    %cst_36 = arith.constant dense<0.000000e+00> : vector<16x16xf32>
    %59 = vector.multi_reduction <add>, %58, %cst_36 [2] : vector<16x16x16xf32> to vector<16x16xf32>
    %60 = arith.addf %59, %1 : vector<16x16xf32>
    %cst_37 = arith.constant dense<0xFF800000> : vector<16xf32>
    %61 = vector.multi_reduction <maximumf>, %60, %cst_37 [1] : vector<16x16xf32> to vector<16xf32>
    %62 = vector.shape_cast %61 : vector<16xf32> to vector<16x1xf32>
    %63 = vector.broadcast %62 : vector<16x1xf32> to vector<16x16xf32>
    %64 = arith.subf %60, %63 : vector<16x16xf32>
    %65 = math.exp %64 : vector<16x16xf32>
    %cst_38 = arith.constant dense<0.000000e+00> : vector<16xf32>
    %66 = vector.multi_reduction <add>, %65, %cst_38 [1] : vector<16x16xf32> to vector<16xf32>
    %67 = vector.shape_cast %66 : vector<16xf32> to vector<16x1xf32>
    %68 = vector.broadcast %67 : vector<16x1xf32> to vector<16x16xf32>
    %69 = arith.divf %65, %68 : vector<16x16xf32>
    %70 = vector.extract_strided_slice %40 {offsets = [0, 0], sizes = [16, 16], strides = [1, 1]} : vector<16x32xf32> to vector<16x16xf32>
    %cst_39 = arith.constant dense<0.000000e+00> : vector<16x16xf32>
    %71 = tpu.matmul %69, %70, %cst_39 {dimension_numbers = #tpu.dot_dimension_numbers<[1], [0], [0], [1], [0, 0, 1, 1], [], []>} : vector<16x16xf32>, vector<16x16xf32>, vector<16x16xf32> -> vector<16x16xf32>
    %72 = vector.extract_strided_slice %17 {offsets = [1, 0], sizes = [1, 16], strides = [1, 1]} : vector<2x16xf32> to vector<1x16xf32>
    %73 = vector.shape_cast %72 : vector<1x16xf32> to vector<1x1x16xf32>
    %74 = vector.extract_strided_slice %53 {offsets = [0, 0, 16], sizes = [16, 16, 16], strides = [1, 1, 1]} : vector<16x16x32xf32> to vector<16x16x16xf32>
    %75 = vector.broadcast %73 : vector<1x1x16xf32> to vector<16x16x16xf32>
    %76 = arith.mulf %74, %75 : vector<16x16x16xf32>
    %cst_40 = arith.constant dense<0.000000e+00> : vector<16x16xf32>
    %77 = vector.multi_reduction <add>, %76, %cst_40 [2] : vector<16x16x16xf32> to vector<16x16xf32>
    %78 = arith.addf %77, %1 : vector<16x16xf32>
    %cst_41 = arith.constant dense<0xFF800000> : vector<16xf32>
    %79 = vector.multi_reduction <maximumf>, %78, %cst_41 [1] : vector<16x16xf32> to vector<16xf32>
    %80 = vector.shape_cast %79 : vector<16xf32> to vector<16x1xf32>
    %81 = vector.broadcast %80 : vector<16x1xf32> to vector<16x16xf32>
    %82 = arith.subf %78, %81 : vector<16x16xf32>
    %83 = math.exp %82 : vector<16x16xf32>
    %cst_42 = arith.constant dense<0.000000e+00> : vector<16xf32>
    %84 = vector.multi_reduction <add>, %83, %cst_42 [1] : vector<16x16xf32> to vector<16xf32>
    %85 = vector.shape_cast %84 : vector<16xf32> to vector<16x1xf32>
    %86 = vector.broadcast %85 : vector<16x1xf32> to vector<16x16xf32>
    %87 = arith.divf %83, %86 : vector<16x16xf32>
    %88 = vector.extract_strided_slice %40 {offsets = [0, 16], sizes = [16, 16], strides = [1, 1]} : vector<16x32xf32> to vector<16x16xf32>
    %cst_43 = arith.constant dense<0.000000e+00> : vector<16x16xf32>
    %89 = tpu.matmul %87, %88, %cst_43 {dimension_numbers = #tpu.dot_dimension_numbers<[1], [0], [0], [1], [0, 0, 1, 1], [], []>} : vector<16x16xf32>, vector<16x16xf32>, vector<16x16xf32> -> vector<16x16xf32>
    %90 = tpu.concatenate %71, %89 in 1 : vector<16x16xf32>, vector<16x16xf32> -> vector<16x32xf32>
    %91 = vector.broadcast %10 : vector<1x32xf32> to vector<16x32xf32>
    %92 = arith.addf %90, %91 : vector<16x32xf32>
    %93 = tpu.concatenate %69, %87 in 0 : vector<16x16xf32>, vector<16x16xf32> -> vector<32x16xf32>
    %cst_44 = arith.constant dense<0.000000e+00> : vector<32x128xf32>
    %94 = tpu.matmul %93, %31, %cst_44 {dimension_numbers = #tpu.dot_dimension_numbers<[1], [0], [0], [1], [0, 0, 1, 1], [], []>} : vector<32x16xf32>, vector<16x128xf32>, vector<32x128xf32> -> vector<32x128xf32>
    %95 = arith.mulf %94, %37 : vector<32x128xf32>
    %96 = vector.shape_cast %95 : vector<32x128xf32> to vector<2x16x128xf32>
    %cst_45 = arith.constant dense<0.000000e+00> : vector<2x128xf32>
    %97 = vector.multi_reduction <add>, %96, %cst_45 [1] : vector<2x16x128xf32> to vector<2x128xf32>
    %cst_46 = arith.constant dense<0.000000e+00> : vector<16x32xf32>
    %98 = tpu.matmul %0, %4, %cst_46 {dimension_numbers = #tpu.dot_dimension_numbers<[1], [0], [0], [1], [0, 0, 1, 1], [], []>} : vector<16x8xf32>, vector<8x32xf32>, vector<16x32xf32> -> vector<16x32xf32>
    %cst_47 = arith.constant dense<0.000000e+00> : vector<16x32xf32>
    %99 = tpu.matmul %92, %19, %cst_47 {dimension_numbers = #tpu.dot_dimension_numbers<[1], [0], [0], [1], [0, 0, 1, 1], [], []>} : vector<16x32xf32>, vector<32x32xf32>, vector<16x32xf32> -> vector<16x32xf32>
    %100 = arith.addf %98, %99 : vector<16x32xf32>
    %101 = vector.broadcast %11 : vector<1x32xf32> to vector<16x32xf32>
    %102 = arith.addf %100, %101 : vector<16x32xf32>
    %cst_48 = arith.constant 0.000000e+00 : f32
    %103 = vector.broadcast %cst_48 : f32 to vector<16x32xf32>
    %104 = arith.maximumf %102, %103 : vector<16x32xf32>
    %cst_49 = arith.constant dense<0.000000e+00> : vector<16x32xf32>
    %105 = tpu.matmul %104, %20, %cst_49 {dimension_numbers = #tpu.dot_dimension_numbers<[1], [0], [0], [1], [0, 0, 1, 1], [], []>} : vector<16x32xf32>, vector<32x32xf32>, vector<16x32xf32> -> vector<16x32xf32>
    %cst_50 = arith.constant dense<0.000000e+00> : vector<16x32xf32>
    %106 = tpu.matmul %0, %5, %cst_50 {dimension_numbers = #tpu.dot_dimension_numbers<[1], [0], [0], [1], [0, 0, 1, 1], [], []>} : vector<16x8xf32>, vector<8x32xf32>, vector<16x32xf32> -> vector<16x32xf32>
    %107 = arith.addf %105, %106 : vector<16x32xf32>
    %108 = vector.broadcast %12 : vector<1x32xf32> to vector<16x32xf32>
    %109 = arith.addf %107, %108 : vector<16x32xf32>
    %cst_51 = arith.constant dense<0.000000e+00> : vector<16x32xf32>
    %110 = tpu.matmul %104, %21, %cst_51 {dimension_numbers = #tpu.dot_dimension_numbers<[1], [0], [0], [1], [0, 0, 1, 1], [], []>} : vector<16x32xf32>, vector<32x32xf32>, vector<16x32xf32> -> vector<16x32xf32>
    %cst_52 = arith.constant dense<0.000000e+00> : vector<16x32xf32>
    %111 = tpu.matmul %0, %6, %cst_52 {dimension_numbers = #tpu.dot_dimension_numbers<[1], [0], [0], [1], [0, 0, 1, 1], [], []>} : vector<16x8xf32>, vector<8x32xf32>, vector<16x32xf32> -> vector<16x32xf32>
    %112 = arith.addf %110, %111 : vector<16x32xf32>
    %113 = vector.broadcast %13 : vector<1x32xf32> to vector<16x32xf32>
    %114 = arith.addf %112, %113 : vector<16x32xf32>
    %115 = vector.shape_cast %114 : vector<16x32xf32> to vector<16x1x32xf32>
    %116 = vector.shape_cast %109 : vector<16x32xf32> to vector<1x16x32xf32>
    %117 = vector.broadcast %115 : vector<16x1x32xf32> to vector<16x16x32xf32>
    %118 = vector.broadcast %116 : vector<1x16x32xf32> to vector<16x16x32xf32>
    %119 = arith.addf %117, %118 : vector<16x16x32xf32>
    %cst_53 = arith.constant 0.000000e+00 : f32
    %120 = vector.broadcast %cst_53 : f32 to vector<16x16x32xf32>
    %121 = arith.cmpf oge, %119, %120 : vector<16x16x32xf32>
    %cst_54 = arith.constant 2.000000e-01 : f32
    %122 = vector.broadcast %cst_54 : f32 to vector<16x16x32xf32>
    %123 = arith.mulf %122, %119 : vector<16x16x32xf32>
    %124 = arith.select %121, %119, %123 : vector<16x16x32xi1>, vector<16x16x32xf32>
    %125 = vector.extract_strided_slice %18 {offsets = [0, 0], sizes = [1, 16], strides = [1, 1]} : vector<2x16xf32> to vector<1x16xf32>
    %126 = vector.shape_cast %125 : vector<1x16xf32> to vector<1x1x16xf32>
    %127 = vector.extract_strided_slice %124 {offsets = [0, 0, 0], sizes = [16, 16, 16], strides = [1, 1, 1]} : vector<16x16x32xf32> to vector<16x16x16xf32>
    %128 = vector.broadcast %126 : vector<1x1x16xf32> to vector<16x16x16xf32>
    %129 = arith.mulf %127, %128 : vector<16x16x16xf32>
    %cst_55 = arith.constant dense<0.000000e+00> : vector<16x16xf32>
    %130 = vector.multi_reduction <add>, %129, %cst_55 [2] : vector<16x16x16xf32> to vector<16x16xf32>
    %131 = arith.addf %130, %1 : vector<16x16xf32>
    %cst_56 = arith.constant dense<0xFF800000> : vector<16xf32>
    %132 = vector.multi_reduction <maximumf>, %131, %cst_56 [1] : vector<16x16xf32> to vector<16xf32>
    %133 = vector.shape_cast %132 : vector<16xf32> to vector<16x1xf32>
    %134 = vector.broadcast %133 : vector<16x1xf32> to vector<16x16xf32>
    %135 = arith.subf %131, %134 : vector<16x16xf32>
    %136 = math.exp %135 : vector<16x16xf32>
    %cst_57 = arith.constant dense<0.000000e+00> : vector<16xf32>
    %137 = vector.multi_reduction <add>, %136, %cst_57 [1] : vector<16x16xf32> to vector<16xf32>
    %138 = vector.shape_cast %137 : vector<16xf32> to vector<16x1xf32>
    %139 = vector.broadcast %138 : vector<16x1xf32> to vector<16x16xf32>
    %140 = arith.divf %136, %139 : vector<16x16xf32>
    %141 = vector.extract_strided_slice %109 {offsets = [0, 0], sizes = [16, 16], strides = [1, 1]} : vector<16x32xf32> to vector<16x16xf32>
    %cst_58 = arith.constant dense<0.000000e+00> : vector<16x16xf32>
    %142 = tpu.matmul %140, %141, %cst_58 {dimension_numbers = #tpu.dot_dimension_numbers<[1], [0], [0], [1], [0, 0, 1, 1], [], []>} : vector<16x16xf32>, vector<16x16xf32>, vector<16x16xf32> -> vector<16x16xf32>
    %143 = vector.extract_strided_slice %18 {offsets = [1, 0], sizes = [1, 16], strides = [1, 1]} : vector<2x16xf32> to vector<1x16xf32>
    %144 = vector.shape_cast %143 : vector<1x16xf32> to vector<1x1x16xf32>
    %145 = vector.extract_strided_slice %124 {offsets = [0, 0, 16], sizes = [16, 16, 16], strides = [1, 1, 1]} : vector<16x16x32xf32> to vector<16x16x16xf32>
    %146 = vector.broadcast %144 : vector<1x1x16xf32> to vector<16x16x16xf32>
    %147 = arith.mulf %145, %146 : vector<16x16x16xf32>
    %cst_59 = arith.constant dense<0.000000e+00> : vector<16x16xf32>
    %148 = vector.multi_reduction <add>, %147, %cst_59 [2] : vector<16x16x16xf32> to vector<16x16xf32>
    %149 = arith.addf %148, %1 : vector<16x16xf32>
    %cst_60 = arith.constant dense<0xFF800000> : vector<16xf32>
    %150 = vector.multi_reduction <maximumf>, %149, %cst_60 [1] : vector<16x16xf32> to vector<16xf32>
    %151 = vector.shape_cast %150 : vector<16xf32> to vector<16x1xf32>
    %152 = vector.broadcast %151 : vector<16x1xf32> to vector<16x16xf32>
    %153 = arith.subf %149, %152 : vector<16x16xf32>
    %154 = math.exp %153 : vector<16x16xf32>
    %cst_61 = arith.constant dense<0.000000e+00> : vector<16xf32>
    %155 = vector.multi_reduction <add>, %154, %cst_61 [1] : vector<16x16xf32> to vector<16xf32>
    %156 = vector.shape_cast %155 : vector<16xf32> to vector<16x1xf32>
    %157 = vector.broadcast %156 : vector<16x1xf32> to vector<16x16xf32>
    %158 = arith.divf %154, %157 : vector<16x16xf32>
    %159 = vector.extract_strided_slice %109 {offsets = [0, 16], sizes = [16, 16], strides = [1, 1]} : vector<16x32xf32> to vector<16x16xf32>
    %cst_62 = arith.constant dense<0.000000e+00> : vector<16x16xf32>
    %160 = tpu.matmul %158, %159, %cst_62 {dimension_numbers = #tpu.dot_dimension_numbers<[1], [0], [0], [1], [0, 0, 1, 1], [], []>} : vector<16x16xf32>, vector<16x16xf32>, vector<16x16xf32> -> vector<16x16xf32>
    %161 = tpu.concatenate %142, %160 in 1 : vector<16x16xf32>, vector<16x16xf32> -> vector<16x32xf32>
    %162 = vector.broadcast %14 : vector<1x32xf32> to vector<16x32xf32>
    %163 = arith.addf %161, %162 : vector<16x32xf32>
    %164 = tpu.concatenate %140, %158 in 0 : vector<16x16xf32>, vector<16x16xf32> -> vector<32x16xf32>
    %cst_63 = arith.constant dense<0.000000e+00> : vector<32x128xf32>
    %165 = tpu.matmul %164, %31, %cst_63 {dimension_numbers = #tpu.dot_dimension_numbers<[1], [0], [0], [1], [0, 0, 1, 1], [], []>} : vector<32x16xf32>, vector<16x128xf32>, vector<32x128xf32> -> vector<32x128xf32>
    %166 = arith.mulf %165, %37 : vector<32x128xf32>
    %167 = vector.shape_cast %166 : vector<32x128xf32> to vector<2x16x128xf32>
    %cst_64 = arith.constant dense<0.000000e+00> : vector<2x128xf32>
    %168 = vector.multi_reduction <add>, %167, %cst_64 [1] : vector<2x16x128xf32> to vector<2x128xf32>
    %cst_65 = arith.constant dense<0.000000e+00> : vector<16x32xf32>
    %169 = tpu.matmul %104, %22, %cst_65 {dimension_numbers = #tpu.dot_dimension_numbers<[1], [0], [0], [1], [0, 0, 1, 1], [], []>} : vector<16x32xf32>, vector<32x32xf32>, vector<16x32xf32> -> vector<16x32xf32>
    %cst_66 = arith.constant dense<0.000000e+00> : vector<16x32xf32>
    %170 = tpu.matmul %0, %7, %cst_66 {dimension_numbers = #tpu.dot_dimension_numbers<[1], [0], [0], [1], [0, 0, 1, 1], [], []>} : vector<16x8xf32>, vector<8x32xf32>, vector<16x32xf32> -> vector<16x32xf32>
    %171 = arith.addf %169, %170 : vector<16x32xf32>
    %cst_67 = arith.constant dense<0.000000e+00> : vector<16x32xf32>
    %172 = tpu.matmul %163, %23, %cst_67 {dimension_numbers = #tpu.dot_dimension_numbers<[1], [0], [0], [1], [0, 0, 1, 1], [], []>} : vector<16x32xf32>, vector<32x32xf32>, vector<16x32xf32> -> vector<16x32xf32>
    %173 = arith.addf %171, %172 : vector<16x32xf32>
    %174 = vector.broadcast %15 : vector<1x32xf32> to vector<16x32xf32>
    %175 = arith.addf %173, %174 : vector<16x32xf32>
    %cst_68 = arith.constant 0.000000e+00 : f32
    %176 = vector.broadcast %cst_68 : f32 to vector<16x32xf32>
    %177 = arith.maximumf %175, %176 : vector<16x32xf32>
    %cst_69 = arith.constant dense<0.000000e+00> : vector<16x4xf32>
    %178 = tpu.matmul %177, %24, %cst_69 {dimension_numbers = #tpu.dot_dimension_numbers<[1], [0], [0], [1], [0, 0, 1, 1], [], []>} : vector<16x32xf32>, vector<32x4xf32>, vector<16x4xf32> -> vector<16x4xf32>
    %179 = vector.broadcast %16 : vector<1x4xf32> to vector<16x4xf32>
    %180 = arith.addf %178, %179 : vector<16x4xf32>
    %cst_70 = arith.constant 0.000000e+00 : f32
    %181 = vector.broadcast %cst_70 : f32 to vector<16x60xf32>
    %182 = tpu.concatenate %104, %177, %180, %181 in 1 : vector<16x32xf32>, vector<16x32xf32>, vector<16x4xf32>, vector<16x60xf32> -> vector<16x128xf32>
    %c0_71 = arith.constant 0 : index
    %c0_72 = arith.constant 0 : index
    %183 = vector.load %arg5[%c0_71, %c0_72] : memref<16x128xf32, #tpu.memory_space<vmem>>, vector<16x128xf32>
    tpu.vector_store %arg5[%c0_71, %c0_72], %182 {strides = array<i32>} : memref<16x128xf32, #tpu.memory_space<vmem>>, vector<16x128xf32>,
    %cst_73 = arith.constant 0.000000e+00 : f32
    %184 = vector.broadcast %cst_73 : f32 to vector<4x128xf32>
    %185 = tpu.concatenate %97, %168, %184 in 0 : vector<2x128xf32>, vector<2x128xf32>, vector<4x128xf32> -> vector<8x128xf32>
    %c0_74 = arith.constant 0 : index
    %c0_75 = arith.constant 0 : index
    %186 = vector.load %arg6[%c0_74, %c0_75] : memref<8x128xf32, #tpu.memory_space<vmem>>, vector<8x128xf32>
    tpu.vector_store %arg6[%c0_74, %c0_75], %185 {strides = array<i32>} : memref<8x128xf32, #tpu.memory_space<vmem>>, vector<8x128xf32>,
    return
  }
  func.func @transform_0(%arg0: i32) -> (i32, i32) {
    %c0_i32 = arith.constant 0 : i32
    %c0_i32_0 = arith.constant 0 : i32
    %c0_i32_1 = arith.constant 0 : i32
    return %c0_i32, %c0_i32_0 : i32, i32
  }
  func.func @transform_1(%arg0: i32) -> (i32, i32) {
    %c0_i32 = arith.constant 0 : i32
    %c0_i32_0 = arith.constant 0 : i32
    %c0_i32_1 = arith.constant 0 : i32
    return %c0_i32, %c0_i32_0 : i32, i32
  }
  func.func @transform_2(%arg0: i32) -> (i32, i32) {
    %c0_i32 = arith.constant 0 : i32
    %c0_i32_0 = arith.constant 0 : i32
    %c0_i32_1 = arith.constant 0 : i32
    return %c0_i32, %c0_i32_0 : i32, i32
  }
  func.func @transform_3(%arg0: i32) -> (i32, i32) {
    %c0_i32 = arith.constant 0 : i32
    %c0_i32_0 = arith.constant 0 : i32
    %c0_i32_1 = arith.constant 0 : i32
    return %c0_i32, %c0_i32_0 : i32, i32
  }
  func.func @transform_4(%arg0: i32) -> (i32, i32) {
    %c0_i32 = arith.constant 0 : i32
    %c0_i32_0 = arith.constant 0 : i32
    %c0_i32_1 = arith.constant 0 : i32
    return %c0_i32, %c0_i32_0 : i32, i32
  }
  func.func @transform_5(%arg0: i32) -> (i32, i32) {
    %c0_i32 = arith.constant 0 : i32
    %c0_i32_0 = arith.constant 0 : i32
    %c0_i32_1 = arith.constant 0 : i32
    return %c0_i32, %c0_i32_0 : i32, i32
  }
}

</mosaic_0001>

<bundles_post_ra>
// kernel: tpu_custom_call.1
= control target key start
LH: loop header
LB: loop body
LE: loop exit
PB: predicated region body
PF: predicated region fallthrough
CT: control target
= control target key end

     0   :  { %11 = vsyncpa [#allocation3], 0  ;;  %s13418_s0 = inlined_call_operand.vmem [shape: f32[16,8], index: 0, kind: input, shape index: {}]   ;;  %s13419_s1 = inlined_call_operand.vmem [shape: f32[16,16], index: 1, kind: input, shape index: {}]   ;;  %s13420_s2 = inlined_call_operand.vmem [shape: s32[2,128], index: 2, kind: input, shape index: {}]   ;;  %s13421_s3 = inlined_call_operand.hbm [shape: f32[64,128], index: 3, kind: input, shape index: {}]   ;;  %s13422_s4 = inlined_call_operand.hbm [shape: f32[16,128], index: 4, kind: output, shape index: {0}]   ;;  %s13423_s5 = inlined_call_operand.hbm [shape: f32[8,128], index: 5, kind: output, shape index: {1}]  }
   0x1   :  { %12 = vsyncpa [#allocation4], 0 }
   0x2   :  { %13 = vsyncpa [#allocation7], 0  ;;  %s9183_s18 = smov [#allocation2]   ;;  %s9111_s22 = scalar_lea.hbm %s13421_s3, 1024 }
   0x3   :  { %s25_s19 = sshll.u32 %s9183_s18, 4  ;;  %p9112_p0 = scmp.ne.s32.totalorder %s13421_s3, %s9111_s22  ;;  %s26_s19 = int_to_ptr.vmem [resolvable:$true] %s25_s19 }
   0x4   :  { %p9115_p1 = scmp.lt.u32.totalorder %s9111_s22, %s13421_s3 }
   0x6   :  { %p9117_p2 = pnand %p9115_p1, %p9112_p0 }
   0x8   :  { %9120 = shalt.err (!%p9117_p2)
}
   0x9   :  { %s9121_s27 = scalar_lea.vmem %s26_s19, 1024  ;;  %p9126_p4 = scmp.lt.s32.totalorder %s26_s19, %s26_s19 }
   0xa   :  { %p9122_p3 = scmp.ne.s32.totalorder %s26_s19, %s9121_s27  ;;  %p9127_p5 = scmp.lt.s32.totalorder %s9121_s27, %s9121_s27 }
   0xc   :  { %p9128_p6 = por %p9127_p5, %p9126_p4 }
   0xe   :  { %p9129_p7 = pnand %p9128_p6, %p9122_p3 }
  0x10   :  { %9132 = shalt.err (!%p9129_p7)
}
  0x11   :  { %s9184_s28 = smov 128   ;;  %s9185_s29 = smov 8  }
  0x12   :  { %31 = dma.hbm_to_vmem [thread:$0]  %s13421_s3, 1024, %s26_s19, [#allocation3], %s9184_s28, %s9184_s28, %s9185_s29  }
  0x13   :  { %9177 = dma.done.wait [#allocation3], 1024  }
  0x14   :  { %9178 = vsyncadd [#allocation3], 4294966272  ;;  %v13424_v0 = vlaneseq  ;;  %vm13655_vm0 = vcmask 64512   ;;  %v40_v4 = vld [vmem:[#allocation2 + $0x8] sm:$0xff]  ;;  %v35_v5 = vld [vmem:[%s13418_s0] sm:$0xff]  ;;  %s9186_s12 = smov 16  }
  0x15   :  { %v36_v6 = vld [vmem:[%s13418_s0 + $0x8] sm:$0xff]  ;;  %8406 = vmatprep.subr.mxu1 %v40_v4  ;;  %8408 = vmatprep.mubr.msk.f32.mxu1 %vm13655_vm0, %v35_v5  ;;  %v39_v7 = vld [vmem:[#allocation2] sm:$0xff]  ;;  %v9258_v8 = vld [vmem:[#allocation2 + $0x39] sm:$0x3]  ;;  %v9187_v34 = vmov 1966171168  }
  0x16   :  { %v9243_v1 = vshrl.u32 %v13424_v0, 7  ;;  %v37_v9 = vld [vmem:[%s13419_s1] sm:$0xff]  ;;  %8407 = vmatpush3.msra.mxu1 %v40_v4  ;;  %8401 = vmatprep.subr.mxu0 %v39_v7  ;;  %v38_v15 = vld [vmem:[%s13419_s1 + $0x8] sm:$0xff]  ;;  %v253_v35 = vunpack.c.l.s4 %v9187_v34  ;;  %v8269_v37 = vld [vmem:[#allocation2 + $0x31] ss:$0 sm:$0xff]  ;;  %s9188_s1 = smov 112  }
  0x17   :  { %8409 = vmatmul.mubr.msk.f32.vlgmr.msra.gmra.mrb[0].mxu1 %vm13655_vm0, %v36_v6  ;;  %8402 = vmatpush3.msra.mxu0 %v39_v7  ;;  %v8266_v40 = vld [vmem:[#allocation2 + $0x30] ss:$0 sm:$0xff]  ;;  %s9192_s17 = smov 64   ;;  %s9194_s26 = smov 32  }
  0x18   :  { %13740 = vst [vmem:[#allocation11_spill] sm:$0xff] %v9243_v1  ;;  %v9246_v2 = vsub.s32 0, %v9243_v1  ;;  %v9249_v3 = vsub.s32 1, %v9243_v1  ;;  %8403 = vmatprep.mubr.msk.f32.mxu0 %vm13655_vm0, %v35_v5  ;;  %v9272_v13 = vsub.s32 2, %v9243_v1  ;;  %v9281_v18 = vsub.s32 3, %v9243_v1 }
  0x19   :  { %8404 = vmatmul.mubr.msk.f32.vlgmr.msra.gmra.mrb[0].mxu0 %vm13655_vm0, %v36_v6  ;;  %v9286_v21 = vsub.s32 4, %v9243_v1  ;;  %v9291_v24 = vsub.s32 5, %v9243_v1  ;;  %v9296_v27 = vsub.s32 6, %v9243_v1  ;;  %v9301_v30 = vsub.s32 7, %v9243_v1 }
  0x1a   :  { %13741 = vst [vmem:[#allocation12_spill] sm:$0xff] %v9246_v2  ;;  %13742 = vst [vmem:[#allocation13_spill] sm:$0xff] %v9249_v3  ;;  %v2207_v10 = vrot.slane %v9258_v8, %v9249_v3  ;;  %v695_v11 = vrot.slane %v37_v9, %v9246_v2  ;;  %v706_v12 = vrot.slane %v37_v9, %v9249_v3  ;;  %v254_v36 = vunpack.c.0.s8 %v253_v35 }
  0x1b   :  { %13743 = vst [vmem:[#allocation14_spill] sm:$0xff] %v9272_v13  ;;  %v717_v14 = vrot.slane %v37_v9, %v9272_v13  ;;  %v783_v16 = vrot.slane %v38_v15, %v9246_v2  ;;  %v794_v17 = vrot.slane %v38_v15, %v9249_v3  ;;  %13744 = vst [vmem:[#allocation15_spill] sm:$0xff] %v9281_v18 }
  0x1c   :  { %2209 = vrot.lane.b32.xlu0 %v2207_v10, %s9186_s12  ;;  %701 = vbcast.lane.b32.xlu1 %v695_v11, 264  ;;  %v728_v19 = vrot.slane %v37_v9, %v9281_v18  ;;  %v805_v20 = vrot.slane %v38_v15, %v9272_v13  ;;  %13745 = vst [vmem:[#allocation16_spill] sm:$0xff] %v9286_v21  ;;  %13746 = vst [vmem:[#allocation17_spill] sm:$0xff] %v9291_v24 }
  0x1d   :  { %v739_v22 = vrot.slane %v37_v9, %v9286_v21  ;;  %v816_v23 = vrot.slane %v38_v15, %v9281_v18  ;;  %v750_v25 = vrot.slane %v37_v9, %v9291_v24  ;;  %v827_v26 = vrot.slane %v38_v15, %v9286_v21  ;;  %13747 = vst [vmem:[#allocation18_spill] sm:$0xff] %v9296_v27 }
  0x1e   :  { %v761_v28 = vrot.slane %v37_v9, %v9296_v27  ;;  %v838_v29 = vrot.slane %v38_v15, %v9291_v24  ;;  %13748 = vst [vmem:[#allocation19_spill] sm:$0xff] %v9301_v30  ;;  %v772_v31 = vrot.slane %v37_v9, %v9301_v30  ;;  %v849_v32 = vrot.slane %v38_v15, %v9296_v27 }
  0x1f   :  { %v860_v33 = vrot.slane %v38_v15, %v9301_v30  ;;  %v9307_v38 = vsub.s32 %v254_v36, %v9243_v1  ;;  %v9331_v61 = vrot.slane %v9258_v8, %v9246_v2 }
  0x20   :  { %697 = vbcast.lane.b32.xlu0 %v695_v11, 256  ;;  %708 = vbcast.lane.b32.xlu1 %v706_v12, 256 }
  0x21   :  { %13749 = vst [vmem:[#allocation20_spill] sm:$0xff] %v9307_v38 }
  0x24   :  { %712 = vbcast.lane.b32.xlu0 %v706_v12, 264  ;;  %719 = vbcast.lane.b32.xlu1 %v717_v14, 256 }
  0x28   :  { %723 = vbcast.lane.b32.xlu0 %v717_v14, 264  ;;  %785 = vbcast.lane.b32.xlu1 %v783_v16, 256 }
  0x2c   :  { %789 = vbcast.lane.b32.xlu0 %v783_v16, 264  ;;  %796 = vbcast.lane.b32.xlu1 %v794_v17, 256 }
  0x30   :  { %800 = vbcast.lane.b32.xlu0 %v794_v17, 264  ;;  %730 = vbcast.lane.b32.xlu1 %v728_v19, 256 }
  0x34   :  { %734 = vbcast.lane.b32.xlu0 %v728_v19, 264  ;;  %807 = vbcast.lane.b32.xlu1 %v805_v20, 256 }
  0x38   :  { %811 = vbcast.lane.b32.xlu0 %v805_v20, 264  ;;  %741 = vbcast.lane.b32.xlu1 %v739_v22, 256 }
  0x3c   :  { %745 = vbcast.lane.b32.xlu0 %v739_v22, 264  ;;  %818 = vbcast.lane.b32.xlu1 %v816_v23, 256 }
  0x40   :  { %822 = vbcast.lane.b32.xlu0 %v816_v23, 264  ;;  %752 = vbcast.lane.b32.xlu1 %v750_v25, 256 }
  0x44   :  { %756 = vbcast.lane.b32.xlu0 %v750_v25, 264  ;;  %829 = vbcast.lane.b32.xlu1 %v827_v26, 256 }
  0x48   :  { %833 = vbcast.lane.b32.xlu0 %v827_v26, 264  ;;  %763 = vbcast.lane.b32.xlu1 %v761_v28, 256 }
  0x4c   :  { %767 = vbcast.lane.b32.xlu0 %v761_v28, 264  ;;  %840 = vbcast.lane.b32.xlu1 %v838_v29, 256 }
  0x50   :  { %844 = vbcast.lane.b32.xlu0 %v838_v29, 264  ;;  %774 = vbcast.lane.b32.xlu1 %v772_v31, 256 }
  0x54   :  { %778 = vbcast.lane.b32.xlu0 %v772_v31, 264  ;;  %851 = vbcast.lane.b32.xlu1 %v849_v32, 256 }
  0x58   :  { %855 = vbcast.lane.b32.xlu0 %v849_v32, 264  ;;  %862 = vbcast.lane.b32.xlu1 %v860_v33, 256 }
  0x5c   :  { %866 = vbcast.lane.b32.xlu0 %v860_v33, 264 }
  0x8e   :  { %v9344_v12 = vpop.permute.xlu0 %2209 }
  0xea   :  { %v8410_v39 = vpop.f32.mrb[0].mxu1 }
  0xeb   :  { %v246_v41 = vadd.f32 %v8410_v39, %v8269_v37  ;;  %v240_v42 = vpop.f32.mrb[1].mxu1 }
  0xec   :  { %v241_v43 = vadd.f32 %v8269_v37, %v240_v42  ;;  %v8405_v44 = vpop.f32.mrb[0].mxu0 }
  0xed   :  { %v307_v45 = vrot.slane %v246_v41, %v9307_v38  ;;  %v9310_v46 = vadd.f32 %v8405_v44, %v8266_v40  ;;  %v161_v47 = vpop.f32.mrb[1].mxu0  ;;  %v300_v51 = vcombine.high %v246_v41, %v246_v41 }
  0xee   :  { %v258_v48 = vrot.slane %v241_v43, %v9307_v38  ;;  %v9313_v49 = vadd.f32 %v8266_v40, %v161_v47  ;;  %v251_v62 = vcombine.high %v241_v43, %v241_v43 }
  0xef   :  { %13750 = vst [vmem:[#allocation21_spill] sm:$0xff] %v9310_v46  ;;  %v315_v50 = vcombine.high %v307_v45, %v307_v45  ;;  %v323_v52 = vrot.slane %v307_v45, %v9307_v38  ;;  %v9323_v56 = vrot.slane %v300_v51, %v9307_v38 }
  0xf0   :  { %13751 = vst [vmem:[#allocation22_spill] sm:$0xff] %v9313_v49  ;;  %v8545_v53 = vpack.c.bf16 %v9310_v46, %v9313_v49  ;;  %v274_v55 = vrot.slane %v258_v48, %v9307_v38  ;;  %v266_v63 = vcombine.high %v258_v48, %v258_v48  ;;  %v9347_v19 = vrot.slane %v251_v62, %v9307_v38 }
  0xf1   :  { %v9319_v54 = vrot.slane %v315_v50, %v9307_v38  ;;  %v345_v57 = vcombine.high %v323_v52, %v323_v52  ;;  %v384_v58 = vrot.slane %v323_v52, %v9246_v2  ;;  %v9335_v4 = vrot.slane %v9323_v56, %v9307_v38 }
  0xf2   :  { %8546 = vmatprep.subr.bf16.mxu0 %v8545_v53  ;;  %v352_v60 = vrot.slane %v274_v55, %v9246_v2  ;;  %v9352_v25 = vrot.slane %v266_v63, %v9307_v38  ;;  %v296_v34 = vcombine.high %v274_v55, %v274_v55  ;;  %v9367_v36 = vrot.slane %v9347_v19, %v9307_v38 }
  0xf3   :  { %8548 = vmatpush3.bf16.msra.mxu0 %v8545_v53  ;;  %v388_v59 = vrot.slane %v9319_v54, %v9246_v2  ;;  %v392_v5 = vrot.slane %v345_v57, %v9246_v2  ;;  %v446_v6 = vadd.f32 %v384_v58, %v9310_v46  ;;  %v445_v7 = vadd.f32 %v384_v58, %v9313_v49 }
  0xf4   :  { %v430_v9 = vadd.f32 %v352_v60, %v9310_v46  ;;  %v429_v10 = vadd.f32 %v352_v60, %v9313_v49  ;;  %v400_v23 = vrot.slane %v9335_v4, %v9246_v2  ;;  %v356_v42 = vrot.slane %v9352_v25, %v9246_v2 }
  0xf5   :  { %v447_v11 = vadd.f32 %v388_v59, %v9313_v49  ;;  %v448_v8 = vadd.f32 %v388_v59, %v9310_v46  ;;  %vm478_vm1 = vcmp.ge.f32.partialorder %v446_v6, 0.0  ;;  %v510_v14 = vmul.f32 0.2, %v446_v6 }
  0xf6   :  { %vm477_vm2 = vcmp.ge.f32.partialorder %v445_v7, 0.0  ;;  %v509_v15 = vmul.f32 0.2, %v445_v7  ;;  %vm462_vm3 = vcmp.ge.f32.partialorder %v430_v9, 0.0  ;;  %v494_v16 = vmul.f32 0.2, %v430_v9 }
  0xf7   :  { %vm461_vm4 = vcmp.ge.f32.partialorder %v429_v10, 0.0  ;;  %v493_v17 = vmul.f32 0.2, %v429_v10  ;;  %v542_v20 = vsel %vm478_vm1, %v446_v6, %v510_v14  ;;  %v449_v35 = vadd.f32 %v392_v5, %v9313_v49 }
  0xf8   :  { %v541_v22 = vsel %vm477_vm2, %v445_v7, %v509_v15  ;;  %v2229_v26 = vmul.f32 %v9344_v12, %v542_v20  ;;  %v526_v29 = vsel %vm462_vm3, %v430_v9, %v494_v16  ;;  %v9360_v33 = vmul.f32 %v9331_v61, %v542_v20 }
  0xf9   :  { %v2228_v28 = vmul.f32 %v9344_v12, %v541_v22  ;;  %v525_v31 = vsel %vm461_vm4, %v429_v10, %v493_v17  ;;  %v9357_v32 = vmul.f32 %v9331_v61, %v541_v22  ;;  %v450_v37 = vadd.f32 %v392_v5, %v9310_v46 }
  0xfa   :  { %2310 = vrot.lane.b32.xlu0 %v2229_v26, %s9188_s1  ;;  %v2213_v39 = vmul.f32 %v9344_v12, %v526_v29  ;;  %v2212_v40 = vmul.f32 %v9344_v12, %v525_v31  ;;  %v453_v41 = vadd.f32 %v400_v23, %v9313_v49  ;;  %v454_v43 = vadd.f32 %v400_v23, %v9310_v46 }
  0xfb   :  { %2308 = vrot.lane.b32.xlu1 %v2228_v28, %s9188_s1  ;;  %v360_v44 = vrot.slane %v296_v34, %v9246_v2  ;;  %v9380_v45 = vmul.f32 %v9331_v61, %v526_v29  ;;  %v316_v47 = vcombine.high %v9323_v56, %v9323_v56  ;;  %v368_v48 = vrot.slane %v9367_v36, %v9246_v2 }
  0xfc   :  { %vm479_vm5 = vcmp.ge.f32.partialorder %v447_v11, 0.0  ;;  %v511_v50 = vmul.f32 0.2, %v447_v11  ;;  %vm480_vm6 = vcmp.ge.f32.partialorder %v448_v8, 0.0  ;;  %v512_v51 = vmul.f32 0.2, %v448_v8 }
  0xfd   :  { %v9387_v52 = vmul.f32 %v9331_v61, %v525_v31  ;;  %vm481_vm7 = vcmp.ge.f32.partialorder %v449_v35, 0.0  ;;  %v513_v53 = vmul.f32 0.2, %v449_v35  ;;  %v432_v55 = vadd.f32 %v356_v42, %v9310_v46 }
  0xfe   :  { %2276 = vrot.lane.b32.xlu0 %v2212_v40, %s9188_s1  ;;  %v431_v57 = vadd.f32 %v356_v42, %v9313_v49  ;;  %v514_v58 = vmul.f32 0.2, %v450_v37  ;;  %v517_v59 = vmul.f32 0.2, %v453_v41  ;;  %v434_v56 = vadd.f32 %v360_v44, %v9310_v46 }
  0xff   :  { %2278 = vrot.lane.b32.xlu1 %v2213_v39, %s9188_s1  ;;  %v433_v60 = vadd.f32 %v360_v44, %v9313_v49  ;;  %v347_v62 = vcombine.high %v9319_v54, %v9319_v54  ;;  %vm482_vm8 = vcmp.ge.f32.partialorder %v450_v37, 0.0  ;;  %vm485_vm9 = vcmp.ge.f32.partialorder %v453_v41, 0.0 }
 0x100   :  { %v9396_v63 = vrot.slane %v316_v47, %v9307_v38  ;;  %v346_v5 = vcombine.high %v9335_v4, %v9335_v4  ;;  %v9401_v6 = vsel %vm479_vm5, %v447_v11, %v511_v50  ;;  %v9404_v7 = vsel %vm480_vm6, %v448_v8, %v512_v51 }
 0x101   :  { %v9406_v9 = vsel %vm481_vm7, %v449_v35, %v513_v53  ;;  %v518_v10 = vmul.f32 0.2, %v454_v43  ;;  %v438_v14 = vadd.f32 %v368_v48, %v9310_v46  ;;  %v437_v54 = vadd.f32 %v368_v48, %v9313_v49 }
 0x102   :  { %v9410_v15 = vsel %vm482_vm8, %v450_v37, %v514_v58  ;;  %v9412_v16 = vsel %vm485_vm9, %v453_v41, %v517_v59  ;;  %vm486_vm10 = vcmp.ge.f32.partialorder %v454_v43, 0.0  ;;  %v495_v17 = vmul.f32 0.2, %v431_v57 }
 0x103   :  { %v396_v4 = vrot.slane %v347_v62, %v9246_v2  ;;  %vm463_vm11 = vcmp.ge.f32.partialorder %v431_v57, 0.0  ;;  %v404_v11 = vrot.slane %v9396_v63, %v9246_v2  ;;  %v408_v8 = vrot.slane %v346_v5, %v9246_v2 }
 0x104   :  { %v9420_v20 = vmul.f32 %v9331_v61, %v9401_v6  ;;  %v9424_v22 = vmul.f32 %v9331_v61, %v9406_v9  ;;  %v9426_v23 = vsel %vm486_vm10, %v454_v43, %v518_v10  ;;  %v9430_v26 = vmul.f32 %v9331_v61, %v9404_v7 }
 0x105   :  { %v9434_v28 = vmul.f32 %v9331_v61, %v9412_v16  ;;  %v9438_v29 = vmul.f32 %v9331_v61, %v9410_v15  ;;  %v267_v31 = vcombine.high %v9347_v19, %v9347_v19  ;;  %vm464_vm12 = vcmp.ge.f32.partialorder %v432_v55, 0.0 }
 0x106   :  { %v496_v34 = vmul.f32 0.2, %v432_v55  ;;  %v9442_v35 = vsel %vm463_vm11, %v431_v57, %v495_v17  ;;  %v298_v37 = vcombine.high %v9352_v25, %v9352_v25  ;;  %v498_v39 = vmul.f32 0.2, %v434_v56 }
 0x107   :  { %v497_v40 = vmul.f32 0.2, %v433_v60  ;;  %v501_v41 = vmul.f32 0.2, %v437_v54  ;;  %v9448_v42 = vmul.f32 %v9331_v61, %v9426_v23  ;;  %v452_v43 = vadd.f32 %v396_v4, %v9310_v46 }
 0x108   :  { %v451_v44 = vadd.f32 %v396_v4, %v9313_v49  ;;  %v456_v19 = vadd.f32 %v404_v11, %v9310_v46  ;;  %v455_v47 = vadd.f32 %v404_v11, %v9313_v49  ;;  %v458_v48 = vadd.f32 %v408_v8, %v9310_v46 }
 0x109   :  { %v457_v50 = vadd.f32 %v408_v8, %v9313_v49  ;;  %v9458_v25 = vmul.f32 %v9331_v61, %v9442_v35  ;;  %vm466_vm13 = vcmp.ge.f32.partialorder %v434_v56, 0.0  ;;  %vm465_vm14 = vcmp.ge.f32.partialorder %v433_v60, 0.0 }
 0x10a   :  { %v502_v51 = vmul.f32 0.2, %v438_v14  ;;  %vm469_vm15 = vcmp.ge.f32.partialorder %v437_v54, 0.0  ;;  %v9461_v53 = vrot.slane %v267_v31, %v9307_v38  ;;  %v297_v57 = vcombine.high %v9367_v36, %v9367_v36 }
 0x10b   :  { %vm470_vm1 = vcmp.ge.f32.partialorder %v438_v14, 0.0  ;;  %v364_v58 = vrot.slane %v298_v37, %v9246_v2  ;;  %v9467_v59 = vsel %vm464_vm12, %v432_v55, %v496_v34  ;;  %v9469_v62 = vsel %vm466_vm13, %v434_v56, %v498_v39 }
 0x10c   :  { %v9471_v5 = vsel %vm465_vm14, %v433_v60, %v497_v40  ;;  %v9473_v10 = vsel %vm469_vm15, %v437_v54, %v501_v41  ;;  %vm593_vm2 = vcmask 130048   ;;  %v9475_v17 = vsel %vm470_vm1, %v438_v14, %v502_v51 }
 0x10d   :  { %v515_v4 = vmul.f32 0.2, %v451_v44  ;;  %v372_v11 = vrot.slane %v9461_v53, %v9246_v2  ;;  %v376_v36 = vrot.slane %v297_v57, %v9246_v2  ;;  %vm484_vm3 = vcmp.ge.f32.partialorder %v452_v43, 0.0 }
 0x10e   :  { %vm483_vm4 = vcmp.ge.f32.partialorder %v451_v44, 0.0  ;;  %v9482_v55 = vmul.f32 %v9331_v61, %v9471_v5  ;;  %v9486_v56 = vmul.f32 %v9331_v61, %v9467_v59  ;;  %v9490_v60 = vmul.f32 %v9331_v61, %v9473_v10 }
 0x10f   :  { %v9494_v14 = vmul.f32 %v9331_v61, %v9469_v62  ;;  %v516_v54 = vmul.f32 0.2, %v452_v43  ;;  %v9498_v8 = vmul.f32 %v9331_v61, %v9475_v17  ;;  %v436_v31 = vadd.f32 %v364_v58, %v9310_v46 }
 0x110   :  { %v435_v34 = vadd.f32 %v364_v58, %v9313_v49  ;;  %v9502_v37 = vsel %vm483_vm4, %v451_v44, %v515_v4  ;;  %vm488_vm5 = vcmp.ge.f32.partialorder %v456_v19, 0.0  ;;  %v520_v39 = vmul.f32 0.2, %v456_v19 }
 0x111   :  { %v519_v40 = vmul.f32 0.2, %v455_v47  ;;  %vm487_vm6 = vcmp.ge.f32.partialorder %v455_v47, 0.0  ;;  %vm490_vm7 = vcmp.ge.f32.partialorder %v458_v48, 0.0  ;;  %v522_v41 = vmul.f32 0.2, %v458_v48 }
 0x112   :  { %vm489_vm8 = vcmp.ge.f32.partialorder %v457_v50, 0.0  ;;  %v521_v51 = vmul.f32 0.2, %v457_v50  ;;  %v500_v57 = vmul.f32 0.2, %v436_v31  ;;  %v440_v0 = vadd.f32 %v372_v11, %v9310_v46 }
 0x113   :  { %v439_v38 = vadd.f32 %v372_v11, %v9313_v49  ;;  %v499_v30 = vmul.f32 0.2, %v435_v34  ;;  %v442_v27 = vadd.f32 %v376_v36, %v9310_v46  ;;  %v441_v58 = vadd.f32 %v376_v36, %v9313_v49 }
 0x114   :  { %v9510_v44 = vmul.f32 %v9331_v61, %v9502_v37  ;;  %v348_v4 = vcombine.high %v9396_v63, %v9396_v63  ;;  %v9514_v24 = vsel %vm487_vm6, %v455_v47, %v519_v40  ;;  %vm468_vm9 = vcmp.ge.f32.partialorder %v436_v31, 0.0 }
 0x115   :  { %vm467_vm10 = vcmp.ge.f32.partialorder %v435_v34, 0.0  ;;  %v642_v21 = vsel %vm593_vm2, %v9357_v32, 0.0  ;;  %v9519_v11 = vsel %vm484_vm3, %v452_v43, %v516_v54  ;;  %vm471_vm11 = vcmp.ge.f32.partialorder %v439_v38, 0.0 }
 0x116   :  { %v503_v18 = vmul.f32 0.2, %v439_v38  ;;  %v9522_v36 = vsel %vm488_vm5, %v456_v19, %v520_v39  ;;  %v9525_v13 = vsel %vm490_vm7, %v458_v48, %v522_v41  ;;  %v9528_v63 = vsel %vm489_vm8, %v457_v50, %v521_v51 }
 0x117   :  { %v505_v47 = vmul.f32 0.2, %v441_v58  ;;  %v9530_v40 = vsel %vm468_vm9, %v436_v31, %v500_v57  ;;  %v9532_v3 = vsel %vm467_vm10, %v435_v34, %v499_v30  ;;  %vm473_vm12 = vcmp.ge.f32.partialorder %v441_v58, 0.0 }
 0x118   :  { %v9536_v32 = vmul.f32 %v9331_v61, %v9514_v24  ;;  %v504_v43 = vmul.f32 0.2, %v440_v0  ;;  %v9538_v19 = vsel %vm471_vm11, %v439_v38, %v503_v18  ;;  %v506_v54 = vmul.f32 0.2, %v442_v27 }
 0x119   :  { %v9542_v48 = vmul.f32 %v9331_v61, %v9519_v11  ;;  %vm472_vm13 = vcmp.ge.f32.partialorder %v440_v0, 0.0  ;;  %vm474_vm14 = vcmp.ge.f32.partialorder %v442_v27, 0.0  ;;  %v9548_v30 = vmul.f32 %v9331_v61, %v9528_v63 }
 0x11a   :  { %v9550_v50 = vsel %vm473_vm12, %v441_v58, %v505_v47  ;;  %v9554_v18 = vmul.f32 %v9331_v61, %v9522_v36  ;;  %v9558_v38 = vmul.f32 %v9331_v61, %v9525_v13  ;;  %v412_v31 = vrot.slane %v348_v4, %v9246_v2 }
 0x11b   :  { %v9565_v34 = vmul.f32 %v9331_v61, %v9532_v3  ;;  %v9569_v39 = vmul.f32 %v9331_v61, %v9538_v19  ;;  %v9573_v41 = vmul.f32 %v9331_v61, %v9530_v40  ;;  %v9575_v51 = vsel %vm472_vm13, %v440_v0, %v504_v43 }
 0x11c   :  { %v9577_v57 = vsel %vm474_vm14, %v442_v27, %v506_v54  ;;  %v460_v58 = vadd.f32 %v412_v31, %v9310_v46  ;;  %v9583_v4 = vmul.f32 %v9331_v61, %v9550_v50  ;;  %vm1071_vm5 = vcmask 130112  }
 0x11d   :  { %643 = vadd.xlane.f32.xlu0 %v642_v21  ;;  %v299_v21 = vcombine.high %v9461_v53, %v9461_v53  ;;  %v645_v53 = vsel %vm593_vm2, %v9360_v33, 0.0  ;;  %13752 = vst [vmem:[#allocation23_spill] sm:$0xff] %v9573_v41  ;;  %v459_v33 = vadd.f32 %v412_v31, %v9313_v49  ;;  %v9587_v41 = vmul.f32 %v9331_v61, %v9575_v51 }
 0x11e   :  { %13753 = vst [vmem:[#allocation24_spill] sm:$0xff] %v9583_v4  ;;  %vm492_vm15 = vcmp.ge.f32.partialorder %v460_v58, 0.0  ;;  %v524_v47 = vmul.f32 0.2, %v460_v58  ;;  %v9591_v0 = vmul.f32 %v9331_v61, %v9577_v57  ;;  %v2230_v31 = vmul.f32 %v9344_v12, %v9401_v6 }
 0x11f   :  { %vm491_vm1 = vcmp.ge.f32.partialorder %v459_v33, 0.0  ;;  %v523_v1 = vmul.f32 0.2, %v459_v33  ;;  %13754 = vst [vmem:[#allocation25_spill] sm:$0xff] %v9587_v41  ;;  %v380_v27 = vrot.slane %v299_v21, %v9246_v2  ;;  %v2237_v6 = vmul.f32 %v9344_v12, %v9426_v23 }
 0x120   :  { %13755 = vst [vmem:[#allocation26_spill] sm:$0xff] %v9591_v0  ;;  %v9594_v43 = vsel %vm492_vm15, %v460_v58, %v524_v47  ;;  %v2220_v23 = vmul.f32 %v9344_v12, %v9473_v10  ;;  %v657_v10 = vsel %vm593_vm2, %v9438_v29, 0.0  ;;  %v2241_v29 = vmul.f32 %v9344_v12, %v9525_v13 }
 0x121   :  { %v9596_v54 = vsel %vm491_vm1, %v459_v33, %v523_v1  ;;  %v443_v4 = vadd.f32 %v380_v27, %v9313_v49  ;;  %v9608_v0 = vmul.f32 %v9331_v61, %v9594_v43  ;;  %v2231_v49 = vmul.f32 %v9344_v12, %v9404_v7 }
 0x122   :  { %v9604_v41 = vmul.f32 %v9331_v61, %v9596_v54  ;;  %v594_v7 = vsel %vm593_vm2, %v9387_v52, 0.0  ;;  %v2221_v52 = vmul.f32 %v9344_v12, %v9475_v17  ;;  %v2234_v17 = vmul.f32 %v9344_v12, %v9502_v37 }
 0x123   :  { %646 = vadd.xlane.f32.xlu1 %v645_v53  ;;  %v444_v53 = vadd.f32 %v380_v27, %v9310_v46  ;;  %vm475_vm4 = vcmp.ge.f32.partialorder %v443_v4, 0.0  ;;  %v507_v1 = vmul.f32 0.2, %v443_v4  ;;  %v600_v37 = vsel %vm593_vm2, %v9458_v25, 0.0 }
 0x124   :  { %v618_v13 = vsel %vm593_vm2, %v9490_v60, 0.0  ;;  %v621_v25 = vsel %vm593_vm2, %v9498_v8, 0.0  ;;  %v2219_v60 = vmul.f32 %v9344_v12, %v9530_v40  ;;  %v2224_v40 = vmul.f32 %v9344_v12, %v9550_v50 }
 0x125   :  { %vm476_vm3 = vcmp.ge.f32.partialorder %v444_v53, 0.0  ;;  %v508_v21 = vmul.f32 0.2, %v444_v53  ;;  %v9612_v33 = vsel %vm475_vm4, %v443_v4, %v507_v1  ;;  %v2232_v4 = vmul.f32 %v9344_v12, %v9406_v9 }
 0x126   :  { %v9616_v47 = vmul.f32 %v9331_v61, %v9612_v33  ;;  %v2215_v9 = vmul.f32 %v9344_v12, %v9467_v59  ;;  %v654_v59 = vsel %vm593_vm2, %v9424_v22, 0.0  ;;  %v2235_v22 = vmul.f32 %v9344_v12, %v9519_v11 }
 0x127   :  { %v9610_v58 = vsel %vm476_vm3, %v444_v53, %v508_v21  ;;  %v2233_v53 = vmul.f32 %v9344_v12, %v9410_v15  ;;  %v2214_v15 = vmul.f32 %v9344_v12, %v9442_v35  ;;  %v648_v35 = vsel %vm593_vm2, %v9420_v20, 0.0 }
 0x128   :  { %v9620_v27 = vmul.f32 %v9331_v61, %v9610_v58  ;;  %v2236_v61 = vmul.f32 %v9344_v12, %v9412_v16  ;;  %v2217_v16 = vmul.f32 %v9344_v12, %v9469_v62  ;;  %v651_v62 = vsel %vm593_vm2, %v9430_v26, 0.0 }
 0x129   :  { %v669_v20 = vsel %vm593_vm2, %v9448_v42, 0.0  ;;  %v2239_v26 = vmul.f32 %v9344_v12, %v9522_v36  ;;  %v2240_v42 = vmul.f32 %v9344_v12, %v9528_v63  ;;  %v603_v11 = vsel %vm593_vm2, %v9486_v56, 0.0  ;;  %v9704_v63 = vpop.permute.xlu1 %701 }
 0x12a   :  { %v609_v36 = vsel %vm593_vm2, %v9494_v14, 0.0  ;;  %13756 = vst [vmem:[#allocation27_spill] sm:$0xff] %v9704_v63  ;;  %v2218_v14 = vmul.f32 %v9344_v12, %v9532_v3  ;;  %v2223_v1 = vmul.f32 %v9344_v12, %v9575_v51  ;;  %v2225_v3 = vmul.f32 %v9344_v12, %v9577_v57 }
 0x12b   :  { %vm1208_vm6 = vcmask 1041409   ;;  %vm1210_vm7 = vcmask 1042434   ;;  %vm1212_vm8 = vcmask 1043459   ;;  %vm1214_vm9 = vcmask 1044484  }
 0x12c   :  { %vm1216_vm10 = vcmask 1045509   ;;  %vm1218_vm11 = vcmask 1046534   ;;  %vm1220_vm12 = vcmask 1047559   ;;  %vm13642_vm4 = vcmask 261120  }
 0x133   :  { %2314 = vrot.lane.b32.xlu0 %v2231_v49, %s9188_s1  ;;  %v597_v49 = vsel %vm593_vm2, %v9380_v45, 0.0  ;;  %v2216_v45 = vmul.f32 %v9344_v12, %v9471_v5  ;;  %v666_v5 = vsel %vm593_vm2, %v9434_v28, 0.0  ;;  %v2238_v28 = vmul.f32 %v9344_v12, %v9514_v24 }
 0x134   :  { %2312 = vrot.lane.b32.xlu1 %v2230_v31, %s9188_s1  ;;  %v606_v24 = vsel %vm593_vm2, %v9482_v55, 0.0  ;;  %v9706_v55 = vpop.permute.xlu0 %697  ;;  %v9708_v31 = vpop.permute.xlu1 %708 }
 0x135   :  { %13757 = vst [vmem:[#allocation28_spill] sm:$0xff] %v9706_v55  ;;  %13758 = vst [vmem:[#allocation29_spill] sm:$0xff] %v9708_v31 }
 0x137   :  { %2318 = vrot.lane.b32.xlu0 %v2233_v53, %s9188_s1 }
 0x138   :  { %2316 = vrot.lane.b32.xlu1 %v2232_v4, %s9188_s1  ;;  %v9710_v56 = vpop.permute.xlu0 %712  ;;  %v9712_v21 = vpop.permute.xlu1 %719  ;;  %v2222_v4 = vmul.f32 %v9344_v12, %v9538_v19 }
 0x139   :  { %13759 = vst [vmem:[#allocation30_spill] sm:$0xff] %v9710_v56  ;;  %13760 = vst [vmem:[#allocation31_spill] sm:$0xff] %v9712_v21 }
 0x13b   :  { %2326 = vrot.lane.b32.xlu0 %v2237_v6, %s9188_s1 }
 0x13c   :  { %2324 = vrot.lane.b32.xlu1 %v2236_v61, %s9188_s1  ;;  %v9720_v8 = vpop.permute.xlu0 %723  ;;  %v9726_v53 = vpop.permute.xlu1 %785 }
 0x13d   :  { %13761 = vst [vmem:[#allocation32_spill] sm:$0xff] %v9720_v8  ;;  %13762 = vst [vmem:[#allocation33_spill] sm:$0xff] %v9726_v53 }
 0x140   :  { %v9734_v61 = vpop.permute.xlu0 %789  ;;  %v9738_v51 = vpop.permute.xlu1 %796 }
 0x141   :  { %13763 = vst [vmem:[#allocation34_spill] sm:$0xff] %v9734_v61  ;;  %13764 = vst [vmem:[#allocation35_spill] sm:$0xff] %v9738_v51 }
 0x144   :  { %v9740_v19 = vpop.permute.xlu0 %800  ;;  %v9742_v6 = vpop.permute.xlu1 %730 }
 0x145   :  { %13765 = vst [vmem:[#allocation36_spill] sm:$0xff] %v9740_v19  ;;  %13766 = vst [vmem:[#allocation37_spill] sm:$0xff] %v9742_v6 }
 0x15a   :  { %598 = vadd.xlane.f32.xlu0 %v597_v49  ;;  %v9744_v49 = vpop.permute.xlu0 %734 }
 0x15b   :  { %13767 = vst [vmem:[#allocation38_spill] sm:$0xff] %v9744_v49 }
 0x15e   :  { %v9748_v57 = vpop.permute.xlu0 %811 }
 0x15f   :  { %13769 = vst [vmem:[#allocation40_spill] sm:$0xff] %v9748_v57 }
 0x160   :  { %595 = vadd.xlane.f32.xlu1 %v594_v7  ;;  %v9746_v7 = vpop.permute.xlu1 %807 }
 0x161   :  { %13768 = vst [vmem:[#allocation39_spill] sm:$0xff] %v9746_v7 }
 0x162   :  { %v9752_v50 = vpop.permute.xlu0 %745 }
 0x163   :  { %13771 = vst [vmem:[#allocation42_spill] sm:$0xff] %v9752_v50 }
 0x170   :  { %2282 = vrot.lane.b32.xlu0 %v2215_v9, %s9188_s1  ;;  %v9750_v9 = vpop.permute.xlu1 %741 }
 0x171   :  { %2280 = vrot.lane.b32.xlu1 %v2214_v15, %s9188_s1  ;;  %13770 = vst [vmem:[#allocation41_spill] sm:$0xff] %v9750_v9 }
 0x174   :  { %2286 = vrot.lane.b32.xlu0 %v2217_v16, %s9188_s1  ;;  %v9754_v15 = vpop.permute.xlu1 %818  ;;  %v9756_v16 = vpop.permute.xlu0 %822 }
 0x175   :  { %2284 = vrot.lane.b32.xlu1 %v2216_v45, %s9188_s1  ;;  %13772 = vst [vmem:[#allocation43_spill] sm:$0xff] %v9754_v15  ;;  %13773 = vst [vmem:[#allocation44_spill] sm:$0xff] %v9756_v16  ;;  %v660_v45 = vsel %vm593_vm2, %v9510_v44, 0.0  ;;  %v675_v44 = vsel %vm593_vm2, %v9554_v18, 0.0  ;;  %v2243_v18 = vmul.f32 %v9344_v12, %v9594_v43 }
 0x178   :  { %2294 = vrot.lane.b32.xlu0 %v2221_v52, %s9188_s1  ;;  %v9760_v52 = vpop.permute.xlu1 %752 }
 0x179   :  { %2292 = vrot.lane.b32.xlu1 %v2220_v23, %s9188_s1  ;;  %13774 = vst [vmem:[#allocation45_spill] sm:$0xff] %v9760_v52  ;;  %v672_v23 = vsel %vm593_vm2, %v9536_v32, 0.0 }
 0x197   :  { %649 = vadd.xlane.f32.xlu0 %v648_v35  ;;  %v663_v35 = vsel %vm593_vm2, %v9542_v48, 0.0  ;;  %v681_v48 = vsel %vm593_vm2, %v9558_v38, 0.0 }
 0x19b   :  { %655 = vadd.xlane.f32.xlu0 %v654_v59  ;;  %v9766_v59 = vpop.permute.xlu0 %756 }
 0x19c   :  { %13775 = vst [vmem:[#allocation46_spill] sm:$0xff] %v9766_v59 }
 0x19d   :  { %652 = vadd.xlane.f32.xlu1 %v651_v62  ;;  %v9768_v62 = vpop.permute.xlu1 %829 }
 0x19e   :  { %13776 = vst [vmem:[#allocation47_spill] sm:$0xff] %v9768_v62 }
 0x19f   :  { %667 = vadd.xlane.f32.xlu0 %v666_v5  ;;  %v678_v5 = vsel %vm593_vm2, %v9548_v30, 0.0 }
 0x1a1   :  { %658 = vadd.xlane.f32.xlu1 %v657_v10  ;;  %v9774_v10 = vpop.permute.xlu0 %833  ;;  %v9776_v32 = vpop.permute.xlu1 %763 }
 0x1a2   :  { %13777 = vst [vmem:[#allocation48_spill] sm:$0xff] %v9774_v10  ;;  %13778 = vst [vmem:[#allocation49_spill] sm:$0xff] %v9776_v32  ;;  %v636_v32 = vsel %vm593_vm2, %v9616_v47, 0.0 }
 0x1a5   :  { %670 = vadd.xlane.f32.xlu1 %v669_v20  ;;  %v9780_v20 = vpop.permute.xlu0 %767 }
 0x1a6   :  { %13779 = vst [vmem:[#allocation50_spill] sm:$0xff] %v9780_v20  ;;  %v687_v20 = vsel %vm593_vm2, %v9608_v0, 0.0 }
 0x1b5   :  { %2322 = vrot.lane.b32.xlu0 %v2235_v22, %s9188_s1  ;;  %v9782_v22 = vpop.permute.xlu1 %840 }
 0x1b6   :  { %2320 = vrot.lane.b32.xlu1 %v2234_v17, %s9188_s1  ;;  %13780 = vst [vmem:[#allocation51_spill] sm:$0xff] %v9782_v22  ;;  %v9784_v17 = vpop.permute.xlu0 %844 }
 0x1b7   :  { %13781 = vst [vmem:[#allocation52_spill] sm:$0xff] %v9784_v17 }
 0x1b9   :  { %2330 = vrot.lane.b32.xlu0 %v2239_v26, %s9188_s1  ;;  %v9786_v30 = vpop.permute.xlu1 %774  ;;  %v2242_v26 = vmul.f32 %v9344_v12, %v9596_v54 }
 0x1ba   :  { %2328 = vrot.lane.b32.xlu1 %v2238_v28, %s9188_s1  ;;  %13782 = vst [vmem:[#allocation53_spill] sm:$0xff] %v9786_v30  ;;  %v9792_v28 = vpop.permute.xlu0 %778 }
 0x1bb   :  { %13783 = vst [vmem:[#allocation54_spill] sm:$0xff] %v9792_v28 }
 0x1bd   :  { %2334 = vrot.lane.b32.xlu0 %v2241_v29, %s9188_s1  ;;  %v9794_v29 = vpop.permute.xlu1 %851 }
 0x1be   :  { %2332 = vrot.lane.b32.xlu1 %v2240_v42, %s9188_s1  ;;  %13784 = vst [vmem:[#allocation55_spill] sm:$0xff] %v9794_v29  ;;  %v9798_v38 = vpop.permute.xlu0 %855 }
 0x1bf   :  { %13785 = vst [vmem:[#allocation56_spill] sm:$0xff] %v9798_v38 }
 0x1c1   :  { %v9800_v42 = vpop.permute.xlu1 %862 }
 0x1c2   :  { %13786 = vst [vmem:[#allocation57_spill] sm:$0xff] %v9800_v42 }
 0x1dc   :  { %601 = vadd.xlane.f32.xlu0 %v600_v37  ;;  %v9802_v37 = vpop.permute.xlu0 %866 }
 0x1dd   :  { %13787 = vst [vmem:[#allocation58_spill] sm:$0xff] %v9802_v37 }
 0x1e0   :  { %607 = vadd.xlane.f32.xlu0 %v606_v24  ;;  %v2309_v24 = vpop.permute.xlu1 %2308 }
 0x1e2   :  { %604 = vadd.xlane.f32.xlu1 %v603_v11  ;;  %v9804_v11 = vpop.permute.xlu0 %2310 }
 0x1e3   :  { %v2423_v47 = vsel %vm593_vm2, %v9804_v11, 0.0 }
 0x1e4   :  { %619 = vadd.xlane.f32.xlu0 %v618_v13  ;;  %v2279_v43 = vpop.permute.xlu1 %2278 }
 0x1e5   :  { %v2375_v59 = vsel %vm593_vm2, %v2279_v43, 0.0 }
 0x1e6   :  { %610 = vadd.xlane.f32.xlu1 %v609_v36  ;;  %v9808_v54 = vpop.permute.xlu0 %2276 }
 0x1e8   :  { %v9806_v13 = vpop.xlane.xlu1 %646 }
 0x1ea   :  { %622 = vadd.xlane.f32.xlu1 %v621_v25  ;;  %v9810_v36 = vpop.xlane.xlu0 %643 }
 0x1ec   :  { %v2313_v25 = vpop.permute.xlu1 %2312 }
 0x1fa   :  { %2290 = vrot.lane.b32.xlu0 %v2219_v60, %s9188_s1  ;;  %v612_v60 = vsel %vm593_vm2, %v9565_v34, 0.0  ;;  %v13790_v34 = vld [vmem:[#allocation25_spill] sm:$0xff] }
 0x1fb   :  { %2288 = vrot.lane.b32.xlu1 %v2218_v14, %s9188_s1  ;;  %v9814_v14 = vpop.permute.xlu0 %2314 }
 0x1fc   :  { %v2429_v11 = vsel %vm593_vm2, %v9814_v14, 0.0 }
 0x1fe   :  { %2298 = vrot.lane.b32.xlu0 %v2223_v1, %s9188_s1  ;;  %v9816_v1 = vpop.permute.xlu1 %2316 }
 0x1ff   :  { %2296 = vrot.lane.b32.xlu1 %v2222_v4, %s9188_s1  ;;  %v624_v4 = vsel %vm593_vm2, %v9569_v39, 0.0 }
 0x202   :  { %2302 = vrot.lane.b32.xlu0 %v2225_v3, %s9188_s1  ;;  %v13788_v3 = vld [vmem:[#allocation23_spill] sm:$0xff] }
 0x203   :  { %2300 = vrot.lane.b32.xlu1 %v2224_v40, %s9188_s1  ;;  %v615_v40 = vsel %vm593_vm2, %v13788_v3, 0.0 }
 0x221   :  { %661 = vadd.xlane.f32.xlu0 %v660_v45  ;;  %v13789_v45 = vld [vmem:[#allocation24_spill] sm:$0xff] }
 0x225   :  { %673 = vadd.xlane.f32.xlu0 %v672_v23  ;;  %v630_v23 = vsel %vm593_vm2, %v13789_v45, 0.0  ;;  %v2227_v45 = vmul.f32 %v9344_v12, %v9610_v58 }
 0x227   :  { %664 = vadd.xlane.f32.xlu1 %v663_v35  ;;  %v9824_v35 = vpop.permute.xlu0 %2318 }
 0x229   :  { %679 = vadd.xlane.f32.xlu0 %v678_v5  ;;  %v627_v5 = vsel %vm593_vm2, %v13790_v34, 0.0 }
 0x22b   :  { %676 = vadd.xlane.f32.xlu1 %v675_v44  ;;  %v2325_v44 = vpop.permute.xlu1 %2324 }
 0x22f   :  { %682 = vadd.xlane.f32.xlu1 %v681_v48  ;;  %v13791_v48 = vld [vmem:[#allocation26_spill] sm:$0xff]  ;;  %v9830_v39 = vpop.xlane.xlu1 %595 }
 0x23f   :  { %2338 = vrot.lane.b32.xlu0 %v2243_v18, %s9188_s1  ;;  %v633_v18 = vsel %vm593_vm2, %v13791_v48, 0.0  ;;  %v9189_v48 = vmov 0  }
 0x240   :  { %2336 = vrot.lane.b32.xlu1 %v2242_v26, %s9188_s1  ;;  %v2327_v26 = vpop.permute.xlu0 %2326  ;;  %8642 = vset.pattern.permute.xlu0 %v9189_v48 }
 0x241   :  { %8641 = vset.pattern.permute.xlu1 %v9189_v48  ;;  %v684_v48 = vsel %vm593_vm2, %v9604_v41, 0.0  ;;  %v639_v41 = vsel %vm593_vm2, %v9620_v27, 0.0 }
 0x25e   :  { %613 = vadd.xlane.f32.xlu0 %v612_v60  ;;  %v9832_v60 = vpop.xlane.xlu0 %598 }
 0x262   :  { %625 = vadd.xlane.f32.xlu0 %v624_v4  ;;  %v2281_v4 = vpop.permute.xlu1 %2280  ;;  %v9834_v3 = vpop.permute.xlu0 %2282 }
 0x264   :  { %616 = vadd.xlane.f32.xlu1 %v615_v40 }
 0x266   :  { %631 = vadd.xlane.f32.xlu0 %v630_v23  ;;  %v2285_v40 = vpop.permute.xlu1 %2284  ;;  %v2226_v23 = vmul.f32 %v9344_v12, %v9612_v33  ;;  %v9840_v34 = vpop.permute.xlu0 %2286 }
 0x267   :  { %v2384_v14 = vsel %vm593_vm2, %v2285_v40, 0.0 }
 0x268   :  { %628 = vadd.xlane.f32.xlu1 %v627_v5 }
 0x26a   :  { %v2293_v5 = vpop.permute.xlu1 %2292  ;;  %v9846_v46 = vpop.permute.xlu0 %2294 }
 0x26b   :  { %v2399_v40 = vsel %vm593_vm2, %v9846_v46, 0.0 }
 0x26c   :  { %634 = vadd.xlane.f32.xlu1 %v633_v18 }
 0x26e   :  { %v9844_v18 = vpop.xlane.xlu1 %652  ;;  %v9848_v2 = vpop.xlane.xlu0 %649 }
 0x272   :  { %v9850_v58 = vpop.xlane.xlu1 %658  ;;  %v9852_v30 = vpop.xlane.xlu0 %655 }
 0x276   :  { %v9854_v12 = vpop.xlane.xlu1 %670  ;;  %v9856_v33 = vpop.xlane.xlu0 %667 }
 0x277   :  { %13792 = vst [vmem:[#allocation23_spill] sm:$0xff] %v9854_v12  ;;  %13793 = vst [vmem:[#allocation24_spill] sm:$0xff] %v9856_v33  ;;  %v2420_v33 = vsel %vm593_vm2, %v2309_v24, 0.0  ;;  %v2372_v24 = vsel %vm593_vm2, %v9808_v54, 0.0 }
 0x27c   :  { %2306 = vrot.lane.b32.xlu0 %v2227_v45, %s9188_s1  ;;  %v2321_v45 = vpop.permute.xlu1 %2320 }
 0x27d   :  { %2304 = vrot.lane.b32.xlu1 %v2226_v23, %s9188_s1  ;;  %v2323_v23 = vpop.permute.xlu0 %2322 }
 0x280   :  { %v2329_v28 = vpop.permute.xlu1 %2328 }
 0x281   :  { %v9860_v42 = vpop.permute.xlu0 %2330 }
 0x282   :  { %v2453_v46 = vsel %vm593_vm2, %v9860_v42, 0.0 }
 0x284   :  { %v2333_v37 = vpop.permute.xlu1 %2332 }
 0x288   :  { %v9867_v12 = vpop.xlane.xlu1 %604 }
 0x28c   :  { %v9876_v0 = vpop.xlane.xlu1 %610 }
 0x290   :  { %v9885_v43 = vpop.xlane.xlu1 %622 }
 0x29b   :  { %685 = vadd.xlane.f32.xlu0 %v684_v48  ;;  %v2335_v48 = vpop.permute.xlu0 %2334 }
 0x29f   :  { %637 = vadd.xlane.f32.xlu0 %v636_v32  ;;  %v9874_v32 = vpop.xlane.xlu0 %601 }
 0x2a1   :  { %688 = vadd.xlane.f32.xlu1 %v687_v20  ;;  %v2426_v20 = vsel %vm593_vm2, %v2313_v25, 0.0  ;;  %v2435_v25 = vsel %vm593_vm2, %v9824_v35, 0.0  ;;  %v2396_v35 = vsel %vm593_vm2, %v2293_v5, 0.0  ;;  %v2441_v5 = vsel %vm593_vm2, %v2323_v23, 0.0 }
 0x2a3   :  { %2421 = vadd.xlane.f32.xlu0 %v2420_v33  ;;  %v9881_v27 = vpop.xlane.xlu0 %607  ;;  %v2444_v33 = vsel %vm593_vm2, %v2325_v44, 0.0  ;;  %v2381_v44 = vsel %vm593_vm2, %v9834_v3, 0.0 }
 0x2a5   :  { %640 = vadd.xlane.f32.xlu1 %v639_v41  ;;  %v2289_v41 = vpop.permute.xlu1 %2288 }
 0x2a7   :  { %2376 = vadd.xlane.f32.xlu0 %v2375_v59  ;;  %v2432_v59 = vsel %vm593_vm2, %v9816_v1, 0.0  ;;  %v9892_v54 = vpop.xlane.xlu0 %619  ;;  %v2447_v1 = vsel %vm593_vm2, %v2327_v26, 0.0  ;;  %v2438_v26 = vsel %vm593_vm2, %v2321_v45, 0.0  ;;  %v2390_v45 = vsel %vm593_vm2, %v2289_v41, 0.0 }
 0x2a9   :  { %2424 = vadd.xlane.f32.xlu1 %v2423_v47  ;;  %v2378_v47 = vsel %vm593_vm2, %v2281_v4, 0.0 }
 0x2ab   :  { %2427 = vadd.xlane.f32.xlu0 %v2426_v20  ;;  %v2291_v20 = vpop.permute.xlu0 %2290 }
 0x2ad   :  { %2373 = vadd.xlane.f32.xlu1 %v2372_v24  ;;  %v2297_v24 = vpop.permute.xlu1 %2296 }
 0x2af   :  { %2433 = vadd.xlane.f32.xlu0 %v2432_v59  ;;  %v2387_v59 = vsel %vm593_vm2, %v9840_v34, 0.0  ;;  %v2299_v4 = vpop.permute.xlu0 %2298 }
 0x2b0   :  { %v2405_v41 = vsel %vm593_vm2, %v2299_v4, 0.0 }
 0x2b1   :  { %2430 = vadd.xlane.f32.xlu1 %v2429_v11  ;;  %v2301_v11 = vpop.permute.xlu1 %2300 }
 0x2b2   :  { %v2408_v42 = vsel %vm593_vm2, %v2301_v11, 0.0 }
 0x2b3   :  { %2445 = vadd.xlane.f32.xlu0 %v2444_v33  ;;  %v2303_v3 = vpop.permute.xlu0 %2302 }
 0x2b5   :  { %2436 = vadd.xlane.f32.xlu1 %v2435_v25  ;;  %v9905_v33 = vpop.xlane.xlu1 %664  ;;  %v2450_v25 = vsel %vm593_vm2, %v2329_v28, 0.0  ;;  %v2459_v28 = vsel %vm593_vm2, %v2335_v48, 0.0 }
 0x2b7   :  { %2379 = vadd.xlane.f32.xlu0 %v2378_v47  ;;  %v9909_v34 = vpop.xlane.xlu0 %661  ;;  %v2456_v47 = vsel %vm593_vm2, %v2333_v37, 0.0  ;;  %v2393_v37 = vsel %vm593_vm2, %v2291_v20, 0.0 }
 0x2b9   :  { %2448 = vadd.xlane.f32.xlu1 %v2447_v1  ;;  %v9912_v1 = vpop.xlane.xlu1 %676 }
 0x2bb   :  { %2385 = vadd.xlane.f32.xlu0 %v2384_v14  ;;  %v9918_v14 = vpop.xlane.xlu0 %673 }
 0x2bd   :  { %2382 = vadd.xlane.f32.xlu1 %v2381_v44  ;;  %v9920_v23 = vpop.xlane.xlu1 %682  ;;  %v2402_v44 = vsel %vm593_vm2, %v2297_v24, 0.0 }
 0x2bf   :  { %2397 = vadd.xlane.f32.xlu0 %v2396_v35  ;;  %v9924_v35 = vpop.xlane.xlu0 %679 }
 0x2c1   :  { %2388 = vadd.xlane.f32.xlu1 %v2387_v59  ;;  %v2337_v59 = vpop.permute.xlu1 %2336 }
 0x2c2   :  { %v2462_v48 = vsel %vm593_vm2, %v2337_v59, 0.0  ;;  %v9955_v59 = vadd.f32 %v9734_v61, %v9806_v13  ;;  %v9975_v13 = vadd.f32 %v9740_v19, %v9844_v18  ;;  %v9995_v18 = vadd.f32 %v9710_v56, %v9867_v12 }
 0x2c3   :  { %2439 = vadd.xlane.f32.xlu0 %v2438_v26  ;;  %v2411_v26 = vsel %vm593_vm2, %v2303_v3, 0.0  ;;  %v10016_v12 = vadd.f32 %v9752_v50, %v9885_v43 }
 0x2c4   :  { %13798 = vst [vmem:[#allocation61_spill] sm:$0xff] %v9975_v13  ;;  %13802 = vst [vmem:[#allocation65_spill] sm:$0xff] %v9995_v18 }
 0x2c5   :  { %2400 = vadd.xlane.f32.xlu1 %v2399_v40  ;;  %v2339_v40 = vpop.permute.xlu0 %2338  ;;  %13806 = vst [vmem:[#allocation69_spill] sm:$0xff] %v10016_v12 }
 0x2c6   :  { %v2465_v24 = vsel %vm593_vm2, %v2339_v40, 0.0 }
 0x2c7   :  { %2451 = vadd.xlane.f32.xlu0 %v2450_v25 }
 0x2c9   :  { %2442 = vadd.xlane.f32.xlu1 %v2441_v5 }
 0x2cb   :  { %2457 = vadd.xlane.f32.xlu0 %v2456_v47 }
 0x2cd   :  { %2454 = vadd.xlane.f32.xlu1 %v2453_v46 }
 0x2cf   :  { %2391 = vadd.xlane.f32.xlu0 %v2390_v45 }
 0x2d1   :  { %2460 = vadd.xlane.f32.xlu1 %v2459_v28 }
 0x2d3   :  { %2403 = vadd.xlane.f32.xlu0 %v2402_v44  ;;  %v9941_v44 = vadd.f32 %v9726_v53, %v9810_v36  ;;  %v9960_v36 = vadd.f32 %v9746_v7, %v9852_v30  ;;  %v9980_v30 = vadd.f32 %v9712_v21, %v9881_v27  ;;  %v10000_v27 = vadd.f32 %v9754_v15, %v9909_v34 }
 0x2d5   :  { %2394 = vadd.xlane.f32.xlu1 %v2393_v37  ;;  %v9946_v37 = vadd.f32 %v9706_v55, %v9830_v39  ;;  %13795 = vst [vmem:[#allocation26_spill] sm:$0xff] %v9960_v36  ;;  %v9965_v39 = vadd.f32 %v9704_v63, %v9832_v60  ;;  %13799 = vst [vmem:[#allocation62_spill] sm:$0xff] %v9980_v30  ;;  %v9985_v60 = vadd.f32 %v9748_v57, %v9850_v58 }
 0x2d6   :  { %13803 = vst [vmem:[#allocation66_spill] sm:$0xff] %v10000_v27  ;;  %v10005_v58 = vadd.f32 %v9720_v8, %v9876_v0 }
 0x2d7   :  { %2409 = vadd.xlane.f32.xlu0 %v2408_v42  ;;  %13794 = vst [vmem:[#allocation25_spill] sm:$0xff] %v9946_v37  ;;  %v9951_v42 = vadd.f32 %v9738_v51, %v9848_v2  ;;  %13796 = vst [vmem:[#allocation59_spill] sm:$0xff] %v9965_v39  ;;  %v9970_v2 = vadd.f32 %v9708_v31, %v9874_v32  ;;  %v9990_v32 = vadd.f32 %v9750_v9, %v9892_v54 }
 0x2d8   :  { %13800 = vst [vmem:[#allocation63_spill] sm:$0xff] %v9985_v60  ;;  %13804 = vst [vmem:[#allocation67_spill] sm:$0xff] %v10005_v58 }
 0x2d9   :  { %2406 = vadd.xlane.f32.xlu1 %v2405_v41  ;;  %13797 = vst [vmem:[#allocation60_spill] sm:$0xff] %v9970_v2  ;;  %13801 = vst [vmem:[#allocation64_spill] sm:$0xff] %v9990_v32 }
 0x2db   :  { %2463 = vadd.xlane.f32.xlu0 %v2462_v48 }
 0x2dd   :  { %2412 = vadd.xlane.f32.xlu1 %v2411_v26  ;;  %v10029_v26 = vadd.f32 %v9756_v16, %v9905_v33 }
 0x2df   :  { %13808 = vst [vmem:[#allocation71_spill] sm:$0xff] %v10029_v26 }
 0x2e1   :  { %2466 = vadd.xlane.f32.xlu1 %v2465_v24 }
 0x2eb   :  { %v614_v20 = vpop.xlane.xlu0 %613 }
 0x2ec   :  { %v10009_v54 = vadd.f32 %v9742_v6, %v614_v20 }
 0x2ee   :  { %13805 = vst [vmem:[#allocation68_spill] sm:$0xff] %v10009_v54 }
 0x2ef   :  { %v626_v25 = vpop.xlane.xlu0 %625 }
 0x2f0   :  { %v10020_v34 = vadd.f32 %v9760_v52, %v626_v25 }
 0x2f1   :  { %v617_v5 = vpop.xlane.xlu1 %616 }
 0x2f2   :  { %13807 = vst [vmem:[#allocation70_spill] sm:$0xff] %v10020_v34  ;;  %v10039_v20 = vadd.f32 %v9744_v49, %v617_v5 }
 0x2f3   :  { %v9931_v47 = vpop.xlane.xlu0 %631 }
 0x2f4   :  { %13810 = vst [vmem:[#allocation73_spill] sm:$0xff] %v10039_v20 }
 0x2f5   :  { %v9933_v11 = vpop.xlane.xlu1 %628 }
 0x2f7   :  { %v2307_v46 = vpop.permute.xlu0 %2306 }
 0x2f8   :  { %v2417_v45 = vsel %vm593_vm2, %v2307_v46, 0.0 }
 0x2f9   :  { %v9935_v4 = vpop.xlane.xlu1 %634  ;;  %2418 = vadd.xlane.f32.xlu1 %v2417_v45 }
 0x2fd   :  { %v2305_v28 = vpop.permute.xlu1 %2304 }
 0x2fe   :  { %v2414_v3 = vsel %vm593_vm2, %v2305_v28, 0.0 }
 0x2ff   :  { %2415 = vadd.xlane.f32.xlu0 %v2414_v3 }
 0x30a   :  { %1013 = vperm.xlu1 %8641, %v9941_v44  }
 0x30e   :  { %965 = vperm.xlu1 %8641, %v9946_v37  }
 0x312   :  { %1019 = vperm.xlu1 %8641, %v9951_v42  }
 0x315   :  { %1016 = vperm.xlu0 %8642, %v9955_v59  }
 0x316   :  { %1025 = vperm.xlu1 %8641, %v9960_v36  }
 0x319   :  { %968 = vperm.xlu0 %8642, %v9965_v39  }
 0x31a   :  { %971 = vperm.xlu1 %8641, %v9970_v2  }
 0x31d   :  { %1022 = vperm.xlu0 %8642, %v9975_v13  }
 0x31e   :  { %977 = vperm.xlu1 %8641, %v9980_v30  }
 0x321   :  { %1028 = vperm.xlu0 %8642, %v9985_v60  }
 0x322   :  { %989 = vperm.xlu1 %8641, %v9990_v32  }
 0x325   :  { %974 = vperm.xlu0 %8642, %v9995_v18  }
 0x326   :  { %1031 = vperm.xlu1 %8641, %v10000_v27  }
 0x328   :  { %v10011_v41 = vpop.xlane.xlu0 %685 }
 0x329   :  { %980 = vperm.xlu0 %8642, %v10005_v58  }
 0x32a   :  { %983 = vperm.xlu1 %8641, %v10009_v54  }
 0x32c   :  { %v10022_v0 = vpop.xlane.xlu0 %637 }
 0x32d   :  { %992 = vperm.xlu0 %8642, %v10016_v12  }
 0x32e   :  { %v10025_v48 = vpop.xlane.xlu1 %688  ;;  %995 = vperm.xlu1 %8641, %v10020_v34  }
 0x330   :  { %v2422_v40 = vpop.xlane.xlu0 %2421 }
 0x331   :  { %1034 = vperm.xlu0 %8642, %v10029_v26   ;;  %v10034_v43 = vadd.f32 %v2422_v40, %v9726_v53 }
 0x332   :  { %v10036_v24 = vpop.xlane.xlu1 %640 }
 0x333   :  { %13809 = vst [vmem:[#allocation72_spill] sm:$0xff] %v10034_v43  ;;  %2581 = vperm.xlu1 %8641, %v10034_v43   ;;  %v13865_v43 = vld [vmem:[#allocation11_spill] sm:$0xff] }
 0x334   :  { %v2377_v25 = vpop.xlane.xlu0 %2376 }
 0x335   :  { %986 = vperm.xlu0 %8642, %v10039_v20   ;;  %v10048_v3 = vadd.f32 %v2377_v25, %v9704_v63 }
 0x336   :  { %v2425_v33 = vpop.xlane.xlu1 %2424 }
 0x337   :  { %v10044_v46 = vadd.f32 %v2425_v33, %v9734_v61  ;;  %13812 = vst [vmem:[#allocation75_spill] sm:$0xff] %v10048_v3 }
 0x338   :  { %v2428_v45 = vpop.xlane.xlu0 %2427 }
 0x339   :  { %13811 = vst [vmem:[#allocation74_spill] sm:$0xff] %v10044_v46  ;;  %2584 = vperm.xlu1 %8641, %v10044_v46   ;;  %v10056_v34 = vadd.f32 %v2428_v45, %v9738_v51 }
 0x33a   :  { %v2374_v28 = vpop.xlane.xlu1 %2373 }
 0x33b   :  { %v10051_v40 = vadd.f32 %v2374_v28, %v9706_v55  ;;  %13814 = vst [vmem:[#allocation77_spill] sm:$0xff] %v10056_v34 }
 0x33c   :  { %v2434_v5 = vpop.xlane.xlu0 %2433 }
 0x33d   :  { %13813 = vst [vmem:[#allocation76_spill] sm:$0xff] %v10051_v40  ;;  %2536 = vperm.xlu1 %8641, %v10048_v3   ;;  %2533 = vperm.xlu0 %8642, %v10051_v40   ;;  %v10064_v28 = vadd.f32 %v2434_v5, %v9746_v7 }
 0x33e   :  { %v2431_v53 = vpop.xlane.xlu1 %2430 }
 0x33f   :  { %v10059_v33 = vadd.f32 %v2431_v53, %v9740_v19  ;;  %13816 = vst [vmem:[#allocation79_spill] sm:$0xff] %v10064_v28 }
 0x340   :  { %v2446_v61 = vpop.xlane.xlu0 %2445 }
 0x341   :  { %13815 = vst [vmem:[#allocation78_spill] sm:$0xff] %v10059_v33  ;;  %2587 = vperm.xlu1 %8641, %v10056_v34   ;;  %2590 = vperm.xlu0 %8642, %v10059_v33   ;;  %v10072_v53 = vadd.f32 %v2446_v61, %v9768_v62 }
 0x342   :  { %v2437_v25 = vpop.xlane.xlu1 %2436 }
 0x343   :  { %v10067_v55 = vadd.f32 %v2437_v25, %v9748_v57  ;;  %13818 = vst [vmem:[#allocation81_spill] sm:$0xff] %v10072_v53 }
 0x344   :  { %v2380_v63 = vpop.xlane.xlu0 %2379 }
 0x345   :  { %13817 = vst [vmem:[#allocation80_spill] sm:$0xff] %v10067_v55  ;;  %2593 = vperm.xlu1 %8641, %v10064_v28   ;;  %2596 = vperm.xlu0 %8642, %v10067_v55   ;;  %v10080_v25 = vadd.f32 %v2380_v63, %v9708_v31 }
 0x346   :  { %v2449_v45 = vpop.xlane.xlu1 %2448 }
 0x347   :  { %v10075_v19 = vadd.f32 %v2449_v45, %v9774_v10  ;;  %13820 = vst [vmem:[#allocation83_spill] sm:$0xff] %v10080_v25 }
 0x348   :  { %v2386_v51 = vpop.xlane.xlu0 %2385 }
 0x349   :  { %13819 = vst [vmem:[#allocation82_spill] sm:$0xff] %v10075_v19  ;;  %2605 = vperm.xlu1 %8641, %v10072_v53   ;;  %2608 = vperm.xlu0 %8642, %v10075_v19   ;;  %v10088_v27 = vadd.f32 %v2386_v51, %v9712_v21 }
 0x34a   :  { %v2383_v5 = vpop.xlane.xlu1 %2382 }
 0x34b   :  { %v10084_v26 = vadd.f32 %v2383_v5, %v9710_v56  ;;  %13822 = vst [vmem:[#allocation85_spill] sm:$0xff] %v10088_v27 }
 0x34c   :  { %v2398_v57 = vpop.xlane.xlu0 %2397 }
 0x34d   :  { %2539 = vperm.xlu1 %8641, %v10080_v25   ;;  %13821 = vst [vmem:[#allocation84_spill] sm:$0xff] %v10084_v26 }
 0x34e   :  { %v2389_v7 = vpop.xlane.xlu1 %2388 }
 0x34f   :  { %v10096_v32 = vadd.f32 %v2389_v7, %v9720_v8 }
 0x350   :  { %v2440_v61 = vpop.xlane.xlu0 %2439 }
 0x351   :  { %2542 = vperm.xlu1 %8641, %v10084_v26   ;;  %13824 = vst [vmem:[#allocation87_spill] sm:$0xff] %v10096_v32 }
 0x352   :  { %v2401_v45 = vpop.xlane.xlu1 %2400 }
 0x353   :  { %v10091_v12 = vadd.f32 %v2401_v45, %v9752_v50  ;;  %v10104_v45 = vadd.f32 %v2398_v57, %v9750_v9 }
 0x354   :  { %v2452_v63 = vpop.xlane.xlu0 %2451 }
 0x355   :  { %13823 = vst [vmem:[#allocation86_spill] sm:$0xff] %v10091_v12  ;;  %2545 = vperm.xlu1 %8641, %v10088_v27   ;;  %2560 = vperm.xlu0 %8642, %v10091_v12   ;;  %13826 = vst [vmem:[#allocation89_spill] sm:$0xff] %v10104_v45 }
 0x356   :  { %v2443_v31 = vpop.xlane.xlu1 %2442 }
 0x357   :  { %v10099_v5 = vadd.f32 %v2443_v31, %v9756_v16  ;;  %v10112_v31 = vadd.f32 %v2440_v61, %v9754_v15  ;;  %v13833_v15 = vld [vmem:[#allocation46_spill] sm:$0xff] }
 0x358   :  { %v2458_v56 = vpop.xlane.xlu0 %2457 }
 0x359   :  { %13825 = vst [vmem:[#allocation88_spill] sm:$0xff] %v10099_v5  ;;  %2548 = vperm.xlu1 %8641, %v10096_v32   ;;  %2602 = vperm.xlu0 %8642, %v10099_v5   ;;  %13828 = vst [vmem:[#allocation91_spill] sm:$0xff] %v10112_v31  ;;  %v13864_v5 = vlaneseq }
 0x35a   :  { %v2455_v51 = vpop.xlane.xlu1 %2454 }
 0x35b   :  { %v10107_v50 = vadd.f32 %v2455_v51, %v9784_v17  ;;  %v10120_v51 = vadd.f32 %v2452_v63, %v9782_v22  ;;  %v1061_v28 = vand.u32 127, %v13864_v5 }
 0x35c   :  { %v2392_v57 = vpop.xlane.xlu0 %2391 }
 0x35d   :  { %13827 = vst [vmem:[#allocation90_spill] sm:$0xff] %v10107_v50  ;;  %2557 = vperm.xlu1 %8641, %v10104_v45   ;;  %2614 = vperm.xlu0 %8642, %v10107_v50   ;;  %13830 = vst [vmem:[#allocation93_spill] sm:$0xff] %v10120_v51  ;;  %v13839_v45 = vld [vmem:[#allocation58_spill] sm:$0xff]  ;;  %v1066_v55 = vadd.s32 4294967288, %v1061_v28  ;;  %v10333_v54 = vsub.s32 %v1061_v28, %v13865_v43 }
 0x35e   :  { %v2461_v7 = vpop.xlane.xlu1 %2460 }
 0x35f   :  { %v10115_v16 = vadd.f32 %v2461_v7, %v9798_v38  ;;  %v10128_v7 = vadd.f32 %v2458_v56, %v9794_v29  ;;  %v10330_v46 = vsub.s32 %v1066_v55, %v13865_v43  ;;  %13867 = vst [vmem:[#allocation117_spill] sm:$0xff] %v10333_v54 }
 0x360   :  { %v2404_v60 = vpop.xlane.xlu0 %2403 }
 0x361   :  { %13829 = vst [vmem:[#allocation92_spill] sm:$0xff] %v10115_v16  ;;  %2599 = vperm.xlu1 %8641, %v10112_v31   ;;  %2620 = vperm.xlu0 %8642, %v10115_v16   ;;  %13832 = vst [vmem:[#allocation95_spill] sm:$0xff] %v10128_v7 }
 0x362   :  { %v2395_v8 = vpop.xlane.xlu1 %2394  ;;  %13866 = vst [vmem:[#allocation116_spill] sm:$0xff] %v10330_v46 }
 0x363   :  { %v10123_v9 = vadd.f32 %v2395_v8, %v9744_v49  ;;  %v10136_v8 = vadd.f32 %v2392_v57, %v9742_v6  ;;  %v13836_v49 = vld [vmem:[#allocation50_spill] sm:$0xff]  ;;  %v13841_v57 = vld [vmem:[#allocation49_spill] sm:$0xff] }
 0x364   :  { %v2410_v56 = vpop.xlane.xlu0 %2409 }
 0x365   :  { %13831 = vst [vmem:[#allocation94_spill] sm:$0xff] %v10123_v9  ;;  %2611 = vperm.xlu1 %8641, %v10120_v51   ;;  %2554 = vperm.xlu0 %8642, %v10123_v9   ;;  %13835 = vst [vmem:[#allocation97_spill] sm:$0xff] %v10136_v8  ;;  %v10152_v6 = vadd.f32 %v2410_v56, %v13841_v57  ;;  %v10167_v56 = vadd.f32 %v13833_v15, %v9933_v11  ;;  %v13848_v9 = vld [vmem:[#allocation53_spill] sm:$0xff] }
 0x366   :  { %v2407_v61 = vpop.xlane.xlu1 %2406 }
 0x367   :  { %v10131_v21 = vadd.f32 %v2407_v61, %v13833_v15  ;;  %v10144_v61 = vadd.f32 %v2404_v60, %v9760_v52  ;;  %13842 = vst [vmem:[#allocation101_spill] sm:$0xff] %v10152_v6  ;;  %v13845_v52 = vld [vmem:[#allocation54_spill] sm:$0xff]  ;;  %13847 = vst [vmem:[#allocation104_spill] sm:$0xff] %v10167_v56 }
 0x369   :  { %13834 = vst [vmem:[#allocation96_spill] sm:$0xff] %v10131_v21  ;;  %2617 = vperm.xlu1 %8641, %v10128_v7   ;;  %2566 = vperm.xlu0 %8642, %v10131_v21   ;;  %13838 = vst [vmem:[#allocation99_spill] sm:$0xff] %v10144_v61  ;;  %v13843_v21 = vld [vmem:[#allocation57_spill] sm:$0xff] }
 0x36a   :  { %v2413_v63 = vpop.xlane.xlu1 %2412 }
 0x36b   :  { %v10139_v36 = vadd.f32 %v2413_v63, %v13836_v49  ;;  %v2464_v63 = vpop.xlane.xlu0 %2463 }
 0x36d   :  { %13837 = vst [vmem:[#allocation98_spill] sm:$0xff] %v10139_v36  ;;  %2551 = vperm.xlu1 %8641, %v10136_v8   ;;  %2572 = vperm.xlu0 %8642, %v10139_v36   ;;  %v10156_v36 = vadd.f32 %v2464_v63, %v13843_v21 }
 0x36e   :  { %v2467_v20 = vpop.xlane.xlu1 %2466 }
 0x36f   :  { %v10147_v12 = vadd.f32 %v2467_v20, %v13839_v45  ;;  %13844 = vst [vmem:[#allocation102_spill] sm:$0xff] %v10156_v36 }
 0x371   :  { %13840 = vst [vmem:[#allocation100_spill] sm:$0xff] %v10147_v12  ;;  %2563 = vperm.xlu1 %8641, %v10144_v61   ;;  %2626 = vperm.xlu0 %8642, %v10147_v12  }
 0x375   :  { %2569 = vperm.xlu1 %8641, %v10152_v6  }
 0x379   :  { %2623 = vperm.xlu1 %8641, %v10156_v36  }
 0x386   :  { %v2419_v60 = vpop.xlane.xlu1 %2418 }
 0x387   :  { %v10160_v8 = vadd.f32 %v2419_v60, %v13845_v52  ;;  %v13850_v60 = vld [vmem:[#allocation23_spill] sm:$0xff] }
 0x388   :  { %v10178_v27 = vadd.f32 %v9774_v10, %v13850_v60  ;;  %v10196_v60 = vadd.f32 %v13841_v57, %v9931_v47  ;;  %v10204_v10 = vadd.f32 %v9784_v17, %v9912_v1  ;;  %v10222_v1 = vadd.f32 %v13848_v9, %v10022_v0 }
 0x389   :  { %13846 = vst [vmem:[#allocation103_spill] sm:$0xff] %v10160_v8  ;;  %2578 = vperm.xlu0 %8642, %v10160_v8   ;;  %v13852_v8 = vld [vmem:[#allocation24_spill] sm:$0xff]  ;;  %v10232_v17 = vadd.f32 %v9798_v38, %v9920_v23  ;;  %v10250_v23 = vadd.f32 %v13843_v21, %v10011_v41 }
 0x38a   :  { %v10163_v20 = vpop.permute.xlu1 %1013  ;;  %13851 = vst [vmem:[#allocation23_spill] sm:$0xff] %v10178_v27  ;;  %v10182_v32 = vadd.f32 %v9768_v62, %v13852_v8  ;;  %13855 = vst [vmem:[#allocation107_spill] sm:$0xff] %v10196_v60 }
 0x38b   :  { %13856 = vst [vmem:[#allocation108_spill] sm:$0xff] %v10204_v10  ;;  %13859 = vst [vmem:[#allocation111_spill] sm:$0xff] %v10222_v1  ;;  %v1139_v43 = vrot.slane %v10163_v20, %v10333_v54 }
 0x38c   :  { %v2416_v61 = vpop.xlane.xlu0 %2415  ;;  %13853 = vst [vmem:[#allocation24_spill] sm:$0xff] %v10182_v32  ;;  %13860 = vst [vmem:[#allocation112_spill] sm:$0xff] %v10232_v17 }
 0x38d   :  { %v10170_v6 = vadd.f32 %v2416_v61, %v13848_v9  ;;  %998 = vperm.xlu0 %8642, %v10167_v56   ;;  %v10190_v61 = vadd.f32 %v13836_v49, %v9935_v4  ;;  %v10210_v4 = vadd.f32 %v9782_v22, %v9918_v14  ;;  %v10218_v49 = vadd.f32 %v13845_v52, %v10036_v24 }
 0x38e   :  { %v10174_v63 = vpop.permute.xlu1 %965  ;;  %v10236_v24 = vadd.f32 %v9794_v29, %v9924_v35  ;;  %v10246_v9 = vadd.f32 %v13839_v45, %v10025_v48  ;;  %13863 = vst [vmem:[#allocation115_spill] sm:$0xff] %v10250_v23 }
 0x38f   :  { %13849 = vst [vmem:[#allocation105_spill] sm:$0xff] %v10170_v6  ;;  %2575 = vperm.xlu1 %8641, %v10170_v6   ;;  %13854 = vst [vmem:[#allocation106_spill] sm:$0xff] %v10190_v61 }
 0x390   :  { %13857 = vst [vmem:[#allocation109_spill] sm:$0xff] %v10210_v4  ;;  %13858 = vst [vmem:[#allocation110_spill] sm:$0xff] %v10218_v49 }
 0x391   :  { %1040 = vperm.xlu0 %8642, %v10178_v27   ;;  %13861 = vst [vmem:[#allocation113_spill] sm:$0xff] %v10236_v24  ;;  %13862 = vst [vmem:[#allocation114_spill] sm:$0xff] %v10246_v9 }
 0x392   :  { %v10186_v11 = vpop.permute.xlu1 %1019 }
 0x393   :  { %1037 = vperm.xlu1 %8641, %v10182_v32   ;;  %v1148_v2 = vrot.slane %v10186_v11, %v10333_v54  ;;  %v1065_v11 = vrot.slane %v10174_v63, %v10333_v54 }
 0x394   :  { %v10192_v15 = vpop.permute.xlu0 %1016 }
 0x395   :  { %1004 = vperm.xlu0 %8642, %v10190_v61   ;;  %v1143_v5 = vrot.slane %v10192_v15, %v10330_v46 }
 0x396   :  { %v10200_v8 = vpop.permute.xlu1 %1025 }
 0x397   :  { %1001 = vperm.xlu1 %8641, %v10196_v60   ;;  %v1144_v20 = vsel %vm1071_vm5, %v1143_v5, %v1139_v43 }
 0x398   :  { %v10206_v62 = vpop.permute.xlu0 %968 }
 0x399   :  { %1046 = vperm.xlu0 %8642, %v10204_v10   ;;  %v1070_v55 = vrot.slane %v10206_v62, %v10330_v46  ;;  %v1157_v62 = vrot.slane %v10200_v8, %v10333_v54 }
 0x39a   :  { %v10214_v47 = vpop.permute.xlu1 %971 }
 0x39b   :  { %1043 = vperm.xlu1 %8641, %v10210_v4   ;;  %v1072_v8 = vsel %vm1071_vm5, %v1070_v55, %v1065_v11 }
 0x39c   :  { %v10224_v57 = vpop.permute.xlu0 %1022 }
 0x39d   :  { %1010 = vperm.xlu0 %8642, %v10218_v49   ;;  %v1152_v58 = vrot.slane %v10224_v57, %v10330_v46 }
 0x39e   :  { %v10228_v14 = vpop.permute.xlu1 %977 }
 0x39f   :  { %1007 = vperm.xlu1 %8641, %v10222_v1  }
 0x3a0   :  { %v10239_v0 = vpop.permute.xlu0 %1028 }
 0x3a1   :  { %1052 = vperm.xlu0 %8642, %v10232_v17   ;;  %v1161_v28 = vrot.slane %v10239_v0, %v10330_v46  ;;  %v1076_v0 = vrot.slane %v10214_v47, %v10333_v54 }
 0x3a2   :  { %v10242_v52 = vpop.permute.xlu1 %989 }
 0x3a3   :  { %1049 = vperm.xlu1 %8641, %v10236_v24   ;;  %v1162_v13 = vsel %vm1071_vm5, %v1161_v28, %v1157_v62 }
 0x3a4   :  { %v10256_v38 = vpop.permute.xlu0 %974 }
 0x3a5   :  { %1058 = vperm.xlu0 %8642, %v10246_v9   ;;  %v1080_v57 = vrot.slane %v10256_v38, %v10330_v46  ;;  %v1153_v38 = vsel %vm1071_vm5, %v1152_v58, %v1148_v2 }
 0x3a6   :  { %v10254_v35 = vpop.permute.xlu1 %1031  ;;  %v1222_v58 = vsel %vm1208_vm6, %v1153_v38, %v1144_v20 }
 0x3a7   :  { %1055 = vperm.xlu1 %8641, %v10250_v23   ;;  %v1081_v47 = vsel %vm1071_vm5, %v1080_v57, %v1076_v0  ;;  %v1166_v43 = vrot.slane %v10254_v35, %v10333_v54  ;;  %v1223_v35 = vsel %vm1210_vm7, %v1162_v13, %v1222_v58 }
 0x3a8   :  { %v10260_v22 = vpop.permute.xlu0 %980 }
 0x3a9   :  { %v1089_v15 = vrot.slane %v10260_v22, %v10330_v46  ;;  %v1085_v22 = vrot.slane %v10228_v14, %v10333_v54 }
 0x3aa   :  { %v10258_v29 = vpop.permute.xlu1 %983 }
 0x3ab   :  { %v1090_v14 = vsel %vm1071_vm5, %v1089_v15, %v1085_v22  ;;  %v1103_v15 = vrot.slane %v10242_v52, %v10333_v54 }
 0x3ac   :  { %v10266_v45 = vpop.permute.xlu0 %992 }
 0x3ae   :  { %v10262_v17 = vpop.permute.xlu1 %995 }
 0x3b0   :  { %v10270_v21 = vpop.permute.xlu0 %1034 }
 0x3b1   :  { %v1170_v2 = vrot.slane %v10270_v21, %v10330_v46 }
 0x3b2   :  { %v10264_v48 = vpop.permute.xlu1 %2581 }
 0x3b3   :  { %v1171_v11 = vsel %vm1071_vm5, %v1170_v2, %v1166_v43  ;;  %v2703_v13 = vrot.slane %v10264_v48, %v10333_v54 }
 0x3b4   :  { %v10276_v24 = vpop.permute.xlu0 %986 }
 0x3b5   :  { %v1098_v39 = vrot.slane %v10276_v24, %v10330_v46  ;;  %v1094_v24 = vrot.slane %v10258_v29, %v10333_v54 }
 0x3b7   :  { %v1099_v29 = vsel %vm1071_vm5, %v1098_v39, %v1094_v24  ;;  %v1209_v39 = vsel %vm1208_vm6, %v1081_v47, %v1072_v8  ;;  %v1112_v8 = vrot.slane %v10262_v17, %v10333_v54  ;;  %v10430_v47 = vsel %vm1212_vm8, %v1171_v11, %v1223_v35 }
 0x3b8   :  { %v10268_v41 = vpop.permute.xlu1 %2584 }
 0x3bc   :  { %v10272_v9 = vpop.permute.xlu1 %2536  ;;  %v10280_v1 = vpop.permute.xlu0 %2533 }
 0x3bd   :  { %v2631_v38 = vrot.slane %v10280_v1, %v10333_v54 }
 0x3c0   :  { %v10274_v23 = vpop.permute.xlu1 %2587  ;;  %v10284_v4 = vpop.permute.xlu0 %2590 }
 0x3c1   :  { %v2716_v5 = vrot.slane %v10284_v4, %v10330_v46  ;;  %v2712_v55 = vrot.slane %v10274_v23, %v10333_v54  ;;  %v1211_v23 = vsel %vm1210_vm7, %v1090_v14, %v1209_v39 }
 0x3c2   :  { %v1213_v52 = vsel %vm1212_vm8, %v1099_v29, %v1211_v23 }
 0x3c3   :  { %v2717_v20 = vsel %vm1071_vm5, %v2716_v5, %v2712_v55 }
 0x3c4   :  { %v10278_v49 = vpop.permute.xlu1 %2593  ;;  %v10290_v27 = vpop.permute.xlu0 %2596 }
 0x3c5   :  { %v2725_v28 = vrot.slane %v10290_v27, %v10330_v46  ;;  %v2721_v21 = vrot.slane %v10278_v49, %v10333_v54  ;;  %v1107_v27 = vrot.slane %v10266_v45, %v10330_v46  ;;  %v2707_v49 = vrot.slane %v10268_v41, %v10330_v46 }
 0x3c6   :  { %v2635_v45 = vrot.slane %v10272_v9, %v10330_v46 }
 0x3c7   :  { %v2726_v41 = vsel %vm1071_vm5, %v2725_v28, %v2721_v21  ;;  %v1108_v9 = vsel %vm1071_vm5, %v1107_v27, %v1103_v15 }
 0x3c8   :  { %v10282_v10 = vpop.permute.xlu1 %2605  ;;  %v10294_v56 = vpop.permute.xlu0 %2608  ;;  %v2636_v58 = vsel %vm1071_vm5, %v2635_v45, %v2631_v38  ;;  %v1215_v29 = vsel %vm1214_vm9, %v1108_v9, %v1213_v52 }
 0x3c9   :  { %v2743_v48 = vrot.slane %v10294_v56, %v10330_v46  ;;  %v2708_v56 = vsel %vm1071_vm5, %v2707_v49, %v2703_v13 }
 0x3cc   :  { %v10286_v61 = vpop.permute.xlu1 %2539 }
 0x3d0   :  { %v10288_v60 = vpop.permute.xlu1 %2542 }
 0x3d1   :  { %v2644_v62 = vrot.slane %v10288_v60, %v10330_v46  ;;  %v2739_v60 = vrot.slane %v10282_v10, %v10333_v54  ;;  %v2779_v10 = vsel %vm1208_vm6, %v2717_v20, %v2708_v56 }
 0x3d2   :  { %v2780_v17 = vsel %vm1210_vm7, %v2726_v41, %v2779_v10 }
 0x3d3   :  { %v2744_v5 = vsel %vm1071_vm5, %v2743_v48, %v2739_v60 }
 0x3d4   :  { %v10292_v32 = vpop.permute.xlu1 %2545  ;;  %v10298_v25 = vpop.permute.xlu0 %2560 }
 0x3d5   :  { %v2649_v55 = vrot.slane %v10292_v32, %v10333_v54  ;;  %v2671_v23 = vrot.slane %v10298_v25, %v10330_v46 }
 0x3d8   :  { %v10296_v6 = vpop.permute.xlu1 %2548  ;;  %v10302_v3 = vpop.permute.xlu0 %2602 }
 0x3d9   :  { %v2734_v1 = vrot.slane %v10302_v3, %v10330_v46 }
 0x3dc   :  { %v10300_v26 = vpop.permute.xlu1 %2557  ;;  %v10306_v36 = vpop.permute.xlu0 %2614 }
 0x3dd   :  { %v2752_v27 = vrot.slane %v10306_v36, %v10330_v46  ;;  %v2667_v49 = vrot.slane %v10300_v26, %v10333_v54 }
 0x3e0   :  { %v10304_v40 = vpop.permute.xlu1 %2599  ;;  %v10310_v7 = vpop.permute.xlu0 %2620 }
 0x3e1   :  { %v2730_v0 = vrot.slane %v10304_v40, %v10333_v54  ;;  %v2640_v40 = vrot.slane %v10286_v61, %v10333_v54  ;;  %v2653_v61 = vrot.slane %v10296_v6, %v10330_v46 }
 0x3e3   :  { %v2645_v2 = vsel %vm1071_vm5, %v2644_v62, %v2640_v40  ;;  %v2735_v3 = vsel %vm1071_vm5, %v2734_v1, %v2730_v0  ;;  %v2654_v32 = vsel %vm1071_vm5, %v2653_v61, %v2649_v55 }
 0x3e4   :  { %v10308_v12 = vpop.permute.xlu1 %2611  ;;  %v10314_v51 = vpop.permute.xlu0 %2554  ;;  %v2772_v35 = vsel %vm1208_vm6, %v2645_v2, %v2636_v58  ;;  %v2781_v15 = vsel %vm1212_vm8, %v2735_v3, %v2780_v17 }
 0x3e5   :  { %v2782_v0 = vsel %vm1214_vm9, %v2744_v5, %v2781_v15  ;;  %v2773_v17 = vsel %vm1210_vm7, %v2654_v32, %v2772_v35  ;;  %v2672_v15 = vsel %vm1071_vm5, %v2671_v23, %v2667_v49 }
 0x3e8   :  { %v10312_v16 = vpop.permute.xlu1 %2617  ;;  %v10318_v53 = vpop.permute.xlu0 %2566 }
 0x3e9   :  { %v2757_v39 = vrot.slane %v10312_v16, %v10333_v54  ;;  %v2662_v16 = vrot.slane %v10314_v51, %v10330_v46  ;;  %v2680_v61 = vrot.slane %v10318_v53, %v10330_v46 }
 0x3ec   :  { %v10316_v50 = vpop.permute.xlu1 %2551  ;;  %v10322_v31 = vpop.permute.xlu0 %2572 }
 0x3ed   :  { %v2658_v51 = vrot.slane %v10316_v50, %v10333_v54 }
 0x3f0   :  { %v10320_v19 = vpop.permute.xlu1 %2563  ;;  %v10327_v33 = vpop.permute.xlu0 %2626 }
 0x3f1   :  { %v2770_v52 = vrot.slane %v10327_v33, %v10330_v46  ;;  %v2676_v1 = vrot.slane %v10320_v19, %v10333_v54 }
 0x3f4   :  { %v10325_v34 = vpop.permute.xlu1 %2569 }
 0x3f5   :  { %v2685_v19 = vrot.slane %v10325_v34, %v10333_v54  ;;  %v2681_v34 = vsel %vm1071_vm5, %v2680_v61, %v2676_v1  ;;  %v13873_v1 = vld [vmem:[#allocation14_spill] sm:$0xff] }
 0x3f8   :  { %v10341_v18 = vpop.permute.xlu1 %2623 }
 0x3f9   :  { %v2766_v11 = vrot.slane %v10341_v18, %v10333_v54 }
 0x3fb   :  { %v2771_v41 = vsel %vm1071_vm5, %v2770_v52, %v2766_v11  ;;  %v13868_v52 = vld [vmem:[#allocation12_spill] sm:$0xff] }
 0x408   :  { %v10337_v30 = vpop.permute.xlu0 %2578 }
 0x40c   :  { %v10364_v37 = vpop.permute.xlu0 %998 }
 0x40d   :  { %v1116_v43 = vrot.slane %v10364_v37, %v10330_v46  ;;  %v2748_v37 = vrot.slane %v10308_v12, %v10333_v54  ;;  %v2761_v12 = vrot.slane %v10310_v7, %v10330_v46 }
 0x40e   :  { %v10371_v63 = vpop.permute.xlu1 %2575 }
 0x40f   :  { %v1117_v13 = vsel %vm1071_vm5, %v1116_v43, %v1112_v8  ;;  %v2753_v26 = vsel %vm1071_vm5, %v2752_v27, %v2748_v37  ;;  %v2762_v7 = vsel %vm1071_vm5, %v2761_v12, %v2757_v39  ;;  %v2663_v8 = vsel %vm1071_vm5, %v2662_v16, %v2658_v51 }
 0x410   :  { %v10391_v57 = vpop.permute.xlu0 %1040  ;;  %v1217_v20 = vsel %vm1216_vm10, %v1117_v13, %v1215_v29  ;;  %v2783_v9 = vsel %vm1216_vm10, %v2753_v26, %v2782_v0  ;;  %v2689_v43 = vrot.slane %v10322_v31, %v10330_v46  ;;  %v2774_v53 = vsel %vm1212_vm8, %v2663_v8, %v2773_v17  ;;  %v13878_v17 = vld [vmem:[#allocation67_spill] sm:$0xff] }
 0x411   :  { %v1179_v45 = vrot.slane %v10391_v57, %v10330_v46  ;;  %v2784_v2 = vsel %vm1218_vm11, %v2762_v7, %v2783_v9  ;;  %v2775_v11 = vsel %vm1214_vm9, %v2672_v15, %v2774_v53  ;;  %v13875_v9 = vld [vmem:[#allocation65_spill] sm:$0xff] }
 0x412   :  { %v10397_v4 = vpop.permute.xlu1 %1037  ;;  %v2785_v58 = vsel %vm1220_vm12, %v2771_v41, %v2784_v2  ;;  %v2690_v37 = vsel %vm1071_vm5, %v2689_v43, %v2685_v19  ;;  %v2776_v12 = vsel %vm1216_vm10, %v2681_v34, %v2775_v11  ;;  %v13876_v2 = vld [vmem:[#allocation15_spill] sm:$0xff]  ;;  %v13877_v19 = vld [vmem:[#allocation62_spill] sm:$0xff]  ;;  %v13881_v34 = vld [vmem:[#allocation68_spill] sm:$0xff] }
 0x413   :  { %v1175_v33 = vrot.slane %v10397_v4, %v10333_v54  ;;  %v2791_v35 = vsel %vm593_vm2, %v2785_v58, -inf  ;;  %v2777_v23 = vsel %vm1218_vm11, %v2690_v37, %v2776_v12 }
 0x414   :  { %v1005_v22 = vpop.permute.xlu0 %1004 }
 0x415   :  { %v1125_v6 = vrot.slane %v1005_v22, %v10330_v46  ;;  %v1180_v3 = vsel %vm1071_vm5, %v1179_v45, %v1175_v33  ;;  %v13870_v33 = vld [vmem:[#allocation61_spill] sm:$0xff] }
 0x416   :  { %v1002_v24 = vpop.permute.xlu1 %1001  ;;  %v1225_v31 = vsel %vm1214_vm9, %v1180_v3, %v10430_v47 }
 0x417   :  { %v1121_v28 = vrot.slane %v1002_v24, %v10333_v54 }
 0x418   :  { %v1047_v14 = vpop.permute.xlu0 %1046 }
 0x419   :  { %v1126_v36 = vsel %vm1071_vm5, %v1125_v6, %v1121_v28  ;;  %v1188_v22 = vrot.slane %v1047_v14, %v10330_v46  ;;  %v2694_v14 = vrot.slane %v10371_v63, %v10333_v54 }
 0x41a   :  { %v1044_v21 = vpop.permute.xlu1 %1043  ;;  %v1219_v50 = vsel %vm1218_vm11, %v1126_v36, %v1217_v20 }
 0x41b   :  { %v1184_v48 = vrot.slane %v1044_v21, %v10333_v54  ;;  %v2698_v21 = vrot.slane %v10337_v30, %v10330_v46 }
 0x41c   :  { %v1011_v25 = vpop.permute.xlu0 %1010 }
 0x41d   :  { %v1134_v62 = vrot.slane %v1011_v25, %v10330_v46  ;;  %v1189_v29 = vsel %vm1071_vm5, %v1188_v22, %v1184_v48  ;;  %v2699_v30 = vsel %vm1071_vm5, %v2698_v21, %v2694_v14  ;;  %v13871_v48 = vld [vmem:[#allocation25_spill] sm:$0xff] }
 0x41e   :  { %v1008_v18 = vpop.permute.xlu1 %1007  ;;  %v1226_v39 = vsel %vm1216_vm10, %v1189_v29, %v1225_v31  ;;  %v2778_v49 = vsel %vm1220_vm12, %v2699_v30, %v2777_v23  ;;  %v13882_v31 = vld [vmem:[#allocation74_spill] sm:$0xff]  ;;  %v13889_v23 = vld [vmem:[#allocation77_spill] sm:$0xff] }
 0x41f   :  { %v1130_v38 = vrot.slane %v1008_v18, %v10333_v54  ;;  %v2788_v13 = vsel %vm593_vm2, %v2778_v49, -inf  ;;  %v13886_v30 = vld [vmem:[#allocation78_spill] sm:$0xff] }
 0x420   :  { %v1053_v60 = vpop.permute.xlu0 %1052 }
 0x421   :  { %v1135_v40 = vsel %vm1071_vm5, %v1134_v62, %v1130_v38  ;;  %v1197_v57 = vrot.slane %v1053_v60, %v10330_v46  ;;  %v13869_v62 = vld [vmem:[#allocation13_spill] sm:$0xff] }
 0x422   :  { %v1050_v24 = vpop.permute.xlu1 %1049  ;;  %v1221_v4 = vsel %vm1220_vm12, %v1135_v40, %v1219_v50  ;;  %v13872_v40 = vld [vmem:[#allocation59_spill] sm:$0xff] }
 0x423   :  { %v1193_v56 = vrot.slane %v1050_v24, %v10333_v54  ;;  %v1231_v10 = vsel %vm593_vm2, %v1221_v4, -inf  ;;  %v13874_v24 = vld [vmem:[#allocation60_spill] sm:$0xff] }
 0x424   :  { %1232 = vmax.xlane.f32.xlu0 %v1231_v10  ;;  %v1059_v5 = vpop.permute.xlu0 %1058 }
 0x425   :  { %v1198_v55 = vsel %vm1071_vm5, %v1197_v57, %v1193_v56  ;;  %v1206_v6 = vrot.slane %v1059_v5, %v10330_v46 }
 0x426   :  { %v1056_v28 = vpop.permute.xlu1 %1055  ;;  %v1227_v27 = vsel %vm1218_vm11, %v1198_v55, %v1226_v39  ;;  %v13885_v39 = vld [vmem:[#allocation72_spill] sm:$0xff] }
 0x427   :  { %v1202_v63 = vrot.slane %v1056_v28, %v10333_v54 }
 0x428   :  { %2792 = vmax.xlane.f32.xlu0 %v2791_v35 }
 0x429   :  { %v1207_v32 = vsel %vm1071_vm5, %v1206_v6, %v1202_v63 }
 0x42a   :  { %v1228_v47 = vsel %vm1220_vm12, %v1207_v32, %v1227_v27 }
 0x42b   :  { %v1234_v16 = vsel %vm593_vm2, %v1228_v47, -inf }
 0x42c   :  { %1235 = vmax.xlane.f32.xlu1 %v1234_v16 }
 0x430   :  { %2789 = vmax.xlane.f32.xlu1 %v2788_v13 }
 0x4b1   :  { %v10539_v26 = vpop.xlane.xlu0 %1232 }
 0x4b2   :  { %v1242_v51 = vrot.slane %v10539_v26, %v13868_v52  ;;  %v1246_v22 = vrot.slane %v10539_v26, %v13869_v62  ;;  %v1250_v57 = vrot.slane %v10539_v26, %v13873_v1  ;;  %v10558_v61 = vrot.slane %v10539_v26, %v13876_v2 }
 0x4b4   :  { %v1319_v60 = vsub.f32 %v13871_v48, %v1242_v51  ;;  %v1320_v50 = vsub.f32 %v13872_v40, %v1242_v51  ;;  %v1322_v8 = vsub.f32 %v13875_v9, %v1246_v22  ;;  %v1323_v3 = vsub.f32 %v13877_v19, %v1250_v57  ;;  %v13895_v48 = vld [vmem:[#allocation88_spill] sm:$0xff]  ;;  %v13900_v9 = vld [vmem:[#allocation82_spill] sm:$0xff] }
 0x4b5   :  { %v10554_v10 = vpop.xlane.xlu0 %2792  ;;  %v1324_v43 = vsub.f32 %v13878_v17, %v1250_v57  ;;  %v1325_v55 = vsub.f32 %v13881_v34, %v10558_v61  ;;  %v13905_v34 = vld [vmem:[#allocation90_spill] sm:$0xff] }
 0x4b6   :  { %v1351_v4 = vmul.f32 1.442695, %v1319_v60  ;;  %v1353_v56 = vmul.f32 1.442695, %v1320_v50  ;;  %v1357_v14 = vmul.f32 1.442695, %v1322_v8  ;;  %v2831_v29 = vrot.slane %v10554_v10, %v13868_v52 }
 0x4b7   :  { %v1359_v6 = vmul.f32 1.442695, %v1323_v3  ;;  %v1361_v28 = vmul.f32 1.442695, %v1324_v43  ;;  %v2835_v21 = vrot.slane %v10554_v10, %v13869_v62  ;;  %v1363_v37 = vmul.f32 1.442695, %v1325_v55 }
 0x4b8   :  { %v2893_v63 = vsub.f32 %v13882_v31, %v2831_v29  ;;  %v2892_v32 = vsub.f32 %v13885_v39, %v2831_v29  ;;  %v2839_v27 = vrot.slane %v10554_v10, %v13873_v1  ;;  %v13908_v31 = vld [vmem:[#allocation93_spill] sm:$0xff]  ;;  %v13909_v39 = vld [vmem:[#allocation19_spill] sm:$0xff] }
 0x4b9   :  { %v10532_v25 = vpop.xlane.xlu1 %1235  ;;  %v2895_v11 = vsub.f32 %v13886_v30, %v2835_v21  ;;  %v2894_v49 = vsub.f32 %v13889_v23, %v2835_v21 }
 0x4ba   :  { %v1274_v36 = vrot.slane %v10532_v25, %v13868_v52  ;;  %v1278_v18 = vrot.slane %v10532_v25, %v13869_v62  ;;  %v2942_v47 = vmul.f32 1.442695, %v2893_v63  ;;  %v2940_v13 = vmul.f32 1.442695, %v2892_v32 }
 0x4bb   :  { %v2859_v32 = vrot.slane %v10554_v10, %v13909_v39 }
 0x4bc   :  { %v1335_v0 = vsub.f32 %v9941_v44, %v1274_v36  ;;  %v1336_v7 = vsub.f32 %v9955_v59, %v1274_v36  ;;  %v1337_v38 = vsub.f32 %v9951_v42, %v1278_v18  ;;  %v1338_v20 = vsub.f32 %v13870_v33, %v1278_v18  ;;  %v13890_v18 = vld [vmem:[#allocation80_spill] sm:$0xff] }
 0x4bd   :  { %v1321_v42 = vsub.f32 %v13874_v24, %v1246_v22  ;;  %v2843_v36 = vrot.slane %v10554_v10, %v13876_v2  ;;  %v10637_v23 = vpop.xlane.xlu1 %2789 }
 0x4be   :  { %v1383_v45 = vmul.f32 1.442695, %v1335_v0  ;;  %v1385_v41 = vmul.f32 1.442695, %v1336_v7  ;;  %v1387_v44 = vmul.f32 1.442695, %v1337_v38  ;;  %v2897_v0 = vsub.f32 %v13890_v18, %v2839_v27 }
 0x4bf   :  { %v1389_v59 = vmul.f32 1.442695, %v1338_v20  ;;  %v1355_v58 = vmul.f32 1.442695, %v1321_v42  ;;  %v2946_v7 = vmul.f32 1.442695, %v2895_v11  ;;  %v2899_v60 = vsub.f32 %v13895_v48, %v2843_v36 }
 0x4c0   :  { %8713 = vpow2.f32 %v1383_v45  ;;  %v13893_v45 = vld [vmem:[#allocation79_spill] sm:$0xff]  ;;  %v2944_v20 = vmul.f32 1.442695, %v2894_v49  ;;  %v13899_v42 = vld [vmem:[#allocation17_spill] sm:$0xff] }
 0x4c1   :  { %8715 = vpow2.f32 %v1385_v41  ;;  %v2896_v33 = vsub.f32 %v13893_v45, %v2839_v27  ;;  %v13894_v41 = vld [vmem:[#allocation16_spill] sm:$0xff]  ;;  %v2799_v45 = vrot.slane %v10637_v23, %v13868_v52 }
 0x4c2   :  { %8717 = vpow2.f32 %v1387_v44  ;;  %v2847_v22 = vrot.slane %v10554_v10, %v13894_v41  ;;  %v2950_v44 = vmul.f32 1.442695, %v2897_v0  ;;  %v13910_v27 = vld [vmem:[#allocation92_spill] sm:$0xff] }
 0x4c3   :  { %8719 = vpow2.f32 %v1389_v59  ;;  %v13898_v59 = vld [vmem:[#allocation91_spill] sm:$0xff]  ;;  %v2948_v24 = vmul.f32 1.442695, %v2896_v33  ;;  %v13914_v0 = vld [vmem:[#allocation100_spill] sm:$0xff] }
 0x4c4   :  { %8721 = vpow2.f32 %v1351_v4  ;;  %v2898_v57 = vsub.f32 %v13898_v59, %v2843_v36  ;;  %v2851_v4 = vrot.slane %v10554_v10, %v13899_v42  ;;  %v2901_v8 = vsub.f32 %v13900_v9, %v2847_v22 }
 0x4c5   :  { %8723 = vpow2.f32 %v1353_v56  ;;  %v2954_v56 = vmul.f32 1.442695, %v2899_v60  ;;  %v2803_v59 = vrot.slane %v10637_v23, %v13869_v62 }
 0x4c6   :  { %8725 = vpow2.f32 %v1355_v58  ;;  %v13903_v58 = vld [vmem:[#allocation81_spill] sm:$0xff]  ;;  %v2952_v43 = vmul.f32 1.442695, %v2898_v57  ;;  %v2903_v55 = vsub.f32 %v13905_v34, %v2851_v4  ;;  %v2902_v63 = vsub.f32 %v13908_v31, %v2851_v4  ;;  %v13918_v57 = vld [vmem:[#allocation76_spill] sm:$0xff]  ;;  %v13925_v31 = vld [vmem:[#allocation83_spill] sm:$0xff] }
 0x4c7   :  { %8727 = vpow2.f32 %v1357_v14  ;;  %v2900_v17 = vsub.f32 %v13903_v58, %v2847_v22  ;;  %v13904_v14 = vld [vmem:[#allocation18_spill] sm:$0xff] }
 0x4c8   :  { %8729 = vpow2.f32 %v1359_v6  ;;  %v2855_v29 = vrot.slane %v10554_v10, %v13904_v14  ;;  %v2958_v6 = vmul.f32 1.442695, %v2901_v8  ;;  %v2962_v11 = vmul.f32 1.442695, %v2903_v55  ;;  %v13917_v22 = vld [vmem:[#allocation102_spill] sm:$0xff] }
 0x4c9   :  { %8731 = vpow2.f32 %v1361_v28  ;;  %v2960_v18 = vmul.f32 1.442695, %v2902_v63  ;;  %v2907_v10 = vsub.f32 %v13914_v0, %v2859_v32  ;;  %v2906_v48 = vsub.f32 %v13917_v22, %v2859_v32 }
 0x4ca   :  { %v10564_v5 = vpop.eup %8713  ;;  %8733 = vpow2.f32 %v1363_v37  ;;  %v2956_v37 = vmul.f32 1.442695, %v2900_v17  ;;  %v2905_v30 = vsub.f32 %v13910_v27, %v2855_v29  ;;  %v2807_v17 = vrot.slane %v10637_v23, %v13873_v1  ;;  %v13926_v27 = vld [vmem:[#allocation87_spill] sm:$0xff] }
 0x4cb   :  { %13879 = vst [vmem:[#allocation61_spill] sm:$0xff] %v10564_v5  ;;  %v10566_v53 = vpop.eup %8715  ;;  %1496 = vperm.xlu1 %8641, %v10564_v5   ;;  %8735 = vpow2.f32 %v2942_v47  ;;  %v2968_v8 = vmul.f32 1.442695, %v2906_v48  ;;  %v2878_v63 = vsub.f32 %v13925_v31, %v2803_v59  ;;  %v2811_v32 = vrot.slane %v10637_v23, %v13876_v2 }
 0x4cc   :  { %13880 = vst [vmem:[#allocation25_spill] sm:$0xff] %v10566_v53  ;;  %1499 = vperm.xlu0 %8642, %v10566_v53   ;;  %v10575_v35 = vpop.eup %8717  ;;  %8737 = vpow2.f32 %v2940_v13  ;;  %v13913_v13 = vld [vmem:[#allocation95_spill] sm:$0xff]  ;;  %v13969_v53 = vld [vmem:[#allocation24_spill] sm:$0xff] }
 0x4cd   :  { %13883 = vst [vmem:[#allocation59_spill] sm:$0xff] %v10575_v35  ;;  %v10577_v15 = vpop.eup %8719  ;;  %8739 = vpow2.f32 %v2946_v7  ;;  %v2904_v36 = vsub.f32 %v13913_v13, %v2855_v29  ;;  %v2966_v7 = vmul.f32 1.442695, %v2905_v30  ;;  %v2881_v30 = vsub.f32 %v13926_v27, %v2807_v17 }
 0x4ce   :  { %13884 = vst [vmem:[#allocation60_spill] sm:$0xff] %v10577_v15  ;;  %v10585_v12 = vpop.eup %8721  ;;  %8741 = vpow2.f32 %v2944_v20 }
 0x4cf   :  { %1502 = vperm.xlu1 %8641, %v10575_v35   ;;  %13887 = vst [vmem:[#allocation65_spill] sm:$0xff] %v10585_v12  ;;  %v10587_v16 = vpop.eup %8723  ;;  %8743 = vpow2.f32 %v2950_v44  ;;  %v2964_v60 = vmul.f32 1.442695, %v2904_v36  ;;  %v2970_v44 = vmul.f32 1.442695, %v2907_v10  ;;  %v13961_v35 = vld [vmem:[#allocation66_spill] sm:$0xff] }
 0x4d0   :  { %1505 = vperm.xlu0 %8642, %v10577_v15   ;;  %13888 = vst [vmem:[#allocation62_spill] sm:$0xff] %v10587_v16  ;;  %v10595_v51 = vpop.eup %8725  ;;  %8745 = vpow2.f32 %v2948_v24  ;;  %v2876_v24 = vsub.f32 %v13918_v57, %v2799_v45  ;;  %v2912_v10 = vmul.f32 1.442695, %v2878_v63  ;;  %v2918_v48 = vmul.f32 1.442695, %v2881_v30 }
 0x4d1   :  { %13891 = vst [vmem:[#allocation67_spill] sm:$0xff] %v10595_v51  ;;  %v10597_v38 = vpop.eup %8727  ;;  %8747 = vpow2.f32 %v2954_v56  ;;  %v13921_v56 = vld [vmem:[#allocation75_spill] sm:$0xff] }
 0x4d2   :  { %13892 = vst [vmem:[#allocation68_spill] sm:$0xff] %v10597_v38  ;;  %v10605_v40 = vpop.eup %8729  ;;  %8749 = vpow2.f32 %v2952_v43  ;;  %v2877_v58 = vsub.f32 %v13921_v56, %v2799_v45  ;;  %v13922_v43 = vld [vmem:[#allocation84_spill] sm:$0xff]  ;;  %v2908_v34 = vmul.f32 1.442695, %v2876_v24  ;;  %v13930_v45 = vld [vmem:[#allocation94_spill] sm:$0xff] }
 0x4d3   :  { %1448 = vperm.xlu1 %8641, %v10585_v12   ;;  %13896 = vst [vmem:[#allocation74_spill] sm:$0xff] %v10605_v40  ;;  %v10607_v50 = vpop.eup %8731  ;;  %8751 = vpow2.f32 %v2958_v6  ;;  %v2879_v29 = vsub.f32 %v13922_v43, %v2803_v59  ;;  %v2883_v22 = vsub.f32 %v13930_v45, %v2811_v32  ;;  %v13933_v59 = vld [vmem:[#allocation97_spill] sm:$0xff]  ;;  %v13934_v56 = vld [vmem:[#allocation86_spill] sm:$0xff]  ;;  %v2827_v45 = vrot.slane %v10637_v23, %v13909_v39 }
 0x4d4   :  { %1451 = vperm.xlu0 %8642, %v10587_v16   ;;  %13897 = vst [vmem:[#allocation72_spill] sm:$0xff] %v10607_v50  ;;  %v10615_v19 = vpop.eup %8733  ;;  %8753 = vpow2.f32 %v2956_v37  ;;  %v2910_v37 = vmul.f32 1.442695, %v2877_v58  ;;  %v2882_v57 = vsub.f32 %v13933_v59, %v2811_v32  ;;  %v13938_v32 = vld [vmem:[#allocation96_spill] sm:$0xff] }
 0x4d5   :  { %13901 = vst [vmem:[#allocation78_spill] sm:$0xff] %v10615_v19  ;;  %v10617_v3 = vpop.eup %8735  ;;  %8755 = vpow2.f32 %v2962_v11  ;;  %v2914_v11 = vmul.f32 1.442695, %v2879_v29 }
 0x4d6   :  { %13902 = vst [vmem:[#allocation77_spill] sm:$0xff] %v10617_v3  ;;  %v10625_v28 = vpop.eup %8737  ;;  %8757 = vpow2.f32 %v2960_v18  ;;  %v13929_v18 = vld [vmem:[#allocation85_spill] sm:$0xff]  ;;  %v2920_v63 = vmul.f32 1.442695, %v2882_v57 }
 0x4d7   :  { %1454 = vperm.xlu1 %8641, %v10595_v51   ;;  %13906 = vst [vmem:[#allocation80_spill] sm:$0xff] %v10625_v28  ;;  %v10627_v21 = vpop.eup %8739  ;;  %8759 = vpow2.f32 %v2966_v7  ;;  %v2880_v0 = vsub.f32 %v13929_v18, %v2807_v17  ;;  %v2815_v7 = vrot.slane %v10637_v23, %v13894_v41  ;;  %v2922_v17 = vmul.f32 1.442695, %v2883_v22  ;;  %v13942_v22 = vld [vmem:[#allocation98_spill] sm:$0xff] }
 0x4d8   :  { %1457 = vperm.xlu0 %8642, %v10597_v38   ;;  %13907 = vst [vmem:[#allocation79_spill] sm:$0xff] %v10627_v21  ;;  %v10635_v47 = vpop.eup %8741  ;;  %8761 = vpow2.f32 %v2964_v60 }
 0x4d9   :  { %13911 = vst [vmem:[#allocation88_spill] sm:$0xff] %v10635_v47  ;;  %v10639_v49 = vpop.eup %8743  ;;  %8763 = vpow2.f32 %v2970_v44  ;;  %v2916_v24 = vmul.f32 1.442695, %v2880_v0  ;;  %v2885_v58 = vsub.f32 %v13934_v56, %v2815_v7  ;;  %v13941_v0 = vld [vmem:[#allocation99_spill] sm:$0xff]  ;;  %v13945_v56 = vld [vmem:[#allocation101_spill] sm:$0xff] }
 0x4da   :  { %13912 = vst [vmem:[#allocation91_spill] sm:$0xff] %v10639_v49  ;;  %v10647_v33 = vpop.eup %8745  ;;  %8765 = vpow2.f32 %v2968_v8  ;;  %v2819_v8 = vrot.slane %v10637_v23, %v13899_v42 }
 0x4db   :  { %1460 = vperm.xlu1 %8641, %v10605_v40   ;;  %13915 = vst [vmem:[#allocation82_spill] sm:$0xff] %v10647_v33  ;;  %v10649_v20 = vpop.eup %8747  ;;  %8767 = vpow2.f32 %v2908_v34  ;;  %v13937_v34 = vld [vmem:[#allocation89_spill] sm:$0xff]  ;;  %v2926_v30 = vmul.f32 1.442695, %v2885_v58 }
 0x4dc   :  { %1463 = vperm.xlu0 %8642, %v10607_v50   ;;  %13916 = vst [vmem:[#allocation81_spill] sm:$0xff] %v10649_v20  ;;  %v10657_v4 = vpop.eup %8749  ;;  %8769 = vpow2.f32 %v2910_v37  ;;  %v2884_v31 = vsub.f32 %v13937_v34, %v2815_v7  ;;  %v2823_v37 = vrot.slane %v10637_v23, %v13904_v14  ;;  %v2887_v27 = vsub.f32 %v13938_v32, %v2819_v8  ;;  %v13970_v50 = vld [vmem:[#allocation23_spill] sm:$0xff] }
 0x4dd   :  { %13919 = vst [vmem:[#allocation90_spill] sm:$0xff] %v10657_v4  ;;  %v10659_v9 = vpop.eup %8751  ;;  %8771 = vpow2.f32 %v2914_v11  ;;  %v1282_v32 = vrot.slane %v10532_v25, %v13873_v1 }
 0x4de   :  { %13920 = vst [vmem:[#allocation93_spill] sm:$0xff] %v10659_v9  ;;  %v10667_v55 = vpop.eup %8753  ;;  %8773 = vpow2.f32 %v2912_v10  ;;  %v2886_v10 = vsub.f32 %v13941_v0, %v2819_v8  ;;  %v2924_v7 = vmul.f32 1.442695, %v2884_v31  ;;  %v2930_v59 = vmul.f32 1.442695, %v2887_v27  ;;  %v13949_v27 = vld [vmem:[#allocation105_spill] sm:$0xff] }
 0x4df   :  { %1466 = vperm.xlu1 %8641, %v10615_v19   ;;  %13923 = vst [vmem:[#allocation92_spill] sm:$0xff] %v10667_v55  ;;  %v10669_v6 = vpop.eup %8755  ;;  %8775 = vpow2.f32 %v2918_v48  ;;  %v2889_v48 = vsub.f32 %v13942_v22, %v2823_v37  ;;  %v2888_v58 = vsub.f32 %v13945_v56, %v2823_v37  ;;  %v13950_v0 = vld [vmem:[#allocation73_spill] sm:$0xff]  ;;  %v13953_v56 = vld [vmem:[#allocation26_spill] sm:$0xff]  ;;  %v1286_v19 = vrot.slane %v10532_v25, %v13876_v2 }
 0x4e0   :  { %3056 = vperm.xlu0 %8642, %v10617_v3   ;;  %13924 = vst [vmem:[#allocation95_spill] sm:$0xff] %v10669_v6  ;;  %v10677_v13 = vpop.eup %8757  ;;  %8777 = vpow2.f32 %v2916_v24  ;;  %v2928_v8 = vmul.f32 1.442695, %v2886_v10  ;;  %v1326_v10 = vsub.f32 %v13950_v0, %v10558_v61 }
 0x4e1   :  { %13927 = vst [vmem:[#allocation100_spill] sm:$0xff] %v10677_v13  ;;  %v10679_v36 = vpop.eup %8759  ;;  %8779 = vpow2.f32 %v2922_v17  ;;  %v13946_v17 = vld [vmem:[#allocation103_spill] sm:$0xff]  ;;  %v2934_v23 = vmul.f32 1.442695, %v2889_v48  ;;  %v2932_v37 = vmul.f32 1.442695, %v2888_v58  ;;  %v1341_v15 = vsub.f32 %v13961_v35, %v1286_v19 }
 0x4e2   :  { %13928 = vst [vmem:[#allocation102_spill] sm:$0xff] %v10679_v36  ;;  %v10687_v60 = vpop.eup %8761  ;;  %8781 = vpow2.f32 %v2920_v63  ;;  %v2891_v34 = vsub.f32 %v13946_v17, %v2827_v45  ;;  %v13954_v17 = vld [vmem:[#allocation63_spill] sm:$0xff] }
 0x4e3   :  { %3053 = vperm.xlu1 %8641, %v10625_v28   ;;  %13931 = vst [vmem:[#allocation76_spill] sm:$0xff] %v10687_v60  ;;  %v10689_v44 = vpop.eup %8763  ;;  %8783 = vpow2.f32 %v2926_v30  ;;  %v2890_v30 = vsub.f32 %v13949_v27, %v2827_v45  ;;  %v1339_v45 = vsub.f32 %v13953_v56, %v1282_v32  ;;  %v1340_v61 = vsub.f32 %v13954_v17, %v1282_v32  ;;  %v13957_v27 = vld [vmem:[#allocation64_spill] sm:$0xff] }
 0x4e4   :  { %3062 = vperm.xlu0 %8642, %v10627_v21   ;;  %13932 = vst [vmem:[#allocation75_spill] sm:$0xff] %v10689_v44  ;;  %v10697_v43 = vpop.eup %8765  ;;  %8785 = vpow2.f32 %v2924_v7  ;;  %v2938_v7 = vmul.f32 1.442695, %v2891_v34  ;;  %v1262_v17 = vrot.slane %v10539_v26, %v13899_v42  ;;  %v1395_v35 = vmul.f32 1.442695, %v1341_v15 }
 0x4e5   :  { %13935 = vst [vmem:[#allocation84_spill] sm:$0xff] %v10697_v43  ;;  %v10699_v29 = vpop.eup %8767  ;;  %8787 = vpow2.f32 %v2930_v59  ;;  %v1258_v59 = vrot.slane %v10539_v26, %v13894_v41  ;;  %v2936_v58 = vmul.f32 1.442695, %v2890_v30  ;;  %v1391_v56 = vmul.f32 1.442695, %v1339_v45  ;;  %v13958_v30 = vld [vmem:[#allocation69_spill] sm:$0xff] }
 0x4e6   :  { %13936 = vst [vmem:[#allocation83_spill] sm:$0xff] %v10699_v29  ;;  %v10707_v11 = vpop.eup %8769  ;;  %8789 = vpow2.f32 %v2928_v8  ;;  %v1365_v8 = vmul.f32 1.442695, %v1326_v10  ;;  %v1393_v32 = vmul.f32 1.442695, %v1340_v61 }
 0x4e7   :  { %3059 = vperm.xlu1 %8641, %v10635_v47   ;;  %13939 = vst [vmem:[#allocation87_spill] sm:$0xff] %v10707_v11  ;;  %v10709_v18 = vpop.eup %8771  ;;  %8791 = vpow2.f32 %v2934_v23  ;;  %v1327_v0 = vsub.f32 %v13957_v27, %v1258_v59 }
 0x4e8   :  { %3068 = vperm.xlu0 %8642, %v10639_v49   ;;  %13940 = vst [vmem:[#allocation85_spill] sm:$0xff] %v10709_v18  ;;  %v10717_v57 = vpop.eup %8773  ;;  %8793 = vpow2.f32 %v2932_v37  ;;  %v1328_v37 = vsub.f32 %v13958_v30, %v1258_v59  ;;  %v13965_v30 = vld [vmem:[#allocation70_spill] sm:$0xff] }
 0x4e9   :  { %13943 = vst [vmem:[#allocation94_spill] sm:$0xff] %v10717_v57  ;;  %v10719_v24 = vpop.eup %8775  ;;  %8795 = vpow2.f32 %v2938_v7  ;;  %v1367_v27 = vmul.f32 1.442695, %v1327_v0  ;;  %v1329_v5 = vsub.f32 %v13965_v30, %v1262_v17  ;;  %v1290_v0 = vrot.slane %v10532_v25, %v13894_v41 }
 0x4ea   :  { %13944 = vst [vmem:[#allocation97_spill] sm:$0xff] %v10719_v24  ;;  %v10725_v31 = vpop.eup %8777  ;;  %8797 = vpow2.f32 %v2936_v58  ;;  %v1369_v45 = vmul.f32 1.442695, %v1328_v37  ;;  %v13962_v58 = vld [vmem:[#allocation71_spill] sm:$0xff]  ;;  %v1266_v30 = vrot.slane %v10539_v26, %v13904_v14 }
 0x4eb   :  { %3065 = vperm.xlu1 %8641, %v10647_v33   ;;  %13947 = vst [vmem:[#allocation86_spill] sm:$0xff] %v10725_v31  ;;  %v10727_v63 = vpop.eup %8779  ;;  %8799 = vpow2.f32 %v1365_v8  ;;  %v1342_v59 = vsub.f32 %v13962_v58, %v1286_v19  ;;  %v1343_v40 = vsub.f32 %v13969_v53, %v1290_v0 }
 0x4ec   :  { %3074 = vperm.xlu0 %8642, %v10649_v20   ;;  %13948 = vst [vmem:[#allocation89_spill] sm:$0xff] %v10727_v63  ;;  %v10736_v22 = vpop.eup %8781  ;;  %8801 = vpow2.f32 %v1391_v56  ;;  %v13966_v56 = vld [vmem:[#allocation104_spill] sm:$0xff] }
 0x4ed   :  { %13951 = vst [vmem:[#allocation96_spill] sm:$0xff] %v10736_v22  ;;  %v10738_v48 = vpop.eup %8783  ;;  %8803 = vpow2.f32 %v1393_v32  ;;  %v1330_v37 = vsub.f32 %v13966_v56, %v1262_v17  ;;  %v1397_v19 = vmul.f32 1.442695, %v1342_v59  ;;  %v1344_v17 = vsub.f32 %v13970_v50, %v1290_v0  ;;  %v13973_v56 = vld [vmem:[#allocation107_spill] sm:$0xff] }
 0x4ee   :  { %13952 = vst [vmem:[#allocation99_spill] sm:$0xff] %v10738_v48  ;;  %v10746_v34 = vpop.eup %8785  ;;  %8805 = vpow2.f32 %v1367_v27  ;;  %v1371_v27 = vmul.f32 1.442695, %v1329_v5  ;;  %v1331_v51 = vsub.f32 %v13973_v56, %v1266_v30  ;;  %v1294_v5 = vrot.slane %v10532_v25, %v13899_v42 }
 0x4ef   :  { %3071 = vperm.xlu1 %8641, %v10657_v4   ;;  %13955 = vst [vmem:[#allocation98_spill] sm:$0xff] %v10746_v34  ;;  %v10748_v23 = vpop.eup %8787  ;;  %8807 = vpow2.f32 %v1369_v45  ;;  %v1373_v15 = vmul.f32 1.442695, %v1330_v37  ;;  %v1399_v53 = vmul.f32 1.442695, %v1343_v40  ;;  %v1270_v56 = vrot.slane %v10539_v26, %v13909_v39 }
 0x4f0   :  { %3080 = vperm.xlu0 %8642, %v10659_v9   ;;  %13956 = vst [vmem:[#allocation101_spill] sm:$0xff] %v10748_v23  ;;  %v10756_v10 = vpop.eup %8789  ;;  %8809 = vpow2.f32 %v1395_v35  ;;  %v13974_v35 = vld [vmem:[#allocation106_spill] sm:$0xff]  ;;  %v1401_v50 = vmul.f32 1.442695, %v1344_v17  ;;  %v1298_v26 = vrot.slane %v10532_v25, %v13904_v14 }
 0x4f1   :  { %13959 = vst [vmem:[#allocation103_spill] sm:$0xff] %v10756_v10  ;;  %v10758_v7 = vpop.eup %8791  ;;  %8811 = vpow2.f32 %v1397_v19  ;;  %v1332_v37 = vsub.f32 %v13974_v35, %v1266_v30  ;;  %v13981_v35 = vld [vmem:[#allocation111_spill] sm:$0xff] }
 0x4f2   :  { %13960 = vst [vmem:[#allocation105_spill] sm:$0xff] %v10758_v7  ;;  %v10766_v8 = vpop.eup %8793  ;;  %8813 = vpow2.f32 %v1371_v27  ;;  %v1375_v27 = vmul.f32 1.442695, %v1331_v51 }
 0x4f3   :  { %3077 = vperm.xlu1 %8641, %v10667_v55   ;;  %13963 = vst [vmem:[#allocation73_spill] sm:$0xff] %v10766_v8  ;;  %v10768_v61 = vpop.eup %8795  ;;  %8815 = vpow2.f32 %v1373_v15  ;;  %v1377_v40 = vmul.f32 1.442695, %v1332_v37 }
 0x4f4   :  { %3086 = vperm.xlu0 %8642, %v10669_v6   ;;  %13964 = vst [vmem:[#allocation26_spill] sm:$0xff] %v10768_v61  ;;  %v10776_v32 = vpop.eup %8797  ;;  %8817 = vpow2.f32 %v1399_v53 }
 0x4f5   :  { %13967 = vst [vmem:[#allocation63_spill] sm:$0xff] %v10776_v32  ;;  %v10778_v58 = vpop.eup %8799  ;;  %8819 = vpow2.f32 %v1401_v50 }
 0x4f6   :  { %13968 = vst [vmem:[#allocation64_spill] sm:$0xff] %v10778_v58  ;;  %v10786_v45 = vpop.eup %8801  ;;  %8821 = vpow2.f32 %v1375_v27  ;;  %v1302_v27 = vrot.slane %v10532_v25, %v13909_v39  ;;  %v13990_v25 = vld [vmem:[#allocation114_spill] sm:$0xff] }
 0x4f7   :  { %3083 = vperm.xlu1 %8641, %v10677_v13   ;;  %13971 = vst [vmem:[#allocation69_spill] sm:$0xff] %v10786_v45  ;;  %v10788_v59 = vpop.eup %8803  ;;  %8823 = vpow2.f32 %v1377_v40 }
 0x4f8   :  { %3092 = vperm.xlu0 %8642, %v10679_v36   ;;  %13972 = vst [vmem:[#allocation66_spill] sm:$0xff] %v10788_v59  ;;  %v10796_v0 = vpop.eup %8805 }
 0x4f9   :  { %13975 = vst [vmem:[#allocation71_spill] sm:$0xff] %v10796_v0  ;;  %v10798_v19 = vpop.eup %8807 }
 0x4fa   :  { %13976 = vst [vmem:[#allocation70_spill] sm:$0xff] %v10798_v19  ;;  %v10806_v15 = vpop.eup %8809 }
 0x4fb   :  { %3089 = vperm.xlu1 %8641, %v10687_v60   ;;  %13979 = vst [vmem:[#allocation104_spill] sm:$0xff] %v10806_v15  ;;  %v10808_v17 = vpop.eup %8811 }
 0x4fc   :  { %3098 = vperm.xlu0 %8642, %v10689_v44   ;;  %13980 = vst [vmem:[#allocation24_spill] sm:$0xff] %v10808_v17 }
 0x4ff   :  { %3095 = vperm.xlu1 %8641, %v10697_v43  }
 0x500   :  { %3005 = vperm.xlu0 %8642, %v10699_v29  }
 0x503   :  { %3008 = vperm.xlu1 %8641, %v10707_v11  }
 0x504   :  { %3014 = vperm.xlu0 %8642, %v10709_v18  }
 0x507   :  { %3011 = vperm.xlu1 %8641, %v10717_v57  }
 0x508   :  { %3020 = vperm.xlu0 %8642, %v10719_v24  }
 0x50b   :  { %3017 = vperm.xlu1 %8641, %v10725_v31  }
 0x50c   :  { %3026 = vperm.xlu0 %8642, %v10727_v63  }
 0x50f   :  { %3023 = vperm.xlu1 %8641, %v10736_v22  }
 0x510   :  { %3032 = vperm.xlu0 %8642, %v10738_v48  }
 0x513   :  { %3029 = vperm.xlu1 %8641, %v10746_v34  }
 0x514   :  { %3038 = vperm.xlu0 %8642, %v10748_v23  }
 0x517   :  { %3035 = vperm.xlu1 %8641, %v10756_v10  }
 0x518   :  { %3044 = vperm.xlu0 %8642, %v10758_v7  }
 0x51b   :  { %3041 = vperm.xlu1 %8641, %v10766_v8  }
 0x51c   :  { %3050 = vperm.xlu0 %8642, %v10768_v61  }
 0x51f   :  { %3047 = vperm.xlu1 %8641, %v10776_v32  }
 0x520   :  { %1469 = vperm.xlu0 %8642, %v10778_v58  }
 0x523   :  { %1508 = vperm.xlu1 %8641, %v10786_v45   ;;  %v13977_v45 = vld [vmem:[#allocation109_spill] sm:$0xff] }
 0x524   :  { %1511 = vperm.xlu0 %8642, %v10788_v59   ;;  %v1345_v58 = vsub.f32 %v13977_v45, %v1294_v5  ;;  %v13978_v59 = vld [vmem:[#allocation108_spill] sm:$0xff]  ;;  %v13982_v45 = vld [vmem:[#allocation110_spill] sm:$0xff] }
 0x525   :  { %v1346_v30 = vsub.f32 %v13978_v59, %v1294_v5  ;;  %v1334_v53 = vsub.f32 %v13982_v45, %v1270_v56  ;;  %v10816_v5 = vpop.eup %8813 }
 0x526   :  { %v1403_v51 = vmul.f32 1.442695, %v1345_v58  ;;  %13983 = vst [vmem:[#allocation23_spill] sm:$0xff] %v10816_v5  ;;  %v10818_v37 = vpop.eup %8815 }
 0x527   :  { %1472 = vperm.xlu1 %8641, %v10796_v0   ;;  %v1333_v0 = vsub.f32 %v13981_v35, %v1270_v56  ;;  %v1405_v59 = vmul.f32 1.442695, %v1346_v30  ;;  %13984 = vst [vmem:[#allocation107_spill] sm:$0xff] %v10818_v37  ;;  %v13985_v35 = vld [vmem:[#allocation113_spill] sm:$0xff]  ;;  %v1381_v58 = vmul.f32 1.442695, %v1334_v53  ;;  %v10826_v40 = vpop.eup %8817 }
 0x528   :  { %1475 = vperm.xlu0 %8642, %v10798_v19   ;;  %8825 = vpow2.f32 %v1403_v51  ;;  %13987 = vst [vmem:[#allocation106_spill] sm:$0xff] %v10826_v40  ;;  %v10828_v30 = vpop.eup %8819  ;;  %v1350_v51 = vsub.f32 %v13990_v25, %v1302_v27 }
 0x529   :  { %v1379_v50 = vmul.f32 1.442695, %v1333_v0  ;;  %8827 = vpow2.f32 %v1405_v59  ;;  %13988 = vst [vmem:[#allocation109_spill] sm:$0xff] %v10828_v30  ;;  %v13989_v0 = vld [vmem:[#allocation115_spill] sm:$0xff]  ;;  %v10834_v53 = vpop.eup %8821 }
 0x52a   :  { %v1349_v45 = vsub.f32 %v13989_v0, %v1302_v27  ;;  %13991 = vst [vmem:[#allocation108_spill] sm:$0xff] %v10834_v53  ;;  %v1413_v59 = vmul.f32 1.442695, %v1350_v51 }
 0x52b   :  { %1514 = vperm.xlu1 %8641, %v10806_v15   ;;  %v1347_v15 = vsub.f32 %v13985_v35, %v1298_v26  ;;  %8829 = vpow2.f32 %v1379_v50 }
 0x52c   :  { %1517 = vperm.xlu0 %8642, %v10808_v17   ;;  %v13986_v17 = vld [vmem:[#allocation112_spill] sm:$0xff]  ;;  %8831 = vpow2.f32 %v1381_v58 }
 0x52d   :  { %v1348_v56 = vsub.f32 %v13986_v17, %v1298_v26  ;;  %v10836_v17 = vpop.eup %8823  ;;  %v1411_v26 = vmul.f32 1.442695, %v1349_v45 }
 0x52e   :  { %13992 = vst [vmem:[#allocation111_spill] sm:$0xff] %v10836_v17 }
 0x52f   :  { %1478 = vperm.xlu1 %8641, %v10816_v5   ;;  %v1407_v5 = vmul.f32 1.442695, %v1347_v15  ;;  %v1409_v35 = vmul.f32 1.442695, %v1348_v56 }
 0x530   :  { %1481 = vperm.xlu0 %8642, %v10818_v37  }
 0x531   :  { %8833 = vpow2.f32 %v1407_v5 }
 0x532   :  { %8835 = vpow2.f32 %v1409_v35  ;;  %v10840_v50 = vpop.eup %8825  ;;  %v14001_v35 = vld [vmem:[#allocation21_spill] sm:$0xff] }
 0x533   :  { %1520 = vperm.xlu1 %8641, %v10826_v40   ;;  %13993 = vst [vmem:[#allocation110_spill] sm:$0xff] %v10840_v50  ;;  %v10842_v15 = vpop.eup %8827  ;;  %8837 = vpow2.f32 %v1411_v26  ;;  %v14002_v26 = vld [vmem:[#allocation22_spill] sm:$0xff] }
 0x534   :  { %1523 = vperm.xlu0 %8642, %v10828_v30   ;;  %13994 = vst [vmem:[#allocation113_spill] sm:$0xff] %v10842_v15  ;;  %8839 = vpow2.f32 %v1413_v59  ;;  %v14003_v59 = vpack.i.bf16 %v14001_v35, %v14002_v26 }
 0x535   :  { %v10846_v27 = vpop.eup %8829 }
 0x536   :  { %13995 = vst [vmem:[#allocation112_spill] sm:$0xff] %v10846_v27  ;;  %v10848_v58 = vpop.eup %8831 }
 0x537   :  { %1484 = vperm.xlu1 %8641, %v10834_v53   ;;  %13996 = vst [vmem:[#allocation115_spill] sm:$0xff] %v10848_v58 }
 0x538   :  { %1487 = vperm.xlu0 %8642, %v10836_v17  }
 0x53b   :  { %1526 = vperm.xlu1 %8641, %v10840_v50   ;;  %v10852_v5 = vpop.eup %8833 }
 0x53c   :  { %1529 = vperm.xlu0 %8642, %v10842_v15   ;;  %13997 = vst [vmem:[#allocation114_spill] sm:$0xff] %v10852_v5  ;;  %v10854_v56 = vpop.eup %8835 }
 0x53d   :  { %13998 = vst [vmem:[#allocation118_spill] sm:$0xff] %v10854_v56  ;;  %v10858_v0 = vpop.eup %8837 }
 0x53e   :  { %13999 = vst [vmem:[#allocation119_spill] sm:$0xff] %v10858_v0  ;;  %v10860_v45 = vpop.eup %8839 }
 0x53f   :  { %1490 = vperm.xlu1 %8641, %v10846_v27   ;;  %14000 = vst [vmem:[#allocation120_spill] sm:$0xff] %v10860_v45 }
 0x540   :  { %1493 = vperm.xlu0 %8642, %v10848_v58  }
 0x543   :  { %1532 = vperm.xlu1 %8641, %v10852_v5  }
 0x544   :  { %1535 = vperm.xlu0 %8642, %v10854_v56  }
 0x547   :  { %1538 = vperm.xlu1 %8641, %v10858_v0  }
 0x548   :  { %1541 = vperm.xlu0 %8642, %v10860_v45  }
 0x54a   :  { %v10864_v25 = vpop.permute.xlu1 %1496 }
 0x54b   :  { %v10866_v51 = vpop.permute.xlu0 %1499  ;;  %8644 = vrot.lane.b32.xlu1 %v14003_v59, %s9188_s1  ;;  %v1618_v42 = vrot.slane %v10864_v25, %v10333_v54 }
 0x54c   :  { %v1622_v3 = vrot.slane %v10866_v51, %v10330_v46 }
 0x54e   :  { %v10872_v5 = vpop.permute.xlu1 %1502 }
 0x54f   :  { %v10874_v56 = vpop.permute.xlu0 %1505  ;;  %v1627_v16 = vrot.slane %v10872_v5, %v10333_v54 }
 0x550   :  { %v1631_v41 = vrot.slane %v10874_v56, %v10330_v46 }
 0x552   :  { %v10876_v27 = vpop.permute.xlu1 %1448 }
 0x553   :  { %v10878_v58 = vpop.permute.xlu0 %1451 }
 0x554   :  { %v1550_v56 = vrot.slane %v10878_v58, %v10330_v46 }
 0x556   :  { %v1455_v0 = vpop.permute.xlu1 %1454 }
 0x557   :  { %v1458_v50 = vpop.permute.xlu0 %1457  ;;  %v1555_v47 = vrot.slane %v1455_v0, %v10333_v54  ;;  %v1546_v0 = vrot.slane %v10876_v27, %v10333_v54 }
 0x558   :  { %v1559_v14 = vrot.slane %v1458_v50, %v10330_v46 }
 0x55a   :  { %v10880_v45 = vpop.permute.xlu1 %1460  ;;  %v1560_v51 = vsel %vm1071_vm5, %v1559_v14, %v1555_v47 }
 0x55b   :  { %v10882_v15 = vpop.permute.xlu0 %1463  ;;  %v1564_v14 = vrot.slane %v10880_v45, %v10333_v54 }
 0x55e   :  { %v10884_v53 = vpop.permute.xlu1 %1466 }
 0x55f   :  { %v10886_v17 = vpop.permute.xlu0 %3056 }
 0x562   :  { %v10888_v35 = vpop.permute.xlu1 %3053 }
 0x563   :  { %v3063_v26 = vpop.permute.xlu0 %3062  ;;  %v3175_v25 = vrot.slane %v10888_v35, %v10333_v54 }
 0x564   :  { %v3188_v12 = vrot.slane %v3063_v26, %v10330_v46  ;;  %v3179_v26 = vrot.slane %v10886_v17, %v10330_v46 }
 0x566   :  { %v3060_v59 = vpop.permute.xlu1 %3059 }
 0x567   :  { %v3069_v40 = vpop.permute.xlu0 %3068  ;;  %v3184_v28 = vrot.slane %v3060_v59, %v10333_v54 }
 0x568   :  { %v3197_v5 = vrot.slane %v3069_v40, %v10330_v46 }
 0x569   :  { %v3189_v35 = vsel %vm1071_vm5, %v3188_v12, %v3184_v28  ;;  %v1568_v12 = vrot.slane %v10882_v15, %v10330_v46  ;;  %v3180_v28 = vsel %vm1071_vm5, %v3179_v26, %v3175_v25  ;;  %v1623_v25 = vsel %vm1071_vm5, %v1622_v3, %v1618_v42 }
 0x56a   :  { %v3066_v30 = vpop.permute.xlu1 %3065  ;;  %v3251_v45 = vsel %vm1208_vm6, %v3189_v35, %v3180_v28  ;;  %v1551_v26 = vsel %vm1071_vm5, %v1550_v56, %v1546_v0 }
 0x56b   :  { %v10890_v37 = vpop.permute.xlu0 %3074  ;;  %v3193_v50 = vrot.slane %v3066_v30, %v10333_v54 }
 0x56d   :  { %v3198_v47 = vsel %vm1071_vm5, %v3197_v5, %v3193_v50 }
 0x56e   :  { %v3072_v19 = vpop.permute.xlu1 %3071 }
 0x56f   :  { %v10892_v38 = vpop.permute.xlu0 %3080  ;;  %v3202_v59 = vrot.slane %v3072_v19, %v10333_v54  ;;  %v3206_v19 = vrot.slane %v10890_v37, %v10330_v46 }
 0x571   :  { %v3207_v37 = vsel %vm1071_vm5, %v3206_v19, %v3202_v59  ;;  %v1632_v59 = vsel %vm1071_vm5, %v1631_v41, %v1627_v16  ;;  %v1569_v19 = vsel %vm1071_vm5, %v1568_v12, %v1564_v14 }
 0x572   :  { %v10894_v61 = vpop.permute.xlu1 %3077 }
 0x573   :  { %v10896_v32 = vpop.permute.xlu0 %3086  ;;  %v3211_v30 = vrot.slane %v10894_v61, %v10333_v54  ;;  %v3215_v61 = vrot.slane %v10892_v38, %v10330_v46 }
 0x575   :  { %v3216_v50 = vsel %vm1071_vm5, %v3215_v61, %v3211_v30 }
 0x576   :  { %v10898_v7 = vpop.permute.xlu1 %3083 }
 0x577   :  { %v10900_v8 = vpop.permute.xlu0 %3092  ;;  %v3220_v58 = vrot.slane %v10898_v7, %v10333_v54  ;;  %v3224_v7 = vrot.slane %v10896_v32, %v10330_v46  ;;  %v3252_v32 = vsel %vm1210_vm7, %v3198_v47, %v3251_v45 }
 0x578   :  { %v3233_v38 = vrot.slane %v10900_v8, %v10330_v46  ;;  %v3253_v30 = vsel %vm1212_vm8, %v3207_v37, %v3252_v32 }
 0x579   :  { %v3225_v5 = vsel %vm1071_vm5, %v3224_v7, %v3220_v58  ;;  %v3254_v42 = vsel %vm1214_vm9, %v3216_v50, %v3253_v30  ;;  %v1694_v7 = vsel %vm1208_vm6, %v1632_v59, %v1623_v25 }
 0x57a   :  { %v10902_v23 = vpop.permute.xlu1 %3089  ;;  %v3255_v58 = vsel %vm1216_vm10, %v3225_v5, %v3254_v42 }
 0x57b   :  { %v10904_v10 = vpop.permute.xlu0 %3098  ;;  %v3229_v40 = vrot.slane %v10902_v23, %v10333_v54 }
 0x57c   :  { %v3242_v8 = vrot.slane %v10904_v10, %v10330_v46 }
 0x57d   :  { %v3234_v35 = vsel %vm1071_vm5, %v3233_v38, %v3229_v40 }
 0x57e   :  { %v10906_v48 = vpop.permute.xlu1 %3095  ;;  %v3256_v47 = vsel %vm1218_vm11, %v3234_v35, %v3255_v58 }
 0x57f   :  { %v10908_v34 = vpop.permute.xlu0 %3005  ;;  %v3238_v23 = vrot.slane %v10906_v48, %v10333_v54  ;;  %v1687_v48 = vsel %vm1208_vm6, %v1560_v51, %v1551_v26  ;;  %v1573_v51 = vrot.slane %v10884_v53, %v10333_v54 }
 0x580   :  { %v1688_v45 = vsel %vm1210_vm7, %v1569_v19, %v1687_v48 }
 0x581   :  { %v3243_v10 = vsel %vm1071_vm5, %v3242_v8, %v3238_v23 }
 0x582   :  { %v10910_v63 = vpop.permute.xlu1 %3008 }
 0x583   :  { %v10912_v22 = vpop.permute.xlu0 %3014 }
 0x584   :  { %v3116_v14 = vrot.slane %v10912_v22, %v10330_v46 }
 0x586   :  { %v10914_v24 = vpop.permute.xlu1 %3011 }
 0x587   :  { %v10916_v31 = vpop.permute.xlu0 %3020  ;;  %v3112_v16 = vrot.slane %v10914_v24, %v10333_v54  ;;  %v3107_v24 = vrot.slane %v10910_v63, %v10330_v46 }
 0x589   :  { %v3117_v40 = vsel %vm1071_vm5, %v3116_v14, %v3112_v16 }
 0x58a   :  { %v10918_v18 = vpop.permute.xlu1 %3017 }
 0x58b   :  { %v10920_v57 = vpop.permute.xlu0 %3026  ;;  %v3121_v3 = vrot.slane %v10918_v18, %v10333_v54  ;;  %v3103_v18 = vrot.slane %v10908_v34, %v10333_v54  ;;  %v3257_v34 = vsel %vm1220_vm12, %v3243_v10, %v3256_v47 }
 0x58c   :  { %v3134_v50 = vrot.slane %v10920_v57, %v10330_v46  ;;  %v3263_v23 = vsel %vm593_vm2, %v3257_v34, 0.0 }
 0x58e   :  { %v10922_v29 = vpop.permute.xlu1 %3023 }
 0x58f   :  { %v10924_v11 = vpop.permute.xlu0 %3032  ;;  %v3130_v5 = vrot.slane %v10922_v29, %v10333_v54 }
 0x592   :  { %v10926_v43 = vpop.permute.xlu1 %3029 }
 0x593   :  { %v10928_v44 = vpop.permute.xlu0 %3038 }
 0x596   :  { %v10930_v60 = vpop.permute.xlu1 %3035 }
 0x597   :  { %v10932_v36 = vpop.permute.xlu0 %3044  ;;  %v3148_v14 = vrot.slane %v10930_v60, %v10333_v54 }
 0x598   :  { %v3161_v34 = vrot.slane %v10932_v36, %v10330_v46 }
 0x59a   :  { %v10934_v13 = vpop.permute.xlu1 %3041 }
 0x59b   :  { %v10936_v6 = vpop.permute.xlu0 %3050 }
 0x59e   :  { %v10938_v55 = vpop.permute.xlu1 %3047 }
 0x59f   :  { %v10940_v9 = vpop.permute.xlu0 %1469  ;;  %v3166_v60 = vrot.slane %v10938_v55, %v10333_v54  ;;  %v3170_v55 = vrot.slane %v10936_v6, %v10330_v46 }
 0x5a0   :  { %v1577_v0 = vrot.slane %v10940_v9, %v10330_v46  ;;  %v3125_v9 = vrot.slane %v10916_v31, %v10330_v46 }
 0x5a1   :  { %v3171_v6 = vsel %vm1071_vm5, %v3170_v55, %v3166_v60  ;;  %v14013_v60 = vld [vmem:[#allocation18_spill] sm:$0xff]  ;;  %v14017_v55 = vld [vmem:[#allocation81_spill] sm:$0xff] }
 0x5a2   :  { %v10942_v4 = vpop.permute.xlu1 %1508  ;;  %v3126_v28 = vsel %vm1071_vm5, %v3125_v9, %v3121_v3  ;;  %v1578_v31 = vsel %vm1071_vm5, %v1577_v0, %v1573_v51  ;;  %v3135_v9 = vsel %vm1071_vm5, %v3134_v50, %v3130_v5 }
 0x5a3   :  { %v10944_v20 = vpop.permute.xlu0 %1511  ;;  %v1689_v25 = vsel %vm1212_vm8, %v1578_v31, %v1688_v45  ;;  %v1636_v57 = vrot.slane %v10942_v4, %v10333_v54 }
 0x5a4   :  { %v1640_v30 = vrot.slane %v10944_v20, %v10330_v46  ;;  %v3139_v20 = vrot.slane %v10926_v43, %v10333_v54  ;;  %v3143_v43 = vrot.slane %v10924_v11, %v10330_v46  ;;  %v3152_v11 = vrot.slane %v10928_v44, %v10330_v46 }
 0x5a6   :  { %v10946_v39 = vpop.permute.xlu1 %1472  ;;  %v1641_v58 = vsel %vm1071_vm5, %v1640_v30, %v1636_v57 }
 0x5a7   :  { %v10948_v33 = vpop.permute.xlu0 %1475  ;;  %v1582_v53 = vrot.slane %v10946_v39, %v10333_v54 }
 0x5a8   :  { %v1586_v61 = vrot.slane %v10948_v33, %v10330_v46 }
 0x5aa   :  { %v10950_v49 = vpop.permute.xlu1 %1514  ;;  %v1587_v38 = vsel %vm1071_vm5, %v1586_v61, %v1582_v53  ;;  %v3157_v61 = vrot.slane %v10934_v13, %v10333_v54 }
 0x5ab   :  { %v10954_v21 = vpop.permute.xlu0 %1517  ;;  %v1690_v19 = vsel %vm1214_vm9, %v1587_v38, %v1689_v25  ;;  %v1645_v42 = vrot.slane %v10950_v49, %v10333_v54 }
 0x5ac   :  { %v1649_v29 = vrot.slane %v10954_v21, %v10330_v46  ;;  %v3162_v36 = vsel %vm1071_vm5, %v3161_v34, %v3157_v61  ;;  %v14015_v34 = vld [vmem:[#allocation82_spill] sm:$0xff] }
 0x5ae   :  { %v10972_v2 = vpop.permute.xlu1 %1478 }
 0x5af   :  { %v10980_v27 = vpop.permute.xlu0 %1481  ;;  %v1591_v63 = vrot.slane %v10972_v2, %v10333_v54 }
 0x5b0   :  { %v1595_v22 = vrot.slane %v10980_v27, %v10330_v46  ;;  %v3108_v27 = vsel %vm1071_vm5, %v3107_v24, %v3103_v18  ;;  %v1650_v24 = vsel %vm1071_vm5, %v1649_v29, %v1645_v42 }
 0x5b1   :  { %v3244_v2 = vsel %vm1208_vm6, %v3117_v40, %v3108_v27  ;;  %v3144_v40 = vsel %vm1071_vm5, %v3143_v43, %v3139_v20 }
 0x5b2   :  { %v11002_v17 = vpop.permute.xlu1 %1520  ;;  %v3245_v32 = vsel %vm1210_vm7, %v3126_v28, %v3244_v2  ;;  %v1596_v59 = vsel %vm1071_vm5, %v1595_v22, %v1591_v63  ;;  %v1695_v22 = vsel %vm1210_vm7, %v1641_v58, %v1694_v7  ;;  %v14008_v58 = vld [vmem:[#allocation77_spill] sm:$0xff] }
 0x5b3   :  { %v11010_v15 = vpop.permute.xlu0 %1523  ;;  %v1691_v3 = vsel %vm1216_vm10, %v1596_v59, %v1690_v19  ;;  %v1696_v44 = vsel %vm1212_vm8, %v1650_v24, %v1695_v22  ;;  %v3246_v7 = vsel %vm1212_vm8, %v3135_v9, %v3245_v32  ;;  %v14010_v24 = vld [vmem:[#allocation17_spill] sm:$0xff] }
 0x5b4   :  { %v1658_v4 = vrot.slane %v11010_v15, %v10330_v46  ;;  %v3247_v27 = vsel %vm1214_vm9, %v3144_v40, %v3246_v7 }
 0x5b6   :  { %v1485_v41 = vpop.permute.xlu1 %1484 }
 0x5b7   :  { %v1488_v56 = vpop.permute.xlu0 %1487  ;;  %v1600_v37 = vrot.slane %v1485_v41, %v10333_v54  ;;  %v1654_v41 = vrot.slane %v11002_v17, %v10333_v54 }
 0x5b8   :  { %v1604_v33 = vrot.slane %v1488_v56, %v10330_v46 }
 0x5b9   :  { %v1659_v53 = vsel %vm1071_vm5, %v1658_v4, %v1654_v41  ;;  %v14004_v4 = vld [vmem:[#allocation15_spill] sm:$0xff] }
 0x5ba   :  { %v1527_v12 = vpop.permute.xlu1 %1526  ;;  %v1605_v8 = vsel %vm1071_vm5, %v1604_v33, %v1600_v37  ;;  %v3153_v33 = vsel %vm1071_vm5, %v3152_v11, %v3148_v14  ;;  %v1697_v37 = vsel %vm1214_vm9, %v1659_v53, %v1696_v44  ;;  %v14012_v11 = vld [vmem:[#allocation88_spill] sm:$0xff] }
 0x5bb   :  { %v1530_v39 = vpop.permute.xlu0 %1529  ;;  %v1663_v21 = vrot.slane %v1527_v12, %v10333_v54  ;;  %v1692_v10 = vsel %vm1218_vm11, %v1605_v8, %v1691_v3  ;;  %v3248_v32 = vsel %vm1216_vm10, %v3153_v33, %v3247_v27  ;;  %v14005_v3 = vld [vmem:[#allocation65_spill] sm:$0xff] }
 0x5bc   :  { %v1667_v0 = vrot.slane %v1530_v39, %v10330_v46  ;;  %v14019_v27 = vld [vmem:[#allocation93_spill] sm:$0xff] }
 0x5be   :  { %v1491_v26 = vpop.permute.xlu1 %1490  ;;  %v1668_v63 = vsel %vm1071_vm5, %v1667_v0, %v1663_v21  ;;  %v14006_v21 = vld [vmem:[#allocation62_spill] sm:$0xff] }
 0x5bf   :  { %v1494_v35 = vpop.permute.xlu0 %1493  ;;  %v1609_v48 = vrot.slane %v1491_v26, %v10333_v54  ;;  %v1698_v45 = vsel %vm1216_vm10, %v1668_v63, %v1697_v37  ;;  %v14014_v63 = vld [vmem:[#allocation91_spill] sm:$0xff] }
 0x5c0   :  { %v1613_v16 = vrot.slane %v1494_v35, %v10330_v46 }
 0x5c2   :  { %v1533_v56 = vpop.permute.xlu1 %1532  ;;  %v1614_v49 = vsel %vm1071_vm5, %v1613_v16, %v1609_v48 }
 0x5c3   :  { %v1536_v15 = vpop.permute.xlu0 %1535  ;;  %v1672_v51 = vrot.slane %v1533_v56, %v10333_v54  ;;  %v1693_v17 = vsel %vm1220_vm12, %v1614_v49, %v1692_v10  ;;  %v14007_v10 = vld [vmem:[#allocation16_spill] sm:$0xff] }
 0x5c4   :  { %v1676_v47 = vrot.slane %v1536_v15, %v10330_v46  ;;  %v1703_v18 = vsel %vm593_vm2, %v1693_v17, 0.0 }
 0x5c5   :  { %1704 = vadd.xlane.f32.xlu0 %v1703_v18  ;;  %v14011_v18 = vld [vmem:[#allocation79_spill] sm:$0xff] }
 0x5c6   :  { %v1539_v12 = vpop.permute.xlu1 %1538  ;;  %v1677_v13 = vsel %vm1071_vm5, %v1676_v47, %v1672_v51  ;;  %v14009_v51 = vld [vmem:[#allocation80_spill] sm:$0xff] }
 0x5c7   :  { %v1542_v28 = vpop.permute.xlu0 %1541  ;;  %v1681_v31 = vrot.slane %v1539_v12, %v10333_v54  ;;  %v1699_v38 = vsel %vm1218_vm11, %v1677_v13, %v1698_v45 }
 0x5c8   :  { %v1685_v39 = vrot.slane %v1542_v28, %v10330_v46  ;;  %v14016_v28 = vld [vmem:[#allocation19_spill] sm:$0xff] }
 0x5c9   :  { %3264 = vadd.xlane.f32.xlu0 %v3263_v23  ;;  %v3249_v23 = vsel %vm1218_vm11, %v3162_v36, %v3248_v32  ;;  %v14022_v32 = vld [vmem:[#allocation100_spill] sm:$0xff] }
 0x5ca   :  { %v8645_v2 = vpop.permute.xlu1 %8644  ;;  %v1686_v50 = vsel %vm1071_vm5, %v1685_v39, %v1681_v31  ;;  %v3250_v57 = vsel %vm1220_vm12, %v3171_v6, %v3249_v23  ;;  %v14018_v39 = vld [vmem:[#allocation90_spill] sm:$0xff] }
 0x5cb   :  { %v8647_v5 = vunpack.i.h.bf16 %v8645_v2  ;;  %v8646_v25 = vunpack.i.l.bf16 %v8645_v2  ;;  %v1700_v59 = vsel %vm1220_vm12, %v1686_v50, %v1699_v38  ;;  %v3260_v8 = vsel %vm593_vm2, %v3250_v57, 0.0  ;;  %v14020_v50 = vld [vmem:[#allocation92_spill] sm:$0xff]  ;;  %v14023_v57 = vld [vmem:[#allocation102_spill] sm:$0xff] }
 0x5cc   :  { %v1706_v26 = vsel %vm593_vm2, %v1700_v59, 0.0 }
 0x5cd   :  { %1707 = vadd.xlane.f32.xlu1 %v1706_v26  ;;  %v8549_v30 = vpack.c.bf16 %v8647_v5, %v8646_v25  ;;  %v14021_v25 = vld [vmem:[#allocation95_spill] sm:$0xff] }
 0x5cf   :  { %8550 = vmatprep.subr.bf16.mxu1 %v8549_v30 }
 0x5d0   :  { %8552 = vmatpush3.bf16.msra.mxu1 %v8549_v30 }
 0x5d1   :  { %3261 = vadd.xlane.f32.xlu1 %v3260_v8 }
 0x652   :  { %v11137_v35 = vpop.xlane.xlu0 %1704 }
 0x653   :  { %v1714_v48 = vrot.slane %v11137_v35, %v13868_v52 }
 0x655   :  { %8841 = vrcp.f32 %v1714_v48  ;;  %v14024_v48 = vld [vmem:[#allocation76_spill] sm:$0xff] }
 0x656   :  { %v3265_v19 = vpop.xlane.xlu0 %3264 }
 0x657   :  { %v3303_v29 = vrot.slane %v3265_v19, %v13868_v52  ;;  %v3307_v42 = vrot.slane %v3265_v19, %v13869_v62  ;;  %v3311_v16 = vrot.slane %v3265_v19, %v13873_v1  ;;  %v3315_v41 = vrot.slane %v3265_v19, %v14004_v4 }
 0x658   :  { %v3319_v43 = vrot.slane %v3265_v19, %v14007_v10  ;;  %v3323_v47 = vrot.slane %v3265_v19, %v14010_v24  ;;  %v3327_v22 = vrot.slane %v3265_v19, %v14013_v60  ;;  %v3331_v31 = vrot.slane %v3265_v19, %v14016_v28 }
 0x659   :  { %8843 = vrcp.f32 %v3303_v29 }
 0x65a   :  { %8845 = vrcp.f32 %v3307_v42  ;;  %v11153_v40 = vpop.xlane.xlu1 %1707 }
 0x65b   :  { %8847 = vrcp.f32 %v3311_v16  ;;  %v14025_v16 = vld [vmem:[#allocation75_spill] sm:$0xff] }
 0x65c   :  { %8849 = vrcp.f32 %v3315_v41  ;;  %v14026_v41 = vld [vmem:[#allocation84_spill] sm:$0xff] }
 0x65d   :  { %8851 = vrcp.f32 %v3319_v43  ;;  %v14028_v43 = vld [vmem:[#allocation83_spill] sm:$0xff] }
 0x65e   :  { %8853 = vrcp.f32 %v3323_v47  ;;  %v3262_v33 = vpop.xlane.xlu1 %3261  ;;  %v14030_v47 = vld [vmem:[#allocation85_spill] sm:$0xff] }
 0x65f   :  { %v8842_v20 = vpop.eup %8841  ;;  %8855 = vrcp.f32 %v3327_v22  ;;  %v3271_v45 = vrot.slane %v3262_v33, %v13868_v52  ;;  %v3275_v5 = vrot.slane %v3262_v33, %v13869_v62  ;;  %v3279_v30 = vrot.slane %v3262_v33, %v13873_v1  ;;  %v14032_v22 = vld [vmem:[#allocation97_spill] sm:$0xff] }
 0x660   :  { %v1792_v0 = vmul.f32 %v8842_v20, %v14005_v3  ;;  %v1793_v56 = vmul.f32 %v8842_v20, %v14006_v21  ;;  %8857 = vrcp.f32 %v3331_v31  ;;  %v3283_v42 = vrot.slane %v3262_v33, %v14004_v4  ;;  %v14034_v31 = vld [vmem:[#allocation89_spill] sm:$0xff] }
 0x661   :  { %8859 = vrcp.f32 %v3271_v45  ;;  %v3287_v21 = vrot.slane %v3262_v33, %v14007_v10  ;;  %v14036_v45 = vld [vmem:[#allocation99_spill] sm:$0xff] }
 0x662   :  { %1872 = vperm.xlu0 %8642, %v1792_v0   ;;  %1875 = vperm.xlu1 %8641, %v1793_v56   ;;  %8861 = vrcp.f32 %v3275_v5  ;;  %v14027_v56 = vld [vmem:[#allocation87_spill] sm:$0xff] }
 0x663   :  { %v8844_v49 = vpop.eup %8843  ;;  %8863 = vrcp.f32 %v3279_v30 }
 0x664   :  { %v3374_v15 = vmul.f32 %v8844_v49, %v14008_v58  ;;  %v3373_v17 = vmul.f32 %v8844_v49, %v14009_v51  ;;  %v8846_v14 = vpop.eup %8845  ;;  %8865 = vrcp.f32 %v3283_v42  ;;  %v3291_v51 = vrot.slane %v3262_v33, %v14010_v24 }
 0x665   :  { %v3377_v9 = vmul.f32 %v8846_v14, %v14011_v18  ;;  %v3376_v61 = vmul.f32 %v8846_v14, %v14012_v11  ;;  %v8848_v53 = vpop.eup %8847  ;;  %8867 = vrcp.f32 %v3287_v21  ;;  %v3295_v11 = vrot.slane %v3262_v33, %v14013_v60 }
 0x666   :  { %3480 = vperm.xlu0 %8642, %v3374_v15   ;;  %3477 = vperm.xlu1 %8641, %v3373_v17   ;;  %v3380_v12 = vmul.f32 %v8848_v53, %v14014_v63  ;;  %v3379_v44 = vmul.f32 %v8848_v53, %v14015_v34  ;;  %v8850_v13 = vpop.eup %8849  ;;  %v14029_v17 = vld [vmem:[#allocation94_spill] sm:$0xff]  ;;  %8869 = vrcp.f32 %v3291_v51  ;;  %v3299_v34 = vrot.slane %v3262_v33, %v14016_v28 }
 0x667   :  { %v3383_v37 = vmul.f32 %v8850_v13, %v14017_v55  ;;  %v3382_v7 = vmul.f32 %v8850_v13, %v14018_v39  ;;  %v8852_v36 = vpop.eup %8851  ;;  %8871 = vrcp.f32 %v3295_v11  ;;  %v1718_v39 = vrot.slane %v11137_v35, %v13869_v62 }
 0x668   :  { %v3386_v2 = vmul.f32 %v8852_v36, %v14019_v27  ;;  %v3385_v38 = vmul.f32 %v8852_v36, %v14020_v50  ;;  %v8854_v6 = vpop.eup %8853  ;;  %8873 = vrcp.f32 %v3299_v34  ;;  %v1722_v33 = vrot.slane %v11137_v35, %v13873_v1  ;;  %v14037_v50 = vld [vmem:[#allocation103_spill] sm:$0xff] }
 0x669   :  { %v3389_v59 = vmul.f32 %v8854_v6, %v14021_v25  ;;  %v3388_v26 = vmul.f32 %v8854_v6, %v14022_v32  ;;  %v8856_v23 = vpop.eup %8855  ;;  %8875 = vrcp.f32 %v1718_v39  ;;  %v14038_v6 = vld [vmem:[#allocation101_spill] sm:$0xff] }
 0x66a   :  { %3486 = vperm.xlu0 %8642, %v3377_v9   ;;  %3483 = vperm.xlu1 %8641, %v3376_v61   ;;  %v3392_v8 = vmul.f32 %v8856_v23, %v14023_v57  ;;  %v3391_v19 = vmul.f32 %v8856_v23, %v14024_v48  ;;  %v8858_v29 = vpop.eup %8857  ;;  %v14031_v61 = vld [vmem:[#allocation86_spill] sm:$0xff]  ;;  %8877 = vrcp.f32 %v1722_v33  ;;  %v14039_v32 = vld [vmem:[#allocation73_spill] sm:$0xff]  ;;  %v14041_v48 = vld [vmem:[#allocation63_spill] sm:$0xff] }
 0x66b   :  { %v3395_v20 = vmul.f32 %v8858_v29, %v14025_v16  ;;  %v3394_v3 = vmul.f32 %v8858_v29, %v14026_v41  ;;  %v8860_v0 = vpop.eup %8859  ;;  %v14040_v23 = vld [vmem:[#allocation105_spill] sm:$0xff]  ;;  %v14042_v29 = vld [vmem:[#allocation26_spill] sm:$0xff]  ;;  %v14043_v41 = vld [vmem:[#allocation68_spill] sm:$0xff] }
 0x66c   :  { %v3350_v49 = vmul.f32 %v8860_v0, %v14027_v56  ;;  %v3349_v58 = vmul.f32 %v8860_v0, %v14028_v43  ;;  %v8862_v15 = vpop.eup %8861  ;;  %v14044_v0 = vld [vmem:[#allocation67_spill] sm:$0xff]  ;;  %v14045_v43 = vld [vmem:[#allocation72_spill] sm:$0xff] }
 0x66d   :  { %v3352_v14 = vmul.f32 %v8862_v15, %v14029_v17  ;;  %v3353_v18 = vmul.f32 %v8862_v15, %v14030_v47  ;;  %v8864_v9 = vpop.eup %8863  ;;  %v14046_v15 = vld [vmem:[#allocation74_spill] sm:$0xff]  ;;  %v14047_v47 = vld [vmem:[#allocation25_spill] sm:$0xff] }
 0x66e   :  { %3492 = vperm.xlu0 %8642, %v3380_v12   ;;  %3489 = vperm.xlu1 %8641, %v3379_v44   ;;  %v3355_v53 = vmul.f32 %v8864_v9, %v14031_v61  ;;  %v3356_v63 = vmul.f32 %v8864_v9, %v14032_v22  ;;  %v8866_v12 = vpop.eup %8865  ;;  %v14033_v44 = vld [vmem:[#allocation96_spill] sm:$0xff]  ;;  %v14048_v9 = vld [vmem:[#allocation61_spill] sm:$0xff] }
 0x66f   :  { %v3358_v13 = vmul.f32 %v8866_v12, %v14033_v44  ;;  %v3359_v55 = vmul.f32 %v8866_v12, %v14034_v31  ;;  %v14049_v22 = vld [vmem:[#allocation60_spill] sm:$0xff]  ;;  %v14050_v12 = vld [vmem:[#allocation59_spill] sm:$0xff] }
 0x670   :  { %v14051_v31 = vld [vmem:[#allocation64_spill] sm:$0xff] }
 0x672   :  { %3498 = vperm.xlu0 %8642, %v3383_v37   ;;  %3495 = vperm.xlu1 %8641, %v3382_v7   ;;  %v8868_v37 = vpop.eup %8867  ;;  %v14035_v7 = vld [vmem:[#allocation98_spill] sm:$0xff] }
 0x673   :  { %v3361_v36 = vmul.f32 %v8868_v37, %v14035_v7  ;;  %v3362_v27 = vmul.f32 %v8868_v37, %v14036_v45  ;;  %v14052_v37 = vld [vmem:[#allocation78_spill] sm:$0xff] }
 0x674   :  { %v14053_v45 = vld [vmem:[#allocation66_spill] sm:$0xff] }
 0x676   :  { %3504 = vperm.xlu0 %8642, %v3386_v2   ;;  %3501 = vperm.xlu1 %8641, %v3385_v38   ;;  %v8870_v2 = vpop.eup %8869 }
 0x677   :  { %v3364_v38 = vmul.f32 %v8870_v2, %v14037_v50  ;;  %v3365_v5 = vmul.f32 %v8870_v2, %v14038_v6  ;;  %v8872_v25 = vpop.eup %8871  ;;  %v14054_v2 = vld [vmem:[#allocation69_spill] sm:$0xff]  ;;  %v14055_v6 = vld [vmem:[#allocation70_spill] sm:$0xff] }
 0x678   :  { %v3368_v30 = vmul.f32 %v8872_v25, %v14040_v23  ;;  %v8874_v57 = vpop.eup %8873  ;;  %v14057_v23 = vld [vmem:[#allocation24_spill] sm:$0xff] }
 0x679   :  { %v3371_v42 = vmul.f32 %v8874_v57, %v14042_v29  ;;  %v8876_v16 = vpop.eup %8875  ;;  %v14059_v29 = vld [vmem:[#allocation107_spill] sm:$0xff] }
 0x67a   :  { %3510 = vperm.xlu0 %8642, %v3389_v59   ;;  %3507 = vperm.xlu1 %8641, %v3388_v26   ;;  %v1746_v59 = vrot.slane %v11153_v40, %v13868_v52  ;;  %v3367_v26 = vmul.f32 %v8872_v25, %v14039_v32  ;;  %v1795_v21 = vmul.f32 %v8876_v16, %v14044_v0  ;;  %v8878_v56 = vpop.eup %8877  ;;  %v14056_v25 = vld [vmem:[#allocation71_spill] sm:$0xff]  ;;  %v14061_v0 = vld [vmem:[#allocation109_spill] sm:$0xff] }
 0x67b   :  { %v1798_v51 = vmul.f32 %v8878_v56, %v14046_v15 }
 0x67c   :  { %8879 = vrcp.f32 %v1746_v59 }
 0x67e   :  { %3516 = vperm.xlu0 %8642, %v3392_v8   ;;  %3513 = vperm.xlu1 %8641, %v3391_v19   ;;  %v1750_v8 = vrot.slane %v11153_v40, %v13869_v62  ;;  %v3370_v19 = vmul.f32 %v8874_v57, %v14041_v48  ;;  %v14058_v57 = vld [vmem:[#allocation104_spill] sm:$0xff] }
 0x680   :  { %8881 = vrcp.f32 %v1750_v8 }
 0x682   :  { %3522 = vperm.xlu0 %8642, %v3395_v20   ;;  %3519 = vperm.xlu1 %8641, %v3394_v3   ;;  %v1726_v20 = vrot.slane %v11137_v35, %v14004_v4  ;;  %v1796_v3 = vmul.f32 %v8876_v16, %v14043_v41  ;;  %v14060_v16 = vld [vmem:[#allocation23_spill] sm:$0xff] }
 0x684   :  { %8883 = vrcp.f32 %v1726_v20 }
 0x686   :  { %3432 = vperm.xlu1 %8641, %v3350_v49   ;;  %3429 = vperm.xlu0 %8642, %v3349_v58   ;;  %v1754_v49 = vrot.slane %v11153_v40, %v13873_v1  ;;  %v1799_v58 = vmul.f32 %v8878_v56, %v14045_v43  ;;  %v8880_v17 = vpop.eup %8879  ;;  %v14062_v56 = vld [vmem:[#allocation106_spill] sm:$0xff] }
 0x687   :  { %v1816_v11 = vmul.f32 %v8880_v17, %v14048_v9  ;;  %v14066_v9 = vld [vmem:[#allocation110_spill] sm:$0xff] }
 0x688   :  { %8885 = vrcp.f32 %v1754_v49 }
 0x68a   :  { %3435 = vperm.xlu1 %8641, %v3352_v14   ;;  %3438 = vperm.xlu0 %8642, %v3353_v18   ;;  %v1730_v14 = vrot.slane %v11137_v35, %v14007_v10  ;;  %v1817_v18 = vmul.f32 %v8880_v17, %v14047_v47  ;;  %v8882_v61 = vpop.eup %8881  ;;  %v14065_v47 = vld [vmem:[#allocation113_spill] sm:$0xff] }
 0x68b   :  { %v1819_v34 = vmul.f32 %v8882_v61, %v14050_v12 }
 0x68c   :  { %8887 = vrcp.f32 %v1730_v14 }
 0x68e   :  { %3441 = vperm.xlu1 %8641, %v3355_v53   ;;  %3444 = vperm.xlu0 %8642, %v3356_v63   ;;  %v1758_v53 = vrot.slane %v11153_v40, %v14004_v4  ;;  %v1820_v63 = vmul.f32 %v8882_v61, %v14049_v22  ;;  %v8884_v44 = vpop.eup %8883 }
 0x68f   :  { %v1801_v39 = vmul.f32 %v8884_v44, %v14052_v37  ;;  %v14071_v37 = vld [vmem:[#allocation120_spill] sm:$0xff] }
 0x690   :  { %8889 = vrcp.f32 %v1758_v53  ;;  %v14067_v53 = vld [vmem:[#allocation115_spill] sm:$0xff] }
 0x692   :  { %3447 = vperm.xlu1 %8641, %v3358_v13   ;;  %3450 = vperm.xlu0 %8642, %v3359_v55   ;;  %v1734_v13 = vrot.slane %v11137_v35, %v14010_v24  ;;  %v1802_v55 = vmul.f32 %v8884_v44, %v14051_v31  ;;  %v8886_v7 = vpop.eup %8885 }
 0x693   :  { %v1822_v33 = vmul.f32 %v8886_v7, %v14054_v2 }
 0x694   :  { %8891 = vrcp.f32 %v1734_v13  ;;  %v14070_v13 = vld [vmem:[#allocation114_spill] sm:$0xff] }
 0x696   :  { %3453 = vperm.xlu1 %8641, %v3361_v36   ;;  %3456 = vperm.xlu0 %8642, %v3362_v27   ;;  %v1762_v36 = vrot.slane %v11153_v40, %v14007_v10  ;;  %v1823_v27 = vmul.f32 %v8886_v7, %v14053_v45  ;;  %v8888_v50 = vpop.eup %8887  ;;  %v14072_v7 = vld [vmem:[#allocation119_spill] sm:$0xff]  ;;  %v11256_v45 = vld [vmem:[%s13420_s2] sm:$0x3]  ;;  %s9191_s2 = smov 96  }
 0x697   :  { %v1804_v59 = vmul.f32 %v8888_v50, %v14056_v25 }
 0x698   :  { %8893 = vrcp.f32 %v1762_v36 }
 0x69a   :  { %3459 = vperm.xlu1 %8641, %v3364_v38   ;;  %3462 = vperm.xlu0 %8642, %v3365_v5   ;;  %v1738_v38 = vrot.slane %v11137_v35, %v14013_v60  ;;  %v1805_v5 = vmul.f32 %v8888_v50, %v14055_v6  ;;  %v8890_v32 = vpop.eup %8889 }
 0x69b   :  { %v1825_v8 = vmul.f32 %v8890_v32, %v14058_v57  ;;  %v11280_v57 = vld [vmem:[#allocation2 + $0x18] sm:$0xff] }
 0x69c   :  { %8895 = vrcp.f32 %v1738_v38  ;;  %v67_v38 = vrot.slane %v11256_v45, %v13868_v52  ;;  %8451 = vmatprep.subr.mxu0 %v11280_v57 }
 0x69e   :  { %3465 = vperm.xlu1 %8641, %v3367_v26   ;;  %3468 = vperm.xlu0 %8642, %v3368_v30   ;;  %v1766_v26 = vrot.slane %v11153_v40, %v14010_v24  ;;  %v1826_v30 = vmul.f32 %v8890_v32, %v14057_v23  ;;  %v8892_v48 = vpop.eup %8891  ;;  %v9097_v32 = vld [vmem:[#allocation2 + $0x8] sm:$0xff] }
 0x69f   :  { %v1807_v20 = vmul.f32 %v8892_v48, %v14060_v16  ;;  %v58_v16 = vld [vmem:[#allocation2 + $0x30] sm:$0xff] }
 0x6a0   :  { %8897 = vrcp.f32 %v1766_v26  ;;  %v9098_v26 = vld [vmem:[#allocation2] sm:$0xff] }
 0x6a1   :  { %v8648_v23 = vpack.i.bf16 %v9097_v32, %v9098_v26 }
 0x6a2   :  { %3471 = vperm.xlu1 %8641, %v3370_v19   ;;  %3474 = vperm.xlu0 %8642, %v3371_v42   ;;  %v1742_v19 = vrot.slane %v11137_v35, %v14016_v28  ;;  %v1808_v42 = vmul.f32 %v8892_v48, %v14059_v29  ;;  %v8894_v41 = vpop.eup %8893  ;;  %v1774_v35 = vrot.slane %v11153_v40, %v14016_v28  ;;  %v11285_v29 = vld [vmem:[#allocation2 + $0x20] sm:$0xff] }
 0x6a3   :  { %v1828_v49 = vmul.f32 %v8894_v41, %v14062_v56  ;;  %v11290_v56 = vld [vmem:[#allocation2 + $0x3b] sm:$0x3] }
 0x6a4   :  { %8899 = vrcp.f32 %v1742_v19 }
 0x6a6   :  { %1881 = vperm.xlu1 %8641, %v1796_v3   ;;  %1878 = vperm.xlu0 %8642, %v1795_v21   ;;  %v1770_v3 = vrot.slane %v11153_v40, %v14013_v60  ;;  %v1829_v21 = vmul.f32 %v8894_v41, %v14061_v0  ;;  %v8896_v43 = vpop.eup %8895 }
 0x6a8   :  { %8901 = vrcp.f32 %v1770_v3 }
 0x6a9   :  { %8903 = vrcp.f32 %v1774_v35 }
 0x6aa   :  { %1887 = vperm.xlu1 %8641, %v1799_v58   ;;  %1884 = vperm.xlu0 %8642, %v1798_v51   ;;  %v14063_v58 = vld [vmem:[#allocation111_spill] sm:$0xff]  ;;  %v14064_v51 = vld [vmem:[#allocation108_spill] sm:$0xff]  ;;  %v8898_v14 = vpop.eup %8897 }
 0x6ab   :  { %v1811_v15 = vmul.f32 %v8896_v43, %v14063_v58  ;;  %v1810_v17 = vmul.f32 %v8896_v43, %v14064_v51 }
 0x6ae   :  { %1923 = vperm.xlu1 %8641, %v1817_v18   ;;  %1920 = vperm.xlu0 %8642, %v1816_v11   ;;  %v1832_v18 = vmul.f32 %v8898_v14, %v14065_v47  ;;  %v1831_v11 = vmul.f32 %v8898_v14, %v14066_v9  ;;  %v8900_v61 = vpop.eup %8899 }
 0x6af   :  { %v1814_v22 = vmul.f32 %v8900_v61, %v14067_v53 }
 0x6b2   :  { %1929 = vperm.xlu1 %8641, %v1820_v63   ;;  %1926 = vperm.xlu0 %8642, %v1819_v34   ;;  %v14068_v63 = vld [vmem:[#allocation112_spill] sm:$0xff]  ;;  %v8902_v40 = vpop.eup %8901  ;;  %v14069_v34 = vld [vmem:[#allocation118_spill] sm:$0xff] }
 0x6b3   :  { %v1813_v12 = vmul.f32 %v8900_v61, %v14068_v63  ;;  %v1835_v44 = vmul.f32 %v8902_v40, %v14069_v34  ;;  %v1834_v31 = vmul.f32 %v8902_v40, %v14070_v13 }
 0x6b6   :  { %1893 = vperm.xlu1 %8641, %v1802_v55   ;;  %1890 = vperm.xlu0 %8642, %v1801_v39   ;;  %v8904_v55 = vpop.eup %8903 }
 0x6b7   :  { %v1838_v39 = vmul.f32 %v8904_v55, %v14071_v37  ;;  %v1837_v36 = vmul.f32 %v8904_v55, %v14072_v7 }
 0x6ba   :  { %1935 = vperm.xlu1 %8641, %v1823_v27   ;;  %1932 = vperm.xlu0 %8642, %v1822_v33   ;;  %v14073_v27 = vld [vmem:[#allocation11_spill] sm:$0xff] }
 0x6bb   :  { %v11259_v2 = vadd.s32 8, %v14073_v27  ;;  %vm68_vm13 = vcmp.eq.s32.totalorder %v14073_v27, %v67_v38 }
 0x6bd   :  { %vm69_vm14 = vcmp.eq.s32.totalorder %v11259_v2, %v67_v38 }
 0x6be   :  { %1899 = vperm.xlu1 %8641, %v1805_v5   ;;  %1896 = vperm.xlu0 %8642, %v1804_v59   ;;  %vm11269_vm15 = vmpackc.low %vm69_vm14, %vm68_vm13  ;;  %v9190_v59 = vmov 1.0|1.0  }
 0x6bf   :  { %8554 = vmatprep.subr.msk.bf16.mxu1 %vm11269_vm15, %v9190_v59 }
 0x6c2   :  { %1941 = vperm.xlu1 %8641, %v1826_v30   ;;  %1938 = vperm.xlu0 %8642, %v1825_v8   ;;  %v11278_v30 = vld [vmem:[#allocation2 + $0x10] sm:$0xff] }
 0x6c3   :  { %v8653_v8 = vpack.i.bf16 %v11280_v57, %v11278_v30 }
 0x6c6   :  { %1905 = vperm.xlu1 %8641, %v1808_v42   ;;  %1902 = vperm.xlu0 %8642, %v1807_v20   ;;  %v57_v42 = vld [vmem:[#allocation2 + $0x28] sm:$0xff]  ;;  %v59_v20 = vld [vmem:[#allocation2 + $0x38] sm:$0xff] }
 0x6c7   :  { %v8668_v41 = vpack.i.bf16 %v57_v42, %v11285_v29 }
 0x6ca   :  { %1947 = vperm.xlu1 %8641, %v1829_v21   ;;  %1944 = vperm.xlu0 %8642, %v1828_v49   ;;  %v8673_v21 = vpack.i.bf16 %v59_v20, %v58_v16  ;;  %v6151_v49 = vrot.slane %v11290_v56, %v13869_v62 }
 0x6ce   :  { %1911 = vperm.xlu1 %8641, %v1811_v15   ;;  %1908 = vperm.xlu0 %8642, %v1810_v17  }
 0x6d2   :  { %1953 = vperm.xlu1 %8641, %v1832_v18   ;;  %1950 = vperm.xlu0 %8642, %v1831_v11  }
 0x6d6   :  { %1917 = vperm.xlu1 %8641, %v1814_v22   ;;  %1914 = vperm.xlu0 %8642, %v1813_v12  }
 0x6da   :  { %1959 = vperm.xlu1 %8641, %v1835_v44   ;;  %1956 = vperm.xlu0 %8642, %v1834_v31  }
 0x6de   :  { %1965 = vperm.xlu1 %8641, %v1838_v39   ;;  %1962 = vperm.xlu0 %8642, %v1837_v36  }
 0x6e1   :  { %v11261_v33 = vpop.permute.xlu0 %1872  ;;  %v11263_v50 = vpop.permute.xlu1 %1875 }
 0x6e2   :  { %8649 = vrot.lane.b32.xlu0 %v8648_v23, %s9191_s2  ;;  %8654 = vrot.lane.b32.xlu1 %v8653_v8, %s9191_s2 }
 0x6e5   :  { %v11273_v5 = vpop.permute.xlu0 %3480  ;;  %v3478_v25 = vpop.permute.xlu1 %3477 }
 0x6e6   :  { %8659 = vrot.lane.b32.xlu0 %v8648_v23, %s9192_s17  ;;  %8664 = vrot.lane.b32.xlu1 %v8653_v8, %s9192_s17  ;;  %v3603_v31 = vrot.slane %v11273_v5, %v10330_v46  ;;  %v3599_v55 = vrot.slane %v3478_v25, %v10333_v54 }
 0x6e8   :  { %v3604_v23 = vsel %vm1071_vm5, %v3603_v31, %v3599_v55 }
 0x6e9   :  { %v3487_v48 = vpop.permute.xlu0 %3486  ;;  %v3484_v19 = vpop.permute.xlu1 %3483 }
 0x6ea   :  { %8669 = vrot.lane.b32.xlu0 %v8668_v41, %s9191_s2  ;;  %8674 = vrot.lane.b32.xlu1 %v8673_v21, %s9191_s2  ;;  %v3612_v40 = vrot.slane %v3487_v48, %v10330_v46  ;;  %v3608_v34 = vrot.slane %v3484_v19, %v10333_v54 }
 0x6ec   :  { %v3613_v37 = vsel %vm1071_vm5, %v3612_v40, %v3608_v34 }
 0x6ed   :  { %v3493_v3 = vpop.permute.xlu0 %3492  ;;  %v3490_v0 = vpop.permute.xlu1 %3489  ;;  %v3675_v8 = vsel %vm1208_vm6, %v3613_v37, %v3604_v23 }
 0x6ee   :  { %6153 = vrot.lane.b32.xlu0 %v6151_v49, %s9186_s12  ;;  %v3621_v39 = vrot.slane %v3493_v3, %v10330_v46  ;;  %v3617_v7 = vrot.slane %v3490_v0, %v10333_v54 }
 0x6f0   :  { %v3622_v48 = vsel %vm1071_vm5, %v3621_v39, %v3617_v7 }
 0x6f1   :  { %v3499_v43 = vpop.permute.xlu0 %3498  ;;  %v3496_v35 = vpop.permute.xlu1 %3495  ;;  %v3676_v7 = vsel %vm1210_vm7, %v3622_v48, %v3675_v8 }
 0x6f2   :  { %v3630_v36 = vrot.slane %v3499_v43, %v10330_v46  ;;  %v3626_v38 = vrot.slane %v3496_v35, %v10333_v54 }
 0x6f4   :  { %v3631_v19 = vsel %vm1071_vm5, %v3630_v36, %v3626_v38 }
 0x6f5   :  { %v11295_v58 = vpop.permute.xlu0 %3504  ;;  %v11297_v15 = vpop.permute.xlu1 %3501 }
 0x6f6   :  { %v3639_v43 = vrot.slane %v11295_v58, %v10330_v46  ;;  %v3635_v35 = vrot.slane %v11297_v15, %v10333_v54 }
 0x6f8   :  { %v3640_v36 = vsel %vm1071_vm5, %v3639_v43, %v3635_v35 }
 0x6f9   :  { %v11299_v51 = vpop.permute.xlu0 %3510  ;;  %v11301_v17 = vpop.permute.xlu1 %3507 }
 0x6fa   :  { %v3644_v40 = vrot.slane %v11301_v17, %v10333_v54 }
 0x6fd   :  { %v11303_v14 = vpop.permute.xlu0 %3516  ;;  %v11305_v47 = vpop.permute.xlu1 %3513 }
 0x6fe   :  { %v3657_v58 = vrot.slane %v11303_v14, %v10330_v46  ;;  %v3653_v15 = vrot.slane %v11305_v47, %v10333_v54 }
 0x701   :  { %v11307_v18 = vpop.permute.xlu0 %3522  ;;  %v11309_v9 = vpop.permute.xlu1 %3519 }
 0x702   :  { %v3666_v17 = vrot.slane %v11307_v18, %v10330_v46  ;;  %v3662_v14 = vrot.slane %v11309_v9, %v10333_v54 }
 0x705   :  { %v3430_v11 = vpop.permute.xlu0 %3429  ;;  %v3433_v61 = vpop.permute.xlu1 %3432 }
 0x706   :  { %v3527_v3 = vrot.slane %v3430_v11, %v10333_v54  ;;  %v3531_v0 = vrot.slane %v3433_v61, %v10330_v46 }
 0x709   :  { %v3439_v53 = vpop.permute.xlu0 %3438  ;;  %v3436_v22 = vpop.permute.xlu1 %3435 }
 0x70a   :  { %v3540_v5 = vrot.slane %v3439_v53, %v10330_v46  ;;  %v3536_v25 = vrot.slane %v3436_v22, %v10333_v54 }
 0x70c   :  { %v3541_v11 = vsel %vm1071_vm5, %v3540_v5, %v3536_v25 }
 0x70d   :  { %v3445_v63 = vpop.permute.xlu0 %3444  ;;  %v3442_v12 = vpop.permute.xlu1 %3441 }
 0x70e   :  { %v3549_v42 = vrot.slane %v3445_v63, %v10330_v46  ;;  %v3545_v16 = vrot.slane %v3442_v12, %v10333_v54  ;;  %v3648_v63 = vrot.slane %v11299_v51, %v10330_v46  ;;  %v3532_v51 = vsel %vm1071_vm5, %v3531_v0, %v3527_v3 }
 0x70f   :  { %v3668_v47 = vsel %vm1208_vm6, %v3541_v11, %v3532_v51 }
 0x710   :  { %v3550_v34 = vsel %vm1071_vm5, %v3549_v42, %v3545_v16  ;;  %v3649_v23 = vsel %vm1071_vm5, %v3648_v63, %v3644_v40  ;;  %v3658_v42 = vsel %vm1071_vm5, %v3657_v58, %v3653_v15 }
 0x711   :  { %v3451_v44 = vpop.permute.xlu0 %3450  ;;  %v3448_v13 = vpop.permute.xlu1 %3447  ;;  %v3669_v38 = vsel %vm1210_vm7, %v3550_v34, %v3668_v47 }
 0x712   :  { %v3558_v21 = vrot.slane %v3451_v44, %v10330_v46  ;;  %v3554_v49 = vrot.slane %v3448_v13, %v10333_v54 }
 0x714   :  { %v3559_v31 = vsel %vm1071_vm5, %v3558_v21, %v3554_v49 }
 0x715   :  { %v3457_v32 = vpop.permute.xlu0 %3456  ;;  %v3454_v26 = vpop.permute.xlu1 %3453  ;;  %v3670_v18 = vsel %vm1212_vm8, %v3559_v31, %v3669_v38 }
 0x716   :  { %v3567_v53 = vrot.slane %v3457_v32, %v10330_v46  ;;  %v3563_v22 = vrot.slane %v3454_v26, %v10333_v54  ;;  %v3677_v26 = vsel %vm1212_vm8, %v3631_v19, %v3676_v7  ;;  %v3667_v19 = vsel %vm1071_vm5, %v3666_v17, %v3662_v14 }
 0x718   :  { %v3568_v39 = vsel %vm1071_vm5, %v3567_v53, %v3563_v22 }
 0x719   :  { %v3463_v20 = vpop.permute.xlu0 %3462  ;;  %v3460_v41 = vpop.permute.xlu1 %3459  ;;  %v3671_v8 = vsel %vm1214_vm9, %v3568_v39, %v3670_v18 }
 0x71a   :  { %v3576_v61 = vrot.slane %v3463_v20, %v10330_v46  ;;  %v3572_v12 = vrot.slane %v3460_v41, %v10333_v54  ;;  %v3678_v20 = vsel %vm1214_vm9, %v3640_v36, %v3677_v26  ;;  %v1970_v26 = vrot.slane %v11261_v33, %v10333_v54 }
 0x71b   :  { %v3679_v3 = vsel %vm1216_vm10, %v3649_v23, %v3678_v20  ;;  %v1974_v23 = vrot.slane %v11263_v50, %v10330_v46 }
 0x71c   :  { %v3577_v32 = vsel %vm1071_vm5, %v3576_v61, %v3572_v12  ;;  %v3680_v53 = vsel %vm1218_vm11, %v3658_v42, %v3679_v3 }
 0x71d   :  { %v3469_v44 = vpop.permute.xlu0 %3468  ;;  %v3466_v13 = vpop.permute.xlu1 %3465  ;;  %v3672_v41 = vsel %vm1216_vm10, %v3577_v32, %v3671_v8  ;;  %v11386_v22 = vsel %vm1220_vm12, %v3667_v19, %v3680_v53  ;;  %v1975_v50 = vsel %vm1071_vm5, %v1974_v23, %v1970_v26 }
 0x71e   :  { %v3585_v55 = vrot.slane %v3469_v44, %v10330_v46  ;;  %v3581_v37 = vrot.slane %v3466_v13, %v10333_v54 }
 0x720   :  { %v3586_v9 = vsel %vm1071_vm5, %v3585_v55, %v3581_v37 }
 0x721   :  { %v3475_v5 = vpop.permute.xlu0 %3474  ;;  %v3472_v25 = vpop.permute.xlu1 %3471  ;;  %v3673_v21 = vsel %vm1218_vm11, %v3586_v9, %v3672_v41 }
 0x722   :  { %v3594_v48 = vrot.slane %v3475_v5, %v10330_v46  ;;  %v3590_v16 = vrot.slane %v3472_v25, %v10333_v54 }
 0x724   :  { %v3595_v0 = vsel %vm1071_vm5, %v3594_v48, %v3590_v16 }
 0x725   :  { %v1879_v49 = vpop.permute.xlu0 %1878  ;;  %v1882_v43 = vpop.permute.xlu1 %1881  ;;  %v11380_v35 = vsel %vm1220_vm12, %v3595_v0, %v3673_v21 }
 0x726   :  { %8422 = vmatprep.mubr.msk.f32.mxu1 %vm593_vm2, %v11380_v35  ;;  %v1979_v7 = vrot.slane %v1879_v49, %v10333_v54  ;;  %v1983_v36 = vrot.slane %v1882_v43, %v10330_v46 }
 0x727   :  { %8423 = vmatmul.mubr.msk.f32.vlgmr.msra.gmra.mrb[2].mxu1 %vm593_vm2, %v11386_v22 }
 0x728   :  { %8556 = vmatpush3.bf16.msk.msra.mxu1 %vm11269_vm15, %v9190_v59  ;;  %v1984_v48 = vsel %vm1071_vm5, %v1983_v36, %v1979_v7 }
 0x729   :  { %v1885_v63 = vpop.permute.xlu0 %1884  ;;  %v1888_v11 = vpop.permute.xlu1 %1887  ;;  %v2111_v49 = vsel %vm1208_vm6, %v1984_v48, %v1975_v50 }
 0x72a   :  { %v1988_v38 = vrot.slane %v1885_v63, %v10333_v54  ;;  %v1992_v32 = vrot.slane %v1888_v11, %v10330_v46 }
 0x72c   :  { %v1993_v16 = vsel %vm1071_vm5, %v1992_v32, %v1988_v38 }
 0x72d   :  { %v11393_v61 = vpop.permute.xlu0 %1920  ;;  %v11395_v12 = vpop.permute.xlu1 %1923  ;;  %v2112_v53 = vsel %vm1210_vm7, %v1993_v16, %v2111_v49 }
 0x731   :  { %v1927_v40 = vpop.permute.xlu0 %1926  ;;  %v1930_v58 = vpop.permute.xlu1 %1929 }
 0x732   :  { %v2051_v63 = vrot.slane %v1927_v40, %v10333_v54  ;;  %v2055_v11 = vrot.slane %v1930_v58, %v10330_v46 }
 0x734   :  { %v2056_v26 = vsel %vm1071_vm5, %v2055_v11, %v2051_v63 }
 0x735   :  { %v1891_v15 = vpop.permute.xlu0 %1890  ;;  %v1894_v34 = vpop.permute.xlu1 %1893 }
 0x736   :  { %v1997_v18 = vrot.slane %v1891_v15, %v10333_v54  ;;  %v2001_v9 = vrot.slane %v1894_v34, %v10330_v46  ;;  %v2042_v15 = vrot.slane %v11393_v61, %v10333_v54  ;;  %v2046_v34 = vrot.slane %v11395_v12, %v10330_v46 }
 0x738   :  { %v2002_v19 = vsel %vm1071_vm5, %v2001_v9, %v1997_v18 }
 0x739   :  { %v1933_v44 = vpop.permute.xlu0 %1932  ;;  %v1936_v13 = vpop.permute.xlu1 %1935 }
 0x73d   :  { %v1897_v51 = vpop.permute.xlu0 %1896  ;;  %v1900_v31 = vpop.permute.xlu1 %1899 }
 0x73e   :  { %v2006_v42 = vrot.slane %v1897_v51, %v10333_v54  ;;  %v2010_v8 = vrot.slane %v1900_v31, %v10330_v46  ;;  %v2113_v51 = vsel %vm1212_vm8, %v2002_v19, %v2112_v53 }
 0x740   :  { %v2011_v43 = vsel %vm1071_vm5, %v2010_v8, %v2006_v42 }
 0x741   :  { %v1939_v55 = vpop.permute.xlu0 %1938  ;;  %v1942_v37 = vpop.permute.xlu1 %1941  ;;  %v2114_v7 = vsel %vm1214_vm9, %v2011_v43, %v2113_v51  ;;  %v11479_v51 = vld [vmem:[%s13418_s0] sm:$0xff] }
 0x742   :  { %v2069_v38 = vrot.slane %v1939_v55, %v10333_v54  ;;  %v2073_v61 = vrot.slane %v1942_v37, %v10330_v46 }
 0x745   :  { %v1903_v17 = vpop.permute.xlu0 %1902  ;;  %v1906_v14 = vpop.permute.xlu1 %1905 }
 0x746   :  { %v2015_v20 = vrot.slane %v1903_v17, %v10333_v54  ;;  %v2019_v33 = vrot.slane %v1906_v14, %v10330_v46  ;;  %v2060_v17 = vrot.slane %v1933_v44, %v10333_v54  ;;  %v2064_v14 = vrot.slane %v1936_v13, %v10330_v46 }
 0x748   :  { %v2020_v31 = vsel %vm1071_vm5, %v2019_v33, %v2015_v20 }
 0x749   :  { %v11397_v47 = vpop.permute.xlu0 %1944  ;;  %v11399_v39 = vpop.permute.xlu1 %1947  ;;  %v2115_v23 = vsel %vm1216_vm10, %v2020_v31, %v2114_v7  ;;  %v11488_v31 = vld [vmem:[%s13418_s0 + $0x8] sm:$0xff] }
 0x74a   :  { %v2078_v44 = vrot.slane %v11397_v47, %v10333_v54  ;;  %v2082_v13 = vrot.slane %v11399_v39, %v10330_v46  ;;  %v2074_v39 = vsel %vm1071_vm5, %v2073_v61, %v2069_v38 }
 0x74c   :  { %v2083_v33 = vsel %vm1071_vm5, %v2082_v13, %v2078_v44 }
 0x74d   :  { %v1909_v5 = vpop.permute.xlu0 %1908  ;;  %v1912_v25 = vpop.permute.xlu1 %1911 }
 0x74e   :  { %v2024_v41 = vrot.slane %v1909_v5, %v10333_v54  ;;  %v2028_v3 = vrot.slane %v1912_v25, %v10330_v46  ;;  %v2047_v5 = vsel %vm1071_vm5, %v2046_v34, %v2042_v15  ;;  %v2065_v25 = vsel %vm1071_vm5, %v2064_v14, %v2060_v17 }
 0x74f   :  { %v2118_v20 = vsel %vm1208_vm6, %v2056_v26, %v2047_v5  ;;  %v9193_v5 = vmov 0.0  }
 0x750   :  { %v2029_v40 = vsel %vm1071_vm5, %v2028_v3, %v2024_v41  ;;  %v2119_v50 = vsel %vm1210_vm7, %v2065_v25, %v2118_v20 }
 0x751   :  { %v1951_v0 = vpop.permute.xlu0 %1950  ;;  %v1954_v21 = vpop.permute.xlu1 %1953  ;;  %v2116_v9 = vsel %vm1218_vm11, %v2029_v40, %v2115_v23  ;;  %v2120_v41 = vsel %vm1212_vm8, %v2074_v39, %v2119_v50 }
 0x752   :  { %v2087_v18 = vrot.slane %v1951_v0, %v10333_v54  ;;  %v2091_v55 = vrot.slane %v1954_v21, %v10330_v46  ;;  %v2121_v49 = vsel %vm1214_vm9, %v2083_v33, %v2120_v41 }
 0x754   :  { %v2092_v19 = vsel %vm1071_vm5, %v2091_v55, %v2087_v18 }
 0x755   :  { %v1915_v36 = vpop.permute.xlu0 %1914  ;;  %v1918_v58 = vpop.permute.xlu1 %1917  ;;  %v2122_v63 = vsel %vm1216_vm10, %v2092_v19, %v2121_v49 }
 0x756   :  { %v2033_v12 = vrot.slane %v1915_v36, %v10333_v54  ;;  %v2037_v32 = vrot.slane %v1918_v58, %v10330_v46 }
 0x758   :  { %v2038_v37 = vsel %vm1071_vm5, %v2037_v32, %v2033_v12 }
 0x759   :  { %v1957_v42 = vpop.permute.xlu0 %1956  ;;  %v1960_v8 = vpop.permute.xlu1 %1959  ;;  %v2117_v47 = vsel %vm1220_vm12, %v2038_v37, %v2116_v9  ;;  %v77_v9 = vrot.slane %v11256_v45, %v13869_v62 }
 0x75a   :  { %v2096_v48 = vrot.slane %v1957_v42, %v10333_v54  ;;  %v2100_v16 = vrot.slane %v1960_v8, %v10330_v46  ;;  %8415 = vmatprep.mubr.msk.f32.mxu0 %vm593_vm2, %v2117_v47  ;;  %8429 = vmatprep.mubr.msk.f32.mxu1 %vm593_vm2, %v2117_v47 }
 0x75b   :  { %vm79_vm1 = vcmp.eq.s32.totalorder %v11259_v2, %v77_v9  ;;  %vm78_vm3 = vcmp.eq.s32.totalorder %v14073_v27, %v77_v9  ;;  %v8297_v9 = vld [vmem:[#allocation2 + $0x35] ss:$0 sm:$0xff] }
 0x75c   :  { %v2101_v3 = vsel %vm1071_vm5, %v2100_v16, %v2096_v48  ;;  %v11503_v25 = vsel %vm79_vm1, 1.0, %v9193_v5  ;;  %v11505_v42 = vsel %vm78_vm3, 1.0, %v9193_v5 }
 0x75d   :  { %v1963_v0 = vpop.permute.xlu0 %1962  ;;  %v1966_v21 = vpop.permute.xlu1 %1965  ;;  %v2123_v15 = vsel %vm1218_vm11, %v2101_v3, %v2122_v63  ;;  %14076 = vst [vmem:[#allocation21_spill] sm:$0xff] %v11503_v25  ;;  %14077 = vst [vmem:[#allocation22_spill] sm:$0xff] %v11505_v42 }
 0x75e   :  { %v2105_v43 = vrot.slane %v1963_v0, %v10333_v54  ;;  %v2109_v53 = vrot.slane %v1966_v21, %v10330_v46 }
 0x760   :  { %v2110_v11 = vsel %vm1071_vm5, %v2109_v53, %v2105_v43 }
 0x761   :  { %v2124_v34 = vsel %vm1220_vm12, %v2110_v11, %v2123_v15 }
 0x762   :  { %8416 = vmatmul.mubr.msk.f32.vlgmr.msra.gmra.mrb[2].mxu0 %vm593_vm2, %v2124_v34  ;;  %8430 = vmatmul.mubr.msk.f32.vlgmr.msra.gmra.mrb[4].mxu1 %vm593_vm2, %v2124_v34 }
 0x763   :  { %8432 = vmatprep.mubr.msk.f32.mxu1 %vm593_vm2, %v11380_v35  ;;  %8452 = vmatpush3.msra.mxu0 %v11280_v57  ;;  %v8650_v57 = vpop.permute.xlu0 %8649  ;;  %v8655_v35 = vpop.permute.xlu1 %8654 }
 0x764   :  { %8453 = vmatprep.mubr.msk.f32.mxu0 %vm13655_vm0, %v11479_v51  ;;  %v8652_v17 = vunpack.i.h.bf16 %v8650_v57  ;;  %v8651_v14 = vunpack.i.l.bf16 %v8650_v57  ;;  %v8657_v7 = vunpack.i.h.bf16 %v8655_v35  ;;  %v8656_v40 = vunpack.i.l.bf16 %v8655_v35 }
 0x766   :  { %8433 = vmatmul.mubr.msk.f32.gmra.mrb[6].mxu1 %vm593_vm2, %v11386_v22  ;;  %8454 = vmatmul.mubr.msk.f32.vlgmr.msra.gmra.mrb[4].mxu0 %vm13655_vm0, %v11488_v31  ;;  %v8557_v36 = vpack.c.bf16 %v8652_v17, %v8651_v14  ;;  %v8561_v58 = vpack.c.bf16 %v8657_v7, %v8656_v40  ;;  %v8276_v14 = vld [vmem:[#allocation2 + $0x32] ss:$0 sm:$0xff] }
 0x767   :  { %v11492_v38 = vpop.permute.xlu0 %8659  ;;  %v11495_v26 = vpop.permute.xlu1 %8664 }
 0x768   :  { %8558 = vmatprep.subr.bf16.mxu1 %v8557_v36 }
 0x769   :  { %8560 = vmatpush3.bf16.msra.mxu1 %v8557_v36 }
 0x76a   :  { %8562 = vmatprep.subr.bf16.mxu1 %v8561_v58 }
 0x76b   :  { %v8670_v22 = vpop.permute.xlu0 %8669  ;;  %v8675_v44 = vpop.permute.xlu1 %8674 }
 0x76c   :  { %v8672_v61 = vunpack.i.h.bf16 %v8670_v22  ;;  %v8671_v12 = vunpack.i.l.bf16 %v8670_v22  ;;  %v8677_v13 = vunpack.i.h.bf16 %v8675_v44  ;;  %v8676_v23 = vunpack.i.l.bf16 %v8675_v44 }
 0x76d   :  { %8564 = vmatpush3.bf16.msra.mxu1 %v8561_v58  ;;  %v8667_v44 = vunpack.i.h.bf16 %v11495_v26 }
 0x76e   :  { %v8565_v32 = vpack.c.bf16 %v8672_v61, %v8671_v12  ;;  %8446 = vmatprep.subr.mxu1 %v11278_v30  ;;  %v8569_v18 = vpack.c.bf16 %v8677_v13, %v8676_v23  ;;  %v8662_v12 = vunpack.i.h.bf16 %v11492_v38  ;;  %v8666_v13 = vunpack.i.l.bf16 %v11495_v26 }
 0x76f   :  { %v11514_v17 = vpop.permute.xlu0 %6153 }
 0x770   :  { %8566 = vmatprep.subr.bf16.mxu0 %v8565_v32 }
 0x771   :  { %8568 = vmatpush3.bf16.msra.mxu0 %v8565_v32  ;;  %v8661_v32 = vunpack.i.l.bf16 %v11492_v38  ;;  %v8287_v38 = vld [vmem:[#allocation2 + $0x33] ss:$0 sm:$0xff] }
 0x772   :  { %8570 = vmatprep.subr.bf16.mxu0 %v8569_v18 }
 0x773   :  { %v8573_v23 = vpack.c.bf16 %v8662_v12, %v8661_v32 }
 0x775   :  { %8572 = vmatpush3.bf16.msra.mxu0 %v8569_v18 }
 0x7fa   :  { %v8424_v55 = vpop.f32.mrb[2].mxu1 }
 0x7fb   :  { %3773 = vrot.lane.b32.xlu1 %v8424_v55, %s9186_s12  ;;  %v3760_v37 = vpop.f32.mrb[3].mxu1 }
 0x7fc   :  { %3771 = vrot.lane.b32.xlu0 %v3760_v37, %s9186_s12 }
 0x835   :  { %v8417_v8 = vpop.f32.mrb[2].mxu0  ;;  %v8431_v47 = vpop.f32.mrb[4].mxu1 }
 0x836   :  { %v3871_v39 = vmul.f32 %v8431_v47, %v11503_v25  ;;  %v2195_v48 = vpop.f32.mrb[3].mxu0  ;;  %v3851_v16 = vpop.f32.mrb[5].mxu1 }
 0x837   :  { %v3870_v20 = vmul.f32 %v11505_v42, %v3851_v16 }
 0x839   :  { %v3874_v33 = vadd.f32 %v3871_v39, %v3870_v20  ;;  %v8434_v50 = vpop.f32.mrb[6].mxu1 }
 0x83a   :  { %v3873_v45 = vmul.f32 %v8434_v50, %v11503_v25  ;;  %v3861_v2 = vpop.f32.mrb[7].mxu1 }
 0x83b   :  { %v3875_v19 = vrot.slane %v3874_v33, 4  ;;  %v3872_v27 = vmul.f32 %v11505_v42, %v3861_v2 }
 0x83d   :  { %v3876_v41 = vadd.f32 %v3875_v19, %v3874_v33  ;;  %v3881_v3 = vadd.f32 %v3873_v45, %v3872_v27  ;;  %v14083_v45 = vld [vmem:[#allocation20_spill] sm:$0xff] }
 0x83f   :  { %v3877_v0 = vrot.slane %v3876_v41, 2  ;;  %v3882_v21 = vrot.slane %v3881_v3, 4 }
 0x841   :  { %v3878_v49 = vadd.f32 %v3877_v0, %v3876_v41  ;;  %v3883_v43 = vadd.f32 %v3882_v21, %v3881_v3 }
 0x843   :  { %v3884_v53 = vrot.slane %v3883_v43, 2  ;;  %v3879_v63 = vrot.slane %v3878_v49, 1 }
 0x845   :  { %v3885_v11 = vadd.f32 %v3884_v53, %v3883_v43  ;;  %v3880_v34 = vadd.f32 %v3879_v63, %v3878_v49 }
 0x847   :  { %v3886_v15 = vrot.slane %v3885_v11, 1 }
 0x849   :  { %v3887_v57 = vadd.f32 %v3886_v15, %v3885_v11 }
 0x84b   :  { %v11512_v35 = vsel %vm1208_vm6, %v3887_v57, %v3880_v34 }
 0x84c   :  { %14078 = vst [vmem:[#allocation65_spill] sm:$0xff] %v11512_v35 }
 0x86d   :  { %v3774_v7 = vpop.permute.xlu1 %3773 }
 0x86e   :  { %v3778_v40 = vsel %vm593_vm2, %v8417_v8, %v3774_v7  ;;  %v3772_v36 = vpop.permute.xlu0 %3771 }
 0x86f   :  { %v3777_v58 = vsel %vm593_vm2, %v2195_v48, %v3772_v36  ;;  %v3784_v61 = vadd.f32 %v8276_v14, %v3778_v40 }
 0x870   :  { %v3783_v22 = vadd.f32 %v8276_v14, %v3777_v58 }
 0x872   :  { %8443 = vmatprep.mubr.msk.f32.mxu1 %vm13642_vm4, %v3783_v22 }
 0x873   :  { %8444 = vmatmul.mubr.msk.f32.vlgmr.msra.gmra.mrb[8].mxu1 %vm13642_vm4, %v3784_v61 }
 0x874   :  { %8447 = vmatpush3.msra.mxu1 %v11278_v30  ;;  %8448 = vmatprep.mubr.msk.f32.mxu1 %vm13655_vm0, %v11479_v51  ;;  %v8577_v30 = vpack.c.bf16 %v8667_v44, %v8666_v13 }
 0x875   :  { %8467 = vmatprep.subr.mxu1 %v11285_v29 }
 0x87b   :  { %8449 = vmatmul.mubr.msk.f32.vlgmr.msra.gmra.mrb[8].mxu1 %vm13655_vm0, %v11488_v31 }
 0x87c   :  { %8468 = vmatpush3.msra.mxu1 %v11285_v29  ;;  %8469 = vmatprep.mubr.msk.f32.mxu1 %vm13655_vm0, %v11479_v51 }
 0x87d   :  { %8574 = vmatprep.subr.bf16.mxu1 %v8573_v23 }
 0x87f   :  { %8470 = vmatmul.mubr.msk.f32.vlgmr.msra.gmra.mrb[10].mxu1 %vm13655_vm0, %v11488_v31  ;;  %v8292_v31 = vld [vmem:[#allocation2 + $0x34] ss:$0 sm:$0xff] }
 0x880   :  { %8576 = vmatpush3.bf16.msra.mxu1 %v8573_v23 }
 0x881   :  { %8578 = vmatprep.subr.bf16.mxu1 %v8577_v30 }
 0x884   :  { %8580 = vmatpush3.bf16.msra.mxu1 %v8577_v30 }
 0x885   :  { %8590 = vmatprep.subr.msk.bf16.mxu1 %vm11269_vm15, %v9190_v59 }
 0x94e   :  { %v8450_v26 = vpop.f32.mrb[8].mxu1 }
 0x94f   :  { %v4066_v18 = vadd.f32 %v8450_v26, %v8287_v38  ;;  %v4052_v55 = vpop.f32.mrb[9].mxu1 }
 0x950   :  { %v4065_v29 = vadd.f32 %v8287_v38, %v4052_v55 }
 0x951   :  { %v11540_v51 = vmax.f32 %v4066_v18, 0.0 }
 0x952   :  { %v11538_v37 = vmax.f32 %v4065_v29, 0.0 }
 0x953   :  { %14080 = vst [vmem:[#allocation77_spill] sm:$0xff] %v11540_v51 }
 0x954   :  { %14079 = vst [vmem:[#allocation62_spill] sm:$0xff] %v11538_v37  ;;  %8464 = vmatprep.mubr.msk.f32.mxu0 %vm13642_vm4, %v11538_v37  ;;  %8480 = vmatprep.mubr.msk.f32.mxu1 %vm13642_vm4, %v11538_v37 }
 0x955   :  { %8465 = vmatmul.mubr.msk.f32.vlgmr.msra.gmra.mrb[4].mxu0 %vm13642_vm4, %v11540_v51  ;;  %8481 = vmatmul.mubr.msk.f32.vlgmr.msra.gmra.mrb[10].mxu1 %vm13642_vm4, %v11540_v51 }
 0x956   :  { %8592 = vmatpush3.bf16.msk.msra.mxu1 %vm11269_vm15, %v9190_v59 }
 0xa28   :  { %v8466_v5 = vpop.f32.mrb[4].mxu0  ;;  %v8482_v8 = vpop.f32.mrb[10].mxu1 }
 0xa29   :  { %v11553_v47 = vadd.f32 %v8466_v5, %v8292_v31  ;;  %v4414_v39 = vadd.f32 %v8482_v8, %v8297_v9  ;;  %v4232_v48 = vpop.f32.mrb[5].mxu0  ;;  %v4400_v16 = vpop.f32.mrb[11].mxu1 }
 0xa2a   :  { %v11555_v20 = vadd.f32 %v8292_v31, %v4232_v48  ;;  %v4413_v33 = vadd.f32 %v8297_v9, %v4400_v16 }
 0xa2b   :  { %14081 = vst [vmem:[#allocation80_spill] sm:$0xff] %v11553_v47  ;;  %v4466_v50 = vcombine.high %v4414_v39, %v4414_v39  ;;  %v4473_v2 = vrot.slane %v4414_v39, %v14083_v45 }
 0xa2c   :  { %14082 = vst [vmem:[#allocation79_spill] sm:$0xff] %v11555_v20  ;;  %v4417_v19 = vcombine.high %v4413_v33, %v4413_v33  ;;  %v4424_v27 = vrot.slane %v4413_v33, %v14083_v45  ;;  %v8581_v6 = vpack.c.bf16 %v11553_v47, %v11555_v20 }
 0xa2d   :  { %v4480_v41 = vrot.slane %v4466_v50, %v14083_v45  ;;  %v4481_v3 = vcombine.high %v4473_v2, %v4473_v2  ;;  %v4489_v0 = vrot.slane %v4473_v2, %v14083_v45 }
 0xa2e   :  { %v4431_v21 = vrot.slane %v4417_v19, %v14083_v45  ;;  %v4432_v49 = vcombine.high %v4424_v27, %v4424_v27  ;;  %8582 = vmatprep.subr.bf16.mxu0 %v8581_v6  ;;  %v4440_v57 = vrot.slane %v4424_v27, %v14083_v45 }
 0xa2f   :  { %v4482_v43 = vcombine.high %v4480_v41, %v4480_v41  ;;  %v4496_v53 = vrot.slane %v4480_v41, %v14083_v45  ;;  %v4503_v63 = vrot.slane %v4481_v3, %v14083_v45  ;;  %v4511_v11 = vcombine.high %v4489_v0, %v4489_v0  ;;  %8584 = vmatpush3.bf16.msra.mxu0 %v8581_v6 }
 0xa30   :  { %v4550_v15 = vrot.slane %v4489_v0, %v13868_v52  ;;  %v4433_v34 = vcombine.high %v4431_v21, %v4431_v21  ;;  %v4447_v14 = vrot.slane %v4431_v21, %v14083_v45  ;;  %v4454_v32 = vrot.slane %v4432_v49, %v14083_v45 }
 0xa31   :  { %v11572_v7 = vrot.slane %v4482_v43, %v14083_v45  ;;  %v4512_v40 = vcombine.high %v4496_v53, %v4496_v53  ;;  %v4513_v36 = vcombine.high %v4503_v63, %v4503_v63  ;;  %v4554_v58 = vrot.slane %v4503_v63, %v13868_v52 }
 0xa32   :  { %v4558_v22 = vrot.slane %v4511_v11, %v13868_v52  ;;  %v4566_v61 = vrot.slane %v4496_v53, %v13868_v52  ;;  %v4612_v12 = vadd.f32 %v4550_v15, %v11553_v47  ;;  %v11590_v30 = vrot.slane %v4433_v34, %v14083_v45 }
 0xa33   :  { %v11580_v44 = vrot.slane %v4513_v36, %v13868_v52  ;;  %v11584_v13 = vrot.slane %v11572_v7, %v13868_v52  ;;  %v11587_v23 = vrot.slane %v4512_v40, %v13868_v52  ;;  %v11593_v38 = vadd.f32 %v4554_v58, %v11553_v47 }
 0xa34   :  { %v11596_v26 = vadd.f32 %v4558_v22, %v11553_v47  ;;  %v11599_v18 = vadd.f32 %v4566_v61, %v11553_v47  ;;  %v4462_v55 = vcombine.high %v4440_v57, %v4440_v57  ;;  %v4463_v5 = vcombine.high %v4447_v14, %v4447_v14 }
 0xa35   :  { %v11603_v29 = vadd.f32 %v11580_v44, %v11553_v47  ;;  %v11607_v31 = vadd.f32 %v11584_v13, %v11553_v47  ;;  %v11611_v9 = vadd.f32 %v11587_v23, %v11553_v47  ;;  %v4464_v8 = vcombine.high %v4454_v32, %v4454_v32 }
 0xa36   :  { %v4518_v39 = vrot.slane %v4440_v57, %v13868_v52  ;;  %v4522_v48 = vrot.slane %v4454_v32, %v13868_v52  ;;  %v4526_v16 = vrot.slane %v4462_v55, %v13868_v52  ;;  %v4534_v33 = vrot.slane %v4447_v14, %v13868_v52 }
 0xa37   :  { %v4538_v50 = vrot.slane %v11590_v30, %v13868_v52  ;;  %v11621_v45 = vrot.slane %v11290_v56, %v13868_v52  ;;  %v4530_v2 = vrot.slane %v4464_v8, %v13868_v52  ;;  %v4542_v19 = vrot.slane %v4463_v5, %v13868_v52 }
 0xa38   :  { %v4595_v27 = vadd.f32 %v4518_v39, %v11555_v20  ;;  %v4596_v6 = vadd.f32 %v4518_v39, %v11553_v47  ;;  %v11628_v41 = vadd.f32 %v4522_v48, %v11555_v20  ;;  %v11631_v3 = vadd.f32 %v4522_v48, %v11553_v47 }
 0xa39   :  { %v11634_v0 = vadd.f32 %v4526_v16, %v11555_v20  ;;  %v11637_v56 = vadd.f32 %v4526_v16, %v11553_v47  ;;  %v11640_v21 = vadd.f32 %v4530_v2, %v11555_v20  ;;  %v11643_v49 = vadd.f32 %v4530_v2, %v11553_v47 }
 0xa3a   :  { %v11646_v43 = vadd.f32 %v4534_v33, %v11555_v20  ;;  %v11649_v53 = vadd.f32 %v4534_v33, %v11553_v47  ;;  %v11652_v63 = vadd.f32 %v4538_v50, %v11555_v20  ;;  %v11655_v11 = vadd.f32 %v4538_v50, %v11553_v47 }
 0xa3b   :  { %v11658_v34 = vadd.f32 %v4542_v19, %v11555_v20  ;;  %v11661_v57 = vadd.f32 %v4542_v19, %v11553_v47  ;;  %vm4644_vm13 = vcmp.ge.f32.partialorder %v4612_v12, 0.0  ;;  %v4676_v14 = vmul.f32 0.2, %v4612_v12 }
 0xa3c   :  { %v4611_v40 = vadd.f32 %v4550_v15, %v11555_v20  ;;  %vm4628_vm14 = vcmp.ge.f32.partialorder %v4596_v6, 0.0  ;;  %v4660_v36 = vmul.f32 0.2, %v4596_v6  ;;  %v4659_v5 = vmul.f32 0.2, %v4595_v27 }
 0xa3d   :  { %v4708_v32 = vsel %vm4644_vm13, %v4612_v12, %v4676_v14  ;;  %vm4627_vm1 = vcmp.ge.f32.partialorder %v4595_v27, 0.0  ;;  %v4613_v12 = vadd.f32 %v4554_v58, %v11555_v20  ;;  %v4615_v2 = vadd.f32 %v4558_v22, %v11555_v20 }
 0xa3e   :  { %vm4643_vm15 = vcmp.ge.f32.partialorder %v4611_v40, 0.0  ;;  %v4675_v55 = vmul.f32 0.2, %v4611_v40  ;;  %v6173_v8 = vmul.f32 %v11514_v17, %v4708_v32  ;;  %v11666_v39 = vmul.f32 %v11621_v45, %v4708_v32 }
 0xa3f   :  { %v4692_v16 = vsel %vm4628_vm14, %v4596_v6, %v4660_v36  ;;  %v4691_v50 = vsel %vm4627_vm1, %v4595_v27, %v4659_v5  ;;  %v4619_v14 = vadd.f32 %v4566_v61, %v11555_v20  ;;  %v4677_v58 = vmul.f32 0.2, %v4613_v12 }
 0xa40   :  { %v4707_v48 = vsel %vm4643_vm15, %v4611_v40, %v4675_v55  ;;  %6254 = vrot.lane.b32.xlu0 %v6173_v8, %s9188_s1  ;;  %v6157_v19 = vmul.f32 %v11514_v17, %v4692_v16  ;;  %v6156_v6 = vmul.f32 %v11514_v17, %v4691_v50  ;;  %v11681_v40 = vmul.f32 %v11621_v45, %v4692_v16 }
 0xa41   :  { %v6172_v33 = vmul.f32 %v11514_v17, %v4707_v48  ;;  %v11671_v15 = vmul.f32 %v11621_v45, %v4707_v48  ;;  %v11684_v36 = vmul.f32 %v11621_v45, %v4691_v50  ;;  %v4679_v22 = vmul.f32 0.2, %v4615_v2 }
 0xa42   :  { %v4678_v27 = vmul.f32 0.2, %v11593_v38  ;;  %vm4645_vm3 = vcmp.ge.f32.partialorder %v4613_v12, 0.0  ;;  %vm4647_vm13 = vcmp.ge.f32.partialorder %v4615_v2, 0.0  ;;  %v4683_v32 = vmul.f32 0.2, %v4619_v14 }
 0xa43   :  { %6252 = vrot.lane.b32.xlu1 %v6172_v33, %s9188_s1  ;;  %vm4646_vm14 = vcmp.ge.f32.partialorder %v11593_v38, 0.0  ;;  %v4680_v55 = vmul.f32 0.2, %v11596_v26  ;;  %vm4651_vm15 = vcmp.ge.f32.partialorder %v4619_v14, 0.0  ;;  %vm4648_vm1 = vcmp.ge.f32.partialorder %v11596_v26, 0.0 }
 0xa44   :  { %6222 = vrot.lane.b32.xlu0 %v6157_v19, %s9188_s1  ;;  %v4684_v61 = vmul.f32 0.2, %v11599_v18  ;;  %v11692_v5 = vsel %vm4645_vm3, %v4613_v12, %v4677_v58  ;;  %v11694_v8 = vsel %vm4647_vm13, %v4615_v2, %v4679_v22  ;;  %vm4652_vm4 = vcmp.ge.f32.partialorder %v11599_v18, 0.0 }
 0xa45   :  { %v11698_v48 = vsel %vm4646_vm14, %v11593_v38, %v4678_v27  ;;  %v11700_v16 = vsel %vm4651_vm15, %v4619_v14, %v4683_v32  ;;  %v11703_v33 = vsel %vm4648_vm1, %v11596_v26, %v4680_v55  ;;  %v11710_v19 = vmul.f32 %v11621_v45, %v11692_v5 }
 0xa46   :  { %v11706_v50 = vsel %vm4652_vm4, %v11599_v18, %v4684_v61  ;;  %v11714_v12 = vmul.f32 %v11621_v45, %v11694_v8  ;;  %v11718_v38 = vmul.f32 %v11621_v45, %v11698_v48  ;;  %v11722_v2 = vmul.f32 %v11621_v45, %v11700_v16 }
 0xa47   :  { %6220 = vrot.lane.b32.xlu1 %v6156_v6, %s9188_s1  ;;  %vm4630_vm3 = vcmp.ge.f32.partialorder %v11631_v3, 0.0  ;;  %v4661_v26 = vmul.f32 0.2, %v11628_v41  ;;  %v11728_v18 = vmul.f32 %v11621_v45, %v11703_v33  ;;  %v4662_v6 = vmul.f32 0.2, %v11631_v3 }
 0xa48   :  { %vm4629_vm4 = vcmp.ge.f32.partialorder %v11628_v41, 0.0  ;;  %v4663_v14 = vmul.f32 0.2, %v11634_v0  ;;  %v11735_v58 = vmul.f32 %v11621_v45, %v11706_v50  ;;  %v4664_v22 = vmul.f32 0.2, %v11637_v56 }
 0xa49   :  { %vm4631_vm13 = vcmp.ge.f32.partialorder %v11634_v0, 0.0  ;;  %v4667_v27 = vmul.f32 0.2, %v11646_v43  ;;  %v4617_v32 = vadd.f32 %v11580_v44, %v11555_v20  ;;  %vm4632_vm14 = vcmp.ge.f32.partialorder %v11637_v56, 0.0 }
 0xa4a   :  { %v4668_v55 = vmul.f32 0.2, %v11649_v53  ;;  %vm4635_vm15 = vcmp.ge.f32.partialorder %v11646_v43, 0.0  ;;  %v4621_v61 = vadd.f32 %v11584_v13, %v11555_v20  ;;  %v11748_v59 = vsel %vm4629_vm4, %v11628_v41, %v4661_v26 }
 0xa4b   :  { %vm4636_vm1 = vcmp.ge.f32.partialorder %v11649_v53, 0.0  ;;  %v4514_v35 = vcombine.high %v11572_v7, %v11572_v7  ;;  %v11754_v42 = vsel %vm4631_vm13, %v11634_v0, %v4663_v14  ;;  %v11759_v44 = vsel %vm4630_vm3, %v11631_v3, %v4662_v6 }
 0xa4c   :  { %v11762_v25 = vsel %vm4632_vm14, %v11637_v56, %v4664_v22  ;;  %v11765_v13 = vsel %vm4635_vm15, %v11646_v43, %v4667_v27  ;;  %v4623_v41 = vadd.f32 %v11587_v23, %v11555_v20  ;;  %v11770_v26 = vsel %vm4636_vm1, %v11649_v53, %v4668_v55 }
 0xa4d   :  { %vm4650_vm4 = vcmp.ge.f32.partialorder %v11603_v29, 0.0  ;;  %v4682_v7 = vmul.f32 0.2, %v11603_v29  ;;  %v11776_v3 = vmul.f32 %v11621_v45, %v11748_v59  ;;  %vm4649_vm3 = vcmp.ge.f32.partialorder %v4617_v32, 0.0 }
 0xa4e   :  { %vm4654_vm13 = vcmp.ge.f32.partialorder %v11607_v31, 0.0  ;;  %v4686_v0 = vmul.f32 0.2, %v11607_v31  ;;  %v11782_v56 = vmul.f32 %v11621_v45, %v11754_v42  ;;  %v4681_v23 = vmul.f32 0.2, %v4617_v32 }
 0xa4f   :  { %v11786_v43 = vmul.f32 %v11621_v45, %v11759_v44  ;;  %v11790_v53 = vmul.f32 %v11621_v45, %v11765_v13  ;;  %v11794_v6 = vmul.f32 %v11621_v45, %v11762_v25  ;;  %v4685_v14 = vmul.f32 0.2, %v4621_v61 }
 0xa50   :  { %v4688_v22 = vmul.f32 0.2, %v11611_v9  ;;  %v4687_v27 = vmul.f32 0.2, %v4623_v41  ;;  %v11799_v55 = vmul.f32 %v11621_v45, %v11770_v26  ;;  %vm4653_vm14 = vcmp.ge.f32.partialorder %v4621_v61, 0.0 }
 0xa51   :  { %vm4656_vm15 = vcmp.ge.f32.partialorder %v11611_v9, 0.0  ;;  %vm4655_vm1 = vcmp.ge.f32.partialorder %v4623_v41, 0.0  ;;  %v4578_v51 = vrot.slane %v4514_v35, %v13868_v52  ;;  %v4465_v37 = vcombine.high %v11590_v30, %v11590_v30 }
 0xa52   :  { %v4807_v28 = vsel %vm593_vm2, %v11671_v15, 0.0  ;;  %v4666_v60 = vmul.f32 0.2, %v11643_v49  ;;  %v11811_v24 = vsel %vm4650_vm4, %v11603_v29, %v4682_v7  ;;  %v11814_v10 = vsel %vm4649_vm3, %v4617_v32, %v4681_v23 }
 0xa53   :  { %v11819_v35 = vsel %vm4654_vm13, %v11607_v31, %v4686_v0  ;;  %vm4634_vm0 = vcmp.ge.f32.partialorder %v11643_v49, 0.0  ;;  %v11822_v30 = vsel %vm4653_vm14, %v4621_v61, %v4685_v14  ;;  %v11825_v15 = vsel %vm4656_vm15, %v11611_v9, %v4688_v22 }
 0xa54   :  { %v11827_v4 = vsel %vm4655_vm1, %v4623_v41, %v4687_v27  ;;  %v4665_v29 = vmul.f32 0.2, %v11640_v21  ;;  %vm4633_vm4 = vcmp.ge.f32.partialorder %v11640_v21, 0.0  ;;  %vm4638_vm3 = vcmp.ge.f32.partialorder %v11655_v11, 0.0 }
 0xa55   :  { %v4670_v32 = vmul.f32 0.2, %v11655_v11  ;;  %v4669_v31 = vmul.f32 0.2, %v11652_v63  ;;  %v11835_v7 = vsel %vm4634_vm0, %v11643_v49, %v4666_v60  ;;  %vm4637_vm13 = vcmp.ge.f32.partialorder %v11652_v63, 0.0 }
 0xa56   :  { %vm4640_vm14 = vcmp.ge.f32.partialorder %v11661_v57, 0.0  ;;  %vm4639_vm15 = vcmp.ge.f32.partialorder %v11658_v34, 0.0  ;;  %v4672_v9 = vmul.f32 0.2, %v11661_v57  ;;  %v4671_v61 = vmul.f32 0.2, %v11658_v34 }
 0xa57   :  { %v11844_v41 = vmul.f32 %v11621_v45, %v11814_v10  ;;  %v11848_v0 = vmul.f32 %v11621_v45, %v11822_v30  ;;  %v11852_v60 = vmul.f32 %v11621_v45, %v11811_v24  ;;  %v11856_v49 = vmul.f32 %v11621_v45, %v11827_v4 }
 0xa58   :  { %v11860_v23 = vmul.f32 %v11621_v45, %v11819_v35  ;;  %v11864_v14 = vmul.f32 %v11621_v45, %v11825_v15  ;;  %v11869_v22 = vsel %vm4633_vm4, %v11640_v21, %v4665_v29  ;;  %v11872_v27 = vsel %vm4637_vm13, %v11652_v63, %v4669_v31 }
 0xa59   :  { %v11875_v1 = vsel %vm4639_vm15, %v11658_v34, %v4671_v61  ;;  %v4626_v62 = vadd.f32 %v4578_v51, %v11553_v47  ;;  %v4546_v54 = vrot.slane %v4465_v37, %v13868_v52  ;;  %v11882_v46 = vsel %vm4638_vm3, %v11655_v11, %v4670_v32 }
 0xa5a   :  { %v11887_v21 = vsel %vm4640_vm14, %v11661_v57, %v4672_v9  ;;  %v4625_v34 = vadd.f32 %v4578_v51, %v11555_v20  ;;  %v11892_v29 = vmul.f32 %v11621_v45, %v11869_v22  ;;  %v11900_v37 = vmul.f32 %v11621_v45, %v11835_v7 }
 0xa5b   :  { %vm4658_vm0 = vcmp.ge.f32.partialorder %v4626_v62, 0.0  ;;  %v4690_v63 = vmul.f32 0.2, %v4626_v62  ;;  %v11904_v11 = vmul.f32 %v11621_v45, %v11875_v1  ;;  %v11908_v51 = vmul.f32 %v11621_v45, %v11882_v46 }
 0xa5c   :  { %14084 = vst [vmem:[#allocation88_spill] sm:$0xff] %v11900_v37  ;;  %vm4657_vm1 = vcmp.ge.f32.partialorder %v4625_v34, 0.0  ;;  %v4689_v57 = vmul.f32 0.2, %v4625_v34  ;;  %v11916_v9 = vmul.f32 %v11621_v45, %v11887_v21  ;;  %v4810_v61 = vsel %vm593_vm2, %v11666_v39, 0.0 }
 0xa5d   :  { %14085 = vst [vmem:[#allocation91_spill] sm:$0xff] %v11904_v11  ;;  %v11910_v32 = vsel %vm4658_vm0, %v4626_v62, %v4690_v63  ;;  %v4610_v52 = vadd.f32 %v4546_v54, %v11553_v47  ;;  %v4609_v11 = vadd.f32 %v4546_v54, %v11555_v20  ;;  %v6174_v47 = vmul.f32 %v11514_v17, %v11692_v5 }
 0xa5e   :  { %v11912_v31 = vsel %vm4657_vm1, %v4625_v34, %v4689_v57  ;;  %v11928_v62 = vmul.f32 %v11621_v45, %v11910_v32  ;;  %v6180_v5 = vmul.f32 %v11514_v17, %v11700_v16  ;;  %v6161_v16 = vmul.f32 %v11514_v17, %v11762_v25 }
 0xa5f   :  { %v11924_v37 = vmul.f32 %v11621_v45, %v11912_v31  ;;  %vm4642_vm4 = vcmp.ge.f32.partialorder %v4610_v52, 0.0  ;;  %v4674_v63 = vmul.f32 0.2, %v4610_v52  ;;  %vm4641_vm3 = vcmp.ge.f32.partialorder %v4609_v11, 0.0 }
 0xa60   :  { %v4673_v34 = vmul.f32 0.2, %v4609_v11  ;;  %v4813_v25 = vsel %vm593_vm2, %v11710_v19, 0.0  ;;  %v4834_v19 = vsel %vm593_vm2, %v11735_v58, 0.0  ;;  %v4765_v58 = vsel %vm593_vm2, %v11776_v3, 0.0 }
 0xa61   :  { %v11930_v57 = vsel %vm4642_vm4, %v4610_v52, %v4674_v63  ;;  %v6177_v52 = vmul.f32 %v11514_v17, %v11703_v33  ;;  %v6158_v33 = vmul.f32 %v11514_v17, %v11748_v59  ;;  %v6164_v59 = vmul.f32 %v11514_v17, %v11765_v13 }
 0xa62   :  { %v11932_v39 = vsel %vm4641_vm3, %v4609_v11, %v4673_v34  ;;  %v11940_v20 = vmul.f32 %v11621_v45, %v11930_v57  ;;  %v6176_v11 = vmul.f32 %v11514_v17, %v11694_v8  ;;  %v6159_v8 = vmul.f32 %v11514_v17, %v11759_v44 }
 0xa63   :  { %4808 = vadd.xlane.f32.xlu0 %v4807_v28  ;;  %v11896_v28 = vmul.f32 %v11621_v45, %v11872_v27  ;;  %v11936_v54 = vmul.f32 %v11621_v45, %v11932_v39  ;;  %v6181_v45 = vmul.f32 %v11514_v17, %v11706_v50  ;;  %v4819_v50 = vsel %vm593_vm2, %v11714_v12, 0.0 }
 0xa64   :  { %v4831_v44 = vsel %vm593_vm2, %v11722_v2, 0.0  ;;  %v4822_v13 = vsel %vm593_vm2, %v11728_v18, 0.0  ;;  %v6179_v12 = vmul.f32 %v11514_v17, %v11811_v24  ;;  %v6183_v2 = vmul.f32 %v11514_v17, %v11819_v35 }
 0xa65   :  { %v6182_v18 = vmul.f32 %v11514_v17, %v11822_v30  ;;  %v6185_v24 = vmul.f32 %v11514_v17, %v11825_v15  ;;  %v4768_v35 = vsel %vm593_vm2, %v11786_v43, 0.0  ;;  %v4783_v30 = vsel %vm593_vm2, %v11790_v53, 0.0 }
 0xa66   :  { %v4786_v3 = vsel %vm593_vm2, %v11799_v55, 0.0  ;;  %v6162_v43 = vmul.f32 %v11514_v17, %v11869_v22  ;;  %v6167_v53 = vmul.f32 %v11514_v17, %v11882_v46  ;;  %v6169_v55 = vmul.f32 %v11514_v17, %v11887_v21 }
 0xa67   :  { %v6168_v15 = vmul.f32 %v11514_v17, %v11875_v1  ;;  %v4825_v46 = vsel %vm593_vm2, %v11844_v41, 0.0  ;;  %v4828_v22 = vsel %vm593_vm2, %v11852_v60, 0.0  ;;  %v4840_v1 = vsel %vm593_vm2, %v11860_v23, 0.0 }
 0xa68   :  { %v4846_v41 = vsel %vm593_vm2, %v11864_v14, 0.0  ;;  %v6186_v60 = vmul.f32 %v11514_v17, %v11912_v31  ;;  %v4789_v31 = vsel %vm593_vm2, %v11896_v28, 0.0  ;;  %v4798_v28 = vsel %vm593_vm2, %v11916_v9, 0.0 }
 0xa6b   :  { %4811 = vadd.xlane.f32.xlu1 %v4810_v61  ;;  %v6175_v61 = vmul.f32 %v11514_v17, %v11698_v48  ;;  %v4759_v48 = vsel %vm593_vm2, %v11684_v36, 0.0  ;;  %v6165_v36 = vmul.f32 %v11514_v17, %v11770_v26  ;;  %v4771_v26 = vsel %vm593_vm2, %v11782_v56, 0.0 }
 0xa6c   :  { %v6163_v56 = vmul.f32 %v11514_v17, %v11835_v7  ;;  %v4837_v7 = vsel %vm593_vm2, %v11848_v0, 0.0  ;;  %v6187_v0 = vmul.f32 %v11514_v17, %v11910_v32  ;;  %v4777_v32 = vsel %vm593_vm2, %v11892_v29, 0.0 }
 0xa6d   :  { %v4792_v29 = vsel %vm593_vm2, %v11908_v51, 0.0  ;;  %v6170_v51 = vmul.f32 %v11514_v17, %v11932_v39 }
 0xa79   :  { %6258 = vrot.lane.b32.xlu0 %v6175_v61, %s9188_s1 }
 0xa7c   :  { %6256 = vrot.lane.b32.xlu1 %v6174_v47, %s9188_s1  ;;  %v4762_v47 = vsel %vm593_vm2, %v11681_v40, 0.0  ;;  %v6160_v40 = vmul.f32 %v11514_v17, %v11754_v42  ;;  %v4816_v42 = vsel %vm593_vm2, %v11718_v38, 0.0  ;;  %v6178_v38 = vmul.f32 %v11514_v17, %v11814_v10 }
 0xa7d   :  { %6262 = vrot.lane.b32.xlu0 %v6177_v52, %s9188_s1  ;;  %v6184_v10 = vmul.f32 %v11514_v17, %v11827_v4  ;;  %v4774_v4 = vsel %vm593_vm2, %v11794_v6, 0.0  ;;  %v6166_v6 = vmul.f32 %v11514_v17, %v11872_v27  ;;  %v4843_v27 = vsel %vm593_vm2, %v11856_v49, 0.0 }
 0xa80   :  { %6260 = vrot.lane.b32.xlu1 %v6176_v11, %s9188_s1 }
 0xa81   :  { %6270 = vrot.lane.b32.xlu0 %v6181_v45, %s9188_s1  ;;  %v14086_v45 = vld [vmem:[#allocation88_spill] sm:$0xff] }
 0xa84   :  { %6268 = vrot.lane.b32.xlu1 %v6180_v5, %s9188_s1  ;;  %v4780_v5 = vsel %vm593_vm2, %v14086_v45, 0.0 }
 0xaa0   :  { %4763 = vadd.xlane.f32.xlu0 %v4762_v47  ;;  %v14087_v47 = vld [vmem:[#allocation91_spill] sm:$0xff] }
 0xaa8   :  { %4760 = vadd.xlane.f32.xlu1 %v4759_v48  ;;  %v4795_v48 = vsel %vm593_vm2, %v14087_v47, 0.0 }
 0xab2   :  { %v6255_v63 = vpop.permute.xlu0 %6254 }
 0xab5   :  { %v6253_v49 = vpop.permute.xlu1 %6252 }
 0xab6   :  { %6226 = vrot.lane.b32.xlu0 %v6159_v8, %s9188_s1  ;;  %v12062_v23 = vpop.permute.xlu0 %6222 }
 0xab9   :  { %6224 = vrot.lane.b32.xlu1 %v6158_v33, %s9188_s1  ;;  %v6221_v21 = vpop.permute.xlu1 %6220 }
 0xaba   :  { %6230 = vrot.lane.b32.xlu0 %v6161_v16, %s9188_s1 }
 0xabd   :  { %6228 = vrot.lane.b32.xlu1 %v6160_v40, %s9188_s1 }
 0xabe   :  { %6238 = vrot.lane.b32.xlu0 %v6165_v36, %s9188_s1 }
 0xac1   :  { %6236 = vrot.lane.b32.xlu1 %v6164_v59, %s9188_s1 }
 0xadd   :  { %4814 = vadd.xlane.f32.xlu0 %v4813_v25 }
 0xae1   :  { %4820 = vadd.xlane.f32.xlu0 %v4819_v50 }
 0xae5   :  { %4817 = vadd.xlane.f32.xlu1 %v4816_v42  ;;  %4832 = vadd.xlane.f32.xlu0 %v4831_v44  ;;  %v6171_v42 = vmul.f32 %v11514_v17, %v11930_v57 }
 0xae9   :  { %4823 = vadd.xlane.f32.xlu1 %v4822_v13 }
 0xaed   :  { %4835 = vadd.xlane.f32.xlu1 %v4834_v19 }
 0xaf0   :  { %v12064_v14 = vpop.xlane.xlu0 %4808 }
 0xaf4   :  { %v6259_v11 = vpop.permute.xlu0 %6258 }
 0xaf8   :  { %v12060_v34 = vpop.xlane.xlu1 %4811  ;;  %v6263_v33 = vpop.permute.xlu0 %6262 }
 0xafb   :  { %6266 = vrot.lane.b32.xlu0 %v6179_v12, %s9188_s1 }
 0xafc   :  { %v6257_v61 = vpop.permute.xlu1 %6256  ;;  %v6271_v40 = vpop.permute.xlu0 %6270 }
 0xafe   :  { %6264 = vrot.lane.b32.xlu1 %v6178_v38, %s9188_s1 }
 0xaff   :  { %6274 = vrot.lane.b32.xlu0 %v6183_v2, %s9188_s1 }
 0xb00   :  { %v6261_v52 = vpop.permute.xlu1 %6260 }
 0xb02   :  { %6272 = vrot.lane.b32.xlu1 %v6182_v18, %s9188_s1 }
 0xb03   :  { %6278 = vrot.lane.b32.xlu0 %v6185_v24, %s9188_s1 }
 0xb04   :  { %v6269_v8 = vpop.permute.xlu1 %6268 }
 0xb06   :  { %6276 = vrot.lane.b32.xlu1 %v6184_v10, %s9188_s1  ;;  %v4849_v10 = vsel %vm593_vm2, %v11924_v37, 0.0 }
 0xb22   :  { %4766 = vadd.xlane.f32.xlu0 %v4765_v58  ;;  %v4801_v58 = vsel %vm593_vm2, %v11936_v54, 0.0 }
 0xb26   :  { %4772 = vadd.xlane.f32.xlu0 %v4771_v26 }
 0xb2a   :  { %4769 = vadd.xlane.f32.xlu1 %v4768_v35  ;;  %4784 = vadd.xlane.f32.xlu0 %v4783_v30  ;;  %v4852_v30 = vsel %vm593_vm2, %v11928_v62, 0.0  ;;  %v6370_v62 = vsel %vm593_vm2, %v6257_v61, 0.0 }
 0xb2d   :  { %v12080_v59 = vpop.xlane.xlu0 %4763 }
 0xb2e   :  { %4775 = vadd.xlane.f32.xlu1 %v4774_v4  ;;  %v6364_v4 = vsel %vm593_vm2, %v6253_v49, 0.0 }
 0xb31   :  { %v6227_v50 = vpop.permute.xlu0 %6226 }
 0xb32   :  { %4787 = vadd.xlane.f32.xlu1 %v4786_v3 }
 0xb35   :  { %v12076_v16 = vpop.xlane.xlu1 %4760  ;;  %v6231_v13 = vpop.permute.xlu0 %6230 }
 0xb39   :  { %v6225_v36 = vpop.permute.xlu1 %6224  ;;  %v12090_v19 = vpop.permute.xlu0 %6238 }
 0xb3d   :  { %v6229_v25 = vpop.permute.xlu1 %6228 }
 0xb3e   :  { %v6328_v49 = vsel %vm593_vm2, %v6229_v25, 0.0 }
 0xb40   :  { %6234 = vrot.lane.b32.xlu0 %v6163_v56, %s9188_s1  ;;  %v4804_v56 = vsel %vm593_vm2, %v11940_v20, 0.0  ;;  %v6376_v20 = vsel %vm593_vm2, %v6261_v52, 0.0  ;;  %v6331_v52 = vsel %vm593_vm2, %v6231_v13, 0.0 }
 0xb41   :  { %v6237_v44 = vpop.permute.xlu1 %6236 }
 0xb42   :  { %v6340_v61 = vsel %vm593_vm2, %v6237_v44, 0.0 }
 0xb43   :  { %6232 = vrot.lane.b32.xlu1 %v6162_v43, %s9188_s1  ;;  %v6316_v43 = vsel %vm593_vm2, %v6221_v21, 0.0 }
 0xb44   :  { %6242 = vrot.lane.b32.xlu0 %v6167_v53, %s9188_s1  ;;  %v6367_v53 = vsel %vm593_vm2, %v6255_v63, 0.0 }
 0xb47   :  { %6240 = vrot.lane.b32.xlu1 %v6166_v6, %s9188_s1 }
 0xb48   :  { %6246 = vrot.lane.b32.xlu0 %v6169_v55, %s9188_s1  ;;  %v6319_v55 = vsel %vm593_vm2, %v12062_v23, 0.0  ;;  %v6325_v23 = vsel %vm593_vm2, %v6227_v50, 0.0 }
 0xb4b   :  { %6244 = vrot.lane.b32.xlu1 %v6168_v15, %s9188_s1 }
 0xb67   :  { %4826 = vadd.xlane.f32.xlu0 %v4825_v46 }
 0xb6a   :  { %v12094_v38 = vpop.xlane.xlu0 %4814 }
 0xb6b   :  { %4838 = vadd.xlane.f32.xlu0 %v4837_v7  ;;  %v6373_v7 = vsel %vm593_vm2, %v6259_v11, 0.0 }
 0xb6e   :  { %v12098_v57 = vpop.xlane.xlu0 %4820 }
 0xb6f   :  { %4829 = vadd.xlane.f32.xlu1 %v4828_v22  ;;  %4844 = vadd.xlane.f32.xlu0 %v4843_v27  ;;  %v6388_v22 = vsel %vm593_vm2, %v6269_v8, 0.0 }
 0xb72   :  { %v12088_v9 = vpop.xlane.xlu1 %4817  ;;  %v12100_v24 = vpop.xlane.xlu0 %4832 }
 0xb73   :  { %4841 = vadd.xlane.f32.xlu1 %v4840_v1  ;;  %v6379_v1 = vsel %vm593_vm2, %v6263_v33, 0.0 }
 0xb76   :  { %v12092_v12 = vpop.xlane.xlu1 %4823  ;;  %v6267_v39 = vpop.permute.xlu0 %6266 }
 0xb77   :  { %4847 = vadd.xlane.f32.xlu1 %v4846_v41  ;;  %v6385_v8 = vsel %vm593_vm2, %v6267_v39, 0.0 }
 0xb7a   :  { %v12096_v2 = vpop.xlane.xlu1 %4835  ;;  %v6275_v35 = vpop.permute.xlu0 %6274 }
 0xb7e   :  { %v6265_v18 = vpop.permute.xlu1 %6264  ;;  %v6279_v37 = vpop.permute.xlu0 %6278 }
 0xb7f   :  { %v6382_v11 = vsel %vm593_vm2, %v6265_v18, 0.0  ;;  %v6403_v50 = vsel %vm593_vm2, %v6279_v37, 0.0 }
 0xb82   :  { %v6273_v17 = vpop.permute.xlu1 %6272 }
 0xb83   :  { %v6394_v47 = vsel %vm593_vm2, %v6273_v17, 0.0 }
 0xb85   :  { %6282 = vrot.lane.b32.xlu0 %v6187_v0, %s9188_s1  ;;  %v6322_v0 = vsel %vm593_vm2, %v6225_v36, 0.0 }
 0xb86   :  { %v6277_v26 = vpop.permute.xlu1 %6276 }
 0xb87   :  { %v6400_v33 = vsel %vm593_vm2, %v6277_v26, 0.0 }
 0xb88   :  { %6280 = vrot.lane.b32.xlu1 %v6186_v60, %s9188_s1  ;;  %v6391_v60 = vsel %vm593_vm2, %v6271_v40, 0.0  ;;  %v6397_v40 = vsel %vm593_vm2, %v6275_v35, 0.0 }
 0xba4   :  { %4778 = vadd.xlane.f32.xlu0 %v4777_v32 }
 0xba8   :  { %4790 = vadd.xlane.f32.xlu0 %v4789_v31 }
 0xbac   :  { %4781 = vadd.xlane.f32.xlu1 %v4780_v5  ;;  %4796 = vadd.xlane.f32.xlu0 %v4795_v48  ;;  %v6343_v5 = vsel %vm593_vm2, %v12090_v19, 0.0 }
 0xbaf   :  { %v12117_v6 = vpop.xlane.xlu0 %4766 }
 0xbb0   :  { %4793 = vadd.xlane.f32.xlu1 %v4792_v29 }
 0xbb3   :  { %v12125_v46 = vpop.xlane.xlu0 %4772 }
 0xbb4   :  { %4799 = vadd.xlane.f32.xlu1 %v4798_v28 }
 0xbb7   :  { %v12109_v3 = vpop.xlane.xlu1 %4769  ;;  %v12130_v41 = vpop.xlane.xlu0 %4784 }
 0xbbb   :  { %v12114_v54 = vpop.xlane.xlu1 %4775  ;;  %v6235_v63 = vpop.permute.xlu0 %6234 }
 0xbbc   :  { %v6337_v44 = vsel %vm593_vm2, %v6235_v63, 0.0 }
 0xbbf   :  { %v12123_v15 = vpop.xlane.xlu1 %4787  ;;  %v6243_v31 = vpop.permute.xlu0 %6242 }
 0xbc0   :  { %v6349_v17 = vsel %vm593_vm2, %v6243_v31, 0.0  ;;  %v14101_v31 = vld [vmem:[#allocation31_spill] sm:$0xff] }
 0xbc2   :  { %6250 = vrot.lane.b32.xlu0 %v6171_v42, %s9188_s1 }
 0xbc3   :  { %v6233_v27 = vpop.permute.xlu1 %6232  ;;  %v6247_v48 = vpop.permute.xlu0 %6246 }
 0xbc4   :  { %v6334_v36 = vsel %vm593_vm2, %v6233_v27, 0.0  ;;  %v14089_v27 = vld [vmem:[#allocation27_spill] sm:$0xff] }
 0xbc5   :  { %6248 = vrot.lane.b32.xlu1 %v6170_v51, %s9188_s1 }
 0xbc7   :  { %v6241_v21 = vpop.permute.xlu1 %6240 }
 0xbc8   :  { %v6346_v51 = vsel %vm593_vm2, %v6241_v21, 0.0 }
 0xbcb   :  { %v6245_v32 = vpop.permute.xlu1 %6244 }
 0xbcc   :  { %v6352_v13 = vsel %vm593_vm2, %v6245_v32, 0.0  ;;  %v14098_v32 = vld [vmem:[#allocation29_spill] sm:$0xff] }
 0xbe1   :  { %4850 = vadd.xlane.f32.xlu0 %v4849_v10  ;;  %v6355_v10 = vsel %vm593_vm2, %v6247_v48, 0.0  ;;  %v14108_v48 = vld [vmem:[#allocation43_spill] sm:$0xff] }
 0xbe5   :  { %4802 = vadd.xlane.f32.xlu0 %v4801_v58 }
 0xbe9   :  { %4853 = vadd.xlane.f32.xlu1 %v4852_v30  ;;  %6365 = vadd.xlane.f32.xlu0 %v6364_v4 }
 0xbed   :  { %4805 = vadd.xlane.f32.xlu1 %v4804_v56  ;;  %6317 = vadd.xlane.f32.xlu0 %v6316_v43 }
 0xbf1   :  { %6368 = vadd.xlane.f32.xlu1 %v6367_v53  ;;  %6371 = vadd.xlane.f32.xlu0 %v6370_v62 }
 0xbf4   :  { %v12148_v28 = vpop.xlane.xlu0 %4826 }
 0xbf5   :  { %6320 = vadd.xlane.f32.xlu1 %v6319_v55  ;;  %6377 = vadd.xlane.f32.xlu0 %v6376_v20 }
 0xbf8   :  { %v12155_v42 = vpop.xlane.xlu0 %4838 }
 0xbf9   :  { %6374 = vadd.xlane.f32.xlu1 %v6373_v7  ;;  %6389 = vadd.xlane.f32.xlu0 %v6388_v22  ;;  %v14088_v7 = vld [vmem:[#allocation33_spill] sm:$0xff] }
 0xbfa   :  { %v12176_v22 = vadd.f32 %v12064_v14, %v14088_v7  ;;  %v14093_v14 = vld [vmem:[#allocation39_spill] sm:$0xff] }
 0xbfb   :  { %v12195_v63 = vadd.f32 %v12098_v57, %v14093_v14 }
 0xbfc   :  { %v12139_v45 = vpop.xlane.xlu1 %4829  ;;  %v4845_v18 = vpop.xlane.xlu0 %4844 }
 0xbfd   :  { %6380 = vadd.xlane.f32.xlu1 %v6379_v1  ;;  %6323 = vadd.xlane.f32.xlu0 %v6322_v0  ;;  %v12181_v1 = vadd.f32 %v12080_v59, %v14089_v27  ;;  %v14091_v0 = vld [vmem:[#allocation35_spill] sm:$0xff]  ;;  %v14094_v59 = vld [vmem:[#allocation28_spill] sm:$0xff] }
 0xbff   :  { %14090 = vst [vmem:[#allocation82_spill] sm:$0xff] %v12181_v1 }
 0xc00   :  { %v12146_v29 = vpop.xlane.xlu1 %4841  ;;  %v6283_v58 = vpop.permute.xlu0 %6282 }
 0xc01   :  { %6392 = vadd.xlane.f32.xlu1 %v6391_v60  ;;  %6329 = vadd.xlane.f32.xlu0 %v6328_v49  ;;  %v6409_v26 = vsel %vm593_vm2, %v6283_v58, 0.0  ;;  %v12186_v60 = vadd.f32 %v12094_v38, %v14091_v0  ;;  %v14092_v49 = vld [vmem:[#allocation34_spill] sm:$0xff]  ;;  %v14096_v38 = vld [vmem:[#allocation47_spill] sm:$0xff] }
 0xc02   :  { %v12191_v21 = vadd.f32 %v12060_v34, %v14092_v49  ;;  %v14097_v34 = vld [vmem:[#allocation36_spill] sm:$0xff] }
 0xc03   :  { %v12211_v57 = vadd.f32 %v12088_v9, %v14097_v34  ;;  %v14103_v9 = vld [vmem:[#allocation48_spill] sm:$0xff] }
 0xc04   :  { %v12152_v25 = vpop.xlane.xlu1 %4847 }
 0xc05   :  { %6326 = vadd.xlane.f32.xlu1 %v6325_v23  ;;  %6341 = vadd.xlane.f32.xlu0 %v6340_v61  ;;  %v12201_v23 = vadd.f32 %v12076_v16, %v14094_v59  ;;  %v12205_v61 = vadd.f32 %v12100_v24, %v14096_v38  ;;  %v14100_v16 = vld [vmem:[#allocation40_spill] sm:$0xff] }
 0xc06   :  { %v12221_v24 = vadd.f32 %v12092_v12, %v14100_v16  ;;  %v14106_v12 = vld [vmem:[#allocation30_spill] sm:$0xff] }
 0xc07   :  { %14095 = vst [vmem:[#allocation81_spill] sm:$0xff] %v12201_v23 }
 0xc08   :  { %v6281_v19 = vpop.permute.xlu1 %6280 }
 0xc09   :  { %6332 = vadd.xlane.f32.xlu1 %v6331_v52  ;;  %6383 = vadd.xlane.f32.xlu0 %v6382_v11  ;;  %v6406_v39 = vsel %vm593_vm2, %v6281_v19, 0.0  ;;  %v12215_v52 = vadd.f32 %v12117_v6, %v14098_v32  ;;  %v12225_v11 = vadd.f32 %v12125_v46, %v14101_v31  ;;  %v12231_v6 = vadd.f32 %v12096_v2, %v14103_v9  ;;  %v14109_v2 = vld [vmem:[#allocation32_spill] sm:$0xff] }
 0xc0a   :  { %v12241_v46 = vadd.f32 %v12109_v3, %v14106_v12 }
 0xc0b   :  { %14099 = vst [vmem:[#allocation90_spill] sm:$0xff] %v12215_v52  ;;  %14102 = vst [vmem:[#allocation93_spill] sm:$0xff] %v12225_v11 }
 0xc0c   :  { %14107 = vst [vmem:[#allocation95_spill] sm:$0xff] %v12241_v46 }
 0xc0d   :  { %6344 = vadd.xlane.f32.xlu1 %v6343_v5  ;;  %6395 = vadd.xlane.f32.xlu0 %v6394_v47  ;;  %v14104_v5 = vld [vmem:[#allocation41_spill] sm:$0xff] }
 0xc0e   :  { %v12235_v47 = vadd.f32 %v12130_v41, %v14104_v5  ;;  %v12251_v41 = vadd.f32 %v12114_v54, %v14109_v2 }
 0xc10   :  { %14105 = vst [vmem:[#allocation92_spill] sm:$0xff] %v12235_v47  ;;  %14110 = vst [vmem:[#allocation100_spill] sm:$0xff] %v12251_v41 }
 0xc11   :  { %6386 = vadd.xlane.f32.xlu1 %v6385_v8  ;;  %6401 = vadd.xlane.f32.xlu0 %v6400_v33  ;;  %v12245_v8 = vadd.f32 %v12148_v28, %v14108_v48  ;;  %v14112_v28 = vld [vmem:[#allocation42_spill] sm:$0xff] }
 0xc15   :  { %6398 = vadd.xlane.f32.xlu1 %v6397_v40  ;;  %6335 = vadd.xlane.f32.xlu0 %v6334_v36  ;;  %v14111_v40 = vld [vmem:[#allocation51_spill] sm:$0xff] }
 0xc16   :  { %v12255_v36 = vadd.f32 %v12155_v42, %v14111_v40  ;;  %v14116_v42 = vld [vmem:[#allocation44_spill] sm:$0xff] }
 0xc19   :  { %6404 = vadd.xlane.f32.xlu1 %v6403_v50  ;;  %6347 = vadd.xlane.f32.xlu0 %v6346_v51  ;;  %v12261_v51 = vadd.f32 %v12123_v15, %v14112_v28 }
 0xc1b   :  { %14113 = vst [vmem:[#allocation102_spill] sm:$0xff] %v12261_v51 }
 0xc1d   :  { %6338 = vadd.xlane.f32.xlu1 %v6337_v44  ;;  %6353 = vadd.xlane.f32.xlu0 %v6352_v13  ;;  %v14114_v44 = vld [vmem:[#allocation55_spill] sm:$0xff] }
 0xc1e   :  { %v12264_v13 = vadd.f32 %v4845_v18, %v14114_v44  ;;  %v14119_v18 = vld [vmem:[#allocation52_spill] sm:$0xff] }
 0xc20   :  { %14115 = vst [vmem:[#allocation76_spill] sm:$0xff] %v12264_v13 }
 0xc21   :  { %6350 = vadd.xlane.f32.xlu1 %v6349_v17  ;;  %6407 = vadd.xlane.f32.xlu0 %v6406_v39  ;;  %v12270_v17 = vadd.f32 %v12139_v45, %v14116_v42  ;;  %v14117_v39 = vld [vmem:[#allocation37_spill] sm:$0xff] }
 0xc25   :  { %6356 = vadd.xlane.f32.xlu1 %v6355_v10 }
 0xc29   :  { %6410 = vadd.xlane.f32.xlu1 %v6409_v26  ;;  %v12279_v26 = vadd.f32 %v12146_v29, %v14119_v18 }
 0xc31   :  { %v4779_v35 = vpop.xlane.xlu0 %4778 }
 0xc32   :  { %v12273_v10 = vadd.f32 %v4779_v35, %v14117_v39  ;;  %v14122_v35 = vld [vmem:[#allocation56_spill] sm:$0xff] }
 0xc34   :  { %14118 = vst [vmem:[#allocation75_spill] sm:$0xff] %v12273_v10 }
 0xc35   :  { %v4791_v30 = vpop.xlane.xlu0 %4790 }
 0xc39   :  { %v12164_v4 = vpop.xlane.xlu1 %4781  ;;  %v12166_v56 = vpop.xlane.xlu0 %4796 }
 0xc3d   :  { %v12168_v37 = vpop.xlane.xlu1 %4793  ;;  %v6251_v43 = vpop.permute.xlu0 %6250 }
 0xc3e   :  { %v6361_v53 = vsel %vm593_vm2, %v6251_v43, 0.0  ;;  %v14120_v43 = vld [vmem:[#allocation45_spill] sm:$0xff] }
 0xc3f   :  { %6362 = vadd.xlane.f32.xlu1 %v6361_v53  ;;  %v12282_v53 = vadd.f32 %v4791_v30, %v14120_v43  ;;  %v14126_v30 = vld [vmem:[#allocation38_spill] sm:$0xff] }
 0xc41   :  { %v12171_v62 = vpop.xlane.xlu1 %4799  ;;  %14121 = vst [vmem:[#allocation84_spill] sm:$0xff] %v12282_v53 }
 0xc45   :  { %v6249_v55 = vpop.permute.xlu1 %6248 }
 0xc46   :  { %v6358_v20 = vsel %vm593_vm2, %v6249_v55, 0.0 }
 0xc47   :  { %6359 = vadd.xlane.f32.xlu0 %v6358_v20  ;;  %v12288_v20 = vadd.f32 %v12152_v25, %v14122_v35 }
 0xc49   :  { %14123 = vst [vmem:[#allocation87_spill] sm:$0xff] %v12288_v20 }
 0xc50   :  { %4968 = vperm.xlu1 %8641, %v12176_v22  }
 0xc54   :  { %4923 = vperm.xlu1 %8641, %v12181_v1   ;;  %v14134_v1 = vld [vmem:[#allocation50_spill] sm:$0xff] }
 0xc58   :  { %4974 = vperm.xlu1 %8641, %v12186_v60  }
 0xc5c   :  { %4980 = vperm.xlu1 %8641, %v12195_v63  }
 0xc5d   :  { %4971 = vperm.xlu0 %8642, %v12191_v21  }
 0xc60   :  { %4992 = vperm.xlu1 %8641, %v12205_v61  }
 0xc61   :  { %4920 = vperm.xlu0 %8642, %v12201_v23   ;;  %v14132_v23 = vld [vmem:[#allocation53_spill] sm:$0xff] }
 0xc64   :  { %4926 = vperm.xlu1 %8641, %v12215_v52  }
 0xc65   :  { %4977 = vperm.xlu0 %8642, %v12211_v57  }
 0xc68   :  { %4932 = vperm.xlu1 %8641, %v12225_v11  }
 0xc69   :  { %4983 = vperm.xlu0 %8642, %v12221_v24  }
 0xc6c   :  { %4944 = vperm.xlu1 %8641, %v12235_v47  }
 0xc6d   :  { %4995 = vperm.xlu0 %8642, %v12231_v6  }
 0xc6e   :  { %v4851_v33 = vpop.xlane.xlu0 %4850 }
 0xc70   :  { %4986 = vperm.xlu1 %8641, %v12245_v8  }
 0xc71   :  { %4929 = vperm.xlu0 %8642, %v12241_v46  }
 0xc72   :  { %v4803_v50 = vpop.xlane.xlu0 %4802 }
 0xc74   :  { %4998 = vperm.xlu1 %8641, %v12255_v36  }
 0xc75   :  { %4935 = vperm.xlu0 %8642, %v12251_v41   ;;  %v12298_v41 = vadd.f32 %v12164_v4, %v14126_v30 }
 0xc76   :  { %v4854_v3 = vpop.xlane.xlu1 %4853  ;;  %v6366_v19 = vpop.xlane.xlu0 %6365 }
 0xc77   :  { %14127 = vst [vmem:[#allocation94_spill] sm:$0xff] %v12298_v41 }
 0xc78   :  { %5004 = vperm.xlu1 %8641, %v12264_v13  }
 0xc79   :  { %4947 = vperm.xlu0 %8642, %v12261_v51   ;;  %v14124_v51 = vld [vmem:[#allocation49_spill] sm:$0xff] }
 0xc7a   :  { %v4806_v54 = vpop.xlane.xlu1 %4805  ;;  %v6318_v58 = vpop.xlane.xlu0 %6317  ;;  %v12292_v47 = vadd.f32 %v12166_v56, %v14124_v51  ;;  %v14130_v56 = vld [vmem:[#allocation46_spill] sm:$0xff] }
 0xc7b   :  { %v12307_v52 = vadd.f32 %v12168_v37, %v14130_v56  ;;  %v14135_v37 = vld [vmem:[#allocation58_spill] sm:$0xff] }
 0xc7c   :  { %4938 = vperm.xlu1 %8641, %v12273_v10   ;;  %14125 = vst [vmem:[#allocation83_spill] sm:$0xff] %v12292_v47 }
 0xc7d   :  { %4989 = vperm.xlu0 %8642, %v12270_v17   ;;  %14131 = vst [vmem:[#allocation86_spill] sm:$0xff] %v12307_v52 }
 0xc7e   :  { %v6369_v15 = vpop.xlane.xlu1 %6368  ;;  %v6372_v55 = vpop.xlane.xlu0 %6371 }
 0xc80   :  { %4950 = vperm.xlu1 %8641, %v12282_v53   ;;  %v14128_v53 = vld [vmem:[#allocation57_spill] sm:$0xff] }
 0xc81   :  { %5001 = vperm.xlu0 %8642, %v12279_v26   ;;  %v12301_v11 = vadd.f32 %v4851_v33, %v14128_v53 }
 0xc82   :  { %v6321_v45 = vpop.xlane.xlu1 %6320  ;;  %v6378_v10 = vpop.xlane.xlu0 %6377 }
 0xc83   :  { %14129 = vst [vmem:[#allocation85_spill] sm:$0xff] %v12301_v11 }
 0xc84   :  { %4956 = vperm.xlu1 %8641, %v12292_v47   ;;  %v12310_v47 = vadd.f32 %v4803_v50, %v14132_v23  ;;  %v12324_v50 = vadd.f32 %v4854_v3, %v14135_v37 }
 0xc85   :  { %5007 = vperm.xlu0 %8642, %v12288_v20   ;;  %v12316_v20 = vadd.f32 %v12171_v62, %v14134_v1  ;;  %v14137_v62 = vld [vmem:[#allocation54_spill] sm:$0xff] }
 0xc86   :  { %v6375_v29 = vpop.xlane.xlu1 %6374  ;;  %v6390_v46 = vpop.xlane.xlu0 %6389  ;;  %14133 = vst [vmem:[#allocation97_spill] sm:$0xff] %v12310_v47  ;;  %v12332_v13 = vadd.f32 %v4806_v54, %v14137_v62  ;;  %v12348_v54 = vadd.f32 %v6321_v45, %v14089_v27 }
 0xc88   :  { %5010 = vperm.xlu1 %8641, %v12301_v11   ;;  %14138 = vst [vmem:[#allocation89_spill] sm:$0xff] %v12348_v54 }
 0xc89   :  { %4941 = vperm.xlu0 %8642, %v12298_v41   ;;  %v12319_v41 = vadd.f32 %v6366_v19, %v14088_v7  ;;  %v12335_v7 = vadd.f32 %v6372_v55, %v14091_v0  ;;  %v12351_v0 = vadd.f32 %v6390_v46, %v14096_v38 }
 0xc8a   :  { %v6381_v25 = vpop.xlane.xlu1 %6380  ;;  %v6324_v4 = vpop.xlane.xlu0 %6323 }
 0xc8b   :  { %14139 = vst [vmem:[#allocation98_spill] sm:$0xff] %v12351_v0  ;;  %v12364_v38 = vadd.f32 %v6381_v25, %v14100_v16 }
 0xc8c   :  { %4962 = vperm.xlu1 %8641, %v12310_v47  }
 0xc8d   :  { %4953 = vperm.xlu0 %8642, %v12307_v52   ;;  %v12327_v52 = vadd.f32 %v6318_v58, %v14094_v59  ;;  %v12340_v59 = vadd.f32 %v6369_v15, %v14092_v49  ;;  %v12343_v58 = vadd.f32 %v6378_v10, %v14093_v14  ;;  %v12356_v49 = vadd.f32 %v6375_v29, %v14097_v34 }
 0xc8e   :  { %v6393_v33 = vpop.xlane.xlu1 %6392  ;;  %v6330_v11 = vpop.xlane.xlu0 %6329  ;;  %v12359_v14 = vadd.f32 %v6324_v4, %v14098_v32 }
 0xc8f   :  { %14136 = vst [vmem:[#allocation96_spill] sm:$0xff] %v12327_v52  ;;  %v12367_v46 = vadd.f32 %v6330_v11, %v14101_v31  ;;  %v12372_v34 = vadd.f32 %v6393_v33, %v14103_v9 }
 0xc90   :  { %6525 = vperm.xlu1 %8641, %v12319_v41   ;;  %14140 = vst [vmem:[#allocation99_spill] sm:$0xff] %v12359_v14 }
 0xc91   :  { %4959 = vperm.xlu0 %8642, %v12316_v20   ;;  %14141 = vst [vmem:[#allocation103_spill] sm:$0xff] %v12367_v46  ;;  %14142 = vst [vmem:[#allocation101_spill] sm:$0xff] %v12372_v34 }
 0xc92   :  { %v6327_v47 = vpop.xlane.xlu1 %6326  ;;  %v6342_v3 = vpop.xlane.xlu0 %6341 }
 0xc93   :  { %v12375_v32 = vadd.f32 %v6342_v3, %v14104_v5  ;;  %v12380_v16 = vadd.f32 %v6327_v47, %v14106_v12 }
 0xc94   :  { %6477 = vperm.xlu1 %8641, %v12327_v52  }
 0xc95   :  { %5013 = vperm.xlu0 %8642, %v12324_v50   ;;  %14143 = vst [vmem:[#allocation73_spill] sm:$0xff] %v12375_v32  ;;  %14144 = vst [vmem:[#allocation105_spill] sm:$0xff] %v12380_v16 }
 0xc96   :  { %v6333_v19 = vpop.xlane.xlu1 %6332  ;;  %v6384_v52 = vpop.xlane.xlu0 %6383 }
 0xc97   :  { %v12383_v31 = vadd.f32 %v6384_v52, %v14108_v48  ;;  %v12388_v5 = vadd.f32 %v6333_v19, %v14109_v2 }
 0xc98   :  { %6531 = vperm.xlu1 %8641, %v12335_v7  }
 0xc99   :  { %4965 = vperm.xlu0 %8642, %v12332_v13   ;;  %14145 = vst [vmem:[#allocation63_spill] sm:$0xff] %v12388_v5 }
 0xc9a   :  { %v6345_v55 = vpop.xlane.xlu1 %6344  ;;  %v6396_v27 = vpop.xlane.xlu0 %6395 }
 0xc9b   :  { %v12391_v29 = vadd.f32 %v6396_v27, %v14111_v40  ;;  %v12396_v47 = vadd.f32 %v6345_v55, %v14112_v28 }
 0xc9c   :  { %6537 = vperm.xlu1 %8641, %v12343_v58  }
 0xc9d   :  { %6528 = vperm.xlu0 %8642, %v12340_v59   ;;  %14146 = vst [vmem:[#allocation26_spill] sm:$0xff] %v12391_v29  ;;  %14147 = vst [vmem:[#allocation68_spill] sm:$0xff] %v12396_v47 }
 0xc9e   :  { %v6387_v10 = vpop.xlane.xlu1 %6386  ;;  %v6402_v45 = vpop.xlane.xlu0 %6401 }
 0xc9f   :  { %v12399_v52 = vadd.f32 %v6402_v45, %v14114_v44  ;;  %v12404_v2 = vadd.f32 %v6387_v10, %v14116_v42 }
 0xca0   :  { %6549 = vperm.xlu1 %8641, %v12351_v0  }
 0xca1   :  { %6480 = vperm.xlu0 %8642, %v12348_v54   ;;  %14148 = vst [vmem:[#allocation67_spill] sm:$0xff] %v12399_v52 }
 0xca2   :  { %v6399_v15 = vpop.xlane.xlu1 %6398  ;;  %v6336_v9 = vpop.xlane.xlu0 %6335 }
 0xca3   :  { %v12407_v40 = vadd.f32 %v6336_v9, %v14117_v39  ;;  %v12412_v44 = vadd.f32 %v6399_v15, %v14119_v18 }
 0xca4   :  { %6483 = vperm.xlu1 %8641, %v12359_v14   ;;  %v14162_v14 = vld [vmem:[#allocation117_spill] sm:$0xff] }
 0xca5   :  { %6534 = vperm.xlu0 %8642, %v12356_v49   ;;  %14149 = vst [vmem:[#allocation72_spill] sm:$0xff] %v12407_v40  ;;  %14150 = vst [vmem:[#allocation74_spill] sm:$0xff] %v12412_v44 }
 0xca6   :  { %v6405_v11 = vpop.xlane.xlu1 %6404  ;;  %v6348_v48 = vpop.xlane.xlu0 %6347 }
 0xca7   :  { %v12415_v4 = vadd.f32 %v6348_v48, %v14120_v43  ;;  %v12420_v42 = vadd.f32 %v6405_v11, %v14122_v35 }
 0xca8   :  { %6489 = vperm.xlu1 %8641, %v12367_v46  }
 0xca9   :  { %6540 = vperm.xlu0 %8642, %v12364_v38   ;;  %14151 = vst [vmem:[#allocation25_spill] sm:$0xff] %v12415_v4  ;;  %14152 = vst [vmem:[#allocation61_spill] sm:$0xff] %v12420_v42 }
 0xcaa   :  { %v6339_v12 = vpop.xlane.xlu1 %6338  ;;  %v6354_v28 = vpop.xlane.xlu0 %6353 }
 0xcab   :  { %v12423_v39 = vadd.f32 %v6354_v28, %v14124_v51  ;;  %v12428_v18 = vadd.f32 %v6339_v12, %v14126_v30 }
 0xcac   :  { %6501 = vperm.xlu1 %8641, %v12375_v32  }
 0xcad   :  { %6552 = vperm.xlu0 %8642, %v12372_v34   ;;  %14153 = vst [vmem:[#allocation60_spill] sm:$0xff] %v12423_v39  ;;  %14154 = vst [vmem:[#allocation59_spill] sm:$0xff] %v12428_v18 }
 0xcae   :  { %v6351_v25 = vpop.xlane.xlu1 %6350  ;;  %v6408_v19 = vpop.xlane.xlu0 %6407 }
 0xcaf   :  { %v12431_v43 = vadd.f32 %v6408_v19, %v14128_v53  ;;  %v12436_v51 = vadd.f32 %v6351_v25, %v14130_v56 }
 0xcb0   :  { %6543 = vperm.xlu1 %8641, %v12383_v31  }
 0xcb1   :  { %6486 = vperm.xlu0 %8642, %v12380_v16   ;;  %14155 = vst [vmem:[#allocation64_spill] sm:$0xff] %v12431_v43  ;;  %14156 = vst [vmem:[#allocation78_spill] sm:$0xff] %v12436_v51 }
 0xcb2   :  { %v6357_v33 = vpop.xlane.xlu1 %6356 }
 0xcb3   :  { %v12440_v55 = vadd.f32 %v6357_v33, %v14134_v1 }
 0xcb4   :  { %6555 = vperm.xlu1 %8641, %v12391_v29  }
 0xcb5   :  { %6492 = vperm.xlu0 %8642, %v12388_v5   ;;  %14157 = vst [vmem:[#allocation66_spill] sm:$0xff] %v12440_v55 }
 0xcb6   :  { %v6411_v3 = vpop.xlane.xlu1 %6410 }
 0xcb7   :  { %v12444_v53 = vadd.f32 %v6411_v3, %v14135_v37 }
 0xcb8   :  { %6561 = vperm.xlu1 %8641, %v12399_v52  }
 0xcb9   :  { %6504 = vperm.xlu0 %8642, %v12396_v47   ;;  %14158 = vst [vmem:[#allocation69_spill] sm:$0xff] %v12444_v53 }
 0xcbc   :  { %6495 = vperm.xlu1 %8641, %v12407_v40  }
 0xcbd   :  { %6546 = vperm.xlu0 %8642, %v12404_v2  }
 0xcc0   :  { %6507 = vperm.xlu1 %8641, %v12415_v4  }
 0xcc1   :  { %6558 = vperm.xlu0 %8642, %v12412_v44  }
 0xcc4   :  { %6513 = vperm.xlu1 %8641, %v12423_v39  }
 0xcc5   :  { %6564 = vperm.xlu0 %8642, %v12420_v42  }
 0xcc8   :  { %6567 = vperm.xlu1 %8641, %v12431_v43  }
 0xcc9   :  { %6498 = vperm.xlu0 %8642, %v12428_v18   ;;  %v14161_v18 = vld [vmem:[#allocation116_spill] sm:$0xff] }
 0xccc   :  { %v6363_v35 = vpop.xlane.xlu1 %6362 }
 0xccd   :  { %6510 = vperm.xlu0 %8642, %v12436_v51   ;;  %v12453_v15 = vadd.f32 %v6363_v35, %v14137_v62 }
 0xccf   :  { %14160 = vst [vmem:[#allocation71_spill] sm:$0xff] %v12453_v15 }
 0xcd0   :  { %v4969_v30 = vpop.permute.xlu1 %4968 }
 0xcd1   :  { %6516 = vperm.xlu0 %8642, %v12440_v55   ;;  %v5090_v54 = vrot.slane %v4969_v30, %v14162_v14 }
 0xcd4   :  { %v6360_v10 = vpop.xlane.xlu0 %6359  ;;  %v12450_v56 = vpop.permute.xlu1 %4923 }
 0xcd5   :  { %v12447_v27 = vadd.f32 %v6360_v10, %v14132_v23  ;;  %6570 = vperm.xlu0 %8642, %v12444_v53   ;;  %v5022_v42 = vrot.slane %v12450_v56, %v14161_v18 }
 0xcd7   :  { %14159 = vst [vmem:[#allocation70_spill] sm:$0xff] %v12447_v27  ;;  %6519 = vperm.xlu1 %8641, %v12447_v27  }
 0xcd8   :  { %v4975_v1 = vpop.permute.xlu1 %4974 }
 0xcd9   :  { %6522 = vperm.xlu0 %8642, %v12453_v15   ;;  %v5099_v53 = vrot.slane %v4975_v1, %v14162_v14 }
 0xcdc   :  { %v4972_v45 = vpop.permute.xlu0 %4971  ;;  %v4981_v11 = vpop.permute.xlu1 %4980 }
 0xcdd   :  { %v5094_v40 = vrot.slane %v4972_v45, %v14161_v18  ;;  %v5108_v52 = vrot.slane %v4981_v11, %v14162_v14 }
 0xcdf   :  { %v5095_v45 = vsel %vm1071_vm5, %v5094_v40, %v5090_v54 }
 0xce0   :  { %v4921_v37 = vpop.permute.xlu0 %4920  ;;  %v4993_v9 = vpop.permute.xlu1 %4992 }
 0xce1   :  { %v5018_v1 = vrot.slane %v4921_v37, %v14162_v14  ;;  %v5126_v40 = vrot.slane %v4993_v9, %v14162_v14 }
 0xce4   :  { %v4978_v12 = vpop.permute.xlu0 %4977  ;;  %v4927_v48 = vpop.permute.xlu1 %4926 }
 0xce5   :  { %v5103_v5 = vrot.slane %v4978_v12, %v14161_v18 }
 0xce7   :  { %v5104_v12 = vsel %vm1071_vm5, %v5103_v5, %v5099_v53 }
 0xce8   :  { %v4984_v23 = vpop.permute.xlu0 %4983  ;;  %v4933_v25 = vpop.permute.xlu1 %4932  ;;  %v5166_v53 = vsel %vm1208_vm6, %v5104_v12, %v5095_v45 }
 0xce9   :  { %v5112_v16 = vrot.slane %v4984_v23, %v14161_v18 }
 0xceb   :  { %v5113_v56 = vsel %vm1071_vm5, %v5112_v16, %v5108_v52 }
 0xcec   :  { %v4996_v28 = vpop.permute.xlu0 %4995  ;;  %v12457_v33 = vpop.permute.xlu1 %4944  ;;  %v5167_v16 = vsel %vm1210_vm7, %v5113_v56, %v5166_v53 }
 0xced   :  { %v5130_v11 = vrot.slane %v4996_v28, %v14161_v18  ;;  %v5054_v56 = vrot.slane %v12457_v33, %v14162_v14 }
 0xcef   :  { %v5131_v9 = vsel %vm1071_vm5, %v5130_v11, %v5126_v40 }
 0xcf0   :  { %v4930_v19 = vpop.permute.xlu0 %4929  ;;  %v4987_v3 = vpop.permute.xlu1 %4986 }
 0xcf1   :  { %v5031_v44 = vrot.slane %v4930_v19, %v14161_v18  ;;  %v5117_v23 = vrot.slane %v4987_v3, %v14162_v14  ;;  %v5036_v19 = vrot.slane %v4933_v25, %v14162_v14 }
 0xcf4   :  { %v4936_v62 = vpop.permute.xlu0 %4935  ;;  %v4999_v35 = vpop.permute.xlu1 %4998 }
 0xcf5   :  { %v5040_v30 = vrot.slane %v4936_v62, %v14161_v18  ;;  %v5135_v25 = vrot.slane %v4999_v35, %v14162_v14 }
 0xcf7   :  { %v5041_v52 = vsel %vm1071_vm5, %v5040_v30, %v5036_v19 }
 0xcf8   :  { %v12459_v10 = vpop.permute.xlu0 %4947  ;;  %v5005_v27 = vpop.permute.xlu1 %5004 }
 0xcf9   :  { %v5144_v28 = vrot.slane %v5005_v27, %v14162_v14  ;;  %v5058_v12 = vrot.slane %v12459_v10, %v14161_v18 }
 0xcfc   :  { %v4990_v15 = vpop.permute.xlu0 %4989  ;;  %v4939_v55 = vpop.permute.xlu1 %4938 }
 0xcfd   :  { %v5121_v43 = vrot.slane %v4990_v15, %v14161_v18  ;;  %v5027_v15 = vrot.slane %v4927_v48, %v14162_v14 }
 0xcff   :  { %v5122_v0 = vsel %vm1071_vm5, %v5121_v43, %v5117_v23  ;;  %v5032_v37 = vsel %vm1071_vm5, %v5031_v44, %v5027_v15  ;;  %v5045_v43 = vrot.slane %v4939_v55, %v14162_v14 }
 0xd00   :  { %v5002_v39 = vpop.permute.xlu0 %5001  ;;  %v4951_v51 = vpop.permute.xlu1 %4950  ;;  %v5168_v44 = vsel %vm1212_vm8, %v5122_v0, %v5167_v16 }
 0xd01   :  { %v5139_v54 = vrot.slane %v5002_v39, %v14161_v18  ;;  %v5063_v0 = vrot.slane %v4951_v51, %v14162_v14 }
 0xd03   :  { %v5140_v62 = vsel %vm1071_vm5, %v5139_v54, %v5135_v25 }
 0xd04   :  { %v5008_v4 = vpop.permute.xlu0 %5007  ;;  %v12461_v47 = vpop.permute.xlu1 %4956 }
 0xd05   :  { %v5148_v48 = vrot.slane %v5008_v4, %v14161_v18  ;;  %v5072_v10 = vrot.slane %v12461_v47, %v14162_v14 }
 0xd08   :  { %v4942_v32 = vpop.permute.xlu0 %4941  ;;  %v5011_v46 = vpop.permute.xlu1 %5010 }
 0xd09   :  { %v5049_v5 = vrot.slane %v4942_v32, %v14161_v18  ;;  %v5023_v32 = vsel %vm1071_vm5, %v5022_v42, %v5018_v1  ;;  %v5149_v42 = vsel %vm1071_vm5, %v5148_v48, %v5144_v28  ;;  %v5153_v30 = vrot.slane %v5011_v46, %v14162_v14 }
 0xd0a   :  { %v5159_v4 = vsel %vm1208_vm6, %v5032_v37, %v5023_v32 }
 0xd0b   :  { %v5050_v45 = vsel %vm1071_vm5, %v5049_v5, %v5045_v43  ;;  %v5160_v55 = vsel %vm1210_vm7, %v5041_v52, %v5159_v4  ;;  %v5059_v5 = vsel %vm1071_vm5, %v5058_v12, %v5054_v56 }
 0xd0c   :  { %v4954_v29 = vpop.permute.xlu0 %4953  ;;  %v4963_v34 = vpop.permute.xlu1 %4962  ;;  %v5161_v11 = vsel %vm1212_vm8, %v5050_v45, %v5160_v55 }
 0xd0d   :  { %v5067_v35 = vrot.slane %v4954_v29, %v14161_v18  ;;  %v5169_v29 = vsel %vm1214_vm9, %v5131_v9, %v5168_v44  ;;  %v5081_v37 = vrot.slane %v4963_v34, %v14162_v14  ;;  %v5162_v16 = vsel %vm1214_vm9, %v5059_v5, %v5161_v11 }
 0xd0e   :  { %v5170_v19 = vsel %vm1216_vm10, %v5140_v62, %v5169_v29 }
 0xd0f   :  { %v5068_v51 = vsel %vm1071_vm5, %v5067_v35, %v5063_v0  ;;  %v5171_v54 = vsel %vm1218_vm11, %v5149_v42, %v5170_v19 }
 0xd10   :  { %v4960_v3 = vpop.permute.xlu0 %4959  ;;  %v12493_v39 = vpop.permute.xlu1 %6525  ;;  %v5163_v52 = vsel %vm1216_vm10, %v5068_v51, %v5162_v16 }
 0xd11   :  { %v5076_v23 = vrot.slane %v4960_v3, %v14161_v18 }
 0xd13   :  { %v5077_v40 = vsel %vm1071_vm5, %v5076_v23, %v5072_v10 }
 0xd14   :  { %v5014_v27 = vpop.permute.xlu0 %5013  ;;  %v12511_v15 = vpop.permute.xlu1 %6477  ;;  %v5164_v43 = vsel %vm1218_vm11, %v5077_v40, %v5163_v52 }
 0xd15   :  { %v5157_v1 = vrot.slane %v5014_v27, %v14161_v18 }
 0xd17   :  { %v5158_v46 = vsel %vm1071_vm5, %v5157_v1, %v5153_v30 }
 0xd18   :  { %v4966_v53 = vpop.permute.xlu0 %4965  ;;  %v5172_v33 = vsel %vm1220_vm12, %v5158_v46, %v5171_v54  ;;  %v6532_v3 = vpop.permute.xlu1 %6531 }
 0xd19   :  { %v5085_v47 = vrot.slane %v4966_v53, %v14161_v18  ;;  %v5178_v48 = vsel %vm593_vm2, %v5172_v33, -inf  ;;  %v6647_v53 = vrot.slane %v12493_v39, %v14162_v14  ;;  %v6656_v33 = vrot.slane %v6532_v3, %v14162_v14 }
 0xd1a   :  { %5179 = vmax.xlane.f32.xlu0 %v5178_v48 }
 0xd1b   :  { %v5086_v25 = vsel %vm1071_vm5, %v5085_v47, %v5081_v37  ;;  %v6575_v47 = vrot.slane %v12511_v15, %v14162_v14 }
 0xd1c   :  { %v6529_v32 = vpop.permute.xlu0 %6528  ;;  %v5165_v9 = vsel %vm1220_vm12, %v5086_v25, %v5164_v43  ;;  %v6538_v34 = vpop.permute.xlu1 %6537 }
 0xd1d   :  { %v5175_v28 = vsel %vm593_vm2, %v5165_v9, -inf  ;;  %v6651_v54 = vrot.slane %v6529_v32, %v14161_v18  ;;  %v6665_v48 = vrot.slane %v6538_v34, %v14162_v14 }
 0xd1e   :  { %5176 = vmax.xlane.f32.xlu1 %v5175_v28 }
 0xd1f   :  { %v6652_v43 = vsel %vm1071_vm5, %v6651_v54, %v6647_v53 }
 0xd20   :  { %v6481_v44 = vpop.permute.xlu0 %6480  ;;  %v6550_v4 = vpop.permute.xlu1 %6549 }
 0xd21   :  { %v6579_v3 = vrot.slane %v6481_v44, %v14161_v18 }
 0xd24   :  { %v6535_v62 = vpop.permute.xlu0 %6534  ;;  %v6484_v45 = vpop.permute.xlu1 %6483 }
 0xd25   :  { %v6660_v5 = vrot.slane %v6535_v62, %v14161_v18  ;;  %v6584_v28 = vrot.slane %v6484_v45, %v14162_v14 }
 0xd27   :  { %v6661_v32 = vsel %vm1071_vm5, %v6660_v5, %v6656_v33 }
 0xd28   :  { %v6541_v35 = vpop.permute.xlu0 %6540  ;;  %v6490_v55 = vpop.permute.xlu1 %6489 }
 0xd29   :  { %v6669_v40 = vrot.slane %v6541_v35, %v14161_v18  ;;  %v6593_v62 = vrot.slane %v6490_v55, %v14162_v14 }
 0xd2b   :  { %v6670_v15 = vsel %vm1071_vm5, %v6669_v40, %v6665_v48 }
 0xd2c   :  { %v6553_v12 = vpop.permute.xlu0 %6552  ;;  %v12535_v42 = vpop.permute.xlu1 %6501 }
 0xd2d   :  { %v6687_v34 = vrot.slane %v6553_v12, %v14161_v18 }
 0xd30   :  { %v6487_v23 = vpop.permute.xlu0 %6486  ;;  %v6544_v27 = vpop.permute.xlu1 %6543 }
 0xd31   :  { %v6588_v16 = vrot.slane %v6487_v23, %v14161_v18  ;;  %v6674_v9 = vrot.slane %v6544_v27, %v14162_v14  ;;  %v6683_v27 = vrot.slane %v6550_v4, %v14162_v14 }
 0xd33   :  { %v6589_v44 = vsel %vm1071_vm5, %v6588_v16, %v6584_v28 }
 0xd34   :  { %v6493_v0 = vpop.permute.xlu0 %6492  ;;  %v6556_v30 = vpop.permute.xlu1 %6555 }
 0xd35   :  { %v6597_v39 = vrot.slane %v6493_v0, %v14161_v18  ;;  %v6723_v0 = vsel %vm1208_vm6, %v6661_v32, %v6652_v43  ;;  %v6692_v55 = vrot.slane %v6556_v30, %v14162_v14 }
 0xd36   :  { %v6724_v5 = vsel %vm1210_vm7, %v6670_v15, %v6723_v0 }
 0xd37   :  { %v6598_v12 = vsel %vm1071_vm5, %v6597_v39, %v6593_v62 }
 0xd38   :  { %v12537_v1 = vpop.permute.xlu0 %6504  ;;  %v6562_v29 = vpop.permute.xlu1 %6561 }
 0xd39   :  { %v6701_v4 = vrot.slane %v6562_v29, %v14162_v14 }
 0xd3c   :  { %v6547_v56 = vpop.permute.xlu0 %6546  ;;  %v6496_v10 = vpop.permute.xlu1 %6495 }
 0xd3d   :  { %v6678_v37 = vrot.slane %v6547_v56, %v14161_v18  ;;  %v6602_v40 = vrot.slane %v6496_v10, %v14162_v14  ;;  %v6615_v10 = vrot.slane %v12537_v1, %v14161_v18 }
 0xd3f   :  { %v6679_v35 = vsel %vm1071_vm5, %v6678_v37, %v6674_v9 }
 0xd40   :  { %v6559_v11 = vpop.permute.xlu0 %6558  ;;  %v6508_v51 = vpop.permute.xlu1 %6507  ;;  %v6725_v53 = vsel %vm1212_vm8, %v6679_v35, %v6724_v5 }
 0xd41   :  { %v6696_v23 = vrot.slane %v6559_v11, %v14161_v18  ;;  %v6580_v11 = vsel %vm1071_vm5, %v6579_v3, %v6575_v47  ;;  %v6620_v32 = vrot.slane %v6508_v51, %v14162_v14 }
 0xd43   :  { %v6697_v37 = vsel %vm1071_vm5, %v6696_v23, %v6692_v55 }
 0xd44   :  { %v6565_v19 = vpop.permute.xlu0 %6564  ;;  %v6514_v52 = vpop.permute.xlu1 %6513 }
 0xd45   :  { %v6705_v45 = vrot.slane %v6565_v19, %v14161_v18  ;;  %v6716_v19 = vsel %vm1208_vm6, %v6589_v44, %v6580_v11  ;;  %v6629_v28 = vrot.slane %v6514_v52, %v14162_v14 }
 0xd46   :  { %v6717_v30 = vsel %vm1210_vm7, %v6598_v12, %v6716_v19 }
 0xd47   :  { %v6706_v47 = vsel %vm1071_vm5, %v6705_v45, %v6701_v4 }
 0xd48   :  { %v6499_v46 = vpop.permute.xlu0 %6498  ;;  %v6568_v33 = vpop.permute.xlu1 %6567 }
 0xd49   :  { %v6606_v56 = vrot.slane %v6499_v46, %v14161_v18  ;;  %v6688_v46 = vsel %vm1071_vm5, %v6687_v34, %v6683_v27  ;;  %v6710_v9 = vrot.slane %v6568_v33, %v14162_v14 }
 0xd4a   :  { %v6726_v3 = vsel %vm1214_vm9, %v6688_v46, %v6725_v53  ;;  %v14163_v46 = vld [vmem:[#allocation12_spill] sm:$0xff]  ;;  %v14164_v53 = vld [vmem:[#allocation13_spill] sm:$0xff] }
 0xd4b   :  { %v6607_v48 = vsel %vm1071_vm5, %v6606_v56, %v6602_v40  ;;  %v6727_v34 = vsel %vm1216_vm10, %v6697_v37, %v6726_v3 }
 0xd4c   :  { %v6511_v25 = vpop.permute.xlu0 %6510  ;;  %v6718_v1 = vsel %vm1212_vm8, %v6607_v48, %v6717_v30  ;;  %v6728_v35 = vsel %vm1218_vm11, %v6706_v47, %v6727_v34  ;;  %v14165_v48 = vld [vmem:[#allocation14_spill] sm:$0xff] }
 0xd4d   :  { %v6624_v16 = vrot.slane %v6511_v25, %v14161_v18  ;;  %v6611_v25 = vrot.slane %v12535_v42, %v14162_v14 }
 0xd4f   :  { %v6625_v62 = vsel %vm1071_vm5, %v6624_v16, %v6620_v32  ;;  %v6616_v23 = vsel %vm1071_vm5, %v6615_v10, %v6611_v25  ;;  %v14167_v25 = vld [vmem:[#allocation16_spill] sm:$0xff] }
 0xd50   :  { %v6517_v54 = vpop.permute.xlu0 %6516  ;;  %v6719_v45 = vsel %vm1214_vm9, %v6616_v23, %v6718_v1 }
 0xd51   :  { %v6633_v29 = vrot.slane %v6517_v54, %v14161_v18  ;;  %v6720_v54 = vsel %vm1216_vm10, %v6625_v62, %v6719_v45  ;;  %v14171_v45 = vld [vmem:[#allocation76_spill] sm:$0xff] }
 0xd53   :  { %v6634_v56 = vsel %vm1071_vm5, %v6633_v29, %v6629_v28 }
 0xd54   :  { %v6571_v43 = vpop.permute.xlu0 %6570  ;;  %v6721_v12 = vsel %vm1218_vm11, %v6634_v56, %v6720_v54 }
 0xd55   :  { %v6714_v39 = vrot.slane %v6571_v43, %v14161_v18  ;;  %v14166_v43 = vld [vmem:[#allocation15_spill] sm:$0xff] }
 0xd56   :  { %v6520_v15 = vpop.permute.xlu1 %6519 }
 0xd57   :  { %v6715_v51 = vsel %vm1071_vm5, %v6714_v39, %v6710_v9  ;;  %v6638_v52 = vrot.slane %v6520_v15, %v14162_v14  ;;  %v14168_v15 = vld [vmem:[#allocation17_spill] sm:$0xff] }
 0xd58   :  { %v6523_v27 = vpop.permute.xlu0 %6522  ;;  %v6729_v42 = vsel %vm1220_vm12, %v6715_v51, %v6728_v35 }
 0xd59   :  { %v6642_v0 = vrot.slane %v6523_v27, %v14161_v18  ;;  %v6735_v44 = vsel %vm593_vm2, %v6729_v42, -inf }
 0xd5a   :  { %6736 = vmax.xlane.f32.xlu1 %v6735_v44 }
 0xd5b   :  { %v6643_v5 = vsel %vm1071_vm5, %v6642_v0, %v6638_v52  ;;  %v14170_v0 = vld [vmem:[#allocation19_spill] sm:$0xff] }
 0xd5c   :  { %v6722_v55 = vsel %vm1220_vm12, %v6643_v5, %v6721_v12  ;;  %v14172_v5 = vld [vmem:[#allocation87_spill] sm:$0xff] }
 0xd5d   :  { %v6732_v40 = vsel %vm593_vm2, %v6722_v55, -inf }
 0xd5e   :  { %6733 = vmax.xlane.f32.xlu0 %v6732_v40 }
 0xda7   :  { %v5180_v11 = vpop.xlane.xlu0 %5179 }
 0xda8   :  { %v5218_v4 = vrot.slane %v5180_v11, %v14163_v46  ;;  %v5222_v33 = vrot.slane %v5180_v11, %v14164_v53  ;;  %v5226_v16 = vrot.slane %v5180_v11, %v14165_v48  ;;  %v5230_v32 = vrot.slane %v5180_v11, %v14166_v43 }
 0xda9   :  { %v5238_v34 = vrot.slane %v5180_v11, %v14168_v15  ;;  %v5246_v44 = vrot.slane %v5180_v11, %v14170_v0 }
 0xdaa   :  { %v5279_v19 = vsub.f32 %v12176_v22, %v5218_v4  ;;  %v5280_v37 = vsub.f32 %v12191_v21, %v5218_v4  ;;  %v5281_v30 = vsub.f32 %v12186_v60, %v5222_v33  ;;  %v5282_v10 = vsub.f32 %v12211_v57, %v5222_v33  ;;  %v14173_v33 = vld [vmem:[#allocation85_spill] sm:$0xff] }
 0xdab   :  { %v5283_v9 = vsub.f32 %v12195_v63, %v5226_v16  ;;  %v5284_v3 = vsub.f32 %v12221_v24, %v5226_v16  ;;  %v5234_v21 = vrot.slane %v5180_v11, %v14167_v25  ;;  %v5285_v28 = vsub.f32 %v12245_v8, %v5230_v32  ;;  %v14169_v8 = vld [vmem:[#allocation18_spill] sm:$0xff]  ;;  %v12641_v55 = vpop.xlane.xlu1 %5176 }
 0xdac   :  { %v5327_v47 = vmul.f32 1.442695, %v5279_v19  ;;  %v5329_v29 = vmul.f32 1.442695, %v5280_v37  ;;  %v5331_v39 = vmul.f32 1.442695, %v5281_v30  ;;  %v5286_v57 = vsub.f32 %v12270_v17, %v5230_v32 }
 0xdad   :  { %v5333_v22 = vmul.f32 1.442695, %v5282_v10  ;;  %v5335_v60 = vmul.f32 1.442695, %v5283_v9  ;;  %v5337_v1 = vmul.f32 1.442695, %v5284_v3  ;;  %v5287_v63 = vsub.f32 %v12205_v61, %v5234_v21 }
 0xdae   :  { %8905 = vpow2.f32 %v5327_v47  ;;  %v5339_v62 = vmul.f32 1.442695, %v5285_v28  ;;  %v5288_v24 = vsub.f32 %v12231_v6, %v5234_v21  ;;  %v5341_v51 = vmul.f32 1.442695, %v5286_v57  ;;  %v14174_v9 = vld [vmem:[#allocation82_spill] sm:$0xff] }
 0xdaf   :  { %8907 = vpow2.f32 %v5329_v29  ;;  %v5242_v17 = vrot.slane %v5180_v11, %v14169_v8  ;;  %v5289_v56 = vsub.f32 %v12255_v36, %v5238_v34  ;;  %v5343_v27 = vmul.f32 1.442695, %v5287_v63  ;;  %v14176_v57 = vld [vmem:[#allocation90_spill] sm:$0xff]  ;;  %v14177_v63 = vld [vmem:[#allocation95_spill] sm:$0xff] }
 0xdb0   :  { %8909 = vpow2.f32 %v5331_v39  ;;  %v5290_v61 = vsub.f32 %v12279_v26, %v5238_v34  ;;  %v5345_v6 = vmul.f32 1.442695, %v5288_v24  ;;  %v5293_v11 = vsub.f32 %v14173_v33, %v5246_v44 }
 0xdb1   :  { %8911 = vpow2.f32 %v5333_v22  ;;  %v5291_v54 = vsub.f32 %v14171_v45, %v5242_v17  ;;  %v5347_v36 = vmul.f32 1.442695, %v5289_v56  ;;  %v5292_v12 = vsub.f32 %v14172_v5, %v5242_v17 }
 0xdb2   :  { %8913 = vpow2.f32 %v5335_v60  ;;  %v5349_v26 = vmul.f32 1.442695, %v5290_v61  ;;  %v5186_v37 = vrot.slane %v12641_v55, %v14163_v46  ;;  %v5294_v16 = vsub.f32 %v12324_v50, %v5246_v44  ;;  %v14175_v50 = vld [vmem:[#allocation81_spill] sm:$0xff]  ;;  %v14179_v44 = vld [vmem:[#allocation100_spill] sm:$0xff] }
 0xdb3   :  { %8915 = vpow2.f32 %v5337_v1  ;;  %v5351_v19 = vmul.f32 1.442695, %v5291_v54  ;;  %v5353_v30 = vmul.f32 1.442695, %v5292_v12  ;;  %v5355_v29 = vmul.f32 1.442695, %v5293_v11 }
 0xdb4   :  { %8917 = vpow2.f32 %v5339_v62  ;;  %v5190_v32 = vrot.slane %v12641_v55, %v14164_v53  ;;  %v5264_v39 = vsub.f32 %v14174_v9, %v5186_v37  ;;  %v5357_v3 = vmul.f32 1.442695, %v5294_v16  ;;  %v14182_v9 = vld [vmem:[#allocation92_spill] sm:$0xff] }
 0xdb5   :  { %8919 = vpow2.f32 %v5341_v51  ;;  %v5263_v22 = vsub.f32 %v14175_v50, %v5186_v37  ;;  %v5194_v60 = vrot.slane %v12641_v55, %v14165_v48  ;;  %v5198_v56 = vrot.slane %v12641_v55, %v14166_v43  ;;  %v14183_v50 = vld [vmem:[#allocation102_spill] sm:$0xff] }
 0xdb6   :  { %8921 = vpow2.f32 %v5343_v27  ;;  %v5265_v1 = vsub.f32 %v14176_v57, %v5190_v32  ;;  %v5297_v34 = vmul.f32 1.442695, %v5264_v39  ;;  %v5266_v62 = vsub.f32 %v14177_v63, %v5190_v32  ;;  %v14178_v27 = vld [vmem:[#allocation93_spill] sm:$0xff]  ;;  %v14184_v63 = vld [vmem:[#allocation84_spill] sm:$0xff] }
 0xdb7   :  { %8923 = vpow2.f32 %v5345_v6  ;;  %v5295_v24 = vmul.f32 1.442695, %v5263_v22  ;;  %v5267_v61 = vsub.f32 %v14178_v27, %v5194_v60  ;;  %v5268_v45 = vsub.f32 %v14179_v44, %v5194_v60 }
 0xdb8   :  { %v12623_v35 = vpop.eup %8905  ;;  %8925 = vpow2.f32 %v5347_v36  ;;  %v5299_v6 = vmul.f32 1.442695, %v5265_v1  ;;  %v5301_v54 = vmul.f32 1.442695, %v5266_v62  ;;  %v5202_v12 = vrot.slane %v12641_v55, %v14167_v25 }
 0xdb9   :  { %v12625_v23 = vpop.eup %8907  ;;  %5440 = vperm.xlu1 %8641, %v12623_v35   ;;  %8927 = vpow2.f32 %v5349_v26  ;;  %v14180_v26 = vld [vmem:[#allocation75_spill] sm:$0xff]  ;;  %v5303_v11 = vmul.f32 1.442695, %v5267_v61  ;;  %v5305_v16 = vmul.f32 1.442695, %v5268_v45  ;;  %v5206_v32 = vrot.slane %v12641_v55, %v14168_v15 }
 0xdba   :  { %5443 = vperm.xlu0 %8642, %v12625_v23   ;;  %v12632_v42 = vpop.eup %8909  ;;  %8929 = vpow2.f32 %v5351_v19  ;;  %v5269_v33 = vsub.f32 %v14180_v26, %v5198_v56  ;;  %v14181_v19 = vld [vmem:[#allocation94_spill] sm:$0xff]  ;;  %v5271_v39 = vsub.f32 %v14182_v9, %v5202_v12  ;;  %v5272_v22 = vsub.f32 %v14183_v50, %v5202_v12 }
 0xdbb   :  { %v12634_v52 = vpop.eup %8911  ;;  %8931 = vpow2.f32 %v5353_v30  ;;  %v5270_v37 = vsub.f32 %v14181_v19, %v5198_v56  ;;  %v5273_v62 = vsub.f32 %v14184_v63, %v5206_v32  ;;  %v14185_v56 = vld [vmem:[#allocation86_spill] sm:$0xff]  ;;  %v5214_v45 = vrot.slane %v12641_v55, %v14170_v0 }
 0xdbc   :  { %v12643_v40 = vpop.eup %8913  ;;  %8933 = vpow2.f32 %v5355_v29  ;;  %v5274_v27 = vsub.f32 %v14185_v56, %v5206_v32  ;;  %v5313_v61 = vmul.f32 1.442695, %v5272_v22 }
 0xdbd   :  { %5446 = vperm.xlu1 %8641, %v12632_v42   ;;  %v12645_v4 = vpop.eup %8915  ;;  %8935 = vpow2.f32 %v5357_v3  ;;  %v5307_v3 = vmul.f32 1.442695, %v5269_v33  ;;  %v5309_v60 = vmul.f32 1.442695, %v5270_v37  ;;  %v5315_v26 = vmul.f32 1.442695, %v5273_v62 }
 0xdbe   :  { %5449 = vperm.xlu0 %8642, %v12634_v52   ;;  %v12653_v10 = vpop.eup %8917  ;;  %8937 = vpow2.f32 %v5297_v34  ;;  %v5210_v34 = vrot.slane %v12641_v55, %v14169_v8  ;;  %v5278_v9 = vsub.f32 %v12332_v13, %v5214_v45 }
 0xdbf   :  { %v12655_v47 = vpop.eup %8919  ;;  %8939 = vpow2.f32 %v5295_v24  ;;  %v5311_v24 = vmul.f32 1.442695, %v5271_v39 }
 0xdc0   :  { %v12663_v21 = vpop.eup %8921  ;;  %8941 = vpow2.f32 %v5299_v6  ;;  %v5276_v33 = vsub.f32 %v12316_v20, %v5210_v34 }
 0xdc1   :  { %5452 = vperm.xlu1 %8641, %v12643_v40   ;;  %v12665_v28 = vpop.eup %8923  ;;  %8943 = vpow2.f32 %v5301_v54  ;;  %v14186_v54 = vld [vmem:[#allocation83_spill] sm:$0xff] }
 0xdc2   :  { %5455 = vperm.xlu0 %8642, %v12645_v4   ;;  %v12673_v51 = vpop.eup %8925  ;;  %8945 = vpow2.f32 %v5303_v11  ;;  %v5275_v12 = vsub.f32 %v14186_v54, %v5210_v34  ;;  %v5317_v11 = vmul.f32 1.442695, %v5274_v27  ;;  %v5321_v39 = vmul.f32 1.442695, %v5276_v33 }
 0xdc3   :  { %v12675_v17 = vpop.eup %8927  ;;  %8947 = vpow2.f32 %v5305_v16  ;;  %v14187_v16 = vld [vmem:[#allocation97_spill] sm:$0xff]  ;;  %v5325_v34 = vmul.f32 1.442695, %v5278_v9 }
 0xdc4   :  { %v12683_v36 = vpop.eup %8929  ;;  %8949 = vpow2.f32 %v5307_v3  ;;  %v5277_v32 = vsub.f32 %v14187_v16, %v5214_v45  ;;  %v5319_v55 = vmul.f32 1.442695, %v5275_v12 }
 0xdc5   :  { %5458 = vperm.xlu1 %8641, %v12653_v10   ;;  %v12685_v5 = vpop.eup %8931  ;;  %8951 = vpow2.f32 %v5309_v60 }
 0xdc6   :  { %5461 = vperm.xlu0 %8642, %v12655_v47   ;;  %v12693_v30 = vpop.eup %8933  ;;  %8953 = vpow2.f32 %v5311_v24  ;;  %v5323_v22 = vmul.f32 1.442695, %v5277_v32 }
 0xdc7   :  { %v12695_v29 = vpop.eup %8935  ;;  %8955 = vpow2.f32 %v5313_v61 }
 0xdc8   :  { %v12703_v57 = vpop.eup %8937  ;;  %8957 = vpow2.f32 %v5315_v26 }
 0xdc9   :  { %5464 = vperm.xlu1 %8641, %v12663_v21   ;;  %v12705_v1 = vpop.eup %8939  ;;  %8959 = vpow2.f32 %v5317_v11 }
 0xdca   :  { %5467 = vperm.xlu0 %8642, %v12665_v28   ;;  %v12713_v6 = vpop.eup %8941  ;;  %8961 = vpow2.f32 %v5319_v55 }
 0xdcb   :  { %v12715_v44 = vpop.eup %8943  ;;  %8963 = vpow2.f32 %v5321_v39 }
 0xdcc   :  { %v12723_v19 = vpop.eup %8945  ;;  %8965 = vpow2.f32 %v5323_v22 }
 0xdcd   :  { %5470 = vperm.xlu1 %8641, %v12673_v51   ;;  %v12725_v37 = vpop.eup %8947  ;;  %8967 = vpow2.f32 %v5325_v34  ;;  %v14189_v34 = vld [vmem:[#allocation98_spill] sm:$0xff] }
 0xdce   :  { %5473 = vperm.xlu0 %8642, %v12675_v17   ;;  %v12731_v3 = vpop.eup %8949 }
 0xdcf   :  { %v12733_v20 = vpop.eup %8951 }
 0xdd0   :  { %v12743_v63 = vpop.eup %8953 }
 0xdd1   :  { %5476 = vperm.xlu1 %8641, %v12683_v36   ;;  %v12747_v56 = vpop.eup %8955 }
 0xdd2   :  { %5479 = vperm.xlu0 %8642, %v12685_v5   ;;  %v12755_v54 = vpop.eup %8957 }
 0xdd5   :  { %5482 = vperm.xlu1 %8641, %v12693_v30  }
 0xdd6   :  { %5485 = vperm.xlu0 %8642, %v12695_v29  }
 0xdd9   :  { %5395 = vperm.xlu1 %8641, %v12703_v57  }
 0xdda   :  { %5392 = vperm.xlu0 %8642, %v12705_v1  }
 0xddd   :  { %5398 = vperm.xlu1 %8641, %v12713_v6  }
 0xdde   :  { %5401 = vperm.xlu0 %8642, %v12715_v44  }
 0xde1   :  { %5404 = vperm.xlu1 %8641, %v12723_v19  }
 0xde2   :  { %5407 = vperm.xlu0 %8642, %v12725_v37  }
 0xde5   :  { %5410 = vperm.xlu1 %8641, %v12731_v3  }
 0xde6   :  { %5413 = vperm.xlu0 %8642, %v12733_v20  }
 0xde7   :  { %v12736_v50 = vpop.xlane.xlu1 %6736 }
 0xde8   :  { %v6775_v60 = vrot.slane %v12736_v50, %v14163_v46  ;;  %v6779_v13 = vrot.slane %v12736_v50, %v14164_v53  ;;  %v6783_v27 = vrot.slane %v12736_v50, %v14165_v48  ;;  %v6787_v26 = vrot.slane %v12736_v50, %v14166_v43 }
 0xde9   :  { %5416 = vperm.xlu1 %8641, %v12743_v63   ;;  %v6791_v55 = vrot.slane %v12736_v50, %v14167_v25 }
 0xdea   :  { %v6836_v62 = vsub.f32 %v12319_v41, %v6775_v60  ;;  %v6837_v24 = vsub.f32 %v12340_v59, %v6775_v60  ;;  %v6838_v61 = vsub.f32 %v12335_v7, %v6779_v13  ;;  %5419 = vperm.xlu0 %8642, %v12747_v56   ;;  %v6839_v45 = vsub.f32 %v12356_v49, %v6779_v13  ;;  %v12757_v59 = vpop.eup %8959 }
 0xdeb   :  { %v6840_v33 = vsub.f32 %v12343_v58, %v6783_v27  ;;  %v6841_v11 = vsub.f32 %v12364_v38, %v6783_v27  ;;  %v12765_v16 = vpop.eup %8961  ;;  %v6842_v9 = vsub.f32 %v12383_v31, %v6787_v26  ;;  %v6843_v39 = vsub.f32 %v12404_v2, %v6787_v26 }
 0xdec   :  { %v6884_v41 = vmul.f32 1.442695, %v6836_v62  ;;  %v6886_v12 = vmul.f32 1.442695, %v6837_v24  ;;  %v6888_v7 = vmul.f32 1.442695, %v6838_v61  ;;  %v12767_v32 = vpop.eup %8963  ;;  %v6795_v13 = vrot.slane %v12736_v50, %v14168_v15 }
 0xded   :  { %5422 = vperm.xlu1 %8641, %v12755_v54   ;;  %v6890_v49 = vmul.f32 1.442695, %v6839_v45  ;;  %v6892_v58 = vmul.f32 1.442695, %v6840_v33  ;;  %v6894_v38 = vmul.f32 1.442695, %v6841_v11  ;;  %v12775_v22 = vpop.eup %8965  ;;  %v6844_v62 = vsub.f32 %v14189_v34, %v6791_v55 }
 0xdee   :  { %8969 = vpow2.f32 %v6884_v41  ;;  %5425 = vperm.xlu0 %8642, %v12757_v59   ;;  %v12777_v60 = vpop.eup %8967  ;;  %v6896_v31 = vmul.f32 1.442695, %v6842_v9  ;;  %v14190_v24 = vld [vmem:[#allocation101_spill] sm:$0xff]  ;;  %v6898_v2 = vmul.f32 1.442695, %v6843_v39  ;;  %v6799_v41 = vrot.slane %v12736_v50, %v14169_v8  ;;  %v14197_v39 = vld [vmem:[#allocation67_spill] sm:$0xff] }
 0xdef   :  { %8971 = vpow2.f32 %v6886_v12  ;;  %14188 = vst [vmem:[#allocation24_spill] sm:$0xff] %v12777_v60  ;;  %v6845_v27 = vsub.f32 %v14190_v24, %v6791_v55  ;;  %v14193_v12 = vld [vmem:[#allocation26_spill] sm:$0xff]  ;;  %v6900_v33 = vmul.f32 1.442695, %v6844_v62  ;;  %v14198_v62 = vld [vmem:[#allocation61_spill] sm:$0xff]  ;;  %v12805_v24 = vpop.xlane.xlu0 %6733 }
 0xdf0   :  { %8973 = vpow2.f32 %v6888_v7  ;;  %v6846_v26 = vsub.f32 %v14193_v12, %v6795_v13  ;;  %v14194_v7 = vld [vmem:[#allocation74_spill] sm:$0xff]  ;;  %v14201_v12 = vld [vmem:[#allocation64_spill] sm:$0xff] }
 0xdf1   :  { %5428 = vperm.xlu1 %8641, %v12765_v16   ;;  %8975 = vpow2.f32 %v6890_v49  ;;  %v6847_v11 = vsub.f32 %v14194_v7, %v6795_v13  ;;  %v6902_v49 = vmul.f32 1.442695, %v6845_v27 }
 0xdf2   :  { %5431 = vperm.xlu0 %8642, %v12767_v32   ;;  %8977 = vpow2.f32 %v6892_v58  ;;  %v6803_v58 = vrot.slane %v12736_v50, %v14170_v0  ;;  %v6904_v34 = vmul.f32 1.442695, %v6846_v26  ;;  %v6743_v26 = vrot.slane %v12805_v24, %v14163_v46 }
 0xdf3   :  { %8979 = vpow2.f32 %v6894_v38  ;;  %v6848_v38 = vsub.f32 %v14197_v39, %v6799_v41  ;;  %v6906_v13 = vmul.f32 1.442695, %v6847_v11 }
 0xdf4   :  { %8981 = vpow2.f32 %v6896_v31  ;;  %v6849_v31 = vsub.f32 %v14198_v62, %v6799_v41  ;;  %v6850_v50 = vsub.f32 %v14201_v12, %v6803_v58  ;;  %v14202_v41 = vld [vmem:[#allocation69_spill] sm:$0xff] }
 0xdf5   :  { %5434 = vperm.xlu1 %8641, %v12775_v22   ;;  %8983 = vpow2.f32 %v6898_v2  ;;  %v6908_v7 = vmul.f32 1.442695, %v6848_v38  ;;  %v6747_v38 = vrot.slane %v12805_v24, %v14164_v53 }
 0xdf6   :  { %5437 = vperm.xlu0 %8642, %v12777_v60   ;;  %8985 = vpow2.f32 %v6900_v33  ;;  %v6851_v33 = vsub.f32 %v14202_v41, %v6803_v58  ;;  %v6910_v11 = vmul.f32 1.442695, %v6849_v31  ;;  %v6912_v62 = vmul.f32 1.442695, %v6850_v50  ;;  %v14206_v58 = vld [vmem:[#allocation89_spill] sm:$0xff] }
 0xdf7   :  { %8987 = vpow2.f32 %v6902_v49  ;;  %v6751_v50 = vrot.slane %v12805_v24, %v14165_v48 }
 0xdf8   :  { %v12785_v61 = vpop.eup %8969  ;;  %8989 = vpow2.f32 %v6904_v34  ;;  %v14205_v34 = vld [vmem:[#allocation96_spill] sm:$0xff] }
 0xdf9   :  { %14191 = vst [vmem:[#allocation104_spill] sm:$0xff] %v12785_v61  ;;  %v12787_v45 = vpop.eup %8971  ;;  %6997 = vperm.xlu1 %8641, %v12785_v61   ;;  %8991 = vpow2.f32 %v6906_v13  ;;  %v6820_v12 = vsub.f32 %v14205_v34, %v6743_v26  ;;  %v6821_v13 = vsub.f32 %v14206_v58, %v6743_v26 }
 0xdfa   :  { %14192 = vst [vmem:[#allocation107_spill] sm:$0xff] %v12787_v45  ;;  %7000 = vperm.xlu0 %8642, %v12787_v45   ;;  %v12795_v55 = vpop.eup %8973  ;;  %8993 = vpow2.f32 %v6908_v7  ;;  %v14209_v7 = vld [vmem:[#allocation99_spill] sm:$0xff] }
 0xdfb   :  { %14195 = vst [vmem:[#allocation23_spill] sm:$0xff] %v12795_v55  ;;  %v12797_v9 = vpop.eup %8975  ;;  %8995 = vpow2.f32 %v6910_v11  ;;  %v14210_v11 = vld [vmem:[#allocation105_spill] sm:$0xff]  ;;  %v6854_v34 = vmul.f32 1.442695, %v6821_v13 }
 0xdfc   :  { %14196 = vst [vmem:[#allocation109_spill] sm:$0xff] %v12797_v9  ;;  %v12807_v27 = vpop.eup %8977  ;;  %8997 = vpow2.f32 %v6912_v62  ;;  %v6755_v62 = vrot.slane %v12805_v24, %v14166_v43 }
 0xdfd   :  { %7003 = vperm.xlu1 %8641, %v12795_v55   ;;  %14199 = vst [vmem:[#allocation106_spill] sm:$0xff] %v12807_v27  ;;  %v12809_v2 = vpop.eup %8979 }
 0xdfe   :  { %7006 = vperm.xlu0 %8642, %v12797_v9   ;;  %14200 = vst [vmem:[#allocation111_spill] sm:$0xff] %v12809_v2  ;;  %v12817_v49 = vpop.eup %8981 }
 0xdff   :  { %14203 = vst [vmem:[#allocation108_spill] sm:$0xff] %v12817_v49  ;;  %v12819_v39 = vpop.eup %8983 }
 0xe00   :  { %14204 = vst [vmem:[#allocation113_spill] sm:$0xff] %v12819_v39  ;;  %v12827_v31 = vpop.eup %8985 }
 0xe01   :  { %7009 = vperm.xlu1 %8641, %v12807_v27   ;;  %v6914_v27 = vmul.f32 1.442695, %v6851_v33  ;;  %14207 = vst [vmem:[#allocation110_spill] sm:$0xff] %v12827_v31  ;;  %v12829_v41 = vpop.eup %8987  ;;  %v6823_v33 = vsub.f32 %v14210_v11, %v6747_v38 }
 0xe02   :  { %7012 = vperm.xlu0 %8642, %v12809_v2   ;;  %14208 = vst [vmem:[#allocation115_spill] sm:$0xff] %v12829_v41  ;;  %v6852_v2 = vmul.f32 1.442695, %v6820_v12  ;;  %v12837_v26 = vpop.eup %8989  ;;  %v14214_v12 = vld [vmem:[#allocation63_spill] sm:$0xff] }
 0xe03   :  { %8999 = vpow2.f32 %v6914_v27  ;;  %14211 = vst [vmem:[#allocation112_spill] sm:$0xff] %v12837_v26  ;;  %v12839_v58 = vpop.eup %8991  ;;  %v6825_v27 = vsub.f32 %v14214_v12, %v6751_v50  ;;  %v6763_v12 = vrot.slane %v12805_v24, %v14168_v15 }
 0xe04   :  { %14212 = vst [vmem:[#allocation118_spill] sm:$0xff] %v12839_v58  ;;  %9001 = vpow2.f32 %v6852_v2  ;;  %v12847_v13 = vpop.eup %8993 }
 0xe05   :  { %7015 = vperm.xlu1 %8641, %v12817_v49   ;;  %v6822_v49 = vsub.f32 %v14209_v7, %v6747_v38  ;;  %9003 = vpow2.f32 %v6854_v34  ;;  %v6858_v38 = vmul.f32 1.442695, %v6823_v33  ;;  %14215 = vst [vmem:[#allocation114_spill] sm:$0xff] %v12847_v13  ;;  %v12849_v11 = vpop.eup %8995 }
 0xe06   :  { %7018 = vperm.xlu0 %8642, %v12819_v39   ;;  %14216 = vst [vmem:[#allocation120_spill] sm:$0xff] %v12849_v11  ;;  %v12857_v33 = vpop.eup %8997 }
 0xe07   :  { %v6856_v7 = vmul.f32 1.442695, %v6822_v49  ;;  %v14218_v49 = vld [vmem:[#allocation59_spill] sm:$0xff]  ;;  %14219 = vst [vmem:[#allocation119_spill] sm:$0xff] %v12857_v33 }
 0xe09   :  { %7021 = vperm.xlu1 %8641, %v12827_v31   ;;  %v14213_v31 = vld [vmem:[#allocation103_spill] sm:$0xff]  ;;  %9005 = vpow2.f32 %v6856_v7 }
 0xe0a   :  { %7024 = vperm.xlu0 %8642, %v12829_v41   ;;  %v6824_v39 = vsub.f32 %v14213_v31, %v6751_v50  ;;  %v14217_v41 = vld [vmem:[#allocation72_spill] sm:$0xff]  ;;  %v6827_v31 = vsub.f32 %v14218_v49, %v6755_v62  ;;  %9007 = vpow2.f32 %v6858_v38  ;;  %v6862_v50 = vmul.f32 1.442695, %v6825_v27 }
 0xe0b   :  { %v6826_v55 = vsub.f32 %v14217_v41, %v6755_v62  ;;  %v6767_v49 = vrot.slane %v12805_v24, %v14169_v8 }
 0xe0c   :  { %v6860_v2 = vmul.f32 1.442695, %v6824_v39  ;;  %v14222_v39 = vld [vmem:[#allocation68_spill] sm:$0xff]  ;;  %v6866_v62 = vmul.f32 1.442695, %v6827_v31 }
 0xe0d   :  { %7027 = vperm.xlu1 %8641, %v12837_v26   ;;  %v6759_v26 = vrot.slane %v12805_v24, %v14167_v25  ;;  %v12859_v34 = vpop.eup %8999  ;;  %v6864_v41 = vmul.f32 1.442695, %v6826_v55  ;;  %v14226_v55 = vld [vmem:[#allocation78_spill] sm:$0xff] }
 0xe0e   :  { %7030 = vperm.xlu0 %8642, %v12839_v58   ;;  %14220 = vst [vmem:[#allocation11_spill] sm:$0xff] %v12859_v34  ;;  %9009 = vpow2.f32 %v6860_v2  ;;  %v12867_v27 = vpop.eup %9001  ;;  %v6831_v2 = vsub.f32 %v14226_v55, %v6763_v12  ;;  %v14233_v55 = vld [vmem:[#allocation70_spill] sm:$0xff] }
 0xe0f   :  { %v6829_v7 = vsub.f32 %v14222_v39, %v6759_v26  ;;  %9011 = vpow2.f32 %v6862_v50  ;;  %14223 = vst [vmem:[#allocation20_spill] sm:$0xff] %v12867_v27  ;;  %v12869_v38 = vpop.eup %9003  ;;  %v6771_v39 = vrot.slane %v12805_v24, %v14170_v0 }
 0xe10   :  { %14224 = vst [vmem:[#allocation88_spill] sm:$0xff] %v12869_v38  ;;  %9013 = vpow2.f32 %v6864_v41 }
 0xe11   :  { %7033 = vperm.xlu1 %8641, %v12847_v13   ;;  %v14221_v13 = vld [vmem:[#allocation73_spill] sm:$0xff]  ;;  %9015 = vpow2.f32 %v6866_v62 }
 0xe12   :  { %7036 = vperm.xlu0 %8642, %v12849_v11   ;;  %v6828_v58 = vsub.f32 %v14221_v13, %v6759_v26  ;;  %v6870_v26 = vmul.f32 1.442695, %v6829_v7 }
 0xe13   :  { %v12877_v31 = vpop.eup %9005 }
 0xe14   :  { %v6868_v13 = vmul.f32 1.442695, %v6828_v58  ;;  %14227 = vst [vmem:[#allocation91_spill] sm:$0xff] %v12877_v31  ;;  %v12879_v50 = vpop.eup %9007  ;;  %v14230_v58 = vld [vmem:[#allocation66_spill] sm:$0xff] }
 0xe15   :  { %7039 = vperm.xlu1 %8641, %v12857_v33   ;;  %v14225_v33 = vld [vmem:[#allocation25_spill] sm:$0xff]  ;;  %14228 = vst [vmem:[#allocation33_spill] sm:$0xff] %v12879_v50  ;;  %v6833_v41 = vsub.f32 %v14230_v58, %v6767_v49 }
 0xe16   :  { %7042 = vperm.xlu0 %8642, %v12859_v34   ;;  %v6830_v11 = vsub.f32 %v14225_v33, %v6763_v12  ;;  %v14229_v34 = vld [vmem:[#allocation60_spill] sm:$0xff]  ;;  %9017 = vpow2.f32 %v6868_v13  ;;  %v6874_v12 = vmul.f32 1.442695, %v6831_v2 }
 0xe17   :  { %9019 = vpow2.f32 %v6870_v26  ;;  %v6878_v13 = vmul.f32 1.442695, %v6833_v41 }
 0xe18   :  { %v6872_v33 = vmul.f32 1.442695, %v6830_v11  ;;  %v12887_v7 = vpop.eup %9009 }
 0xe19   :  { %6949 = vperm.xlu1 %8641, %v12867_v27   ;;  %v6832_v27 = vsub.f32 %v14229_v34, %v6767_v49  ;;  %14231 = vst [vmem:[#allocation27_spill] sm:$0xff] %v12887_v7  ;;  %v12889_v62 = vpop.eup %9011  ;;  %v14234_v34 = vld [vmem:[#allocation71_spill] sm:$0xff] }
 0xe1a   :  { %6952 = vperm.xlu0 %8642, %v12869_v38   ;;  %14232 = vst [vmem:[#allocation35_spill] sm:$0xff] %v12889_v62  ;;  %9021 = vpow2.f32 %v6872_v33  ;;  %v6835_v11 = vsub.f32 %v14234_v34, %v6771_v39 }
 0xe1b   :  { %v6876_v24 = vmul.f32 1.442695, %v6832_v27  ;;  %9023 = vpow2.f32 %v6874_v12 }
 0xe1c   :  { %v6882_v26 = vmul.f32 1.442695, %v6835_v11 }
 0xe1d   :  { %6955 = vperm.xlu1 %8641, %v12877_v31   ;;  %v6834_v31 = vsub.f32 %v14233_v55, %v6771_v39  ;;  %9025 = vpow2.f32 %v6876_v24 }
 0xe1e   :  { %6958 = vperm.xlu0 %8642, %v12879_v50   ;;  %v12895_v50 = vpop.eup %9013  ;;  %9027 = vpow2.f32 %v6878_v13 }
 0xe1f   :  { %14235 = vst [vmem:[#allocation34_spill] sm:$0xff] %v12895_v50  ;;  %v12897_v49 = vpop.eup %9015  ;;  %v6880_v2 = vmul.f32 1.442695, %v6834_v31 }
 0xe20   :  { %14236 = vst [vmem:[#allocation39_spill] sm:$0xff] %v12897_v49  ;;  %v12901_v33 = vpop.eup %9017 }
 0xe21   :  { %6961 = vperm.xlu1 %8641, %v12887_v7   ;;  %14237 = vst [vmem:[#allocation28_spill] sm:$0xff] %v12901_v33  ;;  %v12903_v27 = vpop.eup %9019  ;;  %9029 = vpow2.f32 %v6880_v2 }
 0xe22   :  { %6964 = vperm.xlu0 %8642, %v12889_v62   ;;  %14238 = vst [vmem:[#allocation47_spill] sm:$0xff] %v12903_v27  ;;  %9031 = vpow2.f32 %v6882_v26 }
 0xe24   :  { %v12907_v39 = vpop.eup %9021 }
 0xe25   :  { %6967 = vperm.xlu1 %8641, %v12895_v50   ;;  %14239 = vst [vmem:[#allocation36_spill] sm:$0xff] %v12907_v39  ;;  %v12909_v58 = vpop.eup %9023 }
 0xe26   :  { %6970 = vperm.xlu0 %8642, %v12897_v49   ;;  %14240 = vst [vmem:[#allocation29_spill] sm:$0xff] %v12909_v58 }
 0xe27   :  { %v12913_v31 = vpop.eup %9025 }
 0xe28   :  { %14241 = vst [vmem:[#allocation40_spill] sm:$0xff] %v12913_v31  ;;  %v12915_v41 = vpop.eup %9027 }
 0xe29   :  { %6973 = vperm.xlu1 %8641, %v12901_v33   ;;  %14242 = vst [vmem:[#allocation31_spill] sm:$0xff] %v12915_v41 }
 0xe2a   :  { %6976 = vperm.xlu0 %8642, %v12903_v27  }
 0xe2b   :  { %v12919_v12 = vpop.eup %9029 }
 0xe2c   :  { %14243 = vst [vmem:[#allocation48_spill] sm:$0xff] %v12919_v12  ;;  %v12921_v55 = vpop.eup %9031 }
 0xe2d   :  { %6979 = vperm.xlu1 %8641, %v12907_v39   ;;  %14244 = vst [vmem:[#allocation41_spill] sm:$0xff] %v12921_v55 }
 0xe2e   :  { %6982 = vperm.xlu0 %8642, %v12909_v58  }
 0xe31   :  { %6985 = vperm.xlu1 %8641, %v12913_v31  }
 0xe32   :  { %6988 = vperm.xlu0 %8642, %v12915_v41  }
 0xe35   :  { %6991 = vperm.xlu1 %8641, %v12919_v12  }
 0xe36   :  { %6994 = vperm.xlu0 %8642, %v12921_v55  }
 0xe38   :  { %v5441_v24 = vpop.permute.xlu1 %5440 }
 0xe39   :  { %v5444_v34 = vpop.permute.xlu0 %5443  ;;  %v5562_v62 = vrot.slane %v5441_v24, %v14162_v14 }
 0xe3a   :  { %v5566_v7 = vrot.slane %v5444_v34, %v14161_v18 }
 0xe3c   :  { %v5447_v11 = vpop.permute.xlu1 %5446 }
 0xe3d   :  { %v5450_v13 = vpop.permute.xlu0 %5449  ;;  %v5571_v27 = vrot.slane %v5447_v11, %v14162_v14 }
 0xe3e   :  { %v5575_v41 = vrot.slane %v5450_v13, %v14161_v18 }
 0xe40   :  { %v5453_v2 = vpop.permute.xlu1 %5452  ;;  %v5576_v11 = vsel %vm1071_vm5, %v5575_v41, %v5571_v27 }
 0xe41   :  { %v5456_v26 = vpop.permute.xlu0 %5455  ;;  %v5580_v12 = vrot.slane %v5453_v2, %v14162_v14 }
 0xe42   :  { %v5584_v49 = vrot.slane %v5456_v26, %v14161_v18 }
 0xe44   :  { %v5459_v39 = vpop.permute.xlu1 %5458  ;;  %v5585_v60 = vsel %vm1071_vm5, %v5584_v49, %v5580_v12 }
 0xe45   :  { %v5462_v58 = vpop.permute.xlu0 %5461  ;;  %v5589_v9 = vrot.slane %v5459_v39, %v14162_v14 }
 0xe46   :  { %v5593_v38 = vrot.slane %v5462_v58, %v14161_v18  ;;  %v5567_v58 = vsel %vm1071_vm5, %v5566_v7, %v5562_v62 }
 0xe48   :  { %v5465_v33 = vpop.permute.xlu1 %5464  ;;  %v5594_v39 = vsel %vm1071_vm5, %v5593_v38, %v5589_v9 }
 0xe49   :  { %v5468_v31 = vpop.permute.xlu0 %5467  ;;  %v5598_v13 = vrot.slane %v5465_v33, %v14162_v14  ;;  %v5638_v33 = vsel %vm1208_vm6, %v5576_v11, %v5567_v58 }
 0xe4a   :  { %v5602_v61 = vrot.slane %v5468_v31, %v14161_v18  ;;  %v5639_v41 = vsel %vm1210_vm7, %v5585_v60, %v5638_v33 }
 0xe4b   :  { %v5640_v49 = vsel %vm1212_vm8, %v5594_v39, %v5639_v41 }
 0xe4c   :  { %v5471_v50 = vpop.permute.xlu1 %5470  ;;  %v5603_v27 = vsel %vm1071_vm5, %v5602_v61, %v5598_v13 }
 0xe4d   :  { %v5474_v55 = vpop.permute.xlu0 %5473  ;;  %v5607_v26 = vrot.slane %v5471_v50, %v14162_v14  ;;  %v5641_v9 = vsel %vm1214_vm9, %v5603_v27, %v5640_v49 }
 0xe4e   :  { %v5611_v45 = vrot.slane %v5474_v55, %v14161_v18 }
 0xe50   :  { %v5477_v2 = vpop.permute.xlu1 %5476  ;;  %v5612_v50 = vsel %vm1071_vm5, %v5611_v45, %v5607_v26 }
 0xe51   :  { %v5480_v34 = vpop.permute.xlu0 %5479  ;;  %v5616_v24 = vrot.slane %v5477_v2, %v14162_v14  ;;  %v5642_v62 = vsel %vm1216_vm10, %v5612_v50, %v5641_v9 }
 0xe52   :  { %v5620_v31 = vrot.slane %v5480_v34, %v14161_v18 }
 0xe54   :  { %v5483_v55 = vpop.permute.xlu1 %5482  ;;  %v5621_v12 = vsel %vm1071_vm5, %v5620_v31, %v5616_v24 }
 0xe55   :  { %v5486_v2 = vpop.permute.xlu0 %5485  ;;  %v5625_v7 = vrot.slane %v5483_v55, %v14162_v14  ;;  %v5643_v60 = vsel %vm1218_vm11, %v5621_v12, %v5642_v62 }
 0xe56   :  { %v5629_v38 = vrot.slane %v5486_v2, %v14161_v18 }
 0xe58   :  { %v5396_v11 = vpop.permute.xlu1 %5395  ;;  %v5630_v61 = vsel %vm1071_vm5, %v5629_v38, %v5625_v7 }
 0xe59   :  { %v5393_v45 = vpop.permute.xlu0 %5392  ;;  %v5644_v13 = vsel %vm1220_vm12, %v5630_v61, %v5643_v60  ;;  %v5494_v38 = vrot.slane %v5396_v11, %v14161_v18 }
 0xe5a   :  { %v5650_v26 = vsel %vm593_vm2, %v5644_v13, 0.0  ;;  %v5490_v9 = vrot.slane %v5393_v45, %v14162_v14 }
 0xe5b   :  { %5651 = vadd.xlane.f32.xlu0 %v5650_v26 }
 0xe5c   :  { %v5399_v34 = vpop.permute.xlu1 %5398 }
 0xe5d   :  { %v5402_v24 = vpop.permute.xlu0 %5401  ;;  %v5499_v55 = vrot.slane %v5399_v34, %v14162_v14 }
 0xe5e   :  { %v5503_v50 = vrot.slane %v5402_v24, %v14161_v18 }
 0xe60   :  { %v5405_v58 = vpop.permute.xlu1 %5404  ;;  %v5504_v26 = vsel %vm1071_vm5, %v5503_v50, %v5499_v55 }
 0xe61   :  { %v5408_v39 = vpop.permute.xlu0 %5407  ;;  %v5508_v2 = vrot.slane %v5405_v58, %v14162_v14 }
 0xe62   :  { %v5512_v12 = vrot.slane %v5408_v39, %v14161_v18 }
 0xe64   :  { %v5411_v31 = vpop.permute.xlu1 %5410  ;;  %v5513_v39 = vsel %vm1071_vm5, %v5512_v12, %v5508_v2 }
 0xe65   :  { %v5414_v33 = vpop.permute.xlu0 %5413  ;;  %v5517_v61 = vrot.slane %v5411_v31, %v14162_v14 }
 0xe66   :  { %v5521_v62 = vrot.slane %v5414_v33, %v14161_v18  ;;  %v5495_v33 = vsel %vm1071_vm5, %v5494_v38, %v5490_v9 }
 0xe68   :  { %v5417_v27 = vpop.permute.xlu1 %5416  ;;  %v5522_v31 = vsel %vm1071_vm5, %v5521_v62, %v5517_v61 }
 0xe69   :  { %v5420_v41 = vpop.permute.xlu0 %5419  ;;  %v5526_v13 = vrot.slane %v5417_v27, %v14162_v14  ;;  %v5631_v27 = vsel %vm1208_vm6, %v5504_v26, %v5495_v33 }
 0xe6a   :  { %v5530_v60 = vrot.slane %v5420_v41, %v14161_v18  ;;  %v5632_v55 = vsel %vm1210_vm7, %v5513_v39, %v5631_v27 }
 0xe6b   :  { %v5633_v12 = vsel %vm1212_vm8, %v5522_v31, %v5632_v55 }
 0xe6c   :  { %v5423_v49 = vpop.permute.xlu1 %5422  ;;  %v5531_v50 = vsel %vm1071_vm5, %v5530_v60, %v5526_v13 }
 0xe6d   :  { %v5426_v7 = vpop.permute.xlu0 %5425  ;;  %v5535_v24 = vrot.slane %v5423_v49, %v14162_v14  ;;  %v5634_v38 = vsel %vm1214_vm9, %v5531_v50, %v5633_v12 }
 0xe6e   :  { %v5539_v34 = vrot.slane %v5426_v7, %v14161_v18 }
 0xe70   :  { %v5429_v58 = vpop.permute.xlu1 %5428  ;;  %v5540_v49 = vsel %vm1071_vm5, %v5539_v34, %v5535_v24 }
 0xe71   :  { %v5432_v45 = vpop.permute.xlu0 %5431  ;;  %v5544_v11 = vrot.slane %v5429_v58, %v14162_v14  ;;  %v5635_v61 = vsel %vm1216_vm10, %v5540_v49, %v5634_v38 }
 0xe72   :  { %v5548_v41 = vrot.slane %v5432_v45, %v14161_v18 }
 0xe74   :  { %v5435_v7 = vpop.permute.xlu1 %5434  ;;  %v5549_v2 = vsel %vm1071_vm5, %v5548_v41, %v5544_v11 }
 0xe75   :  { %v5438_v58 = vpop.permute.xlu0 %5437  ;;  %v5553_v9 = vrot.slane %v5435_v7, %v14162_v14  ;;  %v5636_v13 = vsel %vm1218_vm11, %v5549_v2, %v5635_v61 }
 0xe76   :  { %v5557_v62 = vrot.slane %v5438_v58, %v14161_v18 }
 0xe78   :  { %v6998_v26 = vpop.permute.xlu1 %6997  ;;  %v5558_v60 = vsel %vm1071_vm5, %v5557_v62, %v5553_v9 }
 0xe79   :  { %v7001_v34 = vpop.permute.xlu0 %7000  ;;  %v5637_v24 = vsel %vm1220_vm12, %v5558_v60, %v5636_v13  ;;  %v7119_v62 = vrot.slane %v6998_v26, %v14162_v14 }
 0xe7a   :  { %v5647_v39 = vsel %vm593_vm2, %v5637_v24, 0.0  ;;  %v7123_v38 = vrot.slane %v7001_v34, %v14161_v18 }
 0xe7b   :  { %5648 = vadd.xlane.f32.xlu1 %v5647_v39 }
 0xe7c   :  { %v7004_v45 = vpop.permute.xlu1 %7003 }
 0xe7d   :  { %v7007_v11 = vpop.permute.xlu0 %7006  ;;  %v7128_v7 = vrot.slane %v7004_v45, %v14162_v14 }
 0xe7e   :  { %v7132_v49 = vrot.slane %v7007_v11, %v14161_v18 }
 0xe80   :  { %v7010_v33 = vpop.permute.xlu1 %7009  ;;  %v7133_v39 = vsel %vm1071_vm5, %v7132_v49, %v7128_v7 }
 0xe81   :  { %v7013_v31 = vpop.permute.xlu0 %7012  ;;  %v7137_v58 = vrot.slane %v7010_v33, %v14162_v14 }
 0xe82   :  { %v7141_v2 = vrot.slane %v7013_v31, %v14161_v18 }
 0xe84   :  { %v7016_v41 = vpop.permute.xlu1 %7015  ;;  %v7142_v31 = vsel %vm1071_vm5, %v7141_v2, %v7137_v58 }
 0xe85   :  { %v7019_v27 = vpop.permute.xlu0 %7018  ;;  %v7146_v60 = vrot.slane %v7016_v41, %v14162_v14 }
 0xe86   :  { %v7150_v61 = vrot.slane %v7019_v27, %v14161_v18  ;;  %v7124_v27 = vsel %vm1071_vm5, %v7123_v38, %v7119_v62 }
 0xe88   :  { %v7022_v50 = vpop.permute.xlu1 %7021  ;;  %v7151_v41 = vsel %vm1071_vm5, %v7150_v61, %v7146_v60 }
 0xe89   :  { %v7025_v55 = vpop.permute.xlu0 %7024  ;;  %v7155_v24 = vrot.slane %v7022_v50, %v14162_v14  ;;  %v7195_v50 = vsel %vm1208_vm6, %v7133_v39, %v7124_v27 }
 0xe8a   :  { %v7159_v13 = vrot.slane %v7025_v55, %v14161_v18  ;;  %v7196_v7 = vsel %vm1210_vm7, %v7142_v31, %v7195_v50 }
 0xe8b   :  { %v7197_v2 = vsel %vm1212_vm8, %v7151_v41, %v7196_v7 }
 0xe8c   :  { %v7028_v12 = vpop.permute.xlu1 %7027  ;;  %v7160_v49 = vsel %vm1071_vm5, %v7159_v13, %v7155_v24 }
 0xe8d   :  { %v7031_v9 = vpop.permute.xlu0 %7030  ;;  %v7164_v11 = vrot.slane %v7028_v12, %v14162_v14  ;;  %v7198_v62 = vsel %vm1214_vm9, %v7160_v49, %v7197_v2 }
 0xe8e   :  { %v7168_v45 = vrot.slane %v7031_v9, %v14161_v18 }
 0xe90   :  { %v7034_v33 = vpop.permute.xlu1 %7033  ;;  %v7169_v12 = vsel %vm1071_vm5, %v7168_v45, %v7164_v11 }
 0xe91   :  { %v7037_v34 = vpop.permute.xlu0 %7036  ;;  %v7173_v26 = vrot.slane %v7034_v33, %v14162_v14  ;;  %v7199_v60 = vsel %vm1216_vm10, %v7169_v12, %v7198_v62 }
 0xe92   :  { %v7177_v55 = vrot.slane %v7037_v34, %v14161_v18 }
 0xe94   :  { %v7040_v9 = vpop.permute.xlu1 %7039  ;;  %v7178_v58 = vsel %vm1071_vm5, %v7177_v55, %v7173_v26 }
 0xe95   :  { %v7043_v33 = vpop.permute.xlu0 %7042  ;;  %v7182_v38 = vrot.slane %v7040_v9, %v14162_v14  ;;  %v7200_v24 = vsel %vm1218_vm11, %v7178_v58, %v7199_v60 }
 0xe96   :  { %v7186_v61 = vrot.slane %v7043_v33, %v14161_v18 }
 0xe98   :  { %v6950_v39 = vpop.permute.xlu1 %6949  ;;  %v7187_v13 = vsel %vm1071_vm5, %v7186_v61, %v7182_v38 }
 0xe99   :  { %v6953_v45 = vpop.permute.xlu0 %6952  ;;  %v7201_v11 = vsel %vm1220_vm12, %v7187_v13, %v7200_v24  ;;  %v7047_v61 = vrot.slane %v6950_v39, %v14162_v14 }
 0xe9a   :  { %v7207_v31 = vsel %vm593_vm2, %v7201_v11, 0.0  ;;  %v7051_v62 = vrot.slane %v6953_v45, %v14161_v18 }
 0xe9b   :  { %7208 = vadd.xlane.f32.xlu1 %v7207_v31 }
 0xe9c   :  { %v6956_v34 = vpop.permute.xlu1 %6955 }
 0xe9d   :  { %v6959_v26 = vpop.permute.xlu0 %6958  ;;  %v7056_v9 = vrot.slane %v6956_v34, %v14162_v14 }
 0xe9e   :  { %v7060_v12 = vrot.slane %v6959_v26, %v14161_v18 }
 0xea0   :  { %v6962_v27 = vpop.permute.xlu1 %6961  ;;  %v7061_v31 = vsel %vm1071_vm5, %v7060_v12, %v7056_v9 }
 0xea1   :  { %v6965_v41 = vpop.permute.xlu0 %6964  ;;  %v7065_v33 = vrot.slane %v6962_v27, %v14162_v14 }
 0xea2   :  { %v7069_v58 = vrot.slane %v6965_v41, %v14161_v18 }
 0xea4   :  { %v6968_v55 = vpop.permute.xlu1 %6967  ;;  %v7070_v41 = vsel %vm1071_vm5, %v7069_v58, %v7065_v33 }
 0xea5   :  { %v6971_v50 = vpop.permute.xlu0 %6970  ;;  %v7074_v13 = vrot.slane %v6968_v55, %v14162_v14 }
 0xea6   :  { %v7078_v60 = vrot.slane %v6971_v50, %v14161_v18  ;;  %v7052_v50 = vsel %vm1071_vm5, %v7051_v62, %v7047_v61 }
 0xea8   :  { %v6974_v49 = vpop.permute.xlu1 %6973  ;;  %v7079_v55 = vsel %vm1071_vm5, %v7078_v60, %v7074_v13 }
 0xea9   :  { %v6977_v7 = vpop.permute.xlu0 %6976  ;;  %v7083_v11 = vrot.slane %v6974_v49, %v14162_v14  ;;  %v7188_v49 = vsel %vm1208_vm6, %v7061_v31, %v7052_v50 }
 0xeaa   :  { %v7087_v24 = vrot.slane %v6977_v7, %v14161_v18  ;;  %v7189_v9 = vsel %vm1210_vm7, %v7070_v41, %v7188_v49 }
 0xeab   :  { %v7190_v58 = vsel %vm1212_vm8, %v7079_v55, %v7189_v9 }
 0xeac   :  { %v6980_v2 = vpop.permute.xlu1 %6979  ;;  %v7088_v12 = vsel %vm1071_vm5, %v7087_v24, %v7083_v11 }
 0xead   :  { %v6983_v38 = vpop.permute.xlu0 %6982  ;;  %v7092_v26 = vrot.slane %v6980_v2, %v14162_v14  ;;  %v7191_v61 = vsel %vm1214_vm9, %v7088_v12, %v7190_v58 }
 0xeae   :  { %v7096_v34 = vrot.slane %v6983_v38, %v14161_v18 }
 0xeb0   :  { %v6986_v27 = vpop.permute.xlu1 %6985  ;;  %v7097_v2 = vsel %vm1071_vm5, %v7096_v34, %v7092_v26 }
 0xeb1   :  { %v6989_v45 = vpop.permute.xlu0 %6988  ;;  %v7101_v39 = vrot.slane %v6986_v27, %v14162_v14  ;;  %v7192_v13 = vsel %vm1216_vm10, %v7097_v2, %v7191_v61 }
 0xeb2   :  { %v7105_v7 = vrot.slane %v6989_v45, %v14161_v18 }
 0xeb4   :  { %v6992_v38 = vpop.permute.xlu1 %6991  ;;  %v7106_v33 = vsel %vm1071_vm5, %v7105_v7, %v7101_v39 }
 0xeb5   :  { %v6995_v27 = vpop.permute.xlu0 %6994  ;;  %v7110_v62 = vrot.slane %v6992_v38, %v14162_v14  ;;  %v7193_v11 = vsel %vm1218_vm11, %v7106_v33, %v7192_v13 }
 0xeb6   :  { %v7114_v60 = vrot.slane %v6995_v27, %v14161_v18 }
 0xeb8   :  { %v7115_v24 = vsel %vm1071_vm5, %v7114_v60, %v7110_v62 }
 0xeb9   :  { %v7194_v31 = vsel %vm1220_vm12, %v7115_v24, %v7193_v11 }
 0xeba   :  { %v7204_v34 = vsel %vm593_vm2, %v7194_v31, 0.0 }
 0xebb   :  { %7205 = vadd.xlane.f32.xlu0 %v7204_v34 }
 0xee8   :  { %v5652_v26 = vpop.xlane.xlu0 %5651 }
 0xee9   :  { %v5690_v41 = vrot.slane %v5652_v26, %v14163_v46  ;;  %v5694_v45 = vrot.slane %v5652_v26, %v14164_v53  ;;  %v5698_v39 = vrot.slane %v5652_v26, %v14165_v48  ;;  %v5702_v50 = vrot.slane %v5652_v26, %v14166_v43 }
 0xeea   :  { %v5706_v7 = vrot.slane %v5652_v26, %v14167_v25  ;;  %v5710_v2 = vrot.slane %v5652_v26, %v14168_v15  ;;  %v5714_v27 = vrot.slane %v5652_v26, %v14169_v8  ;;  %v5718_v61 = vrot.slane %v5652_v26, %v14170_v0 }
 0xeeb   :  { %9033 = vrcp.f32 %v5690_v41 }
 0xeec   :  { %9035 = vrcp.f32 %v5694_v45 }
 0xeed   :  { %9037 = vrcp.f32 %v5698_v39 }
 0xeee   :  { %9039 = vrcp.f32 %v5702_v50 }
 0xeef   :  { %9041 = vrcp.f32 %v5706_v7 }
 0xef0   :  { %9043 = vrcp.f32 %v5710_v2 }
 0xef1   :  { %9045 = vrcp.f32 %v5714_v27 }
 0xef2   :  { %9047 = vrcp.f32 %v5718_v61 }
 0xef5   :  { %v9034_v55 = vpop.eup %9033 }
 0xef6   :  { %v5760_v49 = vmul.f32 %v9034_v55, %v12623_v35  ;;  %v5761_v12 = vmul.f32 %v9034_v55, %v12625_v23  ;;  %v9036_v9 = vpop.eup %9035 }
 0xef7   :  { %v5763_v38 = vmul.f32 %v9036_v9, %v12632_v42  ;;  %v5764_v58 = vmul.f32 %v9036_v9, %v12634_v52  ;;  %v9038_v33 = vpop.eup %9037 }
 0xef8   :  { %5864 = vperm.xlu1 %8641, %v5760_v49   ;;  %5867 = vperm.xlu0 %8642, %v5761_v12   ;;  %v5766_v35 = vmul.f32 %v9038_v33, %v12643_v40  ;;  %v5767_v23 = vmul.f32 %v9038_v33, %v12645_v4  ;;  %v9040_v62 = vpop.eup %9039 }
 0xef9   :  { %v5769_v42 = vmul.f32 %v9040_v62, %v12653_v10  ;;  %v5770_v52 = vmul.f32 %v9040_v62, %v12655_v47  ;;  %v9042_v60 = vpop.eup %9041 }
 0xefa   :  { %v5772_v13 = vmul.f32 %v9042_v60, %v12663_v21  ;;  %v5773_v40 = vmul.f32 %v9042_v60, %v12665_v28  ;;  %v9044_v24 = vpop.eup %9043 }
 0xefb   :  { %v5775_v10 = vmul.f32 %v9044_v24, %v12673_v51  ;;  %v5776_v47 = vmul.f32 %v9044_v24, %v12675_v17  ;;  %v9046_v34 = vpop.eup %9045 }
 0xefc   :  { %5870 = vperm.xlu1 %8641, %v5763_v38   ;;  %5873 = vperm.xlu0 %8642, %v5764_v58   ;;  %v5778_v28 = vmul.f32 %v9046_v34, %v12683_v36  ;;  %v5779_v26 = vmul.f32 %v9046_v34, %v12685_v5  ;;  %v9048_v41 = vpop.eup %9047 }
 0xefd   :  { %v5781_v51 = vmul.f32 %v9048_v41, %v12693_v30  ;;  %v5782_v17 = vmul.f32 %v9048_v41, %v12695_v29  ;;  %v14251_v41 = vld [vmem:[#allocation106_spill] sm:$0xff] }
 0xf00   :  { %5876 = vperm.xlu1 %8641, %v5766_v35   ;;  %5879 = vperm.xlu0 %8642, %v5767_v23  }
 0xf04   :  { %5882 = vperm.xlu1 %8641, %v5769_v42   ;;  %5885 = vperm.xlu0 %8642, %v5770_v52   ;;  %v14245_v42 = vld [vmem:[#allocation24_spill] sm:$0xff] }
 0xf08   :  { %5888 = vperm.xlu1 %8641, %v5772_v13   ;;  %5891 = vperm.xlu0 %8642, %v5773_v40   ;;  %v5649_v4 = vpop.xlane.xlu1 %5648  ;;  %v14246_v13 = vld [vmem:[#allocation107_spill] sm:$0xff]  ;;  %v14247_v40 = vld [vmem:[#allocation104_spill] sm:$0xff] }
 0xf09   :  { %v5658_v11 = vrot.slane %v5649_v4, %v14163_v46  ;;  %v5662_v31 = vrot.slane %v5649_v4, %v14164_v53  ;;  %v5666_v21 = vrot.slane %v5649_v4, %v14165_v48  ;;  %v5670_v45 = vrot.slane %v5649_v4, %v14166_v43 }
 0xf0a   :  { %v5674_v50 = vrot.slane %v5649_v4, %v14167_v25  ;;  %v5678_v7 = vrot.slane %v5649_v4, %v14168_v15  ;;  %v5682_v12 = vrot.slane %v5649_v4, %v14169_v8  ;;  %v5686_v2 = vrot.slane %v5649_v4, %v14170_v0 }
 0xf0b   :  { %9049 = vrcp.f32 %v5658_v11  ;;  %v14248_v11 = vld [vmem:[#allocation109_spill] sm:$0xff] }
 0xf0c   :  { %5894 = vperm.xlu1 %8641, %v5775_v10   ;;  %5897 = vperm.xlu0 %8642, %v5776_v47   ;;  %9051 = vrcp.f32 %v5662_v31  ;;  %v14249_v10 = vld [vmem:[#allocation23_spill] sm:$0xff] }
 0xf0d   :  { %9053 = vrcp.f32 %v5666_v21 }
 0xf0e   :  { %9055 = vrcp.f32 %v5670_v45 }
 0xf0f   :  { %9057 = vrcp.f32 %v5674_v50  ;;  %v14253_v50 = vld [vmem:[#allocation108_spill] sm:$0xff] }
 0xf10   :  { %5900 = vperm.xlu1 %8641, %v5778_v28   ;;  %5903 = vperm.xlu0 %8642, %v5779_v26   ;;  %9059 = vrcp.f32 %v5678_v7  ;;  %v14250_v28 = vld [vmem:[#allocation111_spill] sm:$0xff] }
 0xf11   :  { %9061 = vrcp.f32 %v5682_v12 }
 0xf12   :  { %9063 = vrcp.f32 %v5686_v2 }
 0xf14   :  { %5906 = vperm.xlu1 %8641, %v5781_v51   ;;  %5909 = vperm.xlu0 %8642, %v5782_v17   ;;  %v14252_v17 = vld [vmem:[#allocation113_spill] sm:$0xff] }
 0xf15   :  { %v9050_v39 = vpop.eup %9049 }
 0xf16   :  { %v5737_v36 = vmul.f32 %v9050_v39, %v12703_v57  ;;  %v5736_v5 = vmul.f32 %v9050_v39, %v12705_v1  ;;  %v9052_v55 = vpop.eup %9051 }
 0xf17   :  { %v5739_v30 = vmul.f32 %v9052_v55, %v12713_v6  ;;  %v5740_v29 = vmul.f32 %v9052_v55, %v12715_v44  ;;  %v9054_v49 = vpop.eup %9053  ;;  %v14254_v55 = vld [vmem:[#allocation115_spill] sm:$0xff] }
 0xf18   :  { %5819 = vperm.xlu1 %8641, %v5737_v36   ;;  %5816 = vperm.xlu0 %8642, %v5736_v5   ;;  %v5742_v57 = vmul.f32 %v9054_v49, %v12723_v19  ;;  %v5743_v1 = vmul.f32 %v9054_v49, %v12725_v37  ;;  %v9056_v9 = vpop.eup %9055 }
 0xf19   :  { %v5745_v6 = vmul.f32 %v9056_v9, %v12731_v3  ;;  %v5746_v44 = vmul.f32 %v9056_v9, %v12733_v20  ;;  %v9058_v38 = vpop.eup %9057  ;;  %v14256_v9 = vld [vmem:[#allocation118_spill] sm:$0xff] }
 0xf1a   :  { %v5748_v58 = vmul.f32 %v9058_v38, %v12743_v63  ;;  %v5749_v19 = vmul.f32 %v9058_v38, %v12747_v56  ;;  %v9060_v33 = vpop.eup %9059 }
 0xf1b   :  { %v5751_v20 = vmul.f32 %v9060_v33, %v12755_v54  ;;  %v5752_v35 = vmul.f32 %v9060_v33, %v12757_v59  ;;  %v9062_v23 = vpop.eup %9061 }
 0xf1c   :  { %5822 = vperm.xlu1 %8641, %v5739_v30   ;;  %5825 = vperm.xlu0 %8642, %v5740_v29   ;;  %v5754_v56 = vmul.f32 %v9062_v23, %v12765_v16  ;;  %v5755_v62 = vmul.f32 %v9062_v23, %v12767_v32  ;;  %v9064_v61 = vpop.eup %9063  ;;  %v14255_v30 = vld [vmem:[#allocation110_spill] sm:$0xff] }
 0xf1d   :  { %v5757_v59 = vmul.f32 %v9064_v61, %v12775_v22  ;;  %v5758_v52 = vmul.f32 %v9064_v61, %v14245_v42  ;;  %v14262_v61 = vld [vmem:[#allocation33_spill] sm:$0xff] }
 0xf20   :  { %5828 = vperm.xlu1 %8641, %v5742_v57   ;;  %5831 = vperm.xlu0 %8642, %v5743_v1  }
 0xf24   :  { %5834 = vperm.xlu1 %8641, %v5745_v6   ;;  %5837 = vperm.xlu0 %8642, %v5746_v44   ;;  %v14257_v6 = vld [vmem:[#allocation112_spill] sm:$0xff] }
 0xf28   :  { %5840 = vperm.xlu1 %8641, %v5748_v58   ;;  %5843 = vperm.xlu0 %8642, %v5749_v19   ;;  %v13095_v37 = vpop.xlane.xlu1 %7208  ;;  %v14258_v19 = vld [vmem:[#allocation120_spill] sm:$0xff] }
 0xf29   :  { %v7247_v27 = vrot.slane %v13095_v37, %v14163_v46  ;;  %v7251_v3 = vrot.slane %v13095_v37, %v14164_v53  ;;  %v7255_v63 = vrot.slane %v13095_v37, %v14165_v48  ;;  %v7259_v54 = vrot.slane %v13095_v37, %v14166_v43 }
 0xf2a   :  { %v7263_v16 = vrot.slane %v13095_v37, %v14167_v25  ;;  %v7267_v22 = vrot.slane %v13095_v37, %v14168_v15  ;;  %v7271_v21 = vrot.slane %v13095_v37, %v14169_v8 }
 0xf2b   :  { %9065 = vrcp.f32 %v7247_v27  ;;  %v14259_v27 = vld [vmem:[#allocation114_spill] sm:$0xff] }
 0xf2c   :  { %5846 = vperm.xlu1 %8641, %v5751_v20   ;;  %5849 = vperm.xlu0 %8642, %v5752_v35   ;;  %9067 = vrcp.f32 %v7251_v3  ;;  %v14260_v35 = vld [vmem:[#allocation88_spill] sm:$0xff] }
 0xf2d   :  { %9069 = vrcp.f32 %v7255_v63  ;;  %v14261_v63 = vld [vmem:[#allocation20_spill] sm:$0xff] }
 0xf2e   :  { %9071 = vrcp.f32 %v7259_v54 }
 0xf2f   :  { %9073 = vrcp.f32 %v7263_v16  ;;  %v14265_v16 = vld [vmem:[#allocation27_spill] sm:$0xff] }
 0xf30   :  { %5852 = vperm.xlu1 %8641, %v5754_v56   ;;  %5855 = vperm.xlu0 %8642, %v5755_v62   ;;  %9075 = vrcp.f32 %v7267_v22 }
 0xf31   :  { %9077 = vrcp.f32 %v7271_v21 }
 0xf34   :  { %5858 = vperm.xlu1 %8641, %v5757_v59   ;;  %5861 = vperm.xlu0 %8642, %v5758_v52   ;;  %v14263_v59 = vld [vmem:[#allocation91_spill] sm:$0xff] }
 0xf35   :  { %v9066_v60 = vpop.eup %9065 }
 0xf36   :  { %v7318_v32 = vmul.f32 %v9066_v60, %v14246_v13  ;;  %v7317_v24 = vmul.f32 %v9066_v60, %v14247_v40  ;;  %v9068_v4 = vpop.eup %9067  ;;  %v14266_v40 = vld [vmem:[#allocation39_spill] sm:$0xff] }
 0xf37   :  { %v7321_v31 = vmul.f32 %v9068_v4, %v14248_v11  ;;  %v7320_v47 = vmul.f32 %v9068_v4, %v14249_v10  ;;  %v9070_v34 = vpop.eup %9069  ;;  %v14267_v4 = vld [vmem:[#allocation34_spill] sm:$0xff] }
 0xf38   :  { %7424 = vperm.xlu0 %8642, %v7318_v32   ;;  %7421 = vperm.xlu1 %8641, %v7317_v24   ;;  %v7324_v26 = vmul.f32 %v9070_v34, %v14250_v28  ;;  %v7323_v45 = vmul.f32 %v9070_v34, %v14251_v41  ;;  %v9072_v51 = vpop.eup %9071  ;;  %v14270_v28 = vld [vmem:[#allocation29_spill] sm:$0xff]  ;;  %v14271_v41 = vld [vmem:[#allocation36_spill] sm:$0xff] }
 0xf39   :  { %v7327_v39 = vmul.f32 %v9072_v51, %v14252_v17  ;;  %v7326_v36 = vmul.f32 %v9072_v51, %v14253_v50  ;;  %v9074_v5 = vpop.eup %9073  ;;  %v14272_v17 = vld [vmem:[#allocation31_spill] sm:$0xff]  ;;  %v14273_v50 = vld [vmem:[#allocation40_spill] sm:$0xff] }
 0xf3a   :  { %v7330_v7 = vmul.f32 %v9074_v5, %v14254_v55  ;;  %v7329_v29 = vmul.f32 %v9074_v5, %v14255_v30  ;;  %v9076_v49 = vpop.eup %9075  ;;  %v14275_v55 = vld [vmem:[#allocation48_spill] sm:$0xff] }
 0xf3b   :  { %v7333_v2 = vmul.f32 %v9076_v49, %v14256_v9  ;;  %v7332_v44 = vmul.f32 %v9076_v49, %v14257_v6  ;;  %v9078_v38 = vpop.eup %9077  ;;  %v9102_v6 = vld [vmem:[#allocation2 + $0x28] sm:$0xff] }
 0xf3c   :  { %7430 = vperm.xlu0 %8642, %v7321_v31   ;;  %7427 = vperm.xlu1 %8641, %v7320_v47   ;;  %v7336_v33 = vmul.f32 %v9078_v38, %v14258_v19  ;;  %v7335_v3 = vmul.f32 %v9078_v38, %v14259_v27  ;;  %v14268_v31 = vld [vmem:[#allocation47_spill] sm:$0xff]  ;;  %v14269_v47 = vld [vmem:[#allocation28_spill] sm:$0xff] }
 0xf3d   :  { %v14278_v19 = vld [vmem:[#allocation80_spill] sm:$0xff] }
 0xf40   :  { %7436 = vperm.xlu0 %8642, %v7324_v26   ;;  %7433 = vperm.xlu1 %8641, %v7323_v45  }
 0xf44   :  { %7442 = vperm.xlu0 %8642, %v7327_v39   ;;  %7439 = vperm.xlu1 %8641, %v7326_v36  }
 0xf48   :  { %v7206_v12 = vpop.xlane.xlu0 %7205  ;;  %7448 = vperm.xlu0 %8642, %v7330_v7   ;;  %7445 = vperm.xlu1 %8641, %v7329_v29   ;;  %v14276_v29 = vld [vmem:[#allocation11_spill] sm:$0xff] }
 0xf49   :  { %v7215_v57 = vrot.slane %v7206_v12, %v14163_v46  ;;  %v7219_v1 = vrot.slane %v7206_v12, %v14164_v53  ;;  %v7223_v58 = vrot.slane %v7206_v12, %v14165_v48  ;;  %v7227_v46 = vrot.slane %v7206_v12, %v14166_v43 }
 0xf4a   :  { %v7231_v20 = vrot.slane %v7206_v12, %v14167_v25  ;;  %v7235_v48 = vrot.slane %v7206_v12, %v14168_v15  ;;  %v7239_v43 = vrot.slane %v7206_v12, %v14169_v8  ;;  %v14264_v25 = vld [vmem:[#allocation35_spill] sm:$0xff]  ;;  %v7243_v15 = vrot.slane %v7206_v12, %v14170_v0 }
 0xf4b   :  { %9079 = vrcp.f32 %v7215_v57  ;;  %v7275_v8 = vrot.slane %v13095_v37, %v14170_v0  ;;  %v14274_v37 = vld [vmem:[#allocation41_spill] sm:$0xff]  ;;  %v14277_v12 = vld [vmem:[#allocation119_spill] sm:$0xff] }
 0xf4c   :  { %7454 = vperm.xlu0 %8642, %v7333_v2   ;;  %7451 = vperm.xlu1 %8641, %v7332_v44   ;;  %9081 = vrcp.f32 %v7219_v1  ;;  %v9101_v2 = vld [vmem:[#allocation2 + $0x20] sm:$0xff] }
 0xf4d   :  { %9083 = vrcp.f32 %v7223_v58  ;;  %v13159_v44 = vpack.i.bf16 %v9102_v6, %v9101_v2 }
 0xf4e   :  { %9085 = vrcp.f32 %v7227_v46  ;;  %v9104_v46 = vld [vmem:[#allocation2 + $0x38] sm:$0xff] }
 0xf4f   :  { %9087 = vrcp.f32 %v7231_v20 }
 0xf50   :  { %7460 = vperm.xlu0 %8642, %v7336_v33   ;;  %7457 = vperm.xlu1 %8641, %v7335_v3   ;;  %9089 = vrcp.f32 %v7235_v48  ;;  %v14279_v33 = vld [vmem:[#allocation79_spill] sm:$0xff]  ;;  %v9103_v3 = vld [vmem:[#allocation2 + $0x30] sm:$0xff] }
 0xf51   :  { %9091 = vrcp.f32 %v7239_v43  ;;  %v14280_v27 = vpack.i.bf16 %v14278_v19, %v14279_v33 }
 0xf52   :  { %9093 = vrcp.f32 %v7243_v15 }
 0xf53   :  { %9095 = vrcp.f32 %v7275_v8 }
 0xf55   :  { %v9080_v53 = vpop.eup %9079 }
 0xf56   :  { %v7294_v23 = vmul.f32 %v9080_v53, %v14260_v35  ;;  %v7293_v56 = vmul.f32 %v9080_v53, %v14261_v63  ;;  %v9082_v62 = vpop.eup %9081  ;;  %v13167_v53 = vpack.i.bf16 %v9104_v46, %v9103_v3 }
 0xf57   :  { %v7297_v54 = vmul.f32 %v9082_v62, %v14262_v61  ;;  %v7296_v42 = vmul.f32 %v9082_v62, %v14263_v59  ;;  %v9084_v52 = vpop.eup %9083 }
 0xf58   :  { %7376 = vperm.xlu0 %8642, %v7294_v23   ;;  %7373 = vperm.xlu1 %8641, %v7293_v56   ;;  %v7300_v60 = vmul.f32 %v9084_v52, %v14264_v25  ;;  %v7299_v13 = vmul.f32 %v9084_v52, %v14265_v16  ;;  %v9086_v32 = vpop.eup %9085 }
 0xf59   :  { %v7303_v24 = vmul.f32 %v9086_v32, %v14266_v40  ;;  %v7302_v22 = vmul.f32 %v9086_v32, %v14267_v4  ;;  %v9088_v11 = vpop.eup %9087 }
 0xf5a   :  { %v7306_v10 = vmul.f32 %v9088_v11, %v14268_v31  ;;  %v7305_v34 = vmul.f32 %v9088_v11, %v14269_v47  ;;  %v9090_v21 = vpop.eup %9089 }
 0xf5b   :  { %v7309_v26 = vmul.f32 %v9090_v21, %v14270_v28  ;;  %v7308_v45 = vmul.f32 %v9090_v21, %v14271_v41  ;;  %v9092_v51 = vpop.eup %9091 }
 0xf5c   :  { %7382 = vperm.xlu0 %8642, %v7297_v54   ;;  %7379 = vperm.xlu1 %8641, %v7296_v42   ;;  %v7312_v39 = vmul.f32 %v9092_v51, %v14272_v17  ;;  %v7311_v36 = vmul.f32 %v9092_v51, %v14273_v50  ;;  %v9094_v0 = vpop.eup %9093 }
 0xf5d   :  { %v7315_v5 = vmul.f32 %v9094_v0, %v14274_v37  ;;  %v7314_v7 = vmul.f32 %v9094_v0, %v14275_v55  ;;  %v9096_v30 = vpop.eup %9095 }
 0xf5e   :  { %v7339_v49 = vmul.f32 %v9096_v30, %v14276_v29  ;;  %v7338_v57 = vmul.f32 %v9096_v30, %v14277_v12 }
 0xf60   :  { %7388 = vperm.xlu0 %8642, %v7300_v60   ;;  %7385 = vperm.xlu1 %8641, %v7299_v13  }
 0xf64   :  { %7394 = vperm.xlu0 %8642, %v7303_v24   ;;  %7391 = vperm.xlu1 %8641, %v7302_v22  }
 0xf68   :  { %7400 = vperm.xlu0 %8642, %v7306_v10   ;;  %7397 = vperm.xlu1 %8641, %v7305_v34  }
 0xf6c   :  { %7406 = vperm.xlu0 %8642, %v7309_v26   ;;  %7403 = vperm.xlu1 %8641, %v7308_v45  }
 0xf70   :  { %7412 = vperm.xlu0 %8642, %v7312_v39   ;;  %7409 = vperm.xlu1 %8641, %v7311_v36  }
 0xf74   :  { %7418 = vperm.xlu0 %8642, %v7315_v5   ;;  %7415 = vperm.xlu1 %8641, %v7314_v7  }
 0xf77   :  { %v5868_v1 = vpop.permute.xlu0 %5867  ;;  %v5865_v9 = vpop.permute.xlu1 %5864 }
 0xf78   :  { %7466 = vperm.xlu0 %8642, %v7339_v49   ;;  %7463 = vperm.xlu1 %8641, %v7338_v57   ;;  %v5990_v22 = vrot.slane %v5868_v1, %v14161_v18  ;;  %v5986_v11 = vrot.slane %v5865_v9, %v14162_v14 }
 0xf7a   :  { %v5991_v26 = vsel %vm1071_vm5, %v5990_v22, %v5986_v11 }
 0xf7b   :  { %v5874_v38 = vpop.permute.xlu0 %5873  ;;  %v5871_v58 = vpop.permute.xlu1 %5870 }
 0xf7c   :  { %8679 = vrot.lane.b32.xlu1 %v14280_v27, %s9188_s1  ;;  %8684 = vrot.lane.b32.xlu0 %v13159_v44, %s9192_s17  ;;  %v5999_v15 = vrot.slane %v5874_v38, %v14161_v18  ;;  %v5995_v40 = vrot.slane %v5871_v58, %v14162_v14 }
 0xf7e   :  { %v6000_v8 = vsel %vm1071_vm5, %v5999_v15, %v5995_v40 }
 0xf7f   :  { %v5880_v20 = vpop.permute.xlu0 %5879  ;;  %v5877_v35 = vpop.permute.xlu1 %5876  ;;  %v6062_v41 = vsel %vm1208_vm6, %v6000_v8, %v5991_v26 }
 0xf80   :  { %8689 = vrot.lane.b32.xlu1 %v13167_v53, %s9192_s17  ;;  %v6008_v31 = vrot.slane %v5880_v20, %v14161_v18  ;;  %v6004_v10 = vrot.slane %v5877_v35, %v14162_v14 }
 0xf82   :  { %v6009_v17 = vsel %vm1071_vm5, %v6008_v31, %v6004_v10 }
 0xf83   :  { %v5886_v23 = vpop.permute.xlu0 %5885  ;;  %v5883_v63 = vpop.permute.xlu1 %5882 }
 0xf84   :  { %v6017_v47 = vrot.slane %v5886_v23, %v14161_v18  ;;  %v6013_v34 = vrot.slane %v5883_v63, %v14162_v14 }
 0xf86   :  { %v6018_v39 = vsel %vm1071_vm5, %v6017_v47, %v6013_v34 }
 0xf87   :  { %v13171_v56 = vpop.permute.xlu0 %5891  ;;  %v13173_v62 = vpop.permute.xlu1 %5888 }
 0xf88   :  { %v6026_v29 = vrot.slane %v13171_v56, %v14161_v18  ;;  %v6022_v49 = vrot.slane %v13173_v62, %v14162_v14 }
 0xf8b   :  { %v13175_v48 = vpop.permute.xlu0 %5897  ;;  %v13177_v61 = vpop.permute.xlu1 %5894 }
 0xf8c   :  { %v6035_v1 = vrot.slane %v13175_v48, %v14161_v18  ;;  %v6031_v38 = vrot.slane %v13177_v61, %v14162_v14  ;;  %v6063_v61 = vsel %vm1210_vm7, %v6009_v17, %v6062_v41 }
 0xf8f   :  { %v13179_v54 = vpop.permute.xlu0 %5903  ;;  %v13181_v59 = vpop.permute.xlu1 %5900 }
 0xf90   :  { %v6044_v58 = vrot.slane %v13179_v54, %v14161_v18  ;;  %v6040_v19 = vrot.slane %v13181_v59, %v14162_v14  ;;  %v6027_v54 = vsel %vm1071_vm5, %v6026_v29, %v6022_v49 }
 0xf93   :  { %v13183_v42 = vpop.permute.xlu0 %5909  ;;  %v13185_v52 = vpop.permute.xlu1 %5906 }
 0xf94   :  { %v6053_v63 = vrot.slane %v13183_v42, %v14161_v18  ;;  %v6049_v56 = vrot.slane %v13185_v52, %v14162_v14 }
 0xf96   :  { %v6054_v22 = vsel %vm1071_vm5, %v6053_v63, %v6049_v56 }
 0xf97   :  { %v5817_v43 = vpop.permute.xlu0 %5816  ;;  %v5820_v25 = vpop.permute.xlu1 %5819 }
 0xf98   :  { %v5914_v5 = vrot.slane %v5817_v43, %v14162_v14  ;;  %v5918_v55 = vrot.slane %v5820_v25, %v14161_v18  ;;  %v6064_v25 = vsel %vm1212_vm8, %v6018_v39, %v6063_v61 }
 0xf9a   :  { %v5919_v46 = vsel %vm1071_vm5, %v5918_v55, %v5914_v5 }
 0xf9b   :  { %v5826_v60 = vpop.permute.xlu0 %5825  ;;  %v5823_v16 = vpop.permute.xlu1 %5822 }
 0xf9c   :  { %v5927_v45 = vrot.slane %v5826_v60, %v14161_v18  ;;  %v5923_v51 = vrot.slane %v5823_v16, %v14162_v14  ;;  %v6036_v60 = vsel %vm1071_vm5, %v6035_v1, %v6031_v38 }
 0xf9e   :  { %v5928_v9 = vsel %vm1071_vm5, %v5927_v45, %v5923_v51 }
 0xf9f   :  { %v5832_v13 = vpop.permute.xlu0 %5831  ;;  %v5829_v32 = vpop.permute.xlu1 %5828  ;;  %v6055_v62 = vsel %vm1208_vm6, %v5928_v9, %v5919_v46 }
 0xfa0   :  { %v5936_v50 = vrot.slane %v5832_v13, %v14161_v18  ;;  %v5932_v36 = vrot.slane %v5829_v32, %v14162_v14  ;;  %v6045_v32 = vsel %vm1071_vm5, %v6044_v58, %v6040_v19 }
 0xfa2   :  { %v5937_v33 = vsel %vm1071_vm5, %v5936_v50, %v5932_v36 }
 0xfa3   :  { %v5838_v24 = vpop.permute.xlu0 %5837  ;;  %v5835_v4 = vpop.permute.xlu1 %5834  ;;  %v6056_v59 = vsel %vm1210_vm7, %v5937_v33, %v6055_v62 }
 0xfa4   :  { %v5945_v7 = vrot.slane %v5838_v24, %v14161_v18  ;;  %v5941_v30 = vrot.slane %v5835_v4, %v14162_v14  ;;  %v6065_v4 = vsel %vm1214_vm9, %v6027_v54, %v6064_v25 }
 0xfa5   :  { %v6066_v8 = vsel %vm1216_vm10, %v6036_v60, %v6065_v4 }
 0xfa6   :  { %v5946_v20 = vsel %vm1071_vm5, %v5945_v7, %v5941_v30  ;;  %v6067_v47 = vsel %vm1218_vm11, %v6045_v32, %v6066_v8 }
 0xfa7   :  { %v5844_v21 = vpop.permute.xlu0 %5843  ;;  %v5841_v28 = vpop.permute.xlu1 %5840  ;;  %v6057_v42 = vsel %vm1212_vm8, %v5946_v20, %v6056_v59  ;;  %v6068_v26 = vsel %vm1220_vm12, %v6054_v22, %v6067_v47 }
 0xfa8   :  { %v5954_v12 = vrot.slane %v5844_v21, %v14161_v18  ;;  %v5950_v57 = vrot.slane %v5841_v28, %v14162_v14 }
 0xfaa   :  { %v5955_v48 = vsel %vm1071_vm5, %v5954_v12, %v5950_v57 }
 0xfab   :  { %v5850_v0 = vpop.permute.xlu0 %5849  ;;  %v5847_v37 = vpop.permute.xlu1 %5846  ;;  %v6058_v15 = vsel %vm1214_vm9, %v5955_v48, %v6057_v42 }
 0xfac   :  { %v5963_v2 = vrot.slane %v5850_v0, %v14161_v18  ;;  %v5959_v6 = vrot.slane %v5847_v37, %v14162_v14 }
 0xfae   :  { %v5964_v43 = vsel %vm1071_vm5, %v5963_v2, %v5959_v6 }
 0xfaf   :  { %v5856_v27 = vpop.permute.xlu0 %5855  ;;  %v5853_v3 = vpop.permute.xlu1 %5852  ;;  %v6059_v11 = vsel %vm1216_vm10, %v5964_v43, %v6058_v15 }
 0xfb0   :  { %v5972_v35 = vrot.slane %v5856_v27, %v14161_v18  ;;  %v5968_v23 = vrot.slane %v5853_v3, %v14162_v14 }
 0xfb2   :  { %v5973_v52 = vsel %vm1071_vm5, %v5972_v35, %v5968_v23 }
 0xfb3   :  { %v5862_v16 = vpop.permute.xlu0 %5861  ;;  %v5859_v13 = vpop.permute.xlu1 %5858  ;;  %v6060_v10 = vsel %vm1218_vm11, %v5973_v52, %v6059_v11 }
 0xfb4   :  { %v5981_v40 = vrot.slane %v5862_v16, %v14161_v18  ;;  %v5977_v24 = vrot.slane %v5859_v13, %v14162_v14 }
 0xfb6   :  { %v5982_v31 = vsel %vm1071_vm5, %v5981_v40, %v5977_v24 }
 0xfb7   :  { %v7425_v34 = vpop.permute.xlu0 %7424  ;;  %v7422_v21 = vpop.permute.xlu1 %7421  ;;  %v6061_v28 = vsel %vm1220_vm12, %v5982_v31, %v6060_v10 }
 0xfb8   :  { %8487 = vmatprep.mubr.msk.f32.mxu0 %vm593_vm2, %v6061_v28  ;;  %8501 = vmatprep.mubr.msk.f32.mxu1 %vm593_vm2, %v6061_v28  ;;  %v7547_v58 = vrot.slane %v7425_v34, %v14161_v18  ;;  %v7543_v19 = vrot.slane %v7422_v21, %v14162_v14 }
 0xfb9   :  { %8488 = vmatmul.mubr.msk.f32.vlgmr.msra.gmra.mrb[6].mxu0 %vm593_vm2, %v6068_v26  ;;  %8502 = vmatmul.mubr.msk.f32.vlgmr.msra.gmra.mrb[12].mxu1 %vm593_vm2, %v6068_v26 }
 0xfba   :  { %v7548_v43 = vsel %vm1071_vm5, %v7547_v58, %v7543_v19 }
 0xfbb   :  { %v7431_v41 = vpop.permute.xlu0 %7430  ;;  %v7428_v45 = vpop.permute.xlu1 %7427 }
 0xfbc   :  { %v7556_v33 = vrot.slane %v7431_v41, %v14161_v18  ;;  %v7552_v27 = vrot.slane %v7428_v45, %v14162_v14 }
 0xfbe   :  { %v7557_v42 = vsel %vm1071_vm5, %v7556_v33, %v7552_v27 }
 0xfbf   :  { %v7437_v51 = vpop.permute.xlu0 %7436  ;;  %v7434_v17 = vpop.permute.xlu1 %7433 }
 0xfc0   :  { %v7565_v20 = vrot.slane %v7437_v51, %v14161_v18  ;;  %v7561_v35 = vrot.slane %v7434_v17, %v14162_v14 }
 0xfc2   :  { %v7566_v32 = vsel %vm1071_vm5, %v7565_v20, %v7561_v35 }
 0xfc3   :  { %v13261_v39 = vpop.permute.xlu0 %7442  ;;  %v13263_v50 = vpop.permute.xlu1 %7439 }
 0xfc4   :  { %v7574_v15 = vrot.slane %v13261_v39, %v14161_v18  ;;  %v7570_v40 = vrot.slane %v13263_v50, %v14162_v14 }
 0xfc7   :  { %v13265_v36 = vpop.permute.xlu0 %7448  ;;  %v13267_v0 = vpop.permute.xlu1 %7445 }
 0xfc8   :  { %v7583_v47 = vrot.slane %v13265_v36, %v14161_v18  ;;  %v7579_v34 = vrot.slane %v13267_v0, %v14162_v14 }
 0xfcb   :  { %v13269_v37 = vpop.permute.xlu0 %7454  ;;  %v13271_v5 = vpop.permute.xlu1 %7451 }
 0xfcc   :  { %v7592_v26 = vrot.slane %v13269_v37, %v14161_v18  ;;  %v7588_v41 = vrot.slane %v13271_v5, %v14162_v14  ;;  %v7575_v37 = vsel %vm1071_vm5, %v7574_v15, %v7570_v40  ;;  %v14285_v15 = vld [vmem:[#allocation77_spill] sm:$0xff] }
 0xfcd   :  { %v9107_v40 = vld [vmem:[#allocation2 + $0x8] sm:$0xff] }
 0xfcf   :  { %v13273_v55 = vpop.permute.xlu0 %7460  ;;  %v13275_v7 = vpop.permute.xlu1 %7457 }
 0xfd0   :  { %v7601_v17 = vrot.slane %v13273_v55, %v14161_v18  ;;  %v7597_v39 = vrot.slane %v13275_v7, %v14162_v14  ;;  %v7584_v55 = vsel %vm1071_vm5, %v7583_v47, %v7579_v34  ;;  %v14287_v47 = vld [vmem:[#allocation21_spill] sm:$0xff] }
 0xfd7   :  { %v7377_v30 = vpop.permute.xlu0 %7376  ;;  %v7374_v29 = vpop.permute.xlu1 %7373 }
 0xfd8   :  { %v7475_v48 = vrot.slane %v7377_v30, %v14161_v18  ;;  %v7471_v61 = vrot.slane %v7374_v29, %v14162_v14 }
 0xfda   :  { %v7476_v11 = vsel %vm1071_vm5, %v7475_v48, %v7471_v61 }
 0xfdb   :  { %v7383_v49 = vpop.permute.xlu0 %7382  ;;  %v7380_v12 = vpop.permute.xlu1 %7379 }
 0xfdc   :  { %v7484_v3 = vrot.slane %v7383_v49, %v14161_v18  ;;  %v7480_v46 = vrot.slane %v7380_v12, %v14162_v14  ;;  %v7619_v12 = vsel %vm1208_vm6, %v7557_v42, %v7548_v43 }
 0xfde   :  { %v7485_v52 = vsel %vm1071_vm5, %v7484_v3, %v7480_v46 }
 0xfdf   :  { %v7389_v57 = vpop.permute.xlu0 %7388  ;;  %v7386_v1 = vpop.permute.xlu1 %7385  ;;  %v7612_v21 = vsel %vm1208_vm6, %v7485_v52, %v7476_v11  ;;  %v9105_v52 = vld [vmem:[%s13418_s0] sm:$0xff]  ;;  %v9110_v11 = vld [vmem:[#allocation2 + $0x18] sm:$0xff] }
 0xfe0   :  { %v7493_v23 = vrot.slane %v7389_v57, %v14161_v18  ;;  %v7489_v63 = vrot.slane %v7386_v1, %v14162_v14  ;;  %v7620_v57 = vsel %vm1210_vm7, %v7566_v32, %v7619_v12  ;;  %v7593_v1 = vsel %vm1071_vm5, %v7592_v26, %v7588_v41  ;;  %v14283_v32 = vld [vmem:[#allocation62_spill] sm:$0xff] }
 0xfe1   :  { %v14288_v26 = vld [vmem:[#allocation22_spill] sm:$0xff] }
 0xfe2   :  { %v7494_v24 = vsel %vm1071_vm5, %v7493_v23, %v7489_v63 }
 0xfe3   :  { %v7395_v9 = vpop.permute.xlu0 %7394  ;;  %v7392_v2 = vpop.permute.xlu1 %7391  ;;  %v7613_v45 = vsel %vm1210_vm7, %v7494_v24, %v7612_v21  ;;  %vm14284_vm7 = vcmask 261120   ;;  %v9108_v24 = vld [vmem:[#allocation2] sm:$0xff] }
 0xfe4   :  { %v7502_v54 = vrot.slane %v7395_v9, %v14161_v18  ;;  %v7498_v59 = vrot.slane %v7392_v2, %v14162_v14 }
 0xfe6   :  { %v7503_v8 = vsel %vm1071_vm5, %v7502_v54, %v7498_v59  ;;  %v44_v59 = vld [vmem:[#allocation2 + $0x28] sm:$0xff] }
 0xfe7   :  { %v7401_v6 = vpop.permute.xlu0 %7400  ;;  %v7398_v38 = vpop.permute.xlu1 %7397  ;;  %v7614_v50 = vsel %vm1212_vm8, %v7503_v8, %v7613_v45 }
 0xfe8   :  { %v7511_v25 = vrot.slane %v7401_v6, %v14161_v18  ;;  %v7507_v60 = vrot.slane %v7398_v38, %v14162_v14  ;;  %v7621_v6 = vsel %vm1212_vm8, %v7575_v37, %v7620_v57  ;;  %v7602_v38 = vsel %vm1071_vm5, %v7601_v17, %v7597_v39 }
 0xfe9   :  { %v7622_v27 = vsel %vm1214_vm9, %v7584_v55, %v7621_v6 }
 0xfea   :  { %v7512_v28 = vsel %vm1071_vm5, %v7511_v25, %v7507_v60  ;;  %v7623_v20 = vsel %vm1216_vm10, %v7593_v1, %v7622_v27 }
 0xfeb   :  { %v7407_v56 = vpop.permute.xlu0 %7406  ;;  %v7404_v62 = vpop.permute.xlu1 %7403  ;;  %v7615_v5 = vsel %vm1214_vm9, %v7512_v28, %v7614_v50  ;;  %v7624_v23 = vsel %vm1218_vm11, %v7602_v38, %v7623_v20  ;;  %vm14286_vm9 = vmmov %vm14284_vm7 }
 0xfec   :  { %v7520_v16 = vrot.slane %v7407_v56, %v14161_v18  ;;  %v7516_v13 = vrot.slane %v7404_v62, %v14162_v14 }
 0xfee   :  { %v7521_v51 = vsel %vm1071_vm5, %v7520_v16, %v7516_v13  ;;  %v9106_v13 = vld [vmem:[%s13418_s0 + $0x8] sm:$0xff]  ;;  %s9195_s0 = smov [#allocation6]  }
 0xfef   :  { %v7413_v4 = vpop.permute.xlu0 %7412  ;;  %v7410_v22 = vpop.permute.xlu1 %7409  ;;  %v7616_v7 = vsel %vm1216_vm10, %v7521_v51, %v7615_v5  ;;  %vm8226_vm10 = vcmask 1041408   ;;  %s8249_s27 = sshll.u32 %s9195_s0, 4  ;;  %s8250_s27 = int_to_ptr.vmem [resolvable:$true] %s8249_s27 }
 0xff0   :  { %v7529_v31 = vrot.slane %v7413_v4, %v14161_v18  ;;  %v7525_v10 = vrot.slane %v7410_v22, %v14162_v14  ;;  %v8693_v4 = vpack.i.bf16 %v9107_v40, %v9108_v24  ;;  %v9109_v22 = vld [vmem:[#allocation2 + $0x10] sm:$0xff]  ;;  %s9133_s30 = scalar_lea.vmem %s8250_s27, 128  ;;  %p9138_p9 = scmp.lt.s32.totalorder %s8250_s27, %s8250_s27 }
 0xff1   :  { %v8698_v8 = vpack.i.bf16 %v9110_v11, %v9109_v22  ;;  %p9134_p8 = scmp.ne.s32.totalorder %s8250_s27, %s9133_s30  ;;  %p9139_p10 = scmp.lt.s32.totalorder %s9133_s30, %s9133_s30 }
 0xff2   :  { %v7530_v36 = vsel %vm1071_vm5, %v7529_v31, %v7525_v10  ;;  %8694 = vrot.lane.b32.xlu0 %v8693_v4, %s9194_s26 }
 0xff3   :  { %v7419_v0 = vpop.permute.xlu0 %7418  ;;  %v7416_v30 = vpop.permute.xlu1 %7415  ;;  %v7617_v2 = vsel %vm1218_vm11, %v7530_v36, %v7616_v7  ;;  %8699 = vrot.lane.b32.xlu1 %v8698_v8, %s9194_s26  ;;  %vm8228_vm11 = vcmask 1043456   ;;  %p9140_p11 = por %p9139_p10, %p9138_p9 }
 0xff4   :  { %v7538_v29 = vrot.slane %v7419_v0, %v14161_v18  ;;  %v7534_v49 = vrot.slane %v7416_v30, %v14162_v14 }
 0xff5   :  { %p9141_p12 = pnand %p9140_p11, %p9134_p8 }
 0xff6   :  { %v7539_v9 = vsel %vm1071_vm5, %v7538_v29, %v7534_v49 }
 0xff7   :  { %v7467_v58 = vpop.permute.xlu0 %7466  ;;  %v7464_v19 = vpop.permute.xlu1 %7463  ;;  %v7618_v33 = vsel %vm1220_vm12, %v7539_v9, %v7617_v2 }
 0xff8   :  { %v7610_v3 = vrot.slane %v7467_v58, %v14161_v18  ;;  %v7606_v46 = vrot.slane %v7464_v19, %v14162_v14  ;;  %8494 = vmatprep.mubr.msk.f32.mxu0 %vm593_vm2, %v7618_v33  ;;  %8504 = vmatprep.mubr.msk.f32.mxu1 %vm593_vm2, %v7618_v33 }
 0xffa   :  { %v7611_v35 = vsel %vm1071_vm5, %v7610_v3, %v7606_v46  ;;  %vm14281_vm5 = vcmask 64512  }
 0xffb   :  { %v8680_v63 = vpop.permute.xlu1 %8679  ;;  %v7625_v56 = vsel %vm1220_vm12, %v7611_v35, %v7624_v23  ;;  %v8685_v62 = vpop.permute.xlu0 %8684  ;;  %vm14282_vm6 = vmmov %vm14281_vm5  ;;  %v14289_v23 = vld [vmem:[#allocation65_spill] sm:$0xff] }
 0xffc   :  { %v8682_v48 = vunpack.i.h.bf16 %v8680_v63  ;;  %v8681_v61 = vunpack.i.l.bf16 %v8680_v63  ;;  %8505 = vmatmul.mubr.msk.f32.gmra.mrb[14].mxu1 %vm593_vm2, %v7625_v56  ;;  %v8687_v14 = vunpack.i.h.bf16 %v8685_v62  ;;  %v8686_v54 = vunpack.i.l.bf16 %v8685_v62  ;;  %v8302_v62 = vld [vmem:[#allocation2 + $0x36] ss:$0 sm:$0xff]  ;;  %vm14290_vm12 = vmmov %vm14284_vm7 }
 0xffe   :  { %v8585_v18 = vpack.c.bf16 %v8682_v48, %v8681_v61  ;;  %v8593_v25 = vpack.c.bf16 %v8687_v14, %v8686_v54 }
 0xfff   :  { %v8690_v43 = vpop.permute.xlu1 %8689 }
0x1000   :  { %8586 = vmatprep.subr.bf16.mxu0 %v8585_v18  ;;  %v8692_v60 = vunpack.i.h.bf16 %v8690_v43  ;;  %v8691_v42 = vunpack.i.l.bf16 %v8690_v43 }
0x1001   :  { %8588 = vmatpush3.bf16.msra.mxu0 %v8585_v18 }
0x1002   :  { %8507 = vmatprep.subr.mxu0 %v44_v59  ;;  %v8597_v16 = vpack.c.bf16 %v8692_v60, %v8691_v42 }
0x1004   :  { %8495 = vmatmul.mubr.msk.f32.vlgmr.msra.gmra.mrb[8].mxu0 %vm593_vm2, %v7625_v56 }
0x1005   :  { %8508 = vmatpush3.msra.mxu0 %v44_v59  ;;  %8509 = vmatprep.mubr.msk.f32.mxu0 %vm14281_vm5, %v9105_v52 }
0x1006   :  { %8594 = vmatprep.subr.bf16.mxu0 %v8593_v25 }
0x1008   :  { %8510 = vmatmul.mubr.msk.f32.vlgmr.msra.gmra.mrb[10].mxu0 %vm14282_vm6, %v9106_v13  ;;  %v8315_v13 = vld [vmem:[#allocation2 + $0x37] ss:$0 sm:$0xff] }
0x1009   :  { %8596 = vmatpush3.bf16.msra.mxu0 %v8593_v25  ;;  %8520 = vmatprep.mubr.msk.f32.mxu0 %vm14284_vm7, %v14283_v32 }
0x100a   :  { %8598 = vmatprep.subr.bf16.mxu0 %v8597_v16 }
0x100d   :  { %8600 = vmatpush3.bf16.msra.mxu0 %v8597_v16 }
0x1010   :  { %8521 = vmatmul.mubr.msk.f32.vlgmr.msra.gmra.mrb[10].mxu0 %vm14286_vm9, %v14285_v15 }
0x1064   :  { %v8695_v51 = vpop.permute.xlu0 %8694 }
0x1065   :  { %v8697_v17 = vunpack.i.h.bf16 %v8695_v51  ;;  %v8696_v39 = vunpack.i.l.bf16 %v8695_v51  ;;  %v8700_v55 = vpop.permute.xlu1 %8699 }
0x1066   :  { %v8702_v7 = vunpack.i.h.bf16 %v8700_v55  ;;  %v8701_v57 = vunpack.i.l.bf16 %v8700_v55 }
0x1067   :  { %v8601_v50 = vpack.c.bf16 %v8697_v17, %v8696_v39 }
0x1068   :  { %v8605_v9 = vpack.c.bf16 %v8702_v7, %v8701_v57 }
0x1069   :  { %8602 = vmatprep.subr.bf16.mxu0 %v8601_v50 }
0x106a   :  { %8604 = vmatpush3.bf16.msra.mxu0 %v8601_v50 }
0x106b   :  { %8606 = vmatprep.subr.bf16.mxu0 %v8605_v9 }
0x106e   :  { %8608 = vmatpush3.bf16.msra.mxu0 %v8605_v9 }
0x108c   :  { %v8489_v31 = vpop.f32.mrb[6].mxu0  ;;  %v8503_v10 = vpop.f32.mrb[12].mxu1 }
0x108d   :  { %v7815_v34 = vmul.f32 %v8503_v10, %v14287_v47  ;;  %v6139_v21 = vpop.f32.mrb[7].mxu0  ;;  %v7795_v28 = vpop.f32.mrb[13].mxu1 }
0x108e   :  { %v7814_v41 = vmul.f32 %v14288_v26, %v7795_v28 }
0x1090   :  { %v7818_v45 = vadd.f32 %v7815_v34, %v7814_v41 }
0x1092   :  { %v7819_v36 = vrot.slane %v7818_v45, 4 }
0x1094   :  { %v7820_v0 = vadd.f32 %v7819_v36, %v7818_v45 }
0x1096   :  { %v7821_v49 = vrot.slane %v7820_v0, 2 }
0x1098   :  { %v7822_v2 = vadd.f32 %v7821_v49, %v7820_v0 }
0x109a   :  { %v7823_v33 = vrot.slane %v7822_v2, 1 }
0x109c   :  { %v7824_v46 = vadd.f32 %v7823_v33, %v7822_v2 }
0x10cf   :  { %v8506_v30 = vpop.f32.mrb[14].mxu1 }
0x10d0   :  { %v7817_v37 = vmul.f32 %v8506_v30, %v14287_v47  ;;  %v7805_v5 = vpop.f32.mrb[15].mxu1 }
0x10d1   :  { %v7816_v29 = vmul.f32 %v14288_v26, %v7805_v5 }
0x10d3   :  { %v7825_v12 = vadd.f32 %v7817_v37, %v7816_v29 }
0x10d5   :  { %v7826_v1 = vrot.slane %v7825_v12, 4 }
0x10d7   :  { %v7827_v6 = vadd.f32 %v7826_v1, %v7825_v12  ;;  %v8496_v38 = vpop.f32.mrb[8].mxu0 }
0x10d8   :  { %7717 = vrot.lane.b32.xlu1 %v8496_v38, %s9186_s12  ;;  %v7704_v58 = vpop.f32.mrb[9].mxu0 }
0x10d9   :  { %v7828_v19 = vrot.slane %v7827_v6, 2  ;;  %7715 = vrot.lane.b32.xlu0 %v7704_v58, %s9186_s12 }
0x10db   :  { %v7829_v27 = vadd.f32 %v7828_v19, %v7827_v6 }
0x10dc   :  { %8709 = vrot.lane.b32.xlu1 %v13167_v53, %s9194_s26 }
0x10dd   :  { %v7830_v3 = vrot.slane %v7829_v27, 1  ;;  %8704 = vrot.lane.b32.xlu0 %v13159_v44, %s9194_s26 }
0x10df   :  { %v7831_v20 = vadd.f32 %v7830_v3, %v7829_v27 }
0x10e1   :  { %v8224_v35 = vsel %vm1212_vm8, %v7831_v20, %v7824_v46  ;;  %vm14291_vm8 = vmmov %vm14284_vm7 }
0x10e2   :  { %v8227_v63 = vsel %vm8226_vm10, %v14289_v23, %v8224_v35 }
0x10e3   :  { %v8229_v56 = vsel %vm8228_vm11, %v8227_v63, 0.0 }
0x10e4   :  { %8230 = vst [vmem:[#allocation6] sm:$0xff] %v8229_v56 }
0x114a   :  { %v7718_v48 = vpop.permute.xlu1 %7717 }
0x114b   :  { %v7722_v61 = vsel %vm593_vm2, %v8489_v31, %v7718_v48  ;;  %v7716_v18 = vpop.permute.xlu0 %7715 }
0x114c   :  { %v7721_v53 = vsel %vm593_vm2, %v6139_v21, %v7716_v18  ;;  %v7728_v54 = vadd.f32 %v8302_v62, %v7722_v61  ;;  %vm14292_vm2 = vmmov %vm14284_vm7 }
0x114d   :  { %v7727_v14 = vadd.f32 %v8302_v62, %v7721_v53  ;;  %vm14293_vm13 = vmmov %vm14292_vm2 }
0x114e   :  { %v8710_v44 = vpop.permute.xlu1 %8709 }
0x114f   :  { %8531 = vmatprep.mubr.msk.f32.mxu0 %vm14290_vm12, %v7727_v14  ;;  %v8705_v59 = vpop.permute.xlu0 %8704  ;;  %v8712_v43 = vunpack.i.h.bf16 %v8710_v44  ;;  %v8711_v25 = vunpack.i.l.bf16 %v8710_v44 }
0x1150   :  { %8532 = vmatmul.mubr.msk.f32.vlgmr.msra.gmra.mrb[10].mxu0 %vm14291_vm8, %v7728_v54  ;;  %v8707_v60 = vunpack.i.h.bf16 %v8705_v59  ;;  %v8706_v42 = vunpack.i.l.bf16 %v8705_v59 }
0x1151   :  { %v8613_v16 = vpack.c.bf16 %v8712_v43, %v8711_v25 }
0x1152   :  { %v8609_v52 = vpack.c.bf16 %v8707_v60, %v8706_v42 }
0x1154   :  { %8610 = vmatprep.subr.bf16.mxu1 %v8609_v52 }
0x1155   :  { %8612 = vmatpush3.bf16.msra.mxu1 %v8609_v52 }
0x1156   :  { %8614 = vmatprep.subr.bf16.mxu1 %v8613_v16 }
0x1159   :  { %8616 = vmatpush3.bf16.msra.mxu1 %v8613_v16 }
0x1223   :  { %v8533_v40 = vpop.f32.mrb[10].mxu0 }
0x1224   :  { %v8094_v24 = vadd.f32 %v8533_v40, %v8315_v13  ;;  %v8078_v4 = vpop.f32.mrb[11].mxu0 }
0x1225   :  { %v8093_v22 = vadd.f32 %v8315_v13, %v8078_v4 }
0x1226   :  { %v8096_v11 = vmax.f32 %v8094_v24, 0.0 }
0x1227   :  { %v8095_v8 = vmax.f32 %v8093_v22, 0.0 }
0x1228   :  { %8196 = vrot.lane.b32.xlu1 %v8096_v11, %s9194_s26 }
0x1229   :  { %8194 = vrot.lane.b32.xlu0 %v8095_v8, %s9194_s26  ;;  %8542 = vmatprep.mubr.msk.f32.mxu1 %vm14292_vm2, %v8095_v8 }
0x122a   :  { %8543 = vmatmul.mubr.msk.f32.vlgmr.msra.gmra.mrb[16].mxu1 %vm14293_vm13, %v8096_v11 }
0x122b   :  { %9144 = shalt.err (!%p9141_p12)
}
0x122c   :  { %s9145_s8 = scalar_lea.hbm %s13423_s5, 128 }
0x122d   :  { %p9146_p13 = scmp.ne.s32.totalorder %s13423_s5, %s9145_s8  ;;  %p9149_p0 = scmp.lt.u32.totalorder %s9145_s8, %s13423_s5 }
0x122f   :  { %p9151_p1 = pnand %p9149_p0, %p9146_p13 }
0x1231   :  { %9154 = shalt.err (!%p9151_p1)
}
0x1232   :  { %8252 = dma.vmem_to_hbm [thread:$0]  %s8250_s27, 128, %s13423_s5, [#allocation7]   ;;  %v8316_v31 = vld [vmem:[#allocation2 + $0x38] ss:$0 sm:$0xff]  ;;  %vm8210_vm14 = vcmask 523264   ;;  %vm8213_vm15 = vcmask 556032   ;;  %vm14294_vm0 = vmmov %vm14292_vm2 }
0x1233   :  { %s9196_s14 = smov [#allocation5]   ;;  %vm14295_vm1 = vmmov %vm14294_vm0 }
0x1234   :  { %s8236_s1 = sshll.u32 %s9196_s14, 4  ;;  %s8237_s1 = int_to_ptr.vmem [resolvable:$true] %s8236_s1 }
0x1235   :  { %s9155_s5 = scalar_lea.vmem %s8237_s1, 256  ;;  %p9160_p3 = scmp.lt.s32.totalorder %s8237_s1, %s8237_s1 }
0x1236   :  { %p9156_p2 = scmp.ne.s32.totalorder %s8237_s1, %s9155_s5  ;;  %p9161_p4 = scmp.lt.s32.totalorder %s9155_s5, %s9155_s5 }
0x1238   :  { %p9162_p5 = por %p9161_p4, %p9160_p3 }
0x123a   :  { %p9163_p6 = pnand %p9162_p5, %p9156_p2 }
0x129a   :  { %v8197_v28 = vpop.permute.xlu1 %8196 }
0x129b   :  { %v8195_v26 = vpop.permute.xlu0 %8194  ;;  %v8209_v41 = vsel %vm14294_vm0, %v14285_v15, %v8197_v28 }
0x129c   :  { %v8208_v51 = vsel %vm14295_vm1, %v14283_v32, %v8195_v26 }
0x12fd   :  { %v8544_v10 = vpop.f32.mrb[16].mxu1 }
0x12fe   :  { %v8191_v47 = vadd.f32 %v8544_v10, %v8316_v31  ;;  %v8185_v34 = vpop.f32.mrb[17].mxu1 }
0x12ff   :  { %v8186_v21 = vadd.f32 %v8316_v31, %v8185_v34 }
0x1300   :  { %8204 = vrot.lane.b32.xlu1 %v8191_v47, %s9192_s17 }
0x1301   :  { %8202 = vrot.lane.b32.xlu0 %v8186_v21, %s9192_s17 }
0x1372   :  { %v8205_v45 = vpop.permute.xlu1 %8204 }
0x1373   :  { %v8212_v17 = vsel %vm8210_vm14, %v8209_v41, %v8205_v45  ;;  %v8203_v39 = vpop.permute.xlu0 %8202 }
0x1374   :  { %v8215_v50 = vsel %vm8213_vm15, %v8212_v17, 0.0  ;;  %v8211_v36 = vsel %vm8210_vm14, %v8208_v51, %v8203_v39 }
0x1375   :  { %8217 = vst [vmem:[#allocation5 + $0x8] sm:$0xff] %v8215_v50  ;;  %v8214_v0 = vsel %vm8213_vm15, %v8211_v36, 0.0 }
0x1376   :  { %8216 = vst [vmem:[#allocation5] sm:$0xff] %v8214_v0 }
0x1377   :  { %9166 = shalt.err (!%p9163_p6)
}
0x1378   :  { %s9167_s2 = scalar_lea.hbm %s13422_s4, 256 }
0x1379   :  { %p9168_p7 = scmp.ne.s32.totalorder %s13422_s4, %s9167_s2  ;;  %p9171_p8 = scmp.lt.u32.totalorder %s9167_s2, %s13422_s4 }
0x137b   :  { %p9173_p9 = pnand %p9171_p8, %p9168_p7 }
0x137d   :  { %9176 = shalt.err (!%p9173_p9)
}
0x137e   :  { %8242 = dma.vmem_to_hbm [thread:$0]  %s8237_s1, 256, %s13422_s4, [#allocation4], %s9184_s28, %s9184_s28, %s9185_s29  }
0x137f   :  { %9179 = dma.done.wait [#allocation4], 256  }
0x1380   :  { %9180 = vsyncadd [#allocation4], 4294967040 }
0x1381   :  { %9181 = dma.done.wait [#allocation7], 128  }
0x1382   :  { %9182 = vsyncadd [#allocation7], 4294967168 }
0x1383   :  { %8259 = vsyncpa [#allocation3], 1 }
0x1384   :  { %8260 = vsyncpa [#allocation4], 1 }
0x1385   :  { %8261 = vsyncpa [#allocation7], 1 }

</bundles_post_ra>
